<compile_context>
chip_gen: v7x
topology: tpu7x:2x2x1
jax: 0.10.0
libtpu: 0.0.40
codegen_flags: <defaults>
</compile_context>

<pallas_src>
import math
import jax
import jax.numpy as jnp
from jax.experimental import pallas as pl
from jax.experimental.pallas import tpu as pltpu

# ----------------------------- config -------------------------------------
B = 2            # batch (raise to >=16 in serving to amortize the weight DMA)
S = 8            # sequence length
M = B * S        # rows fed to the fused QKV projection
H = 768          # hidden size (fixed by the module's Linear(768, num_labels))
F = 768          # FFN intermediate size (synthetic backbone, kept small)
V = 50           # vocab size (synthetic)
NUM_LABELS = 2
LOGIT_PAD = 128  # lane-padded classifier width (sliced to NUM_LABELS outside)

assert F == H, "weight-section packing below assumes F == H"

# three contiguous bf16 weight sections (streamed HBM -> VMEM inside kernel)
W_QKV_COLS = 3 * H                 # [Wq | Wk | Wv]
W_MID_COLS = 2 * H                 # [Wo | W1]
W_TAIL_COLS = 2 * H + LOGIT_PAD    # [W2 | Wp | Wc_pad]

# row indices inside the packed f32 bias / LN-param slab (N_BIAS_ROWS, H)
ROW_BQ, ROW_BK, ROW_BV, ROW_BO = 0, 1, 2, 3
ROW_LN1_G, ROW_LN1_B = 4, 5
ROW_B1, ROW_B2 = 6, 7
ROW_LN2_G, ROW_LN2_B = 8, 9
ROW_BP, ROW_BC = 10, 11
N_BIAS_ROWS = 12


# --------------------------- kernel helpers --------------------------------
def _layer_norm(x, gamma, beta, eps=1e-5):
    mu = jnp.mean(x, axis=-1, keepdims=True)
    var = jnp.mean((x - mu) ** 2, axis=-1, keepdims=True)
    return (x - mu) * jax.lax.rsqrt(var + eps) * gamma + beta


# ---------- fused embed + encoder + pooler + classifier kernel -------------
def fused_kernel(ids_ref, addmask_ref, emb_ref, pos_ref, bias_ref,
                 wqkv_hbm, wmid_hbm, wtail_hbm,
                 out_ref,
                 wqkv_v, wmid_v, wtail_v, h_sc, sems):
    # -- kick off weight streaming HBM -> VMEM (overlaps the embed gather) --
    cp_qkv = pltpu.make_async_copy(wqkv_hbm, wqkv_v, sems.at[0])
    cp_mid = pltpu.make_async_copy(wmid_hbm, wmid_v, sems.at[1])
    cp_tail = pltpu.make_async_copy(wtail_hbm, wtail_v, sems.at[2])
    cp_qkv.start()
    cp_mid.start()
    cp_tail.start()

    # -- embedding gather (word + learned positional), entirely in-kernel ---
    for i in range(M):                                   # M is small & static
        h_sc[pl.ds(i, 1), :] = emb_ref[pl.ds(ids_ref[i], 1), :]
    h03 = h_sc[...].reshape(B, S, H) + pos_ref[...][None, :, :]   # (B,S,H) f32
    h2b = h03.reshape(M, H).astype(jnp.bfloat16)

    # -- fused QKV projection: one (M, H) @ (H, 3H) MXU push -----------------
    cp_qkv.wait()                                        # first weight section
    qkv = jnp.dot(h2b, wqkv_v[...],
                  preferred_element_type=jnp.float32)    # (M, 3H) f32
    # Only the CLS (<s>) query is needed downstream (single-layer backbone),
    # so the post-QKV path runs on (B, H) rows instead of (M, H).
    q_cls = (qkv.reshape(B, S, 3 * H)[:, 0, 0:H]
             + bias_ref[ROW_BQ:ROW_BQ + 1, :]).reshape(B, 1, H)
    k = (qkv[:, H:2 * H] + bias_ref[ROW_BK:ROW_BK + 1, :]).reshape(B, S, H)
    v = (qkv[:, 2 * H:3 * H] + bias_ref[ROW_BV:ROW_BV + 1, :]).reshape(B, S, H)

    # -- single-head attention (CLS query only) with padding mask -----------
    scale = 1.0 / math.sqrt(H)
    scores = jnp.einsum('bqd,bkd->bqk',
                        q_cls.astype(jnp.bfloat16), k.astype(jnp.bfloat16),
                        preferred_element_type=jnp.float32) * scale  # (B,1,S)
    scores = scores + addmask_ref[...][:, None, :]       # additive pad mask
    scores = scores - jnp.max(scores, axis=-1, keepdims=True)
    p = jnp.exp(scores)
    p = p / jnp.sum(p, axis=-1, keepdims=True)           # exact softmax divide
    ctx = jnp.einsum('bqk,bkd->bqd',
                     p.astype(jnp.bfloat16), v.astype(jnp.bfloat16),
                     preferred_element_type=jnp.float32).reshape(B, H)

    # -- attention output proj + residual + LN1 ------------------------------
    cp_mid.wait()                                        # Wo | W1 section
    attn = (jnp.dot(ctx.astype(jnp.bfloat16), wmid_v[:, 0:H],
                    preferred_element_type=jnp.float32)
            + bias_ref[ROW_BO:ROW_BO + 1, :])
    h_cls = h03[:, 0, :]                                 # (B, H) f32 residual
    h1 = _layer_norm(h_cls + attn,
                     bias_ref[ROW_LN1_G:ROW_LN1_G + 1, :],
                     bias_ref[ROW_LN1_B:ROW_LN1_B + 1, :])

    # -- feed-forward block ---------------------------------------------------
    ff = (jnp.dot(h1.astype(jnp.bfloat16), wmid_v[:, H:H + F],
                  preferred_element_type=jnp.float32)
          + bias_ref[ROW_B1:ROW_B1 + 1, :])
    # TODO(synk): HF RoBERTa uses exact (erf) GELU; tanh approximation used here.
    ff = jax.nn.gelu(ff, approximate=True)
    cp_tail.wait()                                       # W2 | Wp | Wc section
    ff = (jnp.dot(ff.astype(jnp.bfloat16), wtail_v[:, 0:H],
                  preferred_element_type=jnp.float32)
          + bias_ref[ROW_B2:ROW_B2 + 1, :])
    enc = _layer_norm(h1 + ff,
                      bias_ref[ROW_LN2_G:ROW_LN2_G + 1, :],
                      bias_ref[ROW_LN2_B:ROW_LN2_B + 1, :])   # (B, H) f32

    # -- pooler + dropout (eval identity) + classifier ------------------------
    pooled = jnp.tanh(
        jnp.dot(enc.astype(jnp.bfloat16), wtail_v[:, H:2 * H],
                preferred_element_type=jnp.float32)
        + bias_ref[ROW_BP:ROW_BP + 1, :])
    # nn.Dropout(0.1) is identity in eval mode.
    # TODO(synk): training-mode dropout (pltpu.prng_random_bits mask) not implemented.
    logits = (jnp.dot(pooled.astype(jnp.bfloat16),
                      wtail_v[:, 2 * H:2 * H + LOGIT_PAD],
                      preferred_element_type=jnp.float32)
              + bias_ref[ROW_BC:ROW_BC + 1, 0:LOGIT_PAD])
    out_ref[...] = logits                                # (B, 128) f32


# ------------------------------ cost estimate --------------------------------
_FLOPS = int(2 * M * H * 3 * H           # fused QKV projection
             + 2 * B * S * H             # CLS scores
             + 2 * B * S * H             # CLS context
             + 2 * B * H * H             # attention output proj
             + 2 * B * H * F + 2 * B * F * H   # FFN (CLS rows only)
             + 2 * B * H * H             # pooler
             + 2 * B * H * LOGIT_PAD)    # classifier (padded)
_TRANSC = int(B * S + B * F + B * H)     # exp + gelu-tanh + pooler tanh
_BYTES = int(H * (W_QKV_COLS + W_MID_COLS + W_TAIL_COLS) * 2   # bf16 weights
             + N_BIAS_ROWS * H * 4       # f32 bias/LN slab
             + V * H * 4 + S * H * 4     # embedding tables
             + M * 4 + B * S * 4         # ids + additive mask
             + B * LOGIT_PAD * 4)        # padded logits out


# ------------------------------ wrapper -------------------------------------
@jax.jit
def roberta_classifier_forward(input_ids, attention_mask, params):
    ids_flat = input_ids.reshape(-1).astype(jnp.int32)
    # Additive attention mask precomputed outside the kernel: 0 keep, -1e9 pad.
    addmask = (1.0 - attention_mask.astype(jnp.float32)) * jnp.float32(-1e9)

    logits_pad = pl.pallas_call(
        fused_kernel,
        out_shape=jax.ShapeDtypeStruct((B, LOGIT_PAD), jnp.float32),
        in_specs=[
            pl.BlockSpec(memory_space=pltpu.MemorySpace.SMEM),   # input_ids
            pl.BlockSpec(memory_space=pltpu.MemorySpace.VMEM),   # additive mask
            pl.BlockSpec(memory_space=pltpu.MemorySpace.VMEM),   # word_emb
            pl.BlockSpec(memory_space=pltpu.MemorySpace.VMEM),   # pos_emb
            pl.BlockSpec(memory_space=pltpu.MemorySpace.VMEM),   # bias/LN slab
            pl.BlockSpec(memory_space=pl.ANY),                   # w_qkv (HBM, streamed)
            pl.BlockSpec(memory_space=pl.ANY),                   # w_mid (HBM, streamed)
            pl.BlockSpec(memory_space=pl.ANY),                   # w_tail (HBM, streamed)
        ],
        out_specs=pl.BlockSpec(memory_space=pltpu.MemorySpace.VMEM),
        scratch_shapes=[
            pltpu.VMEM((H, W_QKV_COLS), jnp.bfloat16),   # streamed QKV weights
            pltpu.VMEM((H, W_MID_COLS), jnp.bfloat16),   # streamed Wo | W1
            pltpu.VMEM((H, W_TAIL_COLS), jnp.bfloat16),  # streamed W2 | Wp | Wc
            pltpu.VMEM((M, H), jnp.float32),             # gathered embeddings
            pltpu.SemaphoreType.DMA((3,)),               # one per weight section
        ],
        compiler_params=pltpu.CompilerParams(
            vmem_limit_bytes=24 * 1024 * 1024),          # footprint ~9 MiB
        cost_estimate=pl.CostEstimate(
            flops=_FLOPS, transcendentals=_TRANSC, bytes_accessed=_BYTES),
    )(ids_flat, addmask, params['word_emb'], params['pos_emb'],
      params['bias_slab'], params['w_qkv'], params['w_mid'], params['w_tail'])

    return logits_pad[:, :NUM_LABELS]


# -------------------------- parameter init ----------------------------------
def init_params(key):
    ks = jax.random.split(key, 10)

    def dense(k, din, dout, scale=0.02):
        return scale * jax.random.normal(k, (din, dout), jnp.float32)

    wq = dense(ks[2], H, H)
    wk = dense(ks[3], H, H)
    wv = dense(ks[4], H, H)
    wo = dense(ks[5], H, H)
    w1 = dense(ks[6], H, F)
    w2 = dense(ks[7], F, H)
    wp = dense(ks[8], H, H)                       # pooler (part of roberta model)
    wc = dense(ks[9], H, NUM_LABELS)              # classifier head (this module)
    wc_pad = jnp.zeros((H, LOGIT_PAD), jnp.float32).at[:, :NUM_LABELS].set(wc)

    # three contiguous bf16 sections, each DMA'd whole (no strided copies)
    w_qkv = jnp.concatenate([wq, wk, wv], axis=1).astype(jnp.bfloat16)
    w_mid = jnp.concatenate([wo, w1], axis=1).astype(jnp.bfloat16)
    w_tail = jnp.concatenate([w2, wp, wc_pad], axis=1).astype(jnp.bfloat16)
    assert w_qkv.shape == (H, W_QKV_COLS)
    assert w_mid.shape == (H, W_MID_COLS)
    assert w_tail.shape == (H, W_TAIL_COLS)

    zeros_h = jnp.zeros((H,), jnp.float32)
    ones_h = jnp.ones((H,), jnp.float32)
    bias_slab = jnp.stack([
        zeros_h, zeros_h, zeros_h,    # bq, bk, bv
        zeros_h,                      # bo
        ones_h, zeros_h,              # ln1 gamma, beta
        zeros_h,                      # b1
        zeros_h,                      # b2
        ones_h, zeros_h,              # ln2 gamma, beta
        zeros_h,                      # bp (pooler bias)
        zeros_h,                      # bc (classifier bias, lane-padded)
    ], axis=0)
    assert bias_slab.shape == (N_BIAS_ROWS, H)

    return {
        'word_emb': 0.02 * jax.random.normal(ks[0], (V, H), jnp.float32),
        'pos_emb': 0.02 * jax.random.normal(ks[1], (S, H), jnp.float32),
        'w_qkv': w_qkv,
        'w_mid': w_mid,
        'w_tail': w_tail,
        'bias_slab': bias_slab,
    }


# ------------------------------- main ---------------------------------------
if __name__ == "__main__":
    key = jax.random.PRNGKey(0)
    k_ids, k_params = jax.random.split(key)

    input_ids = jax.random.randint(k_ids, (B, S), 0, V, dtype=jnp.int32)
    attention_mask = jnp.ones((B, S), dtype=jnp.int32)
    # simulate one padded position in the second sequence
    attention_mask = attention_mask.at[1, S - 1].set(0)

    params = init_params(k_params)

    logits = roberta_classifier_forward(input_ids, attention_mask, params)
    jax.block_until_ready(logits)
    assert logits.shape == (B, NUM_LABELS) and logits.dtype == jnp.float32
    print("KERNEL_OK")
</pallas_src>

<mosaic_0001>
module attributes {stable_mosaic.version = 11 : i64} {
  func.func @fused_kernel(%arg0: memref<16xi32, #tpu.memory_space<smem>>, %arg1: memref<2x8xf32, #tpu.memory_space<vmem>>, %arg2: memref<50x768xf32, #tpu.memory_space<vmem>>, %arg3: memref<8x768xf32, #tpu.memory_space<vmem>>, %arg4: memref<12x768xf32, #tpu.memory_space<vmem>>, %arg5: memref<768x2304xbf16, #tpu.memory_space<any>>, %arg6: memref<768x1536xbf16, #tpu.memory_space<any>>, %arg7: memref<768x1664xbf16, #tpu.memory_space<any>>, %arg8: memref<2x128xf32, #tpu.memory_space<vmem>>, %arg9: memref<768x2304xbf16, #tpu.memory_space<vmem>>, %arg10: memref<768x1536xbf16, #tpu.memory_space<vmem>>, %arg11: memref<768x1664xbf16, #tpu.memory_space<vmem>>, %arg12: memref<16x768xf32, #tpu.memory_space<vmem>>, %arg13: memref<3x!tpu.dma_semaphore, #tpu.memory_space<semaphore_mem>>) attributes {dimension_semantics = [], scalar_prefetch = 0 : i64, scratch_operands = 5 : i64, tpu.core_type = #tpu.core_type<tc>} {
    %c0_i32 = arith.constant 0 : i32
    %0 = tpu.memref_slice %arg13[%c0_i32] : memref<3x!tpu.dma_semaphore, #tpu.memory_space<semaphore_mem>> -> memref<1x!tpu.dma_semaphore, #tpu.memory_space<semaphore_mem>>
    %1 = tpu.memref_squeeze %0 : memref<1x!tpu.dma_semaphore, #tpu.memory_space<semaphore_mem>> -> memref<!tpu.dma_semaphore, #tpu.memory_space<semaphore_mem>>
    tpu.enqueue_dma source(%arg5 : memref<768x2304xbf16, #tpu.memory_space<any>>) target(%arg9 : memref<768x2304xbf16, #tpu.memory_space<vmem>>) target_semaphore(%1 : memref<!tpu.dma_semaphore, #tpu.memory_space<semaphore_mem>>)
    %c1_i32 = arith.constant 1 : i32
    %2 = tpu.memref_slice %arg13[%c1_i32] : memref<3x!tpu.dma_semaphore, #tpu.memory_space<semaphore_mem>> -> memref<1x!tpu.dma_semaphore, #tpu.memory_space<semaphore_mem>>
    %3 = tpu.memref_squeeze %2 : memref<1x!tpu.dma_semaphore, #tpu.memory_space<semaphore_mem>> -> memref<!tpu.dma_semaphore, #tpu.memory_space<semaphore_mem>>
    tpu.enqueue_dma source(%arg6 : memref<768x1536xbf16, #tpu.memory_space<any>>) target(%arg10 : memref<768x1536xbf16, #tpu.memory_space<vmem>>) target_semaphore(%3 : memref<!tpu.dma_semaphore, #tpu.memory_space<semaphore_mem>>)
    %c2_i32 = arith.constant 2 : i32
    %4 = tpu.memref_slice %arg13[%c2_i32] : memref<3x!tpu.dma_semaphore, #tpu.memory_space<semaphore_mem>> -> memref<1x!tpu.dma_semaphore, #tpu.memory_space<semaphore_mem>>
    %5 = tpu.memref_squeeze %4 : memref<1x!tpu.dma_semaphore, #tpu.memory_space<semaphore_mem>> -> memref<!tpu.dma_semaphore, #tpu.memory_space<semaphore_mem>>
    tpu.enqueue_dma source(%arg7 : memref<768x1664xbf16, #tpu.memory_space<any>>) target(%arg11 : memref<768x1664xbf16, #tpu.memory_space<vmem>>) target_semaphore(%5 : memref<!tpu.dma_semaphore, #tpu.memory_space<semaphore_mem>>)
    %c0 = arith.constant 0 : index
    %6 = memref.load %arg0[%c0] : memref<16xi32, #tpu.memory_space<smem>>
    %7 = arith.index_cast %6 : i32 to index
    %c0_0 = arith.constant 0 : index
    %8 = vector.load %arg2[%7, %c0_0] : memref<50x768xf32, #tpu.memory_space<vmem>>, vector<1x768xf32>
    %c0_1 = arith.constant 0 : index
    %c0_2 = arith.constant 0 : index
    %9 = vector.load %arg12[%c0_1, %c0_2] : memref<16x768xf32, #tpu.memory_space<vmem>>, vector<1x768xf32>
    tpu.vector_store %arg12[%c0_1, %c0_2], %8 {strides = array<i32>} : memref<16x768xf32, #tpu.memory_space<vmem>>, vector<1x768xf32>,
    %c1 = arith.constant 1 : index
    %10 = memref.load %arg0[%c1] : memref<16xi32, #tpu.memory_space<smem>>
    %11 = arith.index_cast %10 : i32 to index
    %c0_3 = arith.constant 0 : index
    %12 = vector.load %arg2[%11, %c0_3] : memref<50x768xf32, #tpu.memory_space<vmem>>, vector<1x768xf32>
    %c1_4 = arith.constant 1 : index
    %c0_5 = arith.constant 0 : index
    %13 = vector.load %arg12[%c1_4, %c0_5] : memref<16x768xf32, #tpu.memory_space<vmem>>, vector<1x768xf32>
    tpu.vector_store %arg12[%c1_4, %c0_5], %12 {strides = array<i32>} : memref<16x768xf32, #tpu.memory_space<vmem>>, vector<1x768xf32>,
    %c2 = arith.constant 2 : index
    %14 = memref.load %arg0[%c2] : memref<16xi32, #tpu.memory_space<smem>>
    %15 = arith.index_cast %14 : i32 to index
    %c0_6 = arith.constant 0 : index
    %16 = vector.load %arg2[%15, %c0_6] : memref<50x768xf32, #tpu.memory_space<vmem>>, vector<1x768xf32>
    %c2_7 = arith.constant 2 : index
    %c0_8 = arith.constant 0 : index
    %17 = vector.load %arg12[%c2_7, %c0_8] : memref<16x768xf32, #tpu.memory_space<vmem>>, vector<1x768xf32>
    tpu.vector_store %arg12[%c2_7, %c0_8], %16 {strides = array<i32>} : memref<16x768xf32, #tpu.memory_space<vmem>>, vector<1x768xf32>,
    %c3 = arith.constant 3 : index
    %18 = memref.load %arg0[%c3] : memref<16xi32, #tpu.memory_space<smem>>
    %19 = arith.index_cast %18 : i32 to index
    %c0_9 = arith.constant 0 : index
    %20 = vector.load %arg2[%19, %c0_9] : memref<50x768xf32, #tpu.memory_space<vmem>>, vector<1x768xf32>
    %c3_10 = arith.constant 3 : index
    %c0_11 = arith.constant 0 : index
    %21 = vector.load %arg12[%c3_10, %c0_11] : memref<16x768xf32, #tpu.memory_space<vmem>>, vector<1x768xf32>
    tpu.vector_store %arg12[%c3_10, %c0_11], %20 {strides = array<i32>} : memref<16x768xf32, #tpu.memory_space<vmem>>, vector<1x768xf32>,
    %c4 = arith.constant 4 : index
    %22 = memref.load %arg0[%c4] : memref<16xi32, #tpu.memory_space<smem>>
    %23 = arith.index_cast %22 : i32 to index
    %c0_12 = arith.constant 0 : index
    %24 = vector.load %arg2[%23, %c0_12] : memref<50x768xf32, #tpu.memory_space<vmem>>, vector<1x768xf32>
    %c4_13 = arith.constant 4 : index
    %c0_14 = arith.constant 0 : index
    %25 = vector.load %arg12[%c4_13, %c0_14] : memref<16x768xf32, #tpu.memory_space<vmem>>, vector<1x768xf32>
    tpu.vector_store %arg12[%c4_13, %c0_14], %24 {strides = array<i32>} : memref<16x768xf32, #tpu.memory_space<vmem>>, vector<1x768xf32>,
    %c5 = arith.constant 5 : index
    %26 = memref.load %arg0[%c5] : memref<16xi32, #tpu.memory_space<smem>>
    %27 = arith.index_cast %26 : i32 to index
    %c0_15 = arith.constant 0 : index
    %28 = vector.load %arg2[%27, %c0_15] : memref<50x768xf32, #tpu.memory_space<vmem>>, vector<1x768xf32>
    %c5_16 = arith.constant 5 : index
    %c0_17 = arith.constant 0 : index
    %29 = vector.load %arg12[%c5_16, %c0_17] : memref<16x768xf32, #tpu.memory_space<vmem>>, vector<1x768xf32>
    tpu.vector_store %arg12[%c5_16, %c0_17], %28 {strides = array<i32>} : memref<16x768xf32, #tpu.memory_space<vmem>>, vector<1x768xf32>,
    %c6 = arith.constant 6 : index
    %30 = memref.load %arg0[%c6] : memref<16xi32, #tpu.memory_space<smem>>
    %31 = arith.index_cast %30 : i32 to index
    %c0_18 = arith.constant 0 : index
    %32 = vector.load %arg2[%31, %c0_18] : memref<50x768xf32, #tpu.memory_space<vmem>>, vector<1x768xf32>
    %c6_19 = arith.constant 6 : index
    %c0_20 = arith.constant 0 : index
    %33 = vector.load %arg12[%c6_19, %c0_20] : memref<16x768xf32, #tpu.memory_space<vmem>>, vector<1x768xf32>
    tpu.vector_store %arg12[%c6_19, %c0_20], %32 {strides = array<i32>} : memref<16x768xf32, #tpu.memory_space<vmem>>, vector<1x768xf32>,
    %c7 = arith.constant 7 : index
    %34 = memref.load %arg0[%c7] : memref<16xi32, #tpu.memory_space<smem>>
    %35 = arith.index_cast %34 : i32 to index
    %c0_21 = arith.constant 0 : index
    %36 = vector.load %arg2[%35, %c0_21] : memref<50x768xf32, #tpu.memory_space<vmem>>, vector<1x768xf32>
    %c7_22 = arith.constant 7 : index
    %c0_23 = arith.constant 0 : index
    %37 = vector.load %arg12[%c7_22, %c0_23] : memref<16x768xf32, #tpu.memory_space<vmem>>, vector<1x768xf32>
    tpu.vector_store %arg12[%c7_22, %c0_23], %36 {strides = array<i32>} : memref<16x768xf32, #tpu.memory_space<vmem>>, vector<1x768xf32>,
    %c8 = arith.constant 8 : index
    %38 = memref.load %arg0[%c8] : memref<16xi32, #tpu.memory_space<smem>>
    %39 = arith.index_cast %38 : i32 to index
    %c0_24 = arith.constant 0 : index
    %40 = vector.load %arg2[%39, %c0_24] : memref<50x768xf32, #tpu.memory_space<vmem>>, vector<1x768xf32>
    %c8_25 = arith.constant 8 : index
    %c0_26 = arith.constant 0 : index
    %41 = vector.load %arg12[%c8_25, %c0_26] : memref<16x768xf32, #tpu.memory_space<vmem>>, vector<1x768xf32>
    tpu.vector_store %arg12[%c8_25, %c0_26], %40 {strides = array<i32>} : memref<16x768xf32, #tpu.memory_space<vmem>>, vector<1x768xf32>,
    %c9 = arith.constant 9 : index
    %42 = memref.load %arg0[%c9] : memref<16xi32, #tpu.memory_space<smem>>
    %43 = arith.index_cast %42 : i32 to index
    %c0_27 = arith.constant 0 : index
    %44 = vector.load %arg2[%43, %c0_27] : memref<50x768xf32, #tpu.memory_space<vmem>>, vector<1x768xf32>
    %c9_28 = arith.constant 9 : index
    %c0_29 = arith.constant 0 : index
    %45 = vector.load %arg12[%c9_28, %c0_29] : memref<16x768xf32, #tpu.memory_space<vmem>>, vector<1x768xf32>
    tpu.vector_store %arg12[%c9_28, %c0_29], %44 {strides = array<i32>} : memref<16x768xf32, #tpu.memory_space<vmem>>, vector<1x768xf32>,
    %c10 = arith.constant 10 : index
    %46 = memref.load %arg0[%c10] : memref<16xi32, #tpu.memory_space<smem>>
    %47 = arith.index_cast %46 : i32 to index
    %c0_30 = arith.constant 0 : index
    %48 = vector.load %arg2[%47, %c0_30] : memref<50x768xf32, #tpu.memory_space<vmem>>, vector<1x768xf32>
    %c10_31 = arith.constant 10 : index
    %c0_32 = arith.constant 0 : index
    %49 = vector.load %arg12[%c10_31, %c0_32] : memref<16x768xf32, #tpu.memory_space<vmem>>, vector<1x768xf32>
    tpu.vector_store %arg12[%c10_31, %c0_32], %48 {strides = array<i32>} : memref<16x768xf32, #tpu.memory_space<vmem>>, vector<1x768xf32>,
    %c11 = arith.constant 11 : index
    %50 = memref.load %arg0[%c11] : memref<16xi32, #tpu.memory_space<smem>>
    %51 = arith.index_cast %50 : i32 to index
    %c0_33 = arith.constant 0 : index
    %52 = vector.load %arg2[%51, %c0_33] : memref<50x768xf32, #tpu.memory_space<vmem>>, vector<1x768xf32>
    %c11_34 = arith.constant 11 : index
    %c0_35 = arith.constant 0 : index
    %53 = vector.load %arg12[%c11_34, %c0_35] : memref<16x768xf32, #tpu.memory_space<vmem>>, vector<1x768xf32>
    tpu.vector_store %arg12[%c11_34, %c0_35], %52 {strides = array<i32>} : memref<16x768xf32, #tpu.memory_space<vmem>>, vector<1x768xf32>,
    %c12 = arith.constant 12 : index
    %54 = memref.load %arg0[%c12] : memref<16xi32, #tpu.memory_space<smem>>
    %55 = arith.index_cast %54 : i32 to index
    %c0_36 = arith.constant 0 : index
    %56 = vector.load %arg2[%55, %c0_36] : memref<50x768xf32, #tpu.memory_space<vmem>>, vector<1x768xf32>
    %c12_37 = arith.constant 12 : index
    %c0_38 = arith.constant 0 : index
    %57 = vector.load %arg12[%c12_37, %c0_38] : memref<16x768xf32, #tpu.memory_space<vmem>>, vector<1x768xf32>
    tpu.vector_store %arg12[%c12_37, %c0_38], %56 {strides = array<i32>} : memref<16x768xf32, #tpu.memory_space<vmem>>, vector<1x768xf32>,
    %c13 = arith.constant 13 : index
    %58 = memref.load %arg0[%c13] : memref<16xi32, #tpu.memory_space<smem>>
    %59 = arith.index_cast %58 : i32 to index
    %c0_39 = arith.constant 0 : index
    %60 = vector.load %arg2[%59, %c0_39] : memref<50x768xf32, #tpu.memory_space<vmem>>, vector<1x768xf32>
    %c13_40 = arith.constant 13 : index
    %c0_41 = arith.constant 0 : index
    %61 = vector.load %arg12[%c13_40, %c0_41] : memref<16x768xf32, #tpu.memory_space<vmem>>, vector<1x768xf32>
    tpu.vector_store %arg12[%c13_40, %c0_41], %60 {strides = array<i32>} : memref<16x768xf32, #tpu.memory_space<vmem>>, vector<1x768xf32>,
    %c14 = arith.constant 14 : index
    %62 = memref.load %arg0[%c14] : memref<16xi32, #tpu.memory_space<smem>>
    %63 = arith.index_cast %62 : i32 to index
    %c0_42 = arith.constant 0 : index
    %64 = vector.load %arg2[%63, %c0_42] : memref<50x768xf32, #tpu.memory_space<vmem>>, vector<1x768xf32>
    %c14_43 = arith.constant 14 : index
    %c0_44 = arith.constant 0 : index
    %65 = vector.load %arg12[%c14_43, %c0_44] : memref<16x768xf32, #tpu.memory_space<vmem>>, vector<1x768xf32>
    tpu.vector_store %arg12[%c14_43, %c0_44], %64 {strides = array<i32>} : memref<16x768xf32, #tpu.memory_space<vmem>>, vector<1x768xf32>,
    %c15 = arith.constant 15 : index
    %66 = memref.load %arg0[%c15] : memref<16xi32, #tpu.memory_space<smem>>
    %67 = arith.index_cast %66 : i32 to index
    %c0_45 = arith.constant 0 : index
    %68 = vector.load %arg2[%67, %c0_45] : memref<50x768xf32, #tpu.memory_space<vmem>>, vector<1x768xf32>
    %c15_46 = arith.constant 15 : index
    %c0_47 = arith.constant 0 : index
    %69 = vector.load %arg12[%c15_46, %c0_47] : memref<16x768xf32, #tpu.memory_space<vmem>>, vector<1x768xf32>
    tpu.vector_store %arg12[%c15_46, %c0_47], %68 {strides = array<i32>} : memref<16x768xf32, #tpu.memory_space<vmem>>, vector<1x768xf32>,
    %c0_48 = arith.constant 0 : index
    %c0_49 = arith.constant 0 : index
    %70 = vector.load %arg12[%c0_48, %c0_49] : memref<16x768xf32, #tpu.memory_space<vmem>>, vector<16x768xf32>
    %71 = vector.shape_cast %70 : vector<16x768xf32> to vector<2x8x768xf32>
    %c0_50 = arith.constant 0 : index
    %c0_51 = arith.constant 0 : index
    %72 = vector.load %arg3[%c0_50, %c0_51] : memref<8x768xf32, #tpu.memory_space<vmem>>, vector<8x768xf32>
    %73 = vector.shape_cast %72 : vector<8x768xf32> to vector<1x8x768xf32>
    %74 = vector.broadcast %73 : vector<1x8x768xf32> to vector<2x8x768xf32>
    %75 = arith.addf %71, %74 : vector<2x8x768xf32>
    %76 = vector.shape_cast %75 : vector<2x8x768xf32> to vector<16x768xf32>
    %77 = arith.truncf %76 : vector<16x768xf32> to vector<16x768xbf16>
    %c0_i32_52 = arith.constant 0 : i32
    %78 = tpu.memref_slice %arg13[%c0_i32_52] : memref<3x!tpu.dma_semaphore, #tpu.memory_space<semaphore_mem>> -> memref<1x!tpu.dma_semaphore, #tpu.memory_space<semaphore_mem>>
    %79 = tpu.memref_squeeze %78 : memref<1x!tpu.dma_semaphore, #tpu.memory_space<semaphore_mem>> -> memref<!tpu.dma_semaphore, #tpu.memory_space<semaphore_mem>>
    tpu.wait_dma2 semaphore(%79 : memref<!tpu.dma_semaphore, #tpu.memory_space<semaphore_mem>>) src(%arg5 : memref<768x2304xbf16, #tpu.memory_space<any>>) dst(%arg9 : memref<768x2304xbf16, #tpu.memory_space<vmem>>)
    %c0_53 = arith.constant 0 : index
    %c0_54 = arith.constant 0 : index
    %80 = vector.load %arg9[%c0_53, %c0_54] : memref<768x2304xbf16, #tpu.memory_space<vmem>>, vector<768x2304xbf16>
    %cst = arith.constant dense<0.000000e+00> : vector<16x2304xf32>
    %81 = tpu.matmul %77, %80, %cst {dimension_numbers = #tpu.dot_dimension_numbers<[1], [0], [0], [1], [0, 0, 1, 1], [], []>} : vector<16x768xbf16>, vector<768x2304xbf16>, vector<16x2304xf32> -> vector<16x2304xf32>
    %82 = vector.shape_cast %81 : vector<16x2304xf32> to vector<2x8x2304xf32>
    %83 = vector.extract_strided_slice %82 {offsets = [0, 0, 0], sizes = [2, 1, 768], strides = [1, 1, 1]} : vector<2x8x2304xf32> to vector<2x1x768xf32>
    %84 = vector.shape_cast %83 : vector<2x1x768xf32> to vector<2x768xf32>
    %c0_55 = arith.constant 0 : index
    %c0_56 = arith.constant 0 : index
    %85 = vector.load %arg4[%c0_55, %c0_56] : memref<12x768xf32, #tpu.memory_space<vmem>>, vector<1x768xf32>
    %86 = vector.broadcast %85 : vector<1x768xf32> to vector<2x768xf32>
    %87 = arith.addf %84, %86 : vector<2x768xf32>
    %88 = vector.shape_cast %87 : vector<2x768xf32> to vector<2x1x768xf32>
    %89 = vector.extract_strided_slice %81 {offsets = [0, 768], sizes = [16, 768], strides = [1, 1]} : vector<16x2304xf32> to vector<16x768xf32>
    %c1_57 = arith.constant 1 : index
    %c0_58 = arith.constant 0 : index
    %90 = vector.load %arg4[%c1_57, %c0_58] : memref<12x768xf32, #tpu.memory_space<vmem>>, vector<1x768xf32>
    %91 = vector.broadcast %90 : vector<1x768xf32> to vector<16x768xf32>
    %92 = arith.addf %89, %91 : vector<16x768xf32>
    %93 = vector.shape_cast %92 : vector<16x768xf32> to vector<2x8x768xf32>
    %94 = vector.extract_strided_slice %81 {offsets = [0, 1536], sizes = [16, 768], strides = [1, 1]} : vector<16x2304xf32> to vector<16x768xf32>
    %c2_59 = arith.constant 2 : index
    %c0_60 = arith.constant 0 : index
    %95 = vector.load %arg4[%c2_59, %c0_60] : memref<12x768xf32, #tpu.memory_space<vmem>>, vector<1x768xf32>
    %96 = vector.broadcast %95 : vector<1x768xf32> to vector<16x768xf32>
    %97 = arith.addf %94, %96 : vector<16x768xf32>
    %98 = vector.shape_cast %97 : vector<16x768xf32> to vector<2x8x768xf32>
    %99 = arith.truncf %88 : vector<2x1x768xf32> to vector<2x1x768xbf16>
    %100 = arith.truncf %93 : vector<2x8x768xf32> to vector<2x8x768xbf16>
    "tpu.trace_start"() <{level = 10 : i32, message = "bqd,bkd->bqk"}> : () -> ()
    %cst_61 = arith.constant dense<0.000000e+00> : vector<2x1x8xf32>
    %101 = tpu.matmul %99, %100, %cst_61 {dimension_numbers = #tpu.dot_dimension_numbers<[2], [2], [1], [1], [0, 0, 0, 1, 1, 1], [0], [0]>} : vector<2x1x768xbf16>, vector<2x8x768xbf16>, vector<2x1x8xf32> -> vector<2x1x8xf32>
    "tpu.trace_stop"() : () -> ()
    %cst_62 = arith.constant 0.0360843912 : f32
    %102 = vector.broadcast %cst_62 : f32 to vector<2x1x8xf32>
    %103 = arith.mulf %101, %102 : vector<2x1x8xf32>
    %c0_63 = arith.constant 0 : index
    %c0_64 = arith.constant 0 : index
    %104 = vector.load %arg1[%c0_63, %c0_64] : memref<2x8xf32, #tpu.memory_space<vmem>>, vector<2x8xf32>
    %105 = vector.shape_cast %104 : vector<2x8xf32> to vector<2x1x8xf32>
    %106 = arith.addf %103, %105 : vector<2x1x8xf32>
    %cst_65 = arith.constant dense<0xFF800000> : vector<2x1xf32>
    %107 = vector.multi_reduction <maximumf>, %106, %cst_65 [2] : vector<2x1x8xf32> to vector<2x1xf32>
    %108 = vector.shape_cast %107 : vector<2x1xf32> to vector<2x1x1xf32>
    %109 = vector.broadcast %108 : vector<2x1x1xf32> to vector<2x1x8xf32>
    %110 = arith.subf %106, %109 : vector<2x1x8xf32>
    %111 = math.exp %110 : vector<2x1x8xf32>
    %cst_66 = arith.constant dense<0.000000e+00> : vector<2x1xf32>
    %112 = vector.multi_reduction <add>, %111, %cst_66 [2] : vector<2x1x8xf32> to vector<2x1xf32>
    %113 = vector.shape_cast %112 : vector<2x1xf32> to vector<2x1x1xf32>
    %114 = vector.broadcast %113 : vector<2x1x1xf32> to vector<2x1x8xf32>
    %115 = arith.divf %111, %114 : vector<2x1x8xf32>
    %116 = arith.truncf %115 : vector<2x1x8xf32> to vector<2x1x8xbf16>
    %117 = arith.truncf %98 : vector<2x8x768xf32> to vector<2x8x768xbf16>
    "tpu.trace_start"() <{level = 10 : i32, message = "bqk,bkd->bqd"}> : () -> ()
    %cst_67 = arith.constant dense<0.000000e+00> : vector<2x1x768xf32>
    %118 = tpu.matmul %116, %117, %cst_67 {dimension_numbers = #tpu.dot_dimension_numbers<[2], [1], [1], [2], [0, 0, 0, 1, 1, 2], [0], [0]>} : vector<2x1x8xbf16>, vector<2x8x768xbf16>, vector<2x1x768xf32> -> vector<2x1x768xf32>
    "tpu.trace_stop"() : () -> ()
    %119 = vector.shape_cast %118 : vector<2x1x768xf32> to vector<2x768xf32>
    %c1_i32_68 = arith.constant 1 : i32
    %120 = tpu.memref_slice %arg13[%c1_i32_68] : memref<3x!tpu.dma_semaphore, #tpu.memory_space<semaphore_mem>> -> memref<1x!tpu.dma_semaphore, #tpu.memory_space<semaphore_mem>>
    %121 = tpu.memref_squeeze %120 : memref<1x!tpu.dma_semaphore, #tpu.memory_space<semaphore_mem>> -> memref<!tpu.dma_semaphore, #tpu.memory_space<semaphore_mem>>
    tpu.wait_dma2 semaphore(%121 : memref<!tpu.dma_semaphore, #tpu.memory_space<semaphore_mem>>) src(%arg6 : memref<768x1536xbf16, #tpu.memory_space<any>>) dst(%arg10 : memref<768x1536xbf16, #tpu.memory_space<vmem>>)
    %122 = arith.truncf %119 : vector<2x768xf32> to vector<2x768xbf16>
    %c0_69 = arith.constant 0 : index
    %c0_70 = arith.constant 0 : index
    %123 = vector.load %arg10[%c0_69, %c0_70] : memref<768x1536xbf16, #tpu.memory_space<vmem>>, vector<768x768xbf16>
    %cst_71 = arith.constant dense<0.000000e+00> : vector<2x768xf32>
    %124 = tpu.matmul %122, %123, %cst_71 {dimension_numbers = #tpu.dot_dimension_numbers<[1], [0], [0], [1], [0, 0, 1, 1], [], []>} : vector<2x768xbf16>, vector<768x768xbf16>, vector<2x768xf32> -> vector<2x768xf32>
    %c3_72 = arith.constant 3 : index
    %c0_73 = arith.constant 0 : index
    %125 = vector.load %arg4[%c3_72, %c0_73] : memref<12x768xf32, #tpu.memory_space<vmem>>, vector<1x768xf32>
    %126 = vector.broadcast %125 : vector<1x768xf32> to vector<2x768xf32>
    %127 = arith.addf %124, %126 : vector<2x768xf32>
    %128 = vector.extract_strided_slice %75 {offsets = [0, 0, 0], sizes = [2, 1, 768], strides = [1, 1, 1]} : vector<2x8x768xf32> to vector<2x1x768xf32>
    %129 = vector.shape_cast %128 : vector<2x1x768xf32> to vector<2x768xf32>
    %130 = arith.addf %129, %127 : vector<2x768xf32>
    %c4_74 = arith.constant 4 : index
    %c0_75 = arith.constant 0 : index
    %131 = vector.load %arg4[%c4_74, %c0_75] : memref<12x768xf32, #tpu.memory_space<vmem>>, vector<1x768xf32>
    %c5_76 = arith.constant 5 : index
    %c0_77 = arith.constant 0 : index
    %132 = vector.load %arg4[%c5_76, %c0_77] : memref<12x768xf32, #tpu.memory_space<vmem>>, vector<1x768xf32>
    %cst_78 = arith.constant dense<0.000000e+00> : vector<2xf32>
    %133 = vector.multi_reduction <add>, %130, %cst_78 [1] : vector<2x768xf32> to vector<2xf32>
    %134 = vector.shape_cast %133 : vector<2xf32> to vector<2x1xf32>
    %cst_79 = arith.constant 7.680000e+02 : f32
    %135 = vector.broadcast %cst_79 : f32 to vector<2x1xf32>
    %136 = arith.divf %134, %135 : vector<2x1xf32>
    %137 = vector.broadcast %136 : vector<2x1xf32> to vector<2x768xf32>
    %138 = arith.subf %130, %137 : vector<2x768xf32>
    %139 = arith.mulf %138, %138 : vector<2x768xf32>
    %cst_80 = arith.constant dense<0.000000e+00> : vector<2xf32>
    %140 = vector.multi_reduction <add>, %139, %cst_80 [1] : vector<2x768xf32> to vector<2xf32>
    %141 = vector.shape_cast %140 : vector<2xf32> to vector<2x1xf32>
    %cst_81 = arith.constant 7.680000e+02 : f32
    %142 = vector.broadcast %cst_81 : f32 to vector<2x1xf32>
    %143 = arith.divf %141, %142 : vector<2x1xf32>
    %144 = vector.broadcast %136 : vector<2x1xf32> to vector<2x768xf32>
    %145 = arith.subf %130, %144 : vector<2x768xf32>
    %cst_82 = arith.constant 9.99999974E-6 : f32
    %146 = vector.broadcast %cst_82 : f32 to vector<2x1xf32>
    %147 = arith.addf %143, %146 : vector<2x1xf32>
    %148 = math.rsqrt %147 : vector<2x1xf32>
    %149 = vector.broadcast %148 : vector<2x1xf32> to vector<2x768xf32>
    %150 = arith.mulf %145, %149 : vector<2x768xf32>
    %151 = vector.broadcast %131 : vector<1x768xf32> to vector<2x768xf32>
    %152 = arith.mulf %150, %151 : vector<2x768xf32>
    %153 = vector.broadcast %132 : vector<1x768xf32> to vector<2x768xf32>
    %154 = arith.addf %152, %153 : vector<2x768xf32>
    %155 = arith.truncf %154 : vector<2x768xf32> to vector<2x768xbf16>
    %c0_83 = arith.constant 0 : index
    %c768 = arith.constant 768 : index
    %156 = vector.load %arg10[%c0_83, %c768] : memref<768x1536xbf16, #tpu.memory_space<vmem>>, vector<768x768xbf16>
    %cst_84 = arith.constant dense<0.000000e+00> : vector<2x768xf32>
    %157 = tpu.matmul %155, %156, %cst_84 {dimension_numbers = #tpu.dot_dimension_numbers<[1], [0], [0], [1], [0, 0, 1, 1], [], []>} : vector<2x768xbf16>, vector<768x768xbf16>, vector<2x768xf32> -> vector<2x768xf32>
    %c6_85 = arith.constant 6 : index
    %c0_86 = arith.constant 0 : index
    %158 = vector.load %arg4[%c6_85, %c0_86] : memref<12x768xf32, #tpu.memory_space<vmem>>, vector<1x768xf32>
    %159 = vector.broadcast %158 : vector<1x768xf32> to vector<2x768xf32>
    %160 = arith.addf %157, %159 : vector<2x768xf32>
    %161 = arith.mulf %160, %160 : vector<2x768xf32>
    %162 = arith.mulf %160, %161 : vector<2x768xf32>
    %cst_87 = arith.constant 4.471500e-02 : f32
    %163 = vector.broadcast %cst_87 : f32 to vector<2x768xf32>
    %164 = arith.mulf %163, %162 : vector<2x768xf32>
    %165 = arith.addf %160, %164 : vector<2x768xf32>
    %cst_88 = arith.constant 0.797884583 : f32
    %166 = vector.broadcast %cst_88 : f32 to vector<2x768xf32>
    %167 = arith.mulf %166, %165 : vector<2x768xf32>
    %168 = math.tanh %167 : vector<2x768xf32>
    %cst_89 = arith.constant 1.000000e+00 : f32
    %169 = vector.broadcast %cst_89 : f32 to vector<2x768xf32>
    %170 = arith.addf %169, %168 : vector<2x768xf32>
    %cst_90 = arith.constant 5.000000e-01 : f32
    %171 = vector.broadcast %cst_90 : f32 to vector<2x768xf32>
    %172 = arith.mulf %171, %170 : vector<2x768xf32>
    %173 = arith.mulf %160, %172 : vector<2x768xf32>
    %c2_i32_91 = arith.constant 2 : i32
    %174 = tpu.memref_slice %arg13[%c2_i32_91] : memref<3x!tpu.dma_semaphore, #tpu.memory_space<semaphore_mem>> -> memref<1x!tpu.dma_semaphore, #tpu.memory_space<semaphore_mem>>
    %175 = tpu.memref_squeeze %174 : memref<1x!tpu.dma_semaphore, #tpu.memory_space<semaphore_mem>> -> memref<!tpu.dma_semaphore, #tpu.memory_space<semaphore_mem>>
    tpu.wait_dma2 semaphore(%175 : memref<!tpu.dma_semaphore, #tpu.memory_space<semaphore_mem>>) src(%arg7 : memref<768x1664xbf16, #tpu.memory_space<any>>) dst(%arg11 : memref<768x1664xbf16, #tpu.memory_space<vmem>>)
    %176 = arith.truncf %173 : vector<2x768xf32> to vector<2x768xbf16>
    %c0_92 = arith.constant 0 : index
    %c0_93 = arith.constant 0 : index
    %177 = vector.load %arg11[%c0_92, %c0_93] : memref<768x1664xbf16, #tpu.memory_space<vmem>>, vector<768x768xbf16>
    %cst_94 = arith.constant dense<0.000000e+00> : vector<2x768xf32>
    %178 = tpu.matmul %176, %177, %cst_94 {dimension_numbers = #tpu.dot_dimension_numbers<[1], [0], [0], [1], [0, 0, 1, 1], [], []>} : vector<2x768xbf16>, vector<768x768xbf16>, vector<2x768xf32> -> vector<2x768xf32>
    %c7_95 = arith.constant 7 : index
    %c0_96 = arith.constant 0 : index
    %179 = vector.load %arg4[%c7_95, %c0_96] : memref<12x768xf32, #tpu.memory_space<vmem>>, vector<1x768xf32>
    %180 = vector.broadcast %179 : vector<1x768xf32> to vector<2x768xf32>
    %181 = arith.addf %178, %180 : vector<2x768xf32>
    %182 = arith.addf %154, %181 : vector<2x768xf32>
    %c8_97 = arith.constant 8 : index
    %c0_98 = arith.constant 0 : index
    %183 = vector.load %arg4[%c8_97, %c0_98] : memref<12x768xf32, #tpu.memory_space<vmem>>, vector<1x768xf32>
    %c9_99 = arith.constant 9 : index
    %c0_100 = arith.constant 0 : index
    %184 = vector.load %arg4[%c9_99, %c0_100] : memref<12x768xf32, #tpu.memory_space<vmem>>, vector<1x768xf32>
    %cst_101 = arith.constant dense<0.000000e+00> : vector<2xf32>
    %185 = vector.multi_reduction <add>, %182, %cst_101 [1] : vector<2x768xf32> to vector<2xf32>
    %186 = vector.shape_cast %185 : vector<2xf32> to vector<2x1xf32>
    %cst_102 = arith.constant 7.680000e+02 : f32
    %187 = vector.broadcast %cst_102 : f32 to vector<2x1xf32>
    %188 = arith.divf %186, %187 : vector<2x1xf32>
    %189 = vector.broadcast %188 : vector<2x1xf32> to vector<2x768xf32>
    %190 = arith.subf %182, %189 : vector<2x768xf32>
    %191 = arith.mulf %190, %190 : vector<2x768xf32>
    %cst_103 = arith.constant dense<0.000000e+00> : vector<2xf32>
    %192 = vector.multi_reduction <add>, %191, %cst_103 [1] : vector<2x768xf32> to vector<2xf32>
    %193 = vector.shape_cast %192 : vector<2xf32> to vector<2x1xf32>
    %cst_104 = arith.constant 7.680000e+02 : f32
    %194 = vector.broadcast %cst_104 : f32 to vector<2x1xf32>
    %195 = arith.divf %193, %194 : vector<2x1xf32>
    %196 = vector.broadcast %188 : vector<2x1xf32> to vector<2x768xf32>
    %197 = arith.subf %182, %196 : vector<2x768xf32>
    %cst_105 = arith.constant 9.99999974E-6 : f32
    %198 = vector.broadcast %cst_105 : f32 to vector<2x1xf32>
    %199 = arith.addf %195, %198 : vector<2x1xf32>
    %200 = math.rsqrt %199 : vector<2x1xf32>
    %201 = vector.broadcast %200 : vector<2x1xf32> to vector<2x768xf32>
    %202 = arith.mulf %197, %201 : vector<2x768xf32>
    %203 = vector.broadcast %183 : vector<1x768xf32> to vector<2x768xf32>
    %204 = arith.mulf %202, %203 : vector<2x768xf32>
    %205 = vector.broadcast %184 : vector<1x768xf32> to vector<2x768xf32>
    %206 = arith.addf %204, %205 : vector<2x768xf32>
    %207 = arith.truncf %206 : vector<2x768xf32> to vector<2x768xbf16>
    %c0_106 = arith.constant 0 : index
    %c768_107 = arith.constant 768 : index
    %208 = vector.load %arg11[%c0_106, %c768_107] : memref<768x1664xbf16, #tpu.memory_space<vmem>>, vector<768x768xbf16>
    %cst_108 = arith.constant dense<0.000000e+00> : vector<2x768xf32>
    %209 = tpu.matmul %207, %208, %cst_108 {dimension_numbers = #tpu.dot_dimension_numbers<[1], [0], [0], [1], [0, 0, 1, 1], [], []>} : vector<2x768xbf16>, vector<768x768xbf16>, vector<2x768xf32> -> vector<2x768xf32>
    %c10_109 = arith.constant 10 : index
    %c0_110 = arith.constant 0 : index
    %210 = vector.load %arg4[%c10_109, %c0_110] : memref<12x768xf32, #tpu.memory_space<vmem>>, vector<1x768xf32>
    %211 = vector.broadcast %210 : vector<1x768xf32> to vector<2x768xf32>
    %212 = arith.addf %209, %211 : vector<2x768xf32>
    %213 = math.tanh %212 : vector<2x768xf32>
    %214 = arith.truncf %213 : vector<2x768xf32> to vector<2x768xbf16>
    %c0_111 = arith.constant 0 : index
    %c1536 = arith.constant 1536 : index
    %215 = vector.load %arg11[%c0_111, %c1536] : memref<768x1664xbf16, #tpu.memory_space<vmem>>, vector<768x128xbf16>
    %cst_112 = arith.constant dense<0.000000e+00> : vector<2x128xf32>
    %216 = tpu.matmul %214, %215, %cst_112 {dimension_numbers = #tpu.dot_dimension_numbers<[1], [0], [0], [1], [0, 0, 1, 1], [], []>} : vector<2x768xbf16>, vector<768x128xbf16>, vector<2x128xf32> -> vector<2x128xf32>
    %c11_113 = arith.constant 11 : index
    %c0_114 = arith.constant 0 : index
    %217 = vector.load %arg4[%c11_113, %c0_114] : memref<12x768xf32, #tpu.memory_space<vmem>>, vector<1x128xf32>
    %218 = vector.broadcast %217 : vector<1x128xf32> to vector<2x128xf32>
    %219 = arith.addf %216, %218 : vector<2x128xf32>
    %c0_115 = arith.constant 0 : index
    %c0_116 = arith.constant 0 : index
    %220 = vector.load %arg8[%c0_115, %c0_116] : memref<2x128xf32, #tpu.memory_space<vmem>>, vector<2x128xf32>
    tpu.vector_store %arg8[%c0_115, %c0_116], %219 {strides = array<i32>} : memref<2x128xf32, #tpu.memory_space<vmem>>, vector<2x128xf32>,
    return
  }
}

</mosaic_0001>

<bundles_post_ra>
// kernel: roberta_classifier_forward.1
= control target key start
LH: loop header
LB: loop body
LE: loop exit
PB: predicated region body
PF: predicated region fallthrough
CT: control target
= control target key end

     0   :  { %13 = vsyncpa [#allocation10], 0  ;;  %s8779_s0 = inlined_call_operand.vmem [shape: s32[16], index: 0, kind: input, shape index: {}]   ;;  %s8780_s1 = inlined_call_operand.vmem [shape: f32[2,8], index: 1, kind: input, shape index: {}]   ;;  %s8781_s2 = inlined_call_operand.hbm [shape: f32[50,768], index: 2, kind: input, shape index: {}]   ;;  %s8782_s3 = inlined_call_operand.hbm [shape: f32[8,768], index: 3, kind: input, shape index: {}]   ;;  %s8783_s4 = inlined_call_operand.hbm [shape: f32[12,768], index: 4, kind: input, shape index: {}]   ;;  %s8784_s5 = inlined_call_operand.hbm [shape: bf16[768,2304], index: 5, kind: input, shape index: {}]   ;;  %s8785_s6 = inlined_call_operand.hbm [shape: bf16[768,1536], index: 6, kind: input, shape index: {}]   ;;  %s8786_s7 = inlined_call_operand.hbm [shape: bf16[768,1664], index: 7, kind: input, shape index: {}]   ;;  %s8787_s8 = inlined_call_operand.hbm [shape: f32[2,128], index: 8, kind: output, shape index: {}]  }
   0x1   :  { %14 = vsyncpa [#allocation8], 0 }
   0x2   :  { %15 = vsyncpa [#allocation13], 0 }
   0x3   :  { %16 = vsyncpa [#allocation9], 0  ;;  %s23_s29 = sshll.u32 %s8779_s0, 4  ;;  %s7570_s30 = smov [#allocation12]   ;;  %s24_s29 = int_to_ptr.vmem [resolvable:$true] %s23_s29 }
   0x4   :  { %s47_s9 = sshll.u32 %s7570_s30, 4  ;;  %s7456_s12 = scalar_lea.hbm %s8782_s3, 768  ;;  %s48_s9 = int_to_ptr.vmem [resolvable:$true] %s47_s9 }
   0x5   :  { %p7457_p0 = scmp.ne.s32.totalorder %s8782_s3, %s7456_s12  ;;  %p7460_p1 = scmp.lt.u32.totalorder %s7456_s12, %s8782_s3 }
   0x7   :  { %p7462_p2 = pnand %p7460_p1, %p7457_p0 }
   0x9   :  { %7465 = shalt.err (!%p7462_p2)
}
   0xa   :  { %s7466_s17 = scalar_lea.vmem %s48_s9, 768  ;;  %p7471_p4 = scmp.lt.s32.totalorder %s48_s9, %s48_s9 }
   0xb   :  { %p7467_p3 = scmp.ne.s32.totalorder %s48_s9, %s7466_s17  ;;  %p7472_p5 = scmp.lt.s32.totalorder %s7466_s17, %s7466_s17 }
   0xd   :  { %p7473_p6 = por %p7472_p5, %p7471_p4 }
   0xf   :  { %p7474_p7 = pnand %p7473_p6, %p7467_p3 }
  0x11   :  { %7477 = shalt.err (!%p7474_p7)
}
  0x12   :  { %50 = dma.hbm_to_vmem [thread:$0]  %s8782_s3, 768, %s48_s9, [#allocation13]  }
  0x13   :  { %s7478_s19 = scalar_lea.vmem %s24_s29, 16  ;;  %p7483_p9 = scmp.lt.s32.totalorder %s24_s29, %s24_s29 }
  0x14   :  { %p7479_p8 = scmp.ne.s32.totalorder %s24_s29, %s7478_s19  ;;  %p7484_p10 = scmp.lt.s32.totalorder %s7478_s19, %s7478_s19 }
  0x16   :  { %p7485_p11 = por %p7484_p10, %p7483_p9 }
  0x18   :  { %p7486_p12 = pnand %p7485_p11, %p7479_p8 }
  0x1a   :  { %7489 = shalt.err (!%p7486_p12)
}
  0x1b   :  { %s7571_s20 = smov [#allocation7]   ;;  %s7572_s21 = smov [#allocation11]  }
  0x1c   :  { %26 = dma.vmem_to_smem %s24_s29, 16, %s7571_s20, [#allocation10]  }
  0x1d   :  { %s34_s22 = sshll.u32 %s7572_s21, 4  ;;  %s7490_s25 = scalar_lea.hbm %s8781_s2, 5376  ;;  %s35_s22 = int_to_ptr.vmem [resolvable:$true] %s34_s22 }
  0x1e   :  { %p7491_p13 = scmp.ne.s32.totalorder %s8781_s2, %s7490_s25  ;;  %p7494_p0 = scmp.lt.u32.totalorder %s7490_s25, %s8781_s2 }
  0x20   :  { %p7496_p1 = pnand %p7494_p0, %p7491_p13 }
  0x22   :  { %7499 = shalt.err (!%p7496_p1)
}
  0x23   :  { %s7500_s30 = scalar_lea.vmem %s35_s22, 5376  ;;  %p7505_p3 = scmp.lt.s32.totalorder %s35_s22, %s35_s22 }
  0x24   :  { %p7501_p2 = scmp.ne.s32.totalorder %s35_s22, %s7500_s30  ;;  %p7506_p4 = scmp.lt.s32.totalorder %s7500_s30, %s7500_s30 }
  0x26   :  { %p7507_p5 = por %p7506_p4, %p7505_p3 }
  0x28   :  { %p7508_p6 = pnand %p7507_p5, %p7501_p2 }
  0x2a   :  { %7511 = shalt.err (!%p7508_p6)
}
  0x2b   :  { %s7573_s29 = smov 768   ;;  %s7574_s9 = smov 48  }
  0x2c   :  { %40 = dma.hbm_to_vmem [thread:$0]  %s8781_s2, 5376, %s35_s22, [#allocation8], %s7573_s29, %s7573_s29, %s7574_s9  }
  0x2d   :  { %s7575_s12 = smov [#allocation14]   ;;  %s7512_s16 = scalar_lea.hbm %s8783_s4, 1536 }
  0x2e   :  { %s56_s13 = sshll.u32 %s7575_s12, 4  ;;  %p7513_p7 = scmp.ne.s32.totalorder %s8783_s4, %s7512_s16  ;;  %s57_s13 = int_to_ptr.vmem [resolvable:$true] %s56_s13 }
  0x2f   :  { %p7516_p8 = scmp.lt.u32.totalorder %s7512_s16, %s8783_s4 }
  0x31   :  { %p7518_p9 = pnand %p7516_p8, %p7513_p7 }
  0x33   :  { %7521 = shalt.err (!%p7518_p9)
}
  0x34   :  { %s7522_s20 = scalar_lea.vmem %s57_s13, 1536  ;;  %p7527_p11 = scmp.lt.s32.totalorder %s57_s13, %s57_s13 }
  0x35   :  { %p7523_p10 = scmp.ne.s32.totalorder %s57_s13, %s7522_s20  ;;  %p7528_p12 = scmp.lt.s32.totalorder %s7522_s20, %s7522_s20 }
  0x37   :  { %p7529_p13 = por %p7528_p12, %p7527_p11 }
  0x39   :  { %p7530_p0 = pnand %p7529_p13, %p7523_p10 }
  0x3b   :  { %7533 = shalt.err (!%p7530_p0)
}
  0x3c   :  { %62 = dma.hbm_to_vmem [thread:$0]  %s8783_s4, 1536, %s57_s13, [#allocation13], %s7573_s29, %s7573_s29, %s7574_s9  }
  0x3d   :  { %7556 = dma.done.wait [#allocation10], 16  }
  0x3e   :  { %7557 = vsyncadd [#allocation10], 4294967280 }
  0x3f   :  { %7558 = dma.done.wait [#allocation8], 5376  }
  0x40   :  { %7559 = vsyncadd [#allocation8], 4294961920 }
  0x41   :  { %7560 = dma.done.wait [#allocation13], 2304  }
  0x42   :  { %7561 = vsyncadd [#allocation13], 4294964992 }
  0x43   :  { %75 = sfence }
  0x44   :  { %s81_s22 = sld [smem:[#allocation0]]   ;;  %s7576_s23 = smov [#allocation2]   ;;  %v194_v0 = vlaneseq }
  0x45   :  { %s89_s24 = sshll.u32 %s7576_s23, 4  ;;  %s7577_s25 = smov 2304   ;;  %s90_s24 = int_to_ptr.vmem [resolvable:$true] %s89_s24 }
  0x46   :  { %93 = sst [smem:[#allocation17]] %s7577_s25  ;;  %s7578_s26 = smov 18   ;;  %vm7740_vm0 = vcmp.lt.s32.totalorder %v194_v0, 768 }
  0x47   :  { %95 = sst [smem:[#allocation17 + $0x1]] %s7577_s25  ;;  %s7579_s27 = smov 64  }
  0x48   :  { %97 = sst [smem:[#allocation17 + $0x2]] %s7578_s26  ;;  %s7580_s3 = smov 128  }
  0x49   :  { %99 = sst [smem:[#allocation17 + $0x3]] %s7579_s27  ;;  %s7581_s30 = smov 2  }
  0x4a   :  { %s7063_s4 = sshll.u32 %s81_s22, 26  ;;  %101 = sst [smem:[#allocation17 + $0x4]] %s7580_s3 }
  0x4b   :  { %s7690_s28 = sadd.s32 134217728, %s7063_s4  ;;  %103 = sst [smem:[#allocation17 + $0x5]] %s7581_s30 }
  0x4c   :  { %s7582_s9 = smov 1152   ;;  %107 = sst [smem:[#allocation17 + $0x7]] %s7579_s27 }
  0x4d   :  { %105 = sst [smem:[#allocation17 + $0x6]] %s7582_s9  ;;  %s7583_s10 = smov 4  }
  0x4e   :  { %109 = sst [smem:[#allocation17 + $0x8]] %s7583_s10  ;;  %s7584_s11 = smov [#allocation6]  }
  0x4f   :  { %s7585_s12 = smov [#allocation16]   ;;  %s7586_s15 = smov 1536  }
  0x50   :  { %111 = dma.general %s8784_s5, 110592, %s90_s24, %s7584_s11, %s7585_s12, [#allocation17], %s7690_s28, 0  }
  0x51   :  { %128 = sst [smem:[#allocation19]] %s7586_s15  ;;  %s7587_s16 = smov [#allocation3]  }
  0x52   :  { %130 = sst [smem:[#allocation19 + $0x1]] %s7586_s15  ;;  %s124_s17 = sshll.u32 %s7587_s16, 4  ;;  %s125_s17 = int_to_ptr.vmem [resolvable:$true] %s124_s17 }
  0x53   :  { %s7588_s0 = smov 12   ;;  %134 = sst [smem:[#allocation19 + $0x3]] %s7579_s27 }
  0x54   :  { %132 = sst [smem:[#allocation19 + $0x2]] %s7588_s0  ;;  %s7589_s5 = smov [#allocation6 + $0x1]  }
  0x55   :  { %136 = sst [smem:[#allocation19 + $0x4]] %s7580_s3  ;;  %s7590_s18 = smov [#allocation18]  }
  0x56   :  { %138 = sst [smem:[#allocation19 + $0x5]] %s7581_s30  ;;  %s7591_s2 = smov 1664  }
  0x57   :  { %140 = sst [smem:[#allocation19 + $0x6]] %s7573_s29  ;;  %s7592_s21 = smov [#allocation4]  }
  0x58   :  { %142 = sst [smem:[#allocation19 + $0x7]] %s7579_s27  ;;  %s159_s22 = sshll.u32 %s7592_s21, 4  ;;  %s160_s22 = int_to_ptr.vmem [resolvable:$true] %s159_s22 }
  0x59   :  { %144 = sst [smem:[#allocation19 + $0x8]] %s7583_s10  ;;  %s7593_s23 = smov 13  }
  0x5a   :  { %146 = dma.general %s8785_s6, 73728, %s125_s17, %s7589_s5, %s7590_s18, [#allocation19], %s7690_s28, 0  }
  0x5b   :  { %163 = sst [smem:[#allocation21]] %s7591_s2  ;;  %s7594_s29 = smov 832  }
  0x5c   :  { %165 = sst [smem:[#allocation21 + $0x1]] %s7591_s2  ;;  %s7595_s6 = smov [#allocation6 + $0x2]  }
  0x5d   :  { %167 = sst [smem:[#allocation21 + $0x2]] %s7593_s23  ;;  %s7596_s24 = smov [#allocation20]  }
  0x5e   :  { %169 = sst [smem:[#allocation21 + $0x3]] %s7579_s27 }
  0x5f   :  { %171 = sst [smem:[#allocation21 + $0x4]] %s7580_s3 }
  0x60   :  { %173 = sst [smem:[#allocation21 + $0x5]] %s7581_s30 }
  0x61   :  { %175 = sst [smem:[#allocation21 + $0x6]] %s7594_s29 }
  0x62   :  { %177 = sst [smem:[#allocation21 + $0x7]] %s7579_s27 }
  0x63   :  { %179 = sst [smem:[#allocation21 + $0x8]] %s7583_s10 }
  0x64   :  { %181 = dma.general %s8786_s7, 79872, %s160_s22, %s7595_s6, %s7596_s24, [#allocation21], %s7690_s28, 0  }
  0x65   :  { %s182_s4 = sld [smem:[#allocation7]]  ;;  %s7070_s9 = sld [smem:[#allocation7 + $0x1]]  ;;  %v437_v50 = vld [vmem:[#allocation12] sm:$0xff]  ;;  %v438_v51 = vld [vmem:[#allocation12 + $0x8] sm:$0xff]  ;;  %v439_v52 = vld [vmem:[#allocation12 + $0x10] sm:$0xff] }
  0x66   :  { %s7718_s11 = sld [smem:[#allocation7 + $0x2]]  ;;  %s7720_s3 = sld [smem:[#allocation7 + $0x3]]  ;;  %v440_v53 = vld [vmem:[#allocation12 + $0x18] sm:$0xff]  ;;  %v441_v54 = vld [vmem:[#allocation12 + $0x20] sm:$0xff]  ;;  %v442_v55 = vld [vmem:[#allocation12 + $0x28] sm:$0xff] }
  0x67   :  { %s7722_s12 = sld [smem:[#allocation7 + $0x4]]  ;;  %s7724_s30 = sld [smem:[#allocation7 + $0x5]] }
  0x68   :  { %s7726_s27 = sld [smem:[#allocation7 + $0x6]]  ;;  %s7728_s10 = sld [smem:[#allocation7 + $0x7]] }
  0x69   :  { %s7730_s13 = sld [smem:[#allocation7 + $0x8]]  ;;  %s7732_s14 = sld [smem:[#allocation7 + $0x9]] }
  0x6a   :  { %s7734_s7 = sld [smem:[#allocation7 + $0xa]]  ;;  %s7736_s28 = sld [smem:[#allocation7 + $0xb]] }
  0x6b   :  { %s183_s15 = sshra.s32 %s182_s4, 3  ;;  %s186_s16 = sand.u32 7, %s182_s4 }
  0x6c   :  { %s7069_s17 = smul.u32 48, %s183_s15  ;;  %s201_s0 = sshra.s32 %s7070_s9, 3 }
  0x6d   :  { %s204_s5 = sand.u32 7, %s7070_s9  ;;  %s7071_s18 = smul.u32 48, %s201_s0 }
  0x6e   :  { %s189_s19 = sadd.s32 %s7069_s17, %s186_s16  ;;  %s216_s20 = sshra.s32 %s7718_s11, 3 }
  0x6f   :  { %s207_s2 = sadd.s32 %s7071_s18, %s204_s5  ;;  %s190_s21 = scalar_lea.vmem [#allocation11], %s189_s19 }
  0x70   :  { %v191_v2 = vld [vmem:[%s190_s21] ss:$8 sm:$0xf]  ;;  %s219_s22 = sand.u32 7, %s7718_s11  ;;  %s208_s23 = scalar_lea.vmem [#allocation11], %s207_s2 }
  0x71   :  { %v192_v3 = vld [vmem:[%s190_s21] ss:$8 sm:$0x30]  ;;  %s7073_s29 = smul.u32 48, %s216_s20  ;;  %s231_s6 = sshra.s32 %s7720_s3, 3 }
  0x72   :  { %v193_v4 = vor.u32 %v192_v3, %v191_v2  ;;  %v209_v5 = vld [vmem:[%s208_s23] ss:$8 sm:$0xf]  ;;  %s234_s24 = sand.u32 7, %s7720_s3  ;;  %s7075_s25 = smul.u32 48, %s231_s6 }
  0x73   :  { %v210_v6 = vld [vmem:[%s208_s23] ss:$8 sm:$0x30]  ;;  %s222_s26 = sadd.s32 %s7073_s29, %s219_s22  ;;  %s246_s4 = sshra.s32 %s7722_s12, 3 }
  0x74   :  { %198 = vst.msk [vmem:[#allocation5] ss:$8 sm:$0xf] %vm7740_vm0, %v193_v4  ;;  %199 = vst.msk [vmem:[#allocation5] ss:$8 sm:$0x30] %vm7740_vm0, %v193_v4  ;;  %v211_v7 = vor.u32 %v210_v6, %v209_v5  ;;  %s237_s9 = sadd.s32 %s7075_s25, %s234_s24 }
  0x75   :  { %s223_s11 = scalar_lea.vmem [#allocation11], %s222_s26  ;;  %s249_s15 = sand.u32 7, %s7722_s12 }
  0x76   :  { %213 = vst.msk [vmem:[#allocation5 + $0x1] ss:$8 sm:$0xf] %vm7740_vm0, %v211_v7  ;;  %214 = vst.msk [vmem:[#allocation5 + $0x1] ss:$8 sm:$0x30] %vm7740_vm0, %v211_v7 }
  0x77   :  { %v224_v8 = vld [vmem:[%s223_s11] ss:$8 sm:$0xf]  ;;  %s238_s16 = scalar_lea.vmem [#allocation11], %s237_s9  ;;  %s7077_s3 = smul.u32 48, %s246_s4 }
  0x78   :  { %v225_v9 = vld [vmem:[%s223_s11] ss:$8 sm:$0x30]  ;;  %s261_s17 = sshra.s32 %s7724_s30, 3  ;;  %s264_s0 = sand.u32 7, %s7724_s30 }
  0x79   :  { %v226_v10 = vor.u32 %v225_v9, %v224_v8  ;;  %v239_v11 = vld [vmem:[%s238_s16] ss:$8 sm:$0xf]  ;;  %s7079_s5 = smul.u32 48, %s261_s17  ;;  %s252_s12 = sadd.s32 %s7077_s3, %s249_s15 }
  0x7a   :  { %v240_v12 = vld [vmem:[%s238_s16] ss:$8 sm:$0x30]  ;;  %s276_s18 = sshra.s32 %s7726_s27, 3  ;;  %s253_s20 = scalar_lea.vmem [#allocation11], %s252_s12 }
  0x7b   :  { %228 = vst.msk [vmem:[#allocation5 + $0x2] ss:$8 sm:$0xf] %vm7740_vm0, %v226_v10  ;;  %229 = vst.msk [vmem:[#allocation5 + $0x2] ss:$8 sm:$0x30] %vm7740_vm0, %v226_v10  ;;  %v241_v13 = vor.u32 %v240_v12, %v239_v11  ;;  %s267_s19 = sadd.s32 %s7079_s5, %s264_s0 }
  0x7c   :  { %v254_v14 = vld [vmem:[%s253_s20] ss:$8 sm:$0xf]  ;;  %s279_s2 = sand.u32 7, %s7726_s27  ;;  %s268_s21 = scalar_lea.vmem [#allocation11], %s267_s19 }
  0x7d   :  { %243 = vst.msk [vmem:[#allocation5 + $0x3] ss:$8 sm:$0xf] %vm7740_vm0, %v241_v13  ;;  %244 = vst.msk [vmem:[#allocation5 + $0x3] ss:$8 sm:$0x30] %vm7740_vm0, %v241_v13 }
  0x7e   :  { %v255_v15 = vld [vmem:[%s253_s20] ss:$8 sm:$0x30]  ;;  %s7081_s30 = smul.u32 48, %s276_s18  ;;  %s291_s22 = sshra.s32 %s7728_s10, 3 }
  0x7f   :  { %v256_v16 = vor.u32 %v255_v15, %v254_v14  ;;  %v269_v17 = vld [vmem:[%s268_s21] ss:$8 sm:$0xf]  ;;  %s294_s23 = sand.u32 7, %s7728_s10  ;;  %s7083_s29 = smul.u32 48, %s291_s22 }
  0x80   :  { %v270_v18 = vld [vmem:[%s268_s21] ss:$8 sm:$0x30]  ;;  %s282_s27 = sadd.s32 %s7081_s30, %s279_s2  ;;  %s306_s6 = sshra.s32 %s7730_s13, 3 }
  0x81   :  { %258 = vst.msk [vmem:[#allocation5 + $0x4] ss:$8 sm:$0xf] %vm7740_vm0, %v256_v16  ;;  %259 = vst.msk [vmem:[#allocation5 + $0x4] ss:$8 sm:$0x30] %vm7740_vm0, %v256_v16  ;;  %v271_v19 = vor.u32 %v270_v18, %v269_v17  ;;  %s297_s24 = sadd.s32 %s7083_s29, %s294_s23 }
  0x82   :  { %s283_s25 = scalar_lea.vmem [#allocation11], %s282_s27  ;;  %s309_s26 = sand.u32 7, %s7730_s13 }
  0x83   :  { %273 = vst.msk [vmem:[#allocation5 + $0x5] ss:$8 sm:$0xf] %vm7740_vm0, %v271_v19  ;;  %274 = vst.msk [vmem:[#allocation5 + $0x5] ss:$8 sm:$0x30] %vm7740_vm0, %v271_v19 }
  0x84   :  { %v284_v20 = vld [vmem:[%s283_s25] ss:$8 sm:$0xf]  ;;  %s298_s4 = scalar_lea.vmem [#allocation11], %s297_s24  ;;  %s7085_s10 = smul.u32 48, %s306_s6 }
  0x85   :  { %v285_v21 = vld [vmem:[%s283_s25] ss:$8 sm:$0x30]  ;;  %s321_s9 = sshra.s32 %s7732_s14, 3  ;;  %s324_s11 = sand.u32 7, %s7732_s14 }
  0x86   :  { %v286_v22 = vor.u32 %v285_v21, %v284_v20  ;;  %v299_v23 = vld [vmem:[%s298_s4] ss:$8 sm:$0xf]  ;;  %s7087_s15 = smul.u32 48, %s321_s9  ;;  %s312_s13 = sadd.s32 %s7085_s10, %s309_s26 }
  0x87   :  { %v300_v24 = vld [vmem:[%s298_s4] ss:$8 sm:$0x30]  ;;  %s336_s16 = sshra.s32 %s7734_s7, 3  ;;  %s313_s17 = scalar_lea.vmem [#allocation11], %s312_s13 }
  0x88   :  { %288 = vst.msk [vmem:[#allocation5 + $0x6] ss:$8 sm:$0xf] %vm7740_vm0, %v286_v22  ;;  %289 = vst.msk [vmem:[#allocation5 + $0x6] ss:$8 sm:$0x30] %vm7740_vm0, %v286_v22  ;;  %v301_v25 = vor.u32 %v300_v24, %v299_v23  ;;  %s327_s3 = sadd.s32 %s7087_s15, %s324_s11 }
  0x89   :  { %v314_v26 = vld [vmem:[%s313_s17] ss:$8 sm:$0xf]  ;;  %s339_s0 = sand.u32 7, %s7734_s7  ;;  %s328_s5 = scalar_lea.vmem [#allocation11], %s327_s3 }
  0x8a   :  { %303 = vst.msk [vmem:[#allocation5 + $0x7] ss:$8 sm:$0xf] %vm7740_vm0, %v301_v25  ;;  %304 = vst.msk [vmem:[#allocation5 + $0x7] ss:$8 sm:$0x30] %vm7740_vm0, %v301_v25 }
  0x8b   :  { %v315_v27 = vld [vmem:[%s313_s17] ss:$8 sm:$0x30]  ;;  %s7089_s14 = smul.u32 48, %s336_s16  ;;  %s351_s12 = sshra.s32 %s7736_s28, 3 }
  0x8c   :  { %v316_v28 = vor.u32 %v315_v27, %v314_v26  ;;  %v329_v29 = vld [vmem:[%s328_s5] ss:$8 sm:$0xf]  ;;  %s354_s18 = sand.u32 7, %s7736_s28  ;;  %s7091_s19 = smul.u32 48, %s351_s12 }
  0x8d   :  { %v330_v30 = vld [vmem:[%s328_s5] ss:$8 sm:$0x30]  ;;  %s342_s7 = sadd.s32 %s7089_s14, %s339_s0  ;;  %s7092_s20 = sld [smem:[#allocation7 + $0xc]] }
  0x8e   :  { %318 = vst.msk [vmem:[#allocation5 + $0x30] ss:$8 sm:$0xf] %vm7740_vm0, %v316_v28  ;;  %319 = vst.msk [vmem:[#allocation5 + $0x30] ss:$8 sm:$0x30] %vm7740_vm0, %v316_v28  ;;  %v331_v31 = vor.u32 %v330_v30, %v329_v29  ;;  %s357_s2 = sadd.s32 %s7091_s19, %s354_s18 }
  0x8f   :  { %s343_s21 = scalar_lea.vmem [#allocation11], %s342_s7  ;;  %s7094_s30 = sld [smem:[#allocation7 + $0xd]] }
  0x90   :  { %333 = vst.msk [vmem:[#allocation5 + $0x31] ss:$8 sm:$0xf] %vm7740_vm0, %v331_v31  ;;  %334 = vst.msk [vmem:[#allocation5 + $0x31] ss:$8 sm:$0x30] %vm7740_vm0, %v331_v31 }
  0x91   :  { %v344_v32 = vld [vmem:[%s343_s21] ss:$8 sm:$0xf]  ;;  %s358_s22 = scalar_lea.vmem [#allocation11], %s357_s2  ;;  %s7096_s28 = sld [smem:[#allocation7 + $0xe]] }
  0x92   :  { %v345_v33 = vld [vmem:[%s343_s21] ss:$8 sm:$0x30]  ;;  %s7807_s23 = sld [smem:[#allocation7 + $0xf]]  ;;  %v426_v57 = vld [vmem:[#allocation5 + $0x8] sm:$0xff]  ;;  %v427_v58 = vld [vmem:[#allocation5 + $0x10] sm:$0xff] }
  0x93   :  { %v346_v34 = vor.u32 %v345_v33, %v344_v32  ;;  %v359_v35 = vld [vmem:[%s358_s22] ss:$8 sm:$0xf]  ;;  %s366_s29 = sshra.s32 %s7092_s20, 3  ;;  %s369_s27 = sand.u32 7, %s7092_s20  ;;  %v7833_v63 = vadd.f32 %v438_v51, %v426_v57  ;;  %v7835_v2 = vadd.f32 %v439_v52, %v427_v58 }
  0x94   :  { %v360_v36 = vld [vmem:[%s358_s22] ss:$8 sm:$0x30]  ;;  %s7093_s6 = smul.u32 48, %s366_s29  ;;  %v430_v61 = vld [vmem:[#allocation5 + $0x28] sm:$0xff] }
  0x95   :  { %348 = vst.msk [vmem:[#allocation5 + $0x32] ss:$8 sm:$0xf] %vm7740_vm0, %v346_v34  ;;  %349 = vst.msk [vmem:[#allocation5 + $0x32] ss:$8 sm:$0x30] %vm7740_vm0, %v346_v34  ;;  %v361_v37 = vor.u32 %v360_v36, %v359_v35  ;;  %v7841_v4 = vadd.f32 %v442_v55, %v430_v61 }
  0x96   :  { %s372_s24 = sadd.s32 %s7093_s6, %s369_s27  ;;  %s381_s25 = sshra.s32 %s7094_s30, 3  ;;  %v425_v56 = vld [vmem:[#allocation5] sm:$0xff]  ;;  %v428_v59 = vld [vmem:[#allocation5 + $0x18] sm:$0xff] }
  0x97   :  { %363 = vst.msk [vmem:[#allocation5 + $0x33] ss:$8 sm:$0xf] %vm7740_vm0, %v361_v37  ;;  %364 = vst.msk [vmem:[#allocation5 + $0x33] ss:$8 sm:$0x30] %vm7740_vm0, %v361_v37  ;;  %v7831_v62 = vadd.f32 %v437_v50, %v425_v56  ;;  %v7837_v1 = vadd.f32 %v440_v53, %v428_v59 }
  0x98   :  { %s384_s26 = sand.u32 7, %s7094_s30  ;;  %s373_s4 = scalar_lea.vmem [#allocation11], %s372_s24  ;;  %v429_v60 = vld [vmem:[#allocation5 + $0x20] sm:$0xff]  ;;  %8791 = vst [vmem:[#allocation29_spill] sm:$0xff] %v7841_v4 }
  0x99   :  { %v374_v38 = vld [vmem:[%s373_s4] ss:$8 sm:$0xf]  ;;  %s7095_s10 = smul.u32 48, %s381_s25  ;;  %s396_s9 = sshra.s32 %s7096_s28, 3  ;;  %v7839_v3 = vadd.f32 %v441_v54, %v429_v60 }
  0x9a   :  { %v375_v39 = vld [vmem:[%s373_s4] ss:$8 sm:$0x30]  ;;  %s399_s11 = sand.u32 7, %s7096_s28  ;;  %s7097_s15 = smul.u32 48, %s396_s9 }
  0x9b   :  { %v376_v40 = vor.u32 %v375_v39, %v374_v38  ;;  %s387_s13 = sadd.s32 %s7095_s10, %s384_s26  ;;  %s411_s16 = sshra.s32 %s7807_s23, 3 }
  0x9c   :  { %s402_s3 = sadd.s32 %s7097_s15, %s399_s11  ;;  %s388_s17 = scalar_lea.vmem [#allocation11], %s387_s13 }
  0x9d   :  { %378 = vst.msk [vmem:[#allocation5 + $0x34] ss:$8 sm:$0xf] %vm7740_vm0, %v376_v40  ;;  %379 = vst.msk [vmem:[#allocation5 + $0x34] ss:$8 sm:$0x30] %vm7740_vm0, %v376_v40 }
  0x9e   :  { %v389_v41 = vld [vmem:[%s388_s17] ss:$8 sm:$0xf]  ;;  %s414_s0 = sand.u32 7, %s7807_s23  ;;  %s403_s5 = scalar_lea.vmem [#allocation11], %s402_s3 }
  0x9f   :  { %v390_v42 = vld [vmem:[%s388_s17] ss:$8 sm:$0x30]  ;;  %s7099_s14 = smul.u32 48, %s411_s16 }
  0xa0   :  { %v391_v43 = vor.u32 %v390_v42, %v389_v41  ;;  %v404_v44 = vld [vmem:[%s403_s5] ss:$8 sm:$0xf] }
  0xa1   :  { %v405_v45 = vld [vmem:[%s403_s5] ss:$8 sm:$0x30]  ;;  %s417_s12 = sadd.s32 %s7099_s14, %s414_s0 }
  0xa2   :  { %393 = vst.msk [vmem:[#allocation5 + $0x35] ss:$8 sm:$0xf] %vm7740_vm0, %v391_v43  ;;  %394 = vst.msk [vmem:[#allocation5 + $0x35] ss:$8 sm:$0x30] %vm7740_vm0, %v391_v43  ;;  %v406_v46 = vor.u32 %v405_v45, %v404_v44 }
  0xa3   :  { %s418_s18 = scalar_lea.vmem [#allocation11], %s417_s12 }
  0xa4   :  { %408 = vst.msk [vmem:[#allocation5 + $0x36] ss:$8 sm:$0xf] %vm7740_vm0, %v406_v46  ;;  %409 = vst.msk [vmem:[#allocation5 + $0x36] ss:$8 sm:$0x30] %vm7740_vm0, %v406_v46 }
  0xa5   :  { %v419_v47 = vld [vmem:[%s418_s18] ss:$8 sm:$0xf] }
  0xa6   :  { %v420_v48 = vld [vmem:[%s418_s18] ss:$8 sm:$0x30] }
  0xa7   :  { %v421_v49 = vor.u32 %v420_v48, %v419_v47 }
  0xa9   :  { %423 = vst.msk [vmem:[#allocation5 + $0x37] ss:$8 sm:$0xf] %vm7740_vm0, %v421_v49  ;;  %424 = vst.msk [vmem:[#allocation5 + $0x37] ss:$8 sm:$0x30] %vm7740_vm0, %v421_v49 }
  0xb0   :  { %v431_v5 = vld [vmem:[#allocation5 + $0x30] sm:$0xff]  ;;  %v432_v6 = vld [vmem:[#allocation5 + $0x38] sm:$0xff]  ;;  %v433_v7 = vld [vmem:[#allocation5 + $0x40] sm:$0xff] }
  0xb1   :  { %v434_v8 = vld [vmem:[#allocation5 + $0x48] sm:$0xff]  ;;  %v7843_v9 = vadd.f32 %v437_v50, %v431_v5  ;;  %v7845_v10 = vadd.f32 %v438_v51, %v432_v6  ;;  %v7847_v11 = vadd.f32 %v439_v52, %v433_v7  ;;  %v435_v12 = vld [vmem:[#allocation5 + $0x50] sm:$0xff]  ;;  %v436_v13 = vld [vmem:[#allocation5 + $0x58] sm:$0xff] }
  0xb2   :  { %v7849_v14 = vadd.f32 %v440_v53, %v434_v8  ;;  %v7851_v15 = vadd.f32 %v441_v54, %v435_v12  ;;  %v7853_v16 = vadd.f32 %v442_v55, %v436_v13 }
  0xb3   :  { %v7857_v17 = vpack.c.bf16 %v7843_v9, %v7831_v62  ;;  %v7861_v18 = vpack.c.bf16 %v7845_v10, %v7833_v63  ;;  %v7865_v19 = vpack.c.bf16 %v7847_v11, %v7835_v2 }
  0xb4   :  { %v7869_v20 = vpack.c.bf16 %v7849_v14, %v7837_v1  ;;  %v7873_v21 = vpack.c.bf16 %v7851_v15, %v7839_v3  ;;  %v7877_v22 = vpack.c.bf16 %v7853_v16, %v7841_v4 }
  0xb5   :  { %7562 = dma.done.wait [#allocation6], 110592 }
  0xb6   :  { %7563 = vsyncadd [#allocation6], 4294856704  ;;  %1361 = vmatprep.mubr.bf16.mxu0 %v7861_v18  ;;  %1490 = vmatprep.mubr.bf16.mxu1 %v7861_v18  ;;  %v466_v23 = vld [vmem:[#allocation2 + $0x8] sm:$0xff]  ;;  %v468_v24 = vld [vmem:[#allocation2 + $0x18] sm:$0xff]  ;;  %vm2965_vm1 = vcmask 1043456   ;;  %vm2924_vm2 = vcmask 57344  }
  0xb7   :  { %v465_v25 = vld [vmem:[#allocation2] sm:$0xff]  ;;  %1329 = vmatprep.subr.bf16.mxu0 %v466_v23  ;;  %1458 = vmatprep.subr.bf16.mxu1 %v468_v24  ;;  %v467_v26 = vld [vmem:[#allocation2 + $0x10] sm:$0xff]  ;;  %v484_v27 = vld [vmem:[#allocation2 + $0x98] sm:$0xff]  ;;  %vm2961_vm3 = vcmask 64512  }
  0xb8   :  { %v486_v28 = vld [vmem:[#allocation2 + $0xa8] sm:$0xff]  ;;  %1330 = vmatpush1.bf16.msra.mxu0 %v465_v25  ;;  %1459 = vmatpush1.bf16.msra.mxu1 %v467_v26  ;;  %v483_v29 = vld [vmem:[#allocation2 + $0x90] sm:$0xff]  ;;  %v485_v30 = vld [vmem:[#allocation2 + $0xa0] sm:$0xff] }
  0xb9   :  { %1331 = vmatprep.subr.bf16.mxu0 %v484_v27  ;;  %1460 = vmatprep.subr.bf16.mxu1 %v486_v28  ;;  %v502_v31 = vld [vmem:[#allocation2 + $0x128] sm:$0xff]  ;;  %v504_v32 = vld [vmem:[#allocation2 + $0x138] sm:$0xff]  ;;  %v501_v33 = vld [vmem:[#allocation2 + $0x120] sm:$0xff] }
  0xba   :  { %v503_v34 = vld [vmem:[#allocation2 + $0x130] sm:$0xff]  ;;  %v520_v35 = vld [vmem:[#allocation2 + $0x1b8] sm:$0xff]  ;;  %v522_v36 = vld [vmem:[#allocation2 + $0x1c8] sm:$0xff] }
  0xbb   :  { %v519_v37 = vld [vmem:[#allocation2 + $0x1b0] sm:$0xff]  ;;  %v521_v38 = vld [vmem:[#allocation2 + $0x1c0] sm:$0xff]  ;;  %v538_v39 = vld [vmem:[#allocation2 + $0x248] sm:$0xff] }
  0xbc   :  { %1332 = vmatpush1.bf16.msra.mxu0 %v483_v29  ;;  %1461 = vmatpush1.bf16.msra.mxu1 %v485_v30  ;;  %v540_v40 = vld [vmem:[#allocation2 + $0x258] sm:$0xff]  ;;  %v537_v41 = vld [vmem:[#allocation2 + $0x240] sm:$0xff]  ;;  %v539_v42 = vld [vmem:[#allocation2 + $0x250] sm:$0xff] }
  0xbd   :  { %1333 = vmatprep.subr.bf16.mxu0 %v502_v31  ;;  %1462 = vmatprep.subr.bf16.mxu1 %v504_v32  ;;  %v556_v43 = vld [vmem:[#allocation2 + $0x2d8] sm:$0xff]  ;;  %v558_v44 = vld [vmem:[#allocation2 + $0x2e8] sm:$0xff]  ;;  %v555_v45 = vld [vmem:[#allocation2 + $0x2d0] sm:$0xff] }
  0xbe   :  { %v557_v46 = vld [vmem:[#allocation2 + $0x2e0] sm:$0xff]  ;;  %v574_v47 = vld [vmem:[#allocation2 + $0x368] sm:$0xff]  ;;  %v576_v48 = vld [vmem:[#allocation2 + $0x378] sm:$0xff] }
  0xbf   :  { %v573_v49 = vld [vmem:[#allocation2 + $0x360] sm:$0xff]  ;;  %v575_v50 = vld [vmem:[#allocation2 + $0x370] sm:$0xff]  ;;  %v592_v51 = vld [vmem:[#allocation2 + $0x3f8] sm:$0xff] }
  0xc0   :  { %1334 = vmatpush1.bf16.msra.mxu0 %v501_v33  ;;  %1463 = vmatpush1.bf16.msra.mxu1 %v503_v34  ;;  %v594_v52 = vld [vmem:[#allocation2 + $0x408] sm:$0xff]  ;;  %v591_v53 = vld [vmem:[#allocation2 + $0x3f0] sm:$0xff]  ;;  %v593_v54 = vld [vmem:[#allocation2 + $0x400] sm:$0xff] }
  0xc1   :  { %1335 = vmatprep.subr.bf16.mxu0 %v520_v35  ;;  %1464 = vmatprep.subr.bf16.mxu1 %v522_v36  ;;  %v610_v55 = vld [vmem:[#allocation2 + $0x488] sm:$0xff]  ;;  %v612_v56 = vld [vmem:[#allocation2 + $0x498] sm:$0xff]  ;;  %v609_v57 = vld [vmem:[#allocation2 + $0x480] sm:$0xff] }
  0xc2   :  { %v611_v58 = vld [vmem:[#allocation2 + $0x490] sm:$0xff]  ;;  %v628_v59 = vld [vmem:[#allocation2 + $0x518] sm:$0xff]  ;;  %v630_v60 = vld [vmem:[#allocation2 + $0x528] sm:$0xff] }
  0xc3   :  { %v627_v61 = vld [vmem:[#allocation2 + $0x510] sm:$0xff]  ;;  %v629_v5 = vld [vmem:[#allocation2 + $0x520] sm:$0xff]  ;;  %v646_v6 = vld [vmem:[#allocation2 + $0x5a8] sm:$0xff] }
  0xc4   :  { %1336 = vmatpush1.bf16.msra.mxu0 %v519_v37  ;;  %1465 = vmatpush1.bf16.msra.mxu1 %v521_v38  ;;  %v648_v7 = vld [vmem:[#allocation2 + $0x5b8] sm:$0xff]  ;;  %v645_v8 = vld [vmem:[#allocation2 + $0x5a0] sm:$0xff]  ;;  %v647_v12 = vld [vmem:[#allocation2 + $0x5b0] sm:$0xff] }
  0xc5   :  { %1337 = vmatprep.subr.bf16.mxu0 %v538_v39  ;;  %1466 = vmatprep.subr.bf16.mxu1 %v540_v40  ;;  %v664_v13 = vld [vmem:[#allocation2 + $0x638] sm:$0xff]  ;;  %v666_v23 = vld [vmem:[#allocation2 + $0x648] sm:$0xff]  ;;  %v663_v24 = vld [vmem:[#allocation2 + $0x630] sm:$0xff] }
  0xc6   :  { %v665_v25 = vld [vmem:[#allocation2 + $0x640] sm:$0xff]  ;;  %v682_v26 = vld [vmem:[#allocation2 + $0x6c8] sm:$0xff]  ;;  %v684_v27 = vld [vmem:[#allocation2 + $0x6d8] sm:$0xff] }
  0xc7   :  { %v681_v28 = vld [vmem:[#allocation2 + $0x6c0] sm:$0xff]  ;;  %v683_v29 = vld [vmem:[#allocation2 + $0x6d0] sm:$0xff]  ;;  %v700_v30 = vld [vmem:[#allocation2 + $0x758] sm:$0xff] }
  0xc8   :  { %1338 = vmatpush1.bf16.msra.mxu0 %v537_v41  ;;  %1467 = vmatpush1.bf16.msra.mxu1 %v539_v42  ;;  %v702_v31 = vld [vmem:[#allocation2 + $0x768] sm:$0xff]  ;;  %v699_v32 = vld [vmem:[#allocation2 + $0x750] sm:$0xff]  ;;  %v701_v33 = vld [vmem:[#allocation2 + $0x760] sm:$0xff] }
  0xc9   :  { %1339 = vmatprep.subr.bf16.mxu0 %v556_v43  ;;  %1468 = vmatprep.subr.bf16.mxu1 %v558_v44  ;;  %v718_v34 = vld [vmem:[#allocation2 + $0x7e8] sm:$0xff]  ;;  %v720_v35 = vld [vmem:[#allocation2 + $0x7f8] sm:$0xff]  ;;  %v717_v36 = vld [vmem:[#allocation2 + $0x7e0] sm:$0xff] }
  0xca   :  { %v719_v37 = vld [vmem:[#allocation2 + $0x7f0] sm:$0xff]  ;;  %v736_v38 = vld [vmem:[#allocation2 + $0x878] sm:$0xff]  ;;  %v738_v39 = vld [vmem:[#allocation2 + $0x888] sm:$0xff] }
  0xcb   :  { %v735_v40 = vld [vmem:[#allocation2 + $0x870] sm:$0xff]  ;;  %v737_v41 = vld [vmem:[#allocation2 + $0x880] sm:$0xff]  ;;  %v754_v42 = vld [vmem:[#allocation2 + $0x908] sm:$0xff] }
  0xcc   :  { %1340 = vmatpush1.bf16.msra.mxu0 %v555_v45  ;;  %1469 = vmatpush1.bf16.msra.mxu1 %v557_v46  ;;  %v756_v43 = vld [vmem:[#allocation2 + $0x918] sm:$0xff]  ;;  %v753_v44 = vld [vmem:[#allocation2 + $0x900] sm:$0xff]  ;;  %v755_v45 = vld [vmem:[#allocation2 + $0x910] sm:$0xff] }
  0xcd   :  { %1341 = vmatprep.subr.bf16.mxu0 %v574_v47  ;;  %1470 = vmatprep.subr.bf16.mxu1 %v576_v48  ;;  %v772_v46 = vld [vmem:[#allocation2 + $0x998] sm:$0xff]  ;;  %v774_v47 = vld [vmem:[#allocation2 + $0x9a8] sm:$0xff]  ;;  %v771_v48 = vld [vmem:[#allocation2 + $0x990] sm:$0xff] }
  0xd0   :  { %1342 = vmatpush1.bf16.msra.mxu0 %v573_v49  ;;  %1471 = vmatpush1.bf16.msra.mxu1 %v575_v50  ;;  %v773_v49 = vld [vmem:[#allocation2 + $0x9a0] sm:$0xff]  ;;  %v790_v50 = vld [vmem:[#allocation2 + $0xa28] sm:$0xff] }
  0xd1   :  { %1343 = vmatprep.subr.bf16.mxu0 %v592_v51  ;;  %1472 = vmatprep.subr.bf16.mxu1 %v594_v52  ;;  %v792_v51 = vld [vmem:[#allocation2 + $0xa38] sm:$0xff]  ;;  %v789_v52 = vld [vmem:[#allocation2 + $0xa20] sm:$0xff] }
  0xd4   :  { %1344 = vmatpush1.bf16.msra.mxu0 %v591_v53  ;;  %1473 = vmatpush1.bf16.msra.mxu1 %v593_v54  ;;  %v791_v53 = vld [vmem:[#allocation2 + $0xa30] sm:$0xff]  ;;  %v808_v54 = vld [vmem:[#allocation2 + $0xab8] sm:$0xff] }
  0xd5   :  { %1345 = vmatprep.subr.bf16.mxu0 %v610_v55  ;;  %1474 = vmatprep.subr.bf16.mxu1 %v612_v56  ;;  %v810_v55 = vld [vmem:[#allocation2 + $0xac8] sm:$0xff]  ;;  %v807_v56 = vld [vmem:[#allocation2 + $0xab0] sm:$0xff] }
  0xd8   :  { %1346 = vmatpush1.bf16.msra.mxu0 %v609_v57  ;;  %1475 = vmatpush1.bf16.msra.mxu1 %v611_v58  ;;  %v809_v57 = vld [vmem:[#allocation2 + $0xac0] sm:$0xff]  ;;  %v826_v58 = vld [vmem:[#allocation2 + $0xb48] sm:$0xff] }
  0xd9   :  { %1347 = vmatprep.subr.bf16.mxu0 %v628_v59  ;;  %1476 = vmatprep.subr.bf16.mxu1 %v630_v60  ;;  %v828_v59 = vld [vmem:[#allocation2 + $0xb58] sm:$0xff]  ;;  %v825_v60 = vld [vmem:[#allocation2 + $0xb40] sm:$0xff] }
  0xdc   :  { %1348 = vmatpush1.bf16.msra.mxu0 %v627_v61  ;;  %1477 = vmatpush1.bf16.msra.mxu1 %v629_v5  ;;  %v827_v61 = vld [vmem:[#allocation2 + $0xb50] sm:$0xff]  ;;  %v844_v5 = vld [vmem:[#allocation2 + $0xbd8] sm:$0xff] }
  0xdd   :  { %1349 = vmatprep.subr.bf16.mxu0 %v646_v6  ;;  %1478 = vmatprep.subr.bf16.mxu1 %v648_v7  ;;  %v846_v6 = vld [vmem:[#allocation2 + $0xbe8] sm:$0xff]  ;;  %v843_v7 = vld [vmem:[#allocation2 + $0xbd0] sm:$0xff] }
  0xe0   :  { %1350 = vmatpush1.bf16.msra.mxu0 %v645_v8  ;;  %1479 = vmatpush1.bf16.msra.mxu1 %v647_v12  ;;  %v845_v8 = vld [vmem:[#allocation2 + $0xbe0] sm:$0xff]  ;;  %v862_v12 = vld [vmem:[#allocation2 + $0xc68] sm:$0xff] }
  0xe1   :  { %1351 = vmatprep.subr.bf16.mxu0 %v664_v13  ;;  %1480 = vmatprep.subr.bf16.mxu1 %v666_v23  ;;  %v864_v13 = vld [vmem:[#allocation2 + $0xc78] sm:$0xff]  ;;  %v861_v23 = vld [vmem:[#allocation2 + $0xc60] sm:$0xff] }
  0xe4   :  { %1352 = vmatpush1.bf16.msra.mxu0 %v663_v24  ;;  %1481 = vmatpush1.bf16.msra.mxu1 %v665_v25  ;;  %v863_v24 = vld [vmem:[#allocation2 + $0xc70] sm:$0xff]  ;;  %v880_v25 = vld [vmem:[#allocation2 + $0xcf8] sm:$0xff] }
  0xe5   :  { %1353 = vmatprep.subr.bf16.mxu0 %v682_v26  ;;  %1482 = vmatprep.subr.bf16.mxu1 %v684_v27  ;;  %v882_v26 = vld [vmem:[#allocation2 + $0xd08] sm:$0xff]  ;;  %v879_v27 = vld [vmem:[#allocation2 + $0xcf0] sm:$0xff] }
  0xe8   :  { %1354 = vmatpush1.bf16.msra.mxu0 %v681_v28  ;;  %1483 = vmatpush1.bf16.msra.mxu1 %v683_v29  ;;  %v881_v28 = vld [vmem:[#allocation2 + $0xd00] sm:$0xff]  ;;  %v898_v29 = vld [vmem:[#allocation2 + $0xd88] sm:$0xff] }
  0xe9   :  { %1355 = vmatprep.subr.bf16.mxu0 %v700_v30  ;;  %1484 = vmatprep.subr.bf16.mxu1 %v702_v31  ;;  %v900_v30 = vld [vmem:[#allocation2 + $0xd98] sm:$0xff]  ;;  %v897_v31 = vld [vmem:[#allocation2 + $0xd80] sm:$0xff] }
  0xec   :  { %1356 = vmatpush1.bf16.msra.mxu0 %v699_v32  ;;  %1485 = vmatpush1.bf16.msra.mxu1 %v701_v33  ;;  %v899_v32 = vld [vmem:[#allocation2 + $0xd90] sm:$0xff]  ;;  %v916_v33 = vld [vmem:[#allocation2 + $0xe18] sm:$0xff] }
  0xed   :  { %1357 = vmatprep.subr.bf16.mxu0 %v718_v34  ;;  %1486 = vmatprep.subr.bf16.mxu1 %v720_v35  ;;  %v918_v34 = vld [vmem:[#allocation2 + $0xe28] sm:$0xff]  ;;  %v915_v35 = vld [vmem:[#allocation2 + $0xe10] sm:$0xff] }
  0xf0   :  { %1358 = vmatpush1.bf16.msra.mxu0 %v717_v36  ;;  %1487 = vmatpush1.bf16.msra.mxu1 %v719_v37  ;;  %v917_v36 = vld [vmem:[#allocation2 + $0xe20] sm:$0xff]  ;;  %v934_v37 = vld [vmem:[#allocation2 + $0xea8] sm:$0xff] }
  0xf1   :  { %1359 = vmatprep.subr.bf16.mxu0 %v736_v38  ;;  %1488 = vmatprep.subr.bf16.mxu1 %v738_v39  ;;  %v936_v38 = vld [vmem:[#allocation2 + $0xeb8] sm:$0xff]  ;;  %v933_v39 = vld [vmem:[#allocation2 + $0xea0] sm:$0xff] }
  0xf4   :  { %1360 = vmatpush1.bf16.msra.mxu0 %v735_v40  ;;  %1489 = vmatpush1.bf16.msra.mxu1 %v737_v41  ;;  %v935_v40 = vld [vmem:[#allocation2 + $0xeb0] sm:$0xff]  ;;  %v952_v41 = vld [vmem:[#allocation2 + $0xf38] sm:$0xff] }
  0xf5   :  { %1372 = vmatprep.subr.bf16.mxu0 %v754_v42  ;;  %1501 = vmatprep.subr.bf16.mxu1 %v756_v43  ;;  %v954_v42 = vld [vmem:[#allocation2 + $0xf48] sm:$0xff]  ;;  %v951_v43 = vld [vmem:[#allocation2 + $0xf30] sm:$0xff] }
  0xf7   :  { %1362 = vmatmul.mubr.bf16.vlgmr.msra.gmra.mrb[0].mxu0 %v7857_v17  ;;  %1491 = vmatmul.mubr.bf16.vlgmr.msra.gmra.mrb[0].mxu1 %v7857_v17 }
  0xf8   :  { %1373 = vmatpush1.bf16.msra.mxu0 %v753_v44  ;;  %1502 = vmatpush1.bf16.msra.mxu1 %v755_v45  ;;  %v953_v44 = vld [vmem:[#allocation2 + $0xf40] sm:$0xff]  ;;  %v970_v45 = vld [vmem:[#allocation2 + $0xfc8] sm:$0xff] }
  0xf9   :  { %1374 = vmatprep.subr.bf16.mxu0 %v772_v46  ;;  %1503 = vmatprep.subr.bf16.mxu1 %v774_v47  ;;  %v972_v46 = vld [vmem:[#allocation2 + $0xfd8] sm:$0xff]  ;;  %v969_v47 = vld [vmem:[#allocation2 + $0xfc0] sm:$0xff] }
  0xfa   :  { %1404 = vmatprep.mubr.bf16.mxu0 %v7869_v20  ;;  %1533 = vmatprep.mubr.bf16.mxu1 %v7869_v20 }
  0xfc   :  { %1375 = vmatpush1.bf16.msra.mxu0 %v771_v48  ;;  %1504 = vmatpush1.bf16.msra.mxu1 %v773_v49  ;;  %v971_v48 = vld [vmem:[#allocation2 + $0xfd0] sm:$0xff]  ;;  %v988_v49 = vld [vmem:[#allocation2 + $0x1058] sm:$0xff] }
  0xfd   :  { %1376 = vmatprep.subr.bf16.mxu0 %v790_v50  ;;  %1505 = vmatprep.subr.bf16.mxu1 %v792_v51  ;;  %v990_v50 = vld [vmem:[#allocation2 + $0x1068] sm:$0xff]  ;;  %v987_v51 = vld [vmem:[#allocation2 + $0x1050] sm:$0xff] }
 0x100   :  { %1377 = vmatpush1.bf16.msra.mxu0 %v789_v52  ;;  %1506 = vmatpush1.bf16.msra.mxu1 %v791_v53  ;;  %v989_v52 = vld [vmem:[#allocation2 + $0x1060] sm:$0xff]  ;;  %v1006_v53 = vld [vmem:[#allocation2 + $0x10e8] sm:$0xff] }
 0x101   :  { %1378 = vmatprep.subr.bf16.mxu0 %v808_v54  ;;  %1507 = vmatprep.subr.bf16.mxu1 %v810_v55  ;;  %v1008_v54 = vld [vmem:[#allocation2 + $0x10f8] sm:$0xff]  ;;  %v1005_v55 = vld [vmem:[#allocation2 + $0x10e0] sm:$0xff] }
 0x104   :  { %1379 = vmatpush1.bf16.msra.mxu0 %v807_v56  ;;  %1508 = vmatpush1.bf16.msra.mxu1 %v809_v57  ;;  %v1007_v56 = vld [vmem:[#allocation2 + $0x10f0] sm:$0xff]  ;;  %v1024_v57 = vld [vmem:[#allocation2 + $0x1178] sm:$0xff] }
 0x105   :  { %1380 = vmatprep.subr.bf16.mxu0 %v826_v58  ;;  %1509 = vmatprep.subr.bf16.mxu1 %v828_v59  ;;  %v1026_v58 = vld [vmem:[#allocation2 + $0x1188] sm:$0xff]  ;;  %v1023_v59 = vld [vmem:[#allocation2 + $0x1170] sm:$0xff] }
 0x108   :  { %1381 = vmatpush1.bf16.msra.mxu0 %v825_v60  ;;  %1510 = vmatpush1.bf16.msra.mxu1 %v827_v61  ;;  %v1025_v60 = vld [vmem:[#allocation2 + $0x1180] sm:$0xff]  ;;  %v1042_v61 = vld [vmem:[#allocation2 + $0x1208] sm:$0xff] }
 0x109   :  { %1382 = vmatprep.subr.bf16.mxu0 %v844_v5  ;;  %1511 = vmatprep.subr.bf16.mxu1 %v846_v6  ;;  %v1044_v5 = vld [vmem:[#allocation2 + $0x1218] sm:$0xff]  ;;  %v1041_v6 = vld [vmem:[#allocation2 + $0x1200] sm:$0xff] }
 0x10c   :  { %1383 = vmatpush1.bf16.msra.mxu0 %v843_v7  ;;  %1512 = vmatpush1.bf16.msra.mxu1 %v845_v8  ;;  %v1043_v7 = vld [vmem:[#allocation2 + $0x1210] sm:$0xff]  ;;  %v1060_v8 = vld [vmem:[#allocation2 + $0x1298] sm:$0xff] }
 0x10d   :  { %1384 = vmatprep.subr.bf16.mxu0 %v862_v12  ;;  %1513 = vmatprep.subr.bf16.mxu1 %v864_v13  ;;  %v1062_v12 = vld [vmem:[#allocation2 + $0x12a8] sm:$0xff]  ;;  %v1059_v13 = vld [vmem:[#allocation2 + $0x1290] sm:$0xff] }
 0x110   :  { %1385 = vmatpush1.bf16.msra.mxu0 %v861_v23  ;;  %1514 = vmatpush1.bf16.msra.mxu1 %v863_v24  ;;  %v1061_v23 = vld [vmem:[#allocation2 + $0x12a0] sm:$0xff]  ;;  %v1078_v24 = vld [vmem:[#allocation2 + $0x1328] sm:$0xff] }
 0x111   :  { %1386 = vmatprep.subr.bf16.mxu0 %v880_v25  ;;  %1515 = vmatprep.subr.bf16.mxu1 %v882_v26  ;;  %v1080_v25 = vld [vmem:[#allocation2 + $0x1338] sm:$0xff]  ;;  %v1077_v26 = vld [vmem:[#allocation2 + $0x1320] sm:$0xff] }
 0x114   :  { %1387 = vmatpush1.bf16.msra.mxu0 %v879_v27  ;;  %1516 = vmatpush1.bf16.msra.mxu1 %v881_v28  ;;  %v1079_v27 = vld [vmem:[#allocation2 + $0x1330] sm:$0xff]  ;;  %v1096_v28 = vld [vmem:[#allocation2 + $0x13b8] sm:$0xff] }
 0x115   :  { %1388 = vmatprep.subr.bf16.mxu0 %v898_v29  ;;  %1517 = vmatprep.subr.bf16.mxu1 %v900_v30  ;;  %v1098_v29 = vld [vmem:[#allocation2 + $0x13c8] sm:$0xff]  ;;  %v1095_v30 = vld [vmem:[#allocation2 + $0x13b0] sm:$0xff] }
 0x118   :  { %1389 = vmatpush1.bf16.msra.mxu0 %v897_v31  ;;  %1518 = vmatpush1.bf16.msra.mxu1 %v899_v32  ;;  %v1097_v31 = vld [vmem:[#allocation2 + $0x13c0] sm:$0xff]  ;;  %v1114_v32 = vld [vmem:[#allocation2 + $0x1448] sm:$0xff] }
 0x119   :  { %1390 = vmatprep.subr.bf16.mxu0 %v916_v33  ;;  %1519 = vmatprep.subr.bf16.mxu1 %v918_v34  ;;  %v1116_v33 = vld [vmem:[#allocation2 + $0x1458] sm:$0xff]  ;;  %v1113_v34 = vld [vmem:[#allocation2 + $0x1440] sm:$0xff] }
 0x11c   :  { %1391 = vmatpush1.bf16.msra.mxu0 %v915_v35  ;;  %1520 = vmatpush1.bf16.msra.mxu1 %v917_v36  ;;  %v1115_v35 = vld [vmem:[#allocation2 + $0x1450] sm:$0xff]  ;;  %v1132_v36 = vld [vmem:[#allocation2 + $0x14d8] sm:$0xff] }
 0x11d   :  { %1392 = vmatprep.subr.bf16.mxu0 %v934_v37  ;;  %1521 = vmatprep.subr.bf16.mxu1 %v936_v38  ;;  %v1134_v37 = vld [vmem:[#allocation2 + $0x14e8] sm:$0xff]  ;;  %v1131_v38 = vld [vmem:[#allocation2 + $0x14d0] sm:$0xff] }
 0x120   :  { %1393 = vmatpush1.bf16.msra.mxu0 %v933_v39  ;;  %1522 = vmatpush1.bf16.msra.mxu1 %v935_v40  ;;  %v1133_v39 = vld [vmem:[#allocation2 + $0x14e0] sm:$0xff]  ;;  %v1150_v40 = vld [vmem:[#allocation2 + $0x1568] sm:$0xff] }
 0x121   :  { %1394 = vmatprep.subr.bf16.mxu0 %v952_v41  ;;  %1523 = vmatprep.subr.bf16.mxu1 %v954_v42  ;;  %v1152_v41 = vld [vmem:[#allocation2 + $0x1578] sm:$0xff]  ;;  %v1149_v42 = vld [vmem:[#allocation2 + $0x1560] sm:$0xff] }
 0x124   :  { %1395 = vmatpush1.bf16.msra.mxu0 %v951_v43  ;;  %1524 = vmatpush1.bf16.msra.mxu1 %v953_v44  ;;  %v1151_v43 = vld [vmem:[#allocation2 + $0x1570] sm:$0xff]  ;;  %v1168_v44 = vld [vmem:[#allocation2 + $0x15f8] sm:$0xff] }
 0x125   :  { %1396 = vmatprep.subr.bf16.mxu0 %v970_v45  ;;  %1525 = vmatprep.subr.bf16.mxu1 %v972_v46  ;;  %v1170_v45 = vld [vmem:[#allocation2 + $0x1608] sm:$0xff]  ;;  %v1167_v46 = vld [vmem:[#allocation2 + $0x15f0] sm:$0xff] }
 0x128   :  { %1397 = vmatpush1.bf16.msra.mxu0 %v969_v47  ;;  %1526 = vmatpush1.bf16.msra.mxu1 %v971_v48  ;;  %v1169_v47 = vld [vmem:[#allocation2 + $0x1600] sm:$0xff]  ;;  %v1186_v48 = vld [vmem:[#allocation2 + $0x1688] sm:$0xff] }
 0x129   :  { %1398 = vmatprep.subr.bf16.mxu0 %v988_v49  ;;  %1527 = vmatprep.subr.bf16.mxu1 %v990_v50  ;;  %v1188_v49 = vld [vmem:[#allocation2 + $0x1698] sm:$0xff]  ;;  %v1185_v50 = vld [vmem:[#allocation2 + $0x1680] sm:$0xff] }
 0x12c   :  { %1399 = vmatpush1.bf16.msra.mxu0 %v987_v51  ;;  %1528 = vmatpush1.bf16.msra.mxu1 %v989_v52  ;;  %v1187_v51 = vld [vmem:[#allocation2 + $0x1690] sm:$0xff]  ;;  %v1204_v52 = vld [vmem:[#allocation2 + $0x1718] sm:$0xff] }
 0x12d   :  { %1400 = vmatprep.subr.bf16.mxu0 %v1006_v53  ;;  %1529 = vmatprep.subr.bf16.mxu1 %v1008_v54  ;;  %v1206_v53 = vld [vmem:[#allocation2 + $0x1728] sm:$0xff]  ;;  %v1203_v54 = vld [vmem:[#allocation2 + $0x1710] sm:$0xff] }
 0x130   :  { %1401 = vmatpush1.bf16.msra.mxu0 %v1005_v55  ;;  %1530 = vmatpush1.bf16.msra.mxu1 %v1007_v56  ;;  %v1205_v55 = vld [vmem:[#allocation2 + $0x1720] sm:$0xff]  ;;  %v1222_v56 = vld [vmem:[#allocation2 + $0x17a8] sm:$0xff] }
 0x131   :  { %1402 = vmatprep.subr.bf16.mxu0 %v1024_v57  ;;  %1531 = vmatprep.subr.bf16.mxu1 %v1026_v58  ;;  %v1224_v57 = vld [vmem:[#allocation2 + $0x17b8] sm:$0xff]  ;;  %v1221_v58 = vld [vmem:[#allocation2 + $0x17a0] sm:$0xff] }
 0x134   :  { %1403 = vmatpush1.bf16.msra.mxu0 %v1023_v59  ;;  %1532 = vmatpush1.bf16.msra.mxu1 %v1025_v60  ;;  %v1223_v59 = vld [vmem:[#allocation2 + $0x17b0] sm:$0xff]  ;;  %v1240_v60 = vld [vmem:[#allocation2 + $0x1838] sm:$0xff] }
 0x135   :  { %1415 = vmatprep.subr.bf16.mxu0 %v1042_v61  ;;  %1544 = vmatprep.subr.bf16.mxu1 %v1044_v5  ;;  %v1242_v61 = vld [vmem:[#allocation2 + $0x1848] sm:$0xff]  ;;  %v1239_v5 = vld [vmem:[#allocation2 + $0x1830] sm:$0xff] }
 0x137   :  { %1405 = vmatmul.mubr.bf16.vlgmr.msra.gmra.mrb[0].mxu0 %v7865_v19  ;;  %1534 = vmatmul.mubr.bf16.vlgmr.msra.gmra.mrb[0].mxu1 %v7865_v19 }
 0x138   :  { %1416 = vmatpush1.bf16.msra.mxu0 %v1041_v6  ;;  %1545 = vmatpush1.bf16.msra.mxu1 %v1043_v7  ;;  %v1241_v6 = vld [vmem:[#allocation2 + $0x1840] sm:$0xff]  ;;  %v1258_v7 = vld [vmem:[#allocation2 + $0x18c8] sm:$0xff] }
 0x139   :  { %1417 = vmatprep.subr.bf16.mxu0 %v1060_v8  ;;  %1546 = vmatprep.subr.bf16.mxu1 %v1062_v12  ;;  %v1260_v8 = vld [vmem:[#allocation2 + $0x18d8] sm:$0xff]  ;;  %v1257_v12 = vld [vmem:[#allocation2 + $0x18c0] sm:$0xff] }
 0x13a   :  { %1447 = vmatprep.mubr.bf16.mxu0 %v7877_v22  ;;  %1576 = vmatprep.mubr.bf16.mxu1 %v7877_v22 }
 0x13c   :  { %1418 = vmatpush1.bf16.msra.mxu0 %v1059_v13  ;;  %1547 = vmatpush1.bf16.msra.mxu1 %v1061_v23  ;;  %v1259_v13 = vld [vmem:[#allocation2 + $0x18d0] sm:$0xff]  ;;  %v1276_v23 = vld [vmem:[#allocation2 + $0x1958] sm:$0xff] }
 0x13d   :  { %1419 = vmatprep.subr.bf16.mxu0 %v1078_v24  ;;  %1548 = vmatprep.subr.bf16.mxu1 %v1080_v25  ;;  %v1278_v24 = vld [vmem:[#allocation2 + $0x1968] sm:$0xff]  ;;  %v1275_v25 = vld [vmem:[#allocation2 + $0x1950] sm:$0xff] }
 0x140   :  { %1420 = vmatpush1.bf16.msra.mxu0 %v1077_v26  ;;  %1549 = vmatpush1.bf16.msra.mxu1 %v1079_v27  ;;  %v1277_v26 = vld [vmem:[#allocation2 + $0x1960] sm:$0xff]  ;;  %v1294_v27 = vld [vmem:[#allocation2 + $0x19e8] sm:$0xff] }
 0x141   :  { %1421 = vmatprep.subr.bf16.mxu0 %v1096_v28  ;;  %1550 = vmatprep.subr.bf16.mxu1 %v1098_v29  ;;  %v1296_v28 = vld [vmem:[#allocation2 + $0x19f8] sm:$0xff]  ;;  %v1293_v29 = vld [vmem:[#allocation2 + $0x19e0] sm:$0xff] }
 0x144   :  { %1422 = vmatpush1.bf16.msra.mxu0 %v1095_v30  ;;  %1551 = vmatpush1.bf16.msra.mxu1 %v1097_v31  ;;  %v1295_v30 = vld [vmem:[#allocation2 + $0x19f0] sm:$0xff]  ;;  %v1312_v31 = vld [vmem:[#allocation2 + $0x1a78] sm:$0xff] }
 0x145   :  { %1423 = vmatprep.subr.bf16.mxu0 %v1114_v32  ;;  %1552 = vmatprep.subr.bf16.mxu1 %v1116_v33  ;;  %v1314_v32 = vld [vmem:[#allocation2 + $0x1a88] sm:$0xff]  ;;  %v1311_v33 = vld [vmem:[#allocation2 + $0x1a70] sm:$0xff] }
 0x148   :  { %1424 = vmatpush1.bf16.msra.mxu0 %v1113_v34  ;;  %1553 = vmatpush1.bf16.msra.mxu1 %v1115_v35  ;;  %v1313_v34 = vld [vmem:[#allocation2 + $0x1a80] sm:$0xff]  ;;  %v470_v35 = vld [vmem:[#allocation2 + $0x28] sm:$0xff] }
 0x149   :  { %1425 = vmatprep.subr.bf16.mxu0 %v1132_v36  ;;  %1554 = vmatprep.subr.bf16.mxu1 %v1134_v37  ;;  %v472_v36 = vld [vmem:[#allocation2 + $0x38] sm:$0xff]  ;;  %v469_v37 = vld [vmem:[#allocation2 + $0x20] sm:$0xff] }
 0x14c   :  { %1426 = vmatpush1.bf16.msra.mxu0 %v1131_v38  ;;  %1555 = vmatpush1.bf16.msra.mxu1 %v1133_v39  ;;  %v471_v38 = vld [vmem:[#allocation2 + $0x30] sm:$0xff]  ;;  %v488_v39 = vld [vmem:[#allocation2 + $0xb8] sm:$0xff] }
 0x14d   :  { %1427 = vmatprep.subr.bf16.mxu0 %v1150_v40  ;;  %1556 = vmatprep.subr.bf16.mxu1 %v1152_v41  ;;  %v490_v40 = vld [vmem:[#allocation2 + $0xc8] sm:$0xff]  ;;  %v487_v41 = vld [vmem:[#allocation2 + $0xb0] sm:$0xff] }
 0x150   :  { %1428 = vmatpush1.bf16.msra.mxu0 %v1149_v42  ;;  %1557 = vmatpush1.bf16.msra.mxu1 %v1151_v43  ;;  %v489_v42 = vld [vmem:[#allocation2 + $0xc0] sm:$0xff]  ;;  %v506_v43 = vld [vmem:[#allocation2 + $0x148] sm:$0xff] }
 0x151   :  { %1429 = vmatprep.subr.bf16.mxu0 %v1168_v44  ;;  %1558 = vmatprep.subr.bf16.mxu1 %v1170_v45  ;;  %v508_v44 = vld [vmem:[#allocation2 + $0x158] sm:$0xff]  ;;  %v505_v45 = vld [vmem:[#allocation2 + $0x140] sm:$0xff] }
 0x154   :  { %1430 = vmatpush1.bf16.msra.mxu0 %v1167_v46  ;;  %1559 = vmatpush1.bf16.msra.mxu1 %v1169_v47  ;;  %v507_v46 = vld [vmem:[#allocation2 + $0x150] sm:$0xff]  ;;  %v524_v47 = vld [vmem:[#allocation2 + $0x1d8] sm:$0xff] }
 0x155   :  { %1431 = vmatprep.subr.bf16.mxu0 %v1186_v48  ;;  %1560 = vmatprep.subr.bf16.mxu1 %v1188_v49  ;;  %v526_v48 = vld [vmem:[#allocation2 + $0x1e8] sm:$0xff]  ;;  %v523_v49 = vld [vmem:[#allocation2 + $0x1d0] sm:$0xff] }
 0x158   :  { %1432 = vmatpush1.bf16.msra.mxu0 %v1185_v50  ;;  %1561 = vmatpush1.bf16.msra.mxu1 %v1187_v51  ;;  %v525_v50 = vld [vmem:[#allocation2 + $0x1e0] sm:$0xff]  ;;  %v542_v51 = vld [vmem:[#allocation2 + $0x268] sm:$0xff] }
 0x159   :  { %1433 = vmatprep.subr.bf16.mxu0 %v1204_v52  ;;  %1562 = vmatprep.subr.bf16.mxu1 %v1206_v53  ;;  %v544_v52 = vld [vmem:[#allocation2 + $0x278] sm:$0xff]  ;;  %v541_v53 = vld [vmem:[#allocation2 + $0x260] sm:$0xff] }
 0x15c   :  { %1434 = vmatpush1.bf16.msra.mxu0 %v1203_v54  ;;  %1563 = vmatpush1.bf16.msra.mxu1 %v1205_v55  ;;  %v543_v54 = vld [vmem:[#allocation2 + $0x270] sm:$0xff]  ;;  %v560_v55 = vld [vmem:[#allocation2 + $0x2f8] sm:$0xff] }
 0x15d   :  { %1435 = vmatprep.subr.bf16.mxu0 %v1222_v56  ;;  %1564 = vmatprep.subr.bf16.mxu1 %v1224_v57  ;;  %v562_v56 = vld [vmem:[#allocation2 + $0x308] sm:$0xff]  ;;  %v559_v57 = vld [vmem:[#allocation2 + $0x2f0] sm:$0xff] }
 0x160   :  { %1436 = vmatpush1.bf16.msra.mxu0 %v1221_v58  ;;  %1565 = vmatpush1.bf16.msra.mxu1 %v1223_v59  ;;  %v561_v58 = vld [vmem:[#allocation2 + $0x300] sm:$0xff]  ;;  %v578_v59 = vld [vmem:[#allocation2 + $0x388] sm:$0xff] }
 0x161   :  { %1437 = vmatprep.subr.bf16.mxu0 %v1240_v60  ;;  %1566 = vmatprep.subr.bf16.mxu1 %v1242_v61  ;;  %v580_v60 = vld [vmem:[#allocation2 + $0x398] sm:$0xff]  ;;  %v577_v61 = vld [vmem:[#allocation2 + $0x380] sm:$0xff] }
 0x164   :  { %1438 = vmatpush1.bf16.msra.mxu0 %v1239_v5  ;;  %1567 = vmatpush1.bf16.msra.mxu1 %v1241_v6  ;;  %v579_v5 = vld [vmem:[#allocation2 + $0x390] sm:$0xff]  ;;  %v596_v6 = vld [vmem:[#allocation2 + $0x418] sm:$0xff] }
 0x165   :  { %1439 = vmatprep.subr.bf16.mxu0 %v1258_v7  ;;  %1568 = vmatprep.subr.bf16.mxu1 %v1260_v8  ;;  %v598_v7 = vld [vmem:[#allocation2 + $0x428] sm:$0xff]  ;;  %v595_v8 = vld [vmem:[#allocation2 + $0x410] sm:$0xff] }
 0x168   :  { %1440 = vmatpush1.bf16.msra.mxu0 %v1257_v12  ;;  %1569 = vmatpush1.bf16.msra.mxu1 %v1259_v13  ;;  %v597_v12 = vld [vmem:[#allocation2 + $0x420] sm:$0xff]  ;;  %v614_v13 = vld [vmem:[#allocation2 + $0x4a8] sm:$0xff] }
 0x169   :  { %1441 = vmatprep.subr.bf16.mxu0 %v1276_v23  ;;  %1570 = vmatprep.subr.bf16.mxu1 %v1278_v24  ;;  %v616_v23 = vld [vmem:[#allocation2 + $0x4b8] sm:$0xff]  ;;  %v613_v24 = vld [vmem:[#allocation2 + $0x4a0] sm:$0xff] }
 0x16c   :  { %1442 = vmatpush1.bf16.msra.mxu0 %v1275_v25  ;;  %1571 = vmatpush1.bf16.msra.mxu1 %v1277_v26  ;;  %v615_v25 = vld [vmem:[#allocation2 + $0x4b0] sm:$0xff]  ;;  %v632_v26 = vld [vmem:[#allocation2 + $0x538] sm:$0xff] }
 0x16d   :  { %1443 = vmatprep.subr.bf16.mxu0 %v1294_v27  ;;  %1572 = vmatprep.subr.bf16.mxu1 %v1296_v28  ;;  %v634_v27 = vld [vmem:[#allocation2 + $0x548] sm:$0xff]  ;;  %v631_v28 = vld [vmem:[#allocation2 + $0x530] sm:$0xff] }
 0x170   :  { %1444 = vmatpush1.bf16.msra.mxu0 %v1293_v29  ;;  %1573 = vmatpush1.bf16.msra.mxu1 %v1295_v30  ;;  %v633_v29 = vld [vmem:[#allocation2 + $0x540] sm:$0xff]  ;;  %v650_v30 = vld [vmem:[#allocation2 + $0x5c8] sm:$0xff] }
 0x171   :  { %1445 = vmatprep.subr.bf16.mxu0 %v1312_v31  ;;  %1574 = vmatprep.subr.bf16.mxu1 %v1314_v32  ;;  %v652_v31 = vld [vmem:[#allocation2 + $0x5d8] sm:$0xff]  ;;  %v649_v32 = vld [vmem:[#allocation2 + $0x5c0] sm:$0xff] }
 0x174   :  { %1446 = vmatpush1.bf16.msra.mxu0 %v1311_v33  ;;  %1575 = vmatpush1.bf16.msra.mxu1 %v1313_v34  ;;  %v651_v33 = vld [vmem:[#allocation2 + $0x5d0] sm:$0xff]  ;;  %v668_v34 = vld [vmem:[#allocation2 + $0x658] sm:$0xff] }
 0x175   :  { %1587 = vmatprep.subr.bf16.mxu0 %v470_v35  ;;  %1716 = vmatprep.subr.bf16.mxu1 %v472_v36  ;;  %v670_v35 = vld [vmem:[#allocation2 + $0x668] sm:$0xff]  ;;  %v667_v36 = vld [vmem:[#allocation2 + $0x650] sm:$0xff] }
 0x177   :  { %1448 = vmatmul.mubr.bf16.vlgmr.msra.gmra.mrb[0].mxu0 %v7873_v21  ;;  %1577 = vmatmul.mubr.bf16.vlgmr.msra.gmra.mrb[0].mxu1 %v7873_v21 }
 0x178   :  { %1588 = vmatpush1.bf16.msra.mxu0 %v469_v37  ;;  %1717 = vmatpush1.bf16.msra.mxu1 %v471_v38  ;;  %v669_v37 = vld [vmem:[#allocation2 + $0x660] sm:$0xff]  ;;  %v686_v38 = vld [vmem:[#allocation2 + $0x6e8] sm:$0xff] }
 0x179   :  { %1589 = vmatprep.subr.bf16.mxu0 %v488_v39  ;;  %1718 = vmatprep.subr.bf16.mxu1 %v490_v40  ;;  %v688_v39 = vld [vmem:[#allocation2 + $0x6f8] sm:$0xff]  ;;  %v685_v40 = vld [vmem:[#allocation2 + $0x6e0] sm:$0xff] }
 0x17a   :  { %1619 = vmatprep.mubr.bf16.mxu0 %v7861_v18  ;;  %1748 = vmatprep.mubr.bf16.mxu1 %v7861_v18 }
 0x17c   :  { %1590 = vmatpush1.bf16.msra.mxu0 %v487_v41  ;;  %1719 = vmatpush1.bf16.msra.mxu1 %v489_v42  ;;  %v687_v41 = vld [vmem:[#allocation2 + $0x6f0] sm:$0xff]  ;;  %v704_v42 = vld [vmem:[#allocation2 + $0x778] sm:$0xff] }
 0x17d   :  { %1591 = vmatprep.subr.bf16.mxu0 %v506_v43  ;;  %1720 = vmatprep.subr.bf16.mxu1 %v508_v44  ;;  %v706_v43 = vld [vmem:[#allocation2 + $0x788] sm:$0xff]  ;;  %v703_v44 = vld [vmem:[#allocation2 + $0x770] sm:$0xff] }
 0x180   :  { %1592 = vmatpush1.bf16.msra.mxu0 %v505_v45  ;;  %1721 = vmatpush1.bf16.msra.mxu1 %v507_v46  ;;  %v705_v45 = vld [vmem:[#allocation2 + $0x780] sm:$0xff]  ;;  %v722_v46 = vld [vmem:[#allocation2 + $0x808] sm:$0xff] }
 0x181   :  { %1593 = vmatprep.subr.bf16.mxu0 %v524_v47  ;;  %1722 = vmatprep.subr.bf16.mxu1 %v526_v48  ;;  %v724_v47 = vld [vmem:[#allocation2 + $0x818] sm:$0xff]  ;;  %v721_v48 = vld [vmem:[#allocation2 + $0x800] sm:$0xff] }
 0x184   :  { %1594 = vmatpush1.bf16.msra.mxu0 %v523_v49  ;;  %1723 = vmatpush1.bf16.msra.mxu1 %v525_v50  ;;  %v723_v49 = vld [vmem:[#allocation2 + $0x810] sm:$0xff]  ;;  %v740_v50 = vld [vmem:[#allocation2 + $0x898] sm:$0xff] }
 0x185   :  { %1595 = vmatprep.subr.bf16.mxu0 %v542_v51  ;;  %1724 = vmatprep.subr.bf16.mxu1 %v544_v52  ;;  %v742_v51 = vld [vmem:[#allocation2 + $0x8a8] sm:$0xff]  ;;  %v739_v52 = vld [vmem:[#allocation2 + $0x890] sm:$0xff] }
 0x188   :  { %1596 = vmatpush1.bf16.msra.mxu0 %v541_v53  ;;  %1725 = vmatpush1.bf16.msra.mxu1 %v543_v54  ;;  %v741_v53 = vld [vmem:[#allocation2 + $0x8a0] sm:$0xff]  ;;  %v758_v54 = vld [vmem:[#allocation2 + $0x928] sm:$0xff] }
 0x189   :  { %1597 = vmatprep.subr.bf16.mxu0 %v560_v55  ;;  %1726 = vmatprep.subr.bf16.mxu1 %v562_v56  ;;  %v760_v55 = vld [vmem:[#allocation2 + $0x938] sm:$0xff]  ;;  %v757_v56 = vld [vmem:[#allocation2 + $0x920] sm:$0xff] }
 0x18c   :  { %1598 = vmatpush1.bf16.msra.mxu0 %v559_v57  ;;  %1727 = vmatpush1.bf16.msra.mxu1 %v561_v58  ;;  %v759_v57 = vld [vmem:[#allocation2 + $0x930] sm:$0xff]  ;;  %v776_v58 = vld [vmem:[#allocation2 + $0x9b8] sm:$0xff] }
 0x18d   :  { %1599 = vmatprep.subr.bf16.mxu0 %v578_v59  ;;  %1728 = vmatprep.subr.bf16.mxu1 %v580_v60  ;;  %v778_v59 = vld [vmem:[#allocation2 + $0x9c8] sm:$0xff]  ;;  %v775_v60 = vld [vmem:[#allocation2 + $0x9b0] sm:$0xff] }
 0x190   :  { %1600 = vmatpush1.bf16.msra.mxu0 %v577_v61  ;;  %1729 = vmatpush1.bf16.msra.mxu1 %v579_v5  ;;  %v777_v61 = vld [vmem:[#allocation2 + $0x9c0] sm:$0xff]  ;;  %v794_v5 = vld [vmem:[#allocation2 + $0xa48] sm:$0xff] }
 0x191   :  { %1601 = vmatprep.subr.bf16.mxu0 %v596_v6  ;;  %1730 = vmatprep.subr.bf16.mxu1 %v598_v7  ;;  %v796_v6 = vld [vmem:[#allocation2 + $0xa58] sm:$0xff]  ;;  %v793_v7 = vld [vmem:[#allocation2 + $0xa40] sm:$0xff] }
 0x194   :  { %1602 = vmatpush1.bf16.msra.mxu0 %v595_v8  ;;  %1731 = vmatpush1.bf16.msra.mxu1 %v597_v12  ;;  %v795_v8 = vld [vmem:[#allocation2 + $0xa50] sm:$0xff]  ;;  %v812_v12 = vld [vmem:[#allocation2 + $0xad8] sm:$0xff] }
 0x195   :  { %1603 = vmatprep.subr.bf16.mxu0 %v614_v13  ;;  %1732 = vmatprep.subr.bf16.mxu1 %v616_v23  ;;  %v814_v13 = vld [vmem:[#allocation2 + $0xae8] sm:$0xff]  ;;  %v811_v23 = vld [vmem:[#allocation2 + $0xad0] sm:$0xff] }
 0x198   :  { %1604 = vmatpush1.bf16.msra.mxu0 %v613_v24  ;;  %1733 = vmatpush1.bf16.msra.mxu1 %v615_v25  ;;  %v813_v24 = vld [vmem:[#allocation2 + $0xae0] sm:$0xff]  ;;  %v830_v25 = vld [vmem:[#allocation2 + $0xb68] sm:$0xff] }
 0x199   :  { %1605 = vmatprep.subr.bf16.mxu0 %v632_v26  ;;  %1734 = vmatprep.subr.bf16.mxu1 %v634_v27  ;;  %v832_v26 = vld [vmem:[#allocation2 + $0xb78] sm:$0xff]  ;;  %v829_v27 = vld [vmem:[#allocation2 + $0xb60] sm:$0xff] }
 0x19c   :  { %1606 = vmatpush1.bf16.msra.mxu0 %v631_v28  ;;  %1735 = vmatpush1.bf16.msra.mxu1 %v633_v29  ;;  %v831_v28 = vld [vmem:[#allocation2 + $0xb70] sm:$0xff]  ;;  %v848_v29 = vld [vmem:[#allocation2 + $0xbf8] sm:$0xff] }
 0x19d   :  { %1607 = vmatprep.subr.bf16.mxu0 %v650_v30  ;;  %1736 = vmatprep.subr.bf16.mxu1 %v652_v31  ;;  %v850_v30 = vld [vmem:[#allocation2 + $0xc08] sm:$0xff]  ;;  %v847_v31 = vld [vmem:[#allocation2 + $0xbf0] sm:$0xff] }
 0x1a0   :  { %1608 = vmatpush1.bf16.msra.mxu0 %v649_v32  ;;  %1737 = vmatpush1.bf16.msra.mxu1 %v651_v33  ;;  %v849_v32 = vld [vmem:[#allocation2 + $0xc00] sm:$0xff]  ;;  %v866_v33 = vld [vmem:[#allocation2 + $0xc88] sm:$0xff] }
 0x1a1   :  { %1609 = vmatprep.subr.bf16.mxu0 %v668_v34  ;;  %1738 = vmatprep.subr.bf16.mxu1 %v670_v35  ;;  %v868_v34 = vld [vmem:[#allocation2 + $0xc98] sm:$0xff]  ;;  %v865_v35 = vld [vmem:[#allocation2 + $0xc80] sm:$0xff] }
 0x1a4   :  { %1610 = vmatpush1.bf16.msra.mxu0 %v667_v36  ;;  %1739 = vmatpush1.bf16.msra.mxu1 %v669_v37  ;;  %v867_v36 = vld [vmem:[#allocation2 + $0xc90] sm:$0xff]  ;;  %v884_v37 = vld [vmem:[#allocation2 + $0xd18] sm:$0xff] }
 0x1a5   :  { %1611 = vmatprep.subr.bf16.mxu0 %v686_v38  ;;  %1740 = vmatprep.subr.bf16.mxu1 %v688_v39  ;;  %v886_v38 = vld [vmem:[#allocation2 + $0xd28] sm:$0xff]  ;;  %v883_v39 = vld [vmem:[#allocation2 + $0xd10] sm:$0xff] }
 0x1a8   :  { %1612 = vmatpush1.bf16.msra.mxu0 %v685_v40  ;;  %1741 = vmatpush1.bf16.msra.mxu1 %v687_v41  ;;  %v885_v40 = vld [vmem:[#allocation2 + $0xd20] sm:$0xff]  ;;  %v902_v41 = vld [vmem:[#allocation2 + $0xda8] sm:$0xff] }
 0x1a9   :  { %1613 = vmatprep.subr.bf16.mxu0 %v704_v42  ;;  %1742 = vmatprep.subr.bf16.mxu1 %v706_v43  ;;  %v904_v42 = vld [vmem:[#allocation2 + $0xdb8] sm:$0xff]  ;;  %v901_v43 = vld [vmem:[#allocation2 + $0xda0] sm:$0xff] }
 0x1ac   :  { %1614 = vmatpush1.bf16.msra.mxu0 %v703_v44  ;;  %1743 = vmatpush1.bf16.msra.mxu1 %v705_v45  ;;  %v903_v44 = vld [vmem:[#allocation2 + $0xdb0] sm:$0xff]  ;;  %v920_v45 = vld [vmem:[#allocation2 + $0xe38] sm:$0xff] }
 0x1ad   :  { %1615 = vmatprep.subr.bf16.mxu0 %v722_v46  ;;  %1744 = vmatprep.subr.bf16.mxu1 %v724_v47  ;;  %v922_v46 = vld [vmem:[#allocation2 + $0xe48] sm:$0xff]  ;;  %v919_v47 = vld [vmem:[#allocation2 + $0xe30] sm:$0xff] }
 0x1b0   :  { %1616 = vmatpush1.bf16.msra.mxu0 %v721_v48  ;;  %1745 = vmatpush1.bf16.msra.mxu1 %v723_v49  ;;  %v921_v48 = vld [vmem:[#allocation2 + $0xe40] sm:$0xff]  ;;  %v938_v49 = vld [vmem:[#allocation2 + $0xec8] sm:$0xff] }
 0x1b1   :  { %1617 = vmatprep.subr.bf16.mxu0 %v740_v50  ;;  %1746 = vmatprep.subr.bf16.mxu1 %v742_v51  ;;  %v940_v50 = vld [vmem:[#allocation2 + $0xed8] sm:$0xff]  ;;  %v937_v51 = vld [vmem:[#allocation2 + $0xec0] sm:$0xff] }
 0x1b4   :  { %1618 = vmatpush1.bf16.msra.mxu0 %v739_v52  ;;  %1747 = vmatpush1.bf16.msra.mxu1 %v741_v53  ;;  %v939_v52 = vld [vmem:[#allocation2 + $0xed0] sm:$0xff]  ;;  %v956_v53 = vld [vmem:[#allocation2 + $0xf58] sm:$0xff] }
 0x1b5   :  { %1630 = vmatprep.subr.bf16.mxu0 %v758_v54  ;;  %1759 = vmatprep.subr.bf16.mxu1 %v760_v55  ;;  %v958_v54 = vld [vmem:[#allocation2 + $0xf68] sm:$0xff]  ;;  %v955_v55 = vld [vmem:[#allocation2 + $0xf50] sm:$0xff] }
 0x1b7   :  { %1620 = vmatmul.mubr.bf16.vlgmr.msra.gmra.mrb[4].mxu0 %v7857_v17  ;;  %1749 = vmatmul.mubr.bf16.vlgmr.msra.gmra.mrb[4].mxu1 %v7857_v17 }
 0x1b8   :  { %1631 = vmatpush1.bf16.msra.mxu0 %v757_v56  ;;  %1760 = vmatpush1.bf16.msra.mxu1 %v759_v57  ;;  %v957_v56 = vld [vmem:[#allocation2 + $0xf60] sm:$0xff]  ;;  %v974_v57 = vld [vmem:[#allocation2 + $0xfe8] sm:$0xff] }
 0x1b9   :  { %1632 = vmatprep.subr.bf16.mxu0 %v776_v58  ;;  %1761 = vmatprep.subr.bf16.mxu1 %v778_v59  ;;  %v976_v58 = vld [vmem:[#allocation2 + $0xff8] sm:$0xff]  ;;  %v973_v59 = vld [vmem:[#allocation2 + $0xfe0] sm:$0xff] }
 0x1ba   :  { %1662 = vmatprep.mubr.bf16.mxu0 %v7869_v20  ;;  %1791 = vmatprep.mubr.bf16.mxu1 %v7869_v20 }
 0x1bc   :  { %1633 = vmatpush1.bf16.msra.mxu0 %v775_v60  ;;  %1762 = vmatpush1.bf16.msra.mxu1 %v777_v61  ;;  %v975_v60 = vld [vmem:[#allocation2 + $0xff0] sm:$0xff]  ;;  %v992_v61 = vld [vmem:[#allocation2 + $0x1078] sm:$0xff] }
 0x1bd   :  { %1634 = vmatprep.subr.bf16.mxu0 %v794_v5  ;;  %1763 = vmatprep.subr.bf16.mxu1 %v796_v6  ;;  %v994_v5 = vld [vmem:[#allocation2 + $0x1088] sm:$0xff]  ;;  %v991_v6 = vld [vmem:[#allocation2 + $0x1070] sm:$0xff] }
 0x1c0   :  { %1635 = vmatpush1.bf16.msra.mxu0 %v793_v7  ;;  %1764 = vmatpush1.bf16.msra.mxu1 %v795_v8  ;;  %v993_v7 = vld [vmem:[#allocation2 + $0x1080] sm:$0xff]  ;;  %v1010_v8 = vld [vmem:[#allocation2 + $0x1108] sm:$0xff] }
 0x1c1   :  { %1636 = vmatprep.subr.bf16.mxu0 %v812_v12  ;;  %1765 = vmatprep.subr.bf16.mxu1 %v814_v13  ;;  %v1012_v12 = vld [vmem:[#allocation2 + $0x1118] sm:$0xff]  ;;  %v1009_v13 = vld [vmem:[#allocation2 + $0x1100] sm:$0xff] }
 0x1c4   :  { %1637 = vmatpush1.bf16.msra.mxu0 %v811_v23  ;;  %1766 = vmatpush1.bf16.msra.mxu1 %v813_v24  ;;  %v1011_v23 = vld [vmem:[#allocation2 + $0x1110] sm:$0xff]  ;;  %v1028_v24 = vld [vmem:[#allocation2 + $0x1198] sm:$0xff] }
 0x1c5   :  { %1638 = vmatprep.subr.bf16.mxu0 %v830_v25  ;;  %1767 = vmatprep.subr.bf16.mxu1 %v832_v26  ;;  %v1030_v25 = vld [vmem:[#allocation2 + $0x11a8] sm:$0xff]  ;;  %v1027_v26 = vld [vmem:[#allocation2 + $0x1190] sm:$0xff] }
 0x1c8   :  { %1639 = vmatpush1.bf16.msra.mxu0 %v829_v27  ;;  %1768 = vmatpush1.bf16.msra.mxu1 %v831_v28  ;;  %v1029_v27 = vld [vmem:[#allocation2 + $0x11a0] sm:$0xff]  ;;  %v1046_v28 = vld [vmem:[#allocation2 + $0x1228] sm:$0xff] }
 0x1c9   :  { %1640 = vmatprep.subr.bf16.mxu0 %v848_v29  ;;  %1769 = vmatprep.subr.bf16.mxu1 %v850_v30  ;;  %v1048_v29 = vld [vmem:[#allocation2 + $0x1238] sm:$0xff]  ;;  %v1045_v30 = vld [vmem:[#allocation2 + $0x1220] sm:$0xff] }
 0x1cc   :  { %1641 = vmatpush1.bf16.msra.mxu0 %v847_v31  ;;  %1770 = vmatpush1.bf16.msra.mxu1 %v849_v32  ;;  %v1047_v31 = vld [vmem:[#allocation2 + $0x1230] sm:$0xff]  ;;  %v1064_v32 = vld [vmem:[#allocation2 + $0x12b8] sm:$0xff] }
 0x1cd   :  { %1642 = vmatprep.subr.bf16.mxu0 %v866_v33  ;;  %1771 = vmatprep.subr.bf16.mxu1 %v868_v34  ;;  %v1066_v33 = vld [vmem:[#allocation2 + $0x12c8] sm:$0xff]  ;;  %v1063_v34 = vld [vmem:[#allocation2 + $0x12b0] sm:$0xff] }
 0x1d0   :  { %1643 = vmatpush1.bf16.msra.mxu0 %v865_v35  ;;  %1772 = vmatpush1.bf16.msra.mxu1 %v867_v36  ;;  %v1065_v35 = vld [vmem:[#allocation2 + $0x12c0] sm:$0xff]  ;;  %v1082_v36 = vld [vmem:[#allocation2 + $0x1348] sm:$0xff] }
 0x1d1   :  { %1644 = vmatprep.subr.bf16.mxu0 %v884_v37  ;;  %1773 = vmatprep.subr.bf16.mxu1 %v886_v38  ;;  %v1084_v37 = vld [vmem:[#allocation2 + $0x1358] sm:$0xff]  ;;  %v1081_v38 = vld [vmem:[#allocation2 + $0x1340] sm:$0xff] }
 0x1d4   :  { %1645 = vmatpush1.bf16.msra.mxu0 %v883_v39  ;;  %1774 = vmatpush1.bf16.msra.mxu1 %v885_v40  ;;  %v1083_v39 = vld [vmem:[#allocation2 + $0x1350] sm:$0xff]  ;;  %v1100_v40 = vld [vmem:[#allocation2 + $0x13d8] sm:$0xff] }
 0x1d5   :  { %1646 = vmatprep.subr.bf16.mxu0 %v902_v41  ;;  %1775 = vmatprep.subr.bf16.mxu1 %v904_v42  ;;  %v1102_v41 = vld [vmem:[#allocation2 + $0x13e8] sm:$0xff]  ;;  %v1099_v42 = vld [vmem:[#allocation2 + $0x13d0] sm:$0xff] }
 0x1d8   :  { %1647 = vmatpush1.bf16.msra.mxu0 %v901_v43  ;;  %1776 = vmatpush1.bf16.msra.mxu1 %v903_v44  ;;  %v1101_v43 = vld [vmem:[#allocation2 + $0x13e0] sm:$0xff]  ;;  %v1118_v44 = vld [vmem:[#allocation2 + $0x1468] sm:$0xff] }
 0x1d9   :  { %1648 = vmatprep.subr.bf16.mxu0 %v920_v45  ;;  %1777 = vmatprep.subr.bf16.mxu1 %v922_v46  ;;  %v1120_v45 = vld [vmem:[#allocation2 + $0x1478] sm:$0xff]  ;;  %v1117_v46 = vld [vmem:[#allocation2 + $0x1460] sm:$0xff] }
 0x1dc   :  { %1649 = vmatpush1.bf16.msra.mxu0 %v919_v47  ;;  %1778 = vmatpush1.bf16.msra.mxu1 %v921_v48  ;;  %v1119_v47 = vld [vmem:[#allocation2 + $0x1470] sm:$0xff]  ;;  %v1136_v48 = vld [vmem:[#allocation2 + $0x14f8] sm:$0xff] }
 0x1dd   :  { %1650 = vmatprep.subr.bf16.mxu0 %v938_v49  ;;  %1779 = vmatprep.subr.bf16.mxu1 %v940_v50  ;;  %v1138_v49 = vld [vmem:[#allocation2 + $0x1508] sm:$0xff]  ;;  %v1135_v50 = vld [vmem:[#allocation2 + $0x14f0] sm:$0xff] }
 0x1e0   :  { %1651 = vmatpush1.bf16.msra.mxu0 %v937_v51  ;;  %1780 = vmatpush1.bf16.msra.mxu1 %v939_v52  ;;  %v1137_v51 = vld [vmem:[#allocation2 + $0x1500] sm:$0xff]  ;;  %v1154_v52 = vld [vmem:[#allocation2 + $0x1588] sm:$0xff] }
 0x1e1   :  { %1652 = vmatprep.subr.bf16.mxu0 %v956_v53  ;;  %1781 = vmatprep.subr.bf16.mxu1 %v958_v54  ;;  %v1156_v53 = vld [vmem:[#allocation2 + $0x1598] sm:$0xff]  ;;  %v1153_v54 = vld [vmem:[#allocation2 + $0x1580] sm:$0xff] }
 0x1e4   :  { %1653 = vmatpush1.bf16.msra.mxu0 %v955_v55  ;;  %1782 = vmatpush1.bf16.msra.mxu1 %v957_v56  ;;  %v1155_v55 = vld [vmem:[#allocation2 + $0x1590] sm:$0xff]  ;;  %v1172_v56 = vld [vmem:[#allocation2 + $0x1618] sm:$0xff] }
 0x1e5   :  { %1654 = vmatprep.subr.bf16.mxu0 %v974_v57  ;;  %1783 = vmatprep.subr.bf16.mxu1 %v976_v58  ;;  %v1174_v57 = vld [vmem:[#allocation2 + $0x1628] sm:$0xff]  ;;  %v1171_v58 = vld [vmem:[#allocation2 + $0x1610] sm:$0xff] }
 0x1e8   :  { %1655 = vmatpush1.bf16.msra.mxu0 %v973_v59  ;;  %1784 = vmatpush1.bf16.msra.mxu1 %v975_v60  ;;  %v1173_v59 = vld [vmem:[#allocation2 + $0x1620] sm:$0xff]  ;;  %v1190_v60 = vld [vmem:[#allocation2 + $0x16a8] sm:$0xff] }
 0x1e9   :  { %1656 = vmatprep.subr.bf16.mxu0 %v992_v61  ;;  %1785 = vmatprep.subr.bf16.mxu1 %v994_v5  ;;  %v1192_v61 = vld [vmem:[#allocation2 + $0x16b8] sm:$0xff]  ;;  %v1189_v5 = vld [vmem:[#allocation2 + $0x16a0] sm:$0xff] }
 0x1ec   :  { %1657 = vmatpush1.bf16.msra.mxu0 %v991_v6  ;;  %1786 = vmatpush1.bf16.msra.mxu1 %v993_v7  ;;  %v1191_v6 = vld [vmem:[#allocation2 + $0x16b0] sm:$0xff]  ;;  %v1208_v7 = vld [vmem:[#allocation2 + $0x1738] sm:$0xff] }
 0x1ed   :  { %1658 = vmatprep.subr.bf16.mxu0 %v1010_v8  ;;  %1787 = vmatprep.subr.bf16.mxu1 %v1012_v12  ;;  %v1210_v8 = vld [vmem:[#allocation2 + $0x1748] sm:$0xff]  ;;  %v1207_v12 = vld [vmem:[#allocation2 + $0x1730] sm:$0xff] }
 0x1f0   :  { %1659 = vmatpush1.bf16.msra.mxu0 %v1009_v13  ;;  %1788 = vmatpush1.bf16.msra.mxu1 %v1011_v23  ;;  %v1209_v13 = vld [vmem:[#allocation2 + $0x1740] sm:$0xff]  ;;  %v1226_v23 = vld [vmem:[#allocation2 + $0x17c8] sm:$0xff] }
 0x1f1   :  { %1660 = vmatprep.subr.bf16.mxu0 %v1028_v24  ;;  %1789 = vmatprep.subr.bf16.mxu1 %v1030_v25  ;;  %v1228_v24 = vld [vmem:[#allocation2 + $0x17d8] sm:$0xff]  ;;  %v1225_v25 = vld [vmem:[#allocation2 + $0x17c0] sm:$0xff] }
 0x1f4   :  { %1661 = vmatpush1.bf16.msra.mxu0 %v1027_v26  ;;  %1790 = vmatpush1.bf16.msra.mxu1 %v1029_v27  ;;  %v1227_v26 = vld [vmem:[#allocation2 + $0x17d0] sm:$0xff]  ;;  %v1244_v27 = vld [vmem:[#allocation2 + $0x1858] sm:$0xff] }
 0x1f5   :  { %1673 = vmatprep.subr.bf16.mxu0 %v1046_v28  ;;  %1802 = vmatprep.subr.bf16.mxu1 %v1048_v29  ;;  %v1246_v28 = vld [vmem:[#allocation2 + $0x1868] sm:$0xff]  ;;  %v1243_v29 = vld [vmem:[#allocation2 + $0x1850] sm:$0xff] }
 0x1f7   :  { %1663 = vmatmul.mubr.bf16.vlgmr.msra.gmra.mrb[4].mxu0 %v7865_v19  ;;  %1792 = vmatmul.mubr.bf16.vlgmr.msra.gmra.mrb[4].mxu1 %v7865_v19 }
 0x1f8   :  { %1674 = vmatpush1.bf16.msra.mxu0 %v1045_v30  ;;  %1803 = vmatpush1.bf16.msra.mxu1 %v1047_v31  ;;  %v1245_v30 = vld [vmem:[#allocation2 + $0x1860] sm:$0xff]  ;;  %v1262_v31 = vld [vmem:[#allocation2 + $0x18e8] sm:$0xff] }
 0x1f9   :  { %1675 = vmatprep.subr.bf16.mxu0 %v1064_v32  ;;  %1804 = vmatprep.subr.bf16.mxu1 %v1066_v33  ;;  %v1264_v32 = vld [vmem:[#allocation2 + $0x18f8] sm:$0xff]  ;;  %v1261_v33 = vld [vmem:[#allocation2 + $0x18e0] sm:$0xff] }
 0x1fa   :  { %1705 = vmatprep.mubr.bf16.mxu0 %v7877_v22  ;;  %1834 = vmatprep.mubr.bf16.mxu1 %v7877_v22 }
 0x1fc   :  { %1676 = vmatpush1.bf16.msra.mxu0 %v1063_v34  ;;  %1805 = vmatpush1.bf16.msra.mxu1 %v1065_v35  ;;  %v1263_v34 = vld [vmem:[#allocation2 + $0x18f0] sm:$0xff]  ;;  %v1280_v35 = vld [vmem:[#allocation2 + $0x1978] sm:$0xff] }
 0x1fd   :  { %1677 = vmatprep.subr.bf16.mxu0 %v1082_v36  ;;  %1806 = vmatprep.subr.bf16.mxu1 %v1084_v37  ;;  %v1282_v36 = vld [vmem:[#allocation2 + $0x1988] sm:$0xff]  ;;  %v1279_v37 = vld [vmem:[#allocation2 + $0x1970] sm:$0xff] }
 0x200   :  { %1678 = vmatpush1.bf16.msra.mxu0 %v1081_v38  ;;  %1807 = vmatpush1.bf16.msra.mxu1 %v1083_v39  ;;  %v1281_v38 = vld [vmem:[#allocation2 + $0x1980] sm:$0xff]  ;;  %v1298_v39 = vld [vmem:[#allocation2 + $0x1a08] sm:$0xff] }
 0x201   :  { %1679 = vmatprep.subr.bf16.mxu0 %v1100_v40  ;;  %1808 = vmatprep.subr.bf16.mxu1 %v1102_v41  ;;  %v1300_v40 = vld [vmem:[#allocation2 + $0x1a18] sm:$0xff]  ;;  %v1297_v41 = vld [vmem:[#allocation2 + $0x1a00] sm:$0xff] }
 0x204   :  { %1680 = vmatpush1.bf16.msra.mxu0 %v1099_v42  ;;  %1809 = vmatpush1.bf16.msra.mxu1 %v1101_v43  ;;  %v1299_v42 = vld [vmem:[#allocation2 + $0x1a10] sm:$0xff]  ;;  %v1316_v43 = vld [vmem:[#allocation2 + $0x1a98] sm:$0xff] }
 0x205   :  { %1681 = vmatprep.subr.bf16.mxu0 %v1118_v44  ;;  %1810 = vmatprep.subr.bf16.mxu1 %v1120_v45  ;;  %v1318_v44 = vld [vmem:[#allocation2 + $0x1aa8] sm:$0xff]  ;;  %v1315_v45 = vld [vmem:[#allocation2 + $0x1a90] sm:$0xff] }
 0x208   :  { %1682 = vmatpush1.bf16.msra.mxu0 %v1117_v46  ;;  %1811 = vmatpush1.bf16.msra.mxu1 %v1119_v47  ;;  %v1317_v46 = vld [vmem:[#allocation2 + $0x1aa0] sm:$0xff]  ;;  %v474_v47 = vld [vmem:[#allocation2 + $0x48] sm:$0xff] }
 0x209   :  { %1683 = vmatprep.subr.bf16.mxu0 %v1136_v48  ;;  %1812 = vmatprep.subr.bf16.mxu1 %v1138_v49  ;;  %v476_v48 = vld [vmem:[#allocation2 + $0x58] sm:$0xff]  ;;  %v473_v49 = vld [vmem:[#allocation2 + $0x40] sm:$0xff] }
 0x20c   :  { %1684 = vmatpush1.bf16.msra.mxu0 %v1135_v50  ;;  %1813 = vmatpush1.bf16.msra.mxu1 %v1137_v51  ;;  %v475_v50 = vld [vmem:[#allocation2 + $0x50] sm:$0xff]  ;;  %v492_v51 = vld [vmem:[#allocation2 + $0xd8] sm:$0xff] }
 0x20d   :  { %1685 = vmatprep.subr.bf16.mxu0 %v1154_v52  ;;  %1814 = vmatprep.subr.bf16.mxu1 %v1156_v53  ;;  %v494_v52 = vld [vmem:[#allocation2 + $0xe8] sm:$0xff]  ;;  %v491_v53 = vld [vmem:[#allocation2 + $0xd0] sm:$0xff] }
 0x210   :  { %1686 = vmatpush1.bf16.msra.mxu0 %v1153_v54  ;;  %1815 = vmatpush1.bf16.msra.mxu1 %v1155_v55  ;;  %v493_v54 = vld [vmem:[#allocation2 + $0xe0] sm:$0xff]  ;;  %v510_v55 = vld [vmem:[#allocation2 + $0x168] sm:$0xff] }
 0x211   :  { %1687 = vmatprep.subr.bf16.mxu0 %v1172_v56  ;;  %1816 = vmatprep.subr.bf16.mxu1 %v1174_v57  ;;  %v512_v56 = vld [vmem:[#allocation2 + $0x178] sm:$0xff]  ;;  %v509_v57 = vld [vmem:[#allocation2 + $0x160] sm:$0xff] }
 0x214   :  { %1688 = vmatpush1.bf16.msra.mxu0 %v1171_v58  ;;  %1817 = vmatpush1.bf16.msra.mxu1 %v1173_v59  ;;  %v511_v58 = vld [vmem:[#allocation2 + $0x170] sm:$0xff]  ;;  %v528_v59 = vld [vmem:[#allocation2 + $0x1f8] sm:$0xff] }
 0x215   :  { %1689 = vmatprep.subr.bf16.mxu0 %v1190_v60  ;;  %1818 = vmatprep.subr.bf16.mxu1 %v1192_v61  ;;  %v530_v60 = vld [vmem:[#allocation2 + $0x208] sm:$0xff]  ;;  %v527_v61 = vld [vmem:[#allocation2 + $0x1f0] sm:$0xff] }
 0x218   :  { %1690 = vmatpush1.bf16.msra.mxu0 %v1189_v5  ;;  %1819 = vmatpush1.bf16.msra.mxu1 %v1191_v6  ;;  %v529_v5 = vld [vmem:[#allocation2 + $0x200] sm:$0xff]  ;;  %v546_v6 = vld [vmem:[#allocation2 + $0x288] sm:$0xff] }
 0x219   :  { %1691 = vmatprep.subr.bf16.mxu0 %v1208_v7  ;;  %1820 = vmatprep.subr.bf16.mxu1 %v1210_v8  ;;  %v548_v7 = vld [vmem:[#allocation2 + $0x298] sm:$0xff]  ;;  %v545_v8 = vld [vmem:[#allocation2 + $0x280] sm:$0xff] }
 0x21c   :  { %1692 = vmatpush1.bf16.msra.mxu0 %v1207_v12  ;;  %1821 = vmatpush1.bf16.msra.mxu1 %v1209_v13  ;;  %v547_v12 = vld [vmem:[#allocation2 + $0x290] sm:$0xff]  ;;  %v564_v13 = vld [vmem:[#allocation2 + $0x318] sm:$0xff] }
 0x21d   :  { %1693 = vmatprep.subr.bf16.mxu0 %v1226_v23  ;;  %1822 = vmatprep.subr.bf16.mxu1 %v1228_v24  ;;  %v566_v23 = vld [vmem:[#allocation2 + $0x328] sm:$0xff]  ;;  %v563_v24 = vld [vmem:[#allocation2 + $0x310] sm:$0xff] }
 0x220   :  { %1694 = vmatpush1.bf16.msra.mxu0 %v1225_v25  ;;  %1823 = vmatpush1.bf16.msra.mxu1 %v1227_v26  ;;  %v565_v25 = vld [vmem:[#allocation2 + $0x320] sm:$0xff] }
 0x221   :  { %1695 = vmatprep.subr.bf16.mxu0 %v1244_v27  ;;  %1824 = vmatprep.subr.bf16.mxu1 %v1246_v28  ;;  %v582_v28 = vld [vmem:[#allocation2 + $0x3a8] sm:$0xff] }
 0x224   :  { %1696 = vmatpush1.bf16.msra.mxu0 %v1243_v29  ;;  %1825 = vmatpush1.bf16.msra.mxu1 %v1245_v30 }
 0x225   :  { %1697 = vmatprep.subr.bf16.mxu0 %v1262_v31  ;;  %1826 = vmatprep.subr.bf16.mxu1 %v1264_v32  ;;  %v584_v31 = vld [vmem:[#allocation2 + $0x3b8] sm:$0xff] }
 0x228   :  { %1698 = vmatpush1.bf16.msra.mxu0 %v1261_v33  ;;  %1827 = vmatpush1.bf16.msra.mxu1 %v1263_v34 }
 0x229   :  { %1699 = vmatprep.subr.bf16.mxu0 %v1280_v35  ;;  %1828 = vmatprep.subr.bf16.mxu1 %v1282_v36  ;;  %v581_v36 = vld [vmem:[#allocation2 + $0x3a0] sm:$0xff] }
 0x22c   :  { %1700 = vmatpush1.bf16.msra.mxu0 %v1279_v37  ;;  %1829 = vmatpush1.bf16.msra.mxu1 %v1281_v38  ;;  %v583_v37 = vld [vmem:[#allocation2 + $0x3b0] sm:$0xff]  ;;  %v600_v38 = vld [vmem:[#allocation2 + $0x438] sm:$0xff] }
 0x22d   :  { %1701 = vmatprep.subr.bf16.mxu0 %v1298_v39  ;;  %1830 = vmatprep.subr.bf16.mxu1 %v1300_v40  ;;  %v602_v39 = vld [vmem:[#allocation2 + $0x448] sm:$0xff]  ;;  %v599_v40 = vld [vmem:[#allocation2 + $0x430] sm:$0xff] }
 0x230   :  { %1702 = vmatpush1.bf16.msra.mxu0 %v1297_v41  ;;  %1831 = vmatpush1.bf16.msra.mxu1 %v1299_v42  ;;  %v601_v41 = vld [vmem:[#allocation2 + $0x440] sm:$0xff]  ;;  %v618_v42 = vld [vmem:[#allocation2 + $0x4c8] sm:$0xff] }
 0x231   :  { %1703 = vmatprep.subr.bf16.mxu0 %v1316_v43  ;;  %1832 = vmatprep.subr.bf16.mxu1 %v1318_v44  ;;  %v620_v43 = vld [vmem:[#allocation2 + $0x4d8] sm:$0xff]  ;;  %v617_v44 = vld [vmem:[#allocation2 + $0x4c0] sm:$0xff] }
 0x234   :  { %1704 = vmatpush1.bf16.msra.mxu0 %v1315_v45  ;;  %1833 = vmatpush1.bf16.msra.mxu1 %v1317_v46  ;;  %v619_v45 = vld [vmem:[#allocation2 + $0x4d0] sm:$0xff]  ;;  %v636_v46 = vld [vmem:[#allocation2 + $0x558] sm:$0xff] }
 0x235   :  { %1845 = vmatprep.subr.bf16.mxu0 %v474_v47  ;;  %1974 = vmatprep.subr.bf16.mxu1 %v476_v48  ;;  %v638_v47 = vld [vmem:[#allocation2 + $0x568] sm:$0xff]  ;;  %v635_v48 = vld [vmem:[#allocation2 + $0x550] sm:$0xff] }
 0x237   :  { %1706 = vmatmul.mubr.bf16.vlgmr.msra.gmra.mrb[4].mxu0 %v7873_v21  ;;  %1835 = vmatmul.mubr.bf16.vlgmr.msra.gmra.mrb[4].mxu1 %v7873_v21 }
 0x238   :  { %1846 = vmatpush1.bf16.msra.mxu0 %v473_v49  ;;  %1975 = vmatpush1.bf16.msra.mxu1 %v475_v50  ;;  %v637_v49 = vld [vmem:[#allocation2 + $0x560] sm:$0xff]  ;;  %v654_v50 = vld [vmem:[#allocation2 + $0x5e8] sm:$0xff] }
 0x239   :  { %1847 = vmatprep.subr.bf16.mxu0 %v492_v51  ;;  %1976 = vmatprep.subr.bf16.mxu1 %v494_v52  ;;  %v656_v51 = vld [vmem:[#allocation2 + $0x5f8] sm:$0xff]  ;;  %v653_v52 = vld [vmem:[#allocation2 + $0x5e0] sm:$0xff] }
 0x23a   :  { %1877 = vmatprep.mubr.bf16.mxu0 %v7861_v18  ;;  %2006 = vmatprep.mubr.bf16.mxu1 %v7861_v18 }
 0x23c   :  { %1848 = vmatpush1.bf16.msra.mxu0 %v491_v53  ;;  %1977 = vmatpush1.bf16.msra.mxu1 %v493_v54  ;;  %v655_v53 = vld [vmem:[#allocation2 + $0x5f0] sm:$0xff]  ;;  %v672_v54 = vld [vmem:[#allocation2 + $0x678] sm:$0xff] }
 0x23d   :  { %1849 = vmatprep.subr.bf16.mxu0 %v510_v55  ;;  %1978 = vmatprep.subr.bf16.mxu1 %v512_v56  ;;  %v674_v55 = vld [vmem:[#allocation2 + $0x688] sm:$0xff]  ;;  %v671_v56 = vld [vmem:[#allocation2 + $0x670] sm:$0xff] }
 0x240   :  { %1850 = vmatpush1.bf16.msra.mxu0 %v509_v57  ;;  %1979 = vmatpush1.bf16.msra.mxu1 %v511_v58  ;;  %v673_v57 = vld [vmem:[#allocation2 + $0x680] sm:$0xff]  ;;  %v690_v58 = vld [vmem:[#allocation2 + $0x708] sm:$0xff] }
 0x241   :  { %1851 = vmatprep.subr.bf16.mxu0 %v528_v59  ;;  %1980 = vmatprep.subr.bf16.mxu1 %v530_v60  ;;  %v692_v59 = vld [vmem:[#allocation2 + $0x718] sm:$0xff]  ;;  %v689_v60 = vld [vmem:[#allocation2 + $0x700] sm:$0xff] }
 0x244   :  { %1852 = vmatpush1.bf16.msra.mxu0 %v527_v61  ;;  %1981 = vmatpush1.bf16.msra.mxu1 %v529_v5  ;;  %v691_v61 = vld [vmem:[#allocation2 + $0x710] sm:$0xff]  ;;  %v708_v5 = vld [vmem:[#allocation2 + $0x798] sm:$0xff] }
 0x245   :  { %1853 = vmatprep.subr.bf16.mxu0 %v546_v6  ;;  %1982 = vmatprep.subr.bf16.mxu1 %v548_v7  ;;  %v710_v6 = vld [vmem:[#allocation2 + $0x7a8] sm:$0xff]  ;;  %v707_v7 = vld [vmem:[#allocation2 + $0x790] sm:$0xff] }
 0x248   :  { %1854 = vmatpush1.bf16.msra.mxu0 %v545_v8  ;;  %1983 = vmatpush1.bf16.msra.mxu1 %v547_v12  ;;  %v709_v8 = vld [vmem:[#allocation2 + $0x7a0] sm:$0xff]  ;;  %v726_v12 = vld [vmem:[#allocation2 + $0x828] sm:$0xff] }
 0x249   :  { %1855 = vmatprep.subr.bf16.mxu0 %v564_v13  ;;  %1984 = vmatprep.subr.bf16.mxu1 %v566_v23  ;;  %v728_v13 = vld [vmem:[#allocation2 + $0x838] sm:$0xff]  ;;  %v725_v23 = vld [vmem:[#allocation2 + $0x820] sm:$0xff] }
 0x24a   :  { %v7905_v26 = vpop.f32.mrb[0].mxu0  ;;  %v7907_v27 = vpop.f32.mrb[0].mxu1 }
 0x24b   :  { %v7909_v29 = vpop.f32.mrb[1].mxu0  ;;  %v7911_v30 = vpop.f32.mrb[1].mxu1 }
 0x24c   :  { %v7913_v32 = vpop.f32.mrb[2].mxu0  ;;  %v7915_v33 = vpop.f32.mrb[2].mxu1  ;;  %1856 = vmatpush1.bf16.msra.mxu0 %v563_v24  ;;  %1985 = vmatpush1.bf16.msra.mxu1 %v565_v25  ;;  %v727_v24 = vld [vmem:[#allocation2 + $0x830] sm:$0xff]  ;;  %v744_v25 = vld [vmem:[#allocation2 + $0x8b8] sm:$0xff] }
 0x24d   :  { %v7917_v34 = vpop.f32.mrb[3].mxu0  ;;  %v7919_v35 = vpop.f32.mrb[3].mxu1  ;;  %1857 = vmatprep.subr.bf16.mxu0 %v582_v28  ;;  %1986 = vmatprep.subr.bf16.mxu1 %v584_v31  ;;  %v746_v28 = vld [vmem:[#allocation2 + $0x8c8] sm:$0xff]  ;;  %v743_v31 = vld [vmem:[#allocation2 + $0x8b0] sm:$0xff] }
 0x250   :  { %1858 = vmatpush1.bf16.msra.mxu0 %v581_v36  ;;  %1987 = vmatpush1.bf16.msra.mxu1 %v583_v37  ;;  %v745_v36 = vld [vmem:[#allocation2 + $0x8c0] sm:$0xff]  ;;  %v762_v37 = vld [vmem:[#allocation2 + $0x948] sm:$0xff] }
 0x251   :  { %1859 = vmatprep.subr.bf16.mxu0 %v600_v38  ;;  %1988 = vmatprep.subr.bf16.mxu1 %v602_v39  ;;  %v764_v38 = vld [vmem:[#allocation2 + $0x958] sm:$0xff]  ;;  %v761_v39 = vld [vmem:[#allocation2 + $0x940] sm:$0xff] }
 0x254   :  { %1860 = vmatpush1.bf16.msra.mxu0 %v599_v40  ;;  %1989 = vmatpush1.bf16.msra.mxu1 %v601_v41  ;;  %v763_v40 = vld [vmem:[#allocation2 + $0x950] sm:$0xff]  ;;  %v780_v41 = vld [vmem:[#allocation2 + $0x9d8] sm:$0xff] }
 0x255   :  { %1861 = vmatprep.subr.bf16.mxu0 %v618_v42  ;;  %1990 = vmatprep.subr.bf16.mxu1 %v620_v43  ;;  %v782_v42 = vld [vmem:[#allocation2 + $0x9e8] sm:$0xff]  ;;  %v779_v43 = vld [vmem:[#allocation2 + $0x9d0] sm:$0xff] }
 0x258   :  { %1862 = vmatpush1.bf16.msra.mxu0 %v617_v44  ;;  %1991 = vmatpush1.bf16.msra.mxu1 %v619_v45  ;;  %v781_v44 = vld [vmem:[#allocation2 + $0x9e0] sm:$0xff]  ;;  %v798_v45 = vld [vmem:[#allocation2 + $0xa68] sm:$0xff] }
 0x259   :  { %1863 = vmatprep.subr.bf16.mxu0 %v636_v46  ;;  %1992 = vmatprep.subr.bf16.mxu1 %v638_v47  ;;  %v800_v46 = vld [vmem:[#allocation2 + $0xa78] sm:$0xff]  ;;  %v797_v47 = vld [vmem:[#allocation2 + $0xa60] sm:$0xff] }
 0x25c   :  { %1864 = vmatpush1.bf16.msra.mxu0 %v635_v48  ;;  %1993 = vmatpush1.bf16.msra.mxu1 %v637_v49  ;;  %v799_v48 = vld [vmem:[#allocation2 + $0xa70] sm:$0xff]  ;;  %v816_v49 = vld [vmem:[#allocation2 + $0xaf8] sm:$0xff] }
 0x25d   :  { %1865 = vmatprep.subr.bf16.mxu0 %v654_v50  ;;  %1994 = vmatprep.subr.bf16.mxu1 %v656_v51  ;;  %v818_v50 = vld [vmem:[#allocation2 + $0xb08] sm:$0xff]  ;;  %v815_v51 = vld [vmem:[#allocation2 + $0xaf0] sm:$0xff] }
 0x260   :  { %1866 = vmatpush1.bf16.msra.mxu0 %v653_v52  ;;  %1995 = vmatpush1.bf16.msra.mxu1 %v655_v53  ;;  %v817_v52 = vld [vmem:[#allocation2 + $0xb00] sm:$0xff]  ;;  %v834_v53 = vld [vmem:[#allocation2 + $0xb88] sm:$0xff] }
 0x261   :  { %1867 = vmatprep.subr.bf16.mxu0 %v672_v54  ;;  %1996 = vmatprep.subr.bf16.mxu1 %v674_v55  ;;  %v836_v54 = vld [vmem:[#allocation2 + $0xb98] sm:$0xff]  ;;  %v833_v55 = vld [vmem:[#allocation2 + $0xb80] sm:$0xff] }
 0x264   :  { %1868 = vmatpush1.bf16.msra.mxu0 %v671_v56  ;;  %1997 = vmatpush1.bf16.msra.mxu1 %v673_v57  ;;  %v835_v56 = vld [vmem:[#allocation2 + $0xb90] sm:$0xff]  ;;  %v852_v57 = vld [vmem:[#allocation2 + $0xc18] sm:$0xff] }
 0x265   :  { %1869 = vmatprep.subr.bf16.mxu0 %v690_v58  ;;  %1998 = vmatprep.subr.bf16.mxu1 %v692_v59  ;;  %v854_v58 = vld [vmem:[#allocation2 + $0xc28] sm:$0xff]  ;;  %v851_v59 = vld [vmem:[#allocation2 + $0xc10] sm:$0xff] }
 0x268   :  { %1870 = vmatpush1.bf16.msra.mxu0 %v689_v60  ;;  %1999 = vmatpush1.bf16.msra.mxu1 %v691_v61  ;;  %v853_v60 = vld [vmem:[#allocation2 + $0xc20] sm:$0xff]  ;;  %v870_v61 = vld [vmem:[#allocation2 + $0xca8] sm:$0xff] }
 0x269   :  { %1871 = vmatprep.subr.bf16.mxu0 %v708_v5  ;;  %2000 = vmatprep.subr.bf16.mxu1 %v710_v6  ;;  %v872_v5 = vld [vmem:[#allocation2 + $0xcb8] sm:$0xff]  ;;  %v869_v6 = vld [vmem:[#allocation2 + $0xca0] sm:$0xff] }
 0x26c   :  { %1872 = vmatpush1.bf16.msra.mxu0 %v707_v7  ;;  %2001 = vmatpush1.bf16.msra.mxu1 %v709_v8  ;;  %v871_v7 = vld [vmem:[#allocation2 + $0xcb0] sm:$0xff]  ;;  %v888_v8 = vld [vmem:[#allocation2 + $0xd38] sm:$0xff] }
 0x26d   :  { %1873 = vmatprep.subr.bf16.mxu0 %v726_v12  ;;  %2002 = vmatprep.subr.bf16.mxu1 %v728_v13  ;;  %v890_v12 = vld [vmem:[#allocation2 + $0xd48] sm:$0xff]  ;;  %v887_v13 = vld [vmem:[#allocation2 + $0xd30] sm:$0xff] }
 0x270   :  { %1874 = vmatpush1.bf16.msra.mxu0 %v725_v23  ;;  %2003 = vmatpush1.bf16.msra.mxu1 %v727_v24  ;;  %v889_v23 = vld [vmem:[#allocation2 + $0xd40] sm:$0xff]  ;;  %v906_v24 = vld [vmem:[#allocation2 + $0xdc8] sm:$0xff] }
 0x271   :  { %1875 = vmatprep.subr.bf16.mxu0 %v744_v25  ;;  %2004 = vmatprep.subr.bf16.mxu1 %v746_v28  ;;  %v908_v25 = vld [vmem:[#allocation2 + $0xdd8] sm:$0xff]  ;;  %v905_v28 = vld [vmem:[#allocation2 + $0xdc0] sm:$0xff] }
 0x274   :  { %1876 = vmatpush1.bf16.msra.mxu0 %v743_v31  ;;  %2005 = vmatpush1.bf16.msra.mxu1 %v745_v36  ;;  %v907_v31 = vld [vmem:[#allocation2 + $0xdd0] sm:$0xff]  ;;  %v924_v36 = vld [vmem:[#allocation2 + $0xe58] sm:$0xff] }
 0x275   :  { %1888 = vmatprep.subr.bf16.mxu0 %v762_v37  ;;  %2017 = vmatprep.subr.bf16.mxu1 %v764_v38  ;;  %v926_v37 = vld [vmem:[#allocation2 + $0xe68] sm:$0xff]  ;;  %v923_v38 = vld [vmem:[#allocation2 + $0xe50] sm:$0xff] }
 0x277   :  { %1878 = vmatmul.mubr.bf16.vlgmr.msra.gmra.mrb[8].mxu0 %v7857_v17  ;;  %2007 = vmatmul.mubr.bf16.vlgmr.msra.gmra.mrb[8].mxu1 %v7857_v17 }
 0x278   :  { %1889 = vmatpush1.bf16.msra.mxu0 %v761_v39  ;;  %2018 = vmatpush1.bf16.msra.mxu1 %v763_v40  ;;  %v925_v39 = vld [vmem:[#allocation2 + $0xe60] sm:$0xff]  ;;  %v942_v40 = vld [vmem:[#allocation2 + $0xee8] sm:$0xff] }
 0x279   :  { %1890 = vmatprep.subr.bf16.mxu0 %v780_v41  ;;  %2019 = vmatprep.subr.bf16.mxu1 %v782_v42  ;;  %v944_v41 = vld [vmem:[#allocation2 + $0xef8] sm:$0xff]  ;;  %v941_v42 = vld [vmem:[#allocation2 + $0xee0] sm:$0xff] }
 0x27a   :  { %1920 = vmatprep.mubr.bf16.mxu0 %v7869_v20  ;;  %2049 = vmatprep.mubr.bf16.mxu1 %v7869_v20 }
 0x27c   :  { %1891 = vmatpush1.bf16.msra.mxu0 %v779_v43  ;;  %2020 = vmatpush1.bf16.msra.mxu1 %v781_v44  ;;  %v943_v43 = vld [vmem:[#allocation2 + $0xef0] sm:$0xff]  ;;  %v960_v44 = vld [vmem:[#allocation2 + $0xf78] sm:$0xff] }
 0x27d   :  { %1892 = vmatprep.subr.bf16.mxu0 %v798_v45  ;;  %2021 = vmatprep.subr.bf16.mxu1 %v800_v46  ;;  %v962_v45 = vld [vmem:[#allocation2 + $0xf88] sm:$0xff]  ;;  %v959_v46 = vld [vmem:[#allocation2 + $0xf70] sm:$0xff] }
 0x280   :  { %1893 = vmatpush1.bf16.msra.mxu0 %v797_v47  ;;  %2022 = vmatpush1.bf16.msra.mxu1 %v799_v48  ;;  %v961_v47 = vld [vmem:[#allocation2 + $0xf80] sm:$0xff]  ;;  %v978_v48 = vld [vmem:[#allocation2 + $0x1008] sm:$0xff] }
 0x281   :  { %1894 = vmatprep.subr.bf16.mxu0 %v816_v49  ;;  %2023 = vmatprep.subr.bf16.mxu1 %v818_v50  ;;  %v980_v49 = vld [vmem:[#allocation2 + $0x1018] sm:$0xff]  ;;  %v977_v50 = vld [vmem:[#allocation2 + $0x1000] sm:$0xff] }
 0x284   :  { %1895 = vmatpush1.bf16.msra.mxu0 %v815_v51  ;;  %2024 = vmatpush1.bf16.msra.mxu1 %v817_v52  ;;  %v979_v51 = vld [vmem:[#allocation2 + $0x1010] sm:$0xff]  ;;  %v996_v52 = vld [vmem:[#allocation2 + $0x1098] sm:$0xff] }
 0x285   :  { %1896 = vmatprep.subr.bf16.mxu0 %v834_v53  ;;  %2025 = vmatprep.subr.bf16.mxu1 %v836_v54  ;;  %v998_v53 = vld [vmem:[#allocation2 + $0x10a8] sm:$0xff]  ;;  %v995_v54 = vld [vmem:[#allocation2 + $0x1090] sm:$0xff] }
 0x288   :  { %1897 = vmatpush1.bf16.msra.mxu0 %v833_v55  ;;  %2026 = vmatpush1.bf16.msra.mxu1 %v835_v56  ;;  %v997_v55 = vld [vmem:[#allocation2 + $0x10a0] sm:$0xff]  ;;  %v1014_v56 = vld [vmem:[#allocation2 + $0x1128] sm:$0xff] }
 0x289   :  { %1898 = vmatprep.subr.bf16.mxu0 %v852_v57  ;;  %2027 = vmatprep.subr.bf16.mxu1 %v854_v58  ;;  %v1016_v57 = vld [vmem:[#allocation2 + $0x1138] sm:$0xff]  ;;  %v1013_v58 = vld [vmem:[#allocation2 + $0x1120] sm:$0xff] }
 0x28c   :  { %1899 = vmatpush1.bf16.msra.mxu0 %v851_v59  ;;  %2028 = vmatpush1.bf16.msra.mxu1 %v853_v60  ;;  %v1015_v59 = vld [vmem:[#allocation2 + $0x1130] sm:$0xff]  ;;  %v1032_v60 = vld [vmem:[#allocation2 + $0x11b8] sm:$0xff] }
 0x28d   :  { %1900 = vmatprep.subr.bf16.mxu0 %v870_v61  ;;  %2029 = vmatprep.subr.bf16.mxu1 %v872_v5  ;;  %v1034_v61 = vld [vmem:[#allocation2 + $0x11c8] sm:$0xff]  ;;  %v1031_v5 = vld [vmem:[#allocation2 + $0x11b0] sm:$0xff] }
 0x290   :  { %1901 = vmatpush1.bf16.msra.mxu0 %v869_v6  ;;  %2030 = vmatpush1.bf16.msra.mxu1 %v871_v7  ;;  %v1033_v6 = vld [vmem:[#allocation2 + $0x11c0] sm:$0xff]  ;;  %v1050_v7 = vld [vmem:[#allocation2 + $0x1248] sm:$0xff] }
 0x291   :  { %1902 = vmatprep.subr.bf16.mxu0 %v888_v8  ;;  %2031 = vmatprep.subr.bf16.mxu1 %v890_v12  ;;  %v1052_v8 = vld [vmem:[#allocation2 + $0x1258] sm:$0xff]  ;;  %v1049_v12 = vld [vmem:[#allocation2 + $0x1240] sm:$0xff] }
 0x294   :  { %1903 = vmatpush1.bf16.msra.mxu0 %v887_v13  ;;  %2032 = vmatpush1.bf16.msra.mxu1 %v889_v23  ;;  %v1051_v13 = vld [vmem:[#allocation2 + $0x1250] sm:$0xff]  ;;  %v1068_v23 = vld [vmem:[#allocation2 + $0x12d8] sm:$0xff] }
 0x295   :  { %1904 = vmatprep.subr.bf16.mxu0 %v906_v24  ;;  %2033 = vmatprep.subr.bf16.mxu1 %v908_v25  ;;  %v1070_v24 = vld [vmem:[#allocation2 + $0x12e8] sm:$0xff]  ;;  %v1067_v25 = vld [vmem:[#allocation2 + $0x12d0] sm:$0xff] }
 0x298   :  { %1905 = vmatpush1.bf16.msra.mxu0 %v905_v28  ;;  %2034 = vmatpush1.bf16.msra.mxu1 %v907_v31  ;;  %v1069_v28 = vld [vmem:[#allocation2 + $0x12e0] sm:$0xff]  ;;  %v1086_v31 = vld [vmem:[#allocation2 + $0x1368] sm:$0xff] }
 0x299   :  { %1906 = vmatprep.subr.bf16.mxu0 %v924_v36  ;;  %2035 = vmatprep.subr.bf16.mxu1 %v926_v37  ;;  %v1088_v36 = vld [vmem:[#allocation2 + $0x1378] sm:$0xff]  ;;  %v1085_v37 = vld [vmem:[#allocation2 + $0x1360] sm:$0xff] }
 0x29c   :  { %1907 = vmatpush1.bf16.msra.mxu0 %v923_v38  ;;  %2036 = vmatpush1.bf16.msra.mxu1 %v925_v39  ;;  %v1087_v38 = vld [vmem:[#allocation2 + $0x1370] sm:$0xff]  ;;  %v1104_v39 = vld [vmem:[#allocation2 + $0x13f8] sm:$0xff] }
 0x29d   :  { %1908 = vmatprep.subr.bf16.mxu0 %v942_v40  ;;  %2037 = vmatprep.subr.bf16.mxu1 %v944_v41  ;;  %v1106_v40 = vld [vmem:[#allocation2 + $0x1408] sm:$0xff]  ;;  %v1103_v41 = vld [vmem:[#allocation2 + $0x13f0] sm:$0xff] }
 0x2a0   :  { %1909 = vmatpush1.bf16.msra.mxu0 %v941_v42  ;;  %2038 = vmatpush1.bf16.msra.mxu1 %v943_v43  ;;  %v1105_v42 = vld [vmem:[#allocation2 + $0x1400] sm:$0xff]  ;;  %v1122_v43 = vld [vmem:[#allocation2 + $0x1488] sm:$0xff] }
 0x2a1   :  { %1910 = vmatprep.subr.bf16.mxu0 %v960_v44  ;;  %2039 = vmatprep.subr.bf16.mxu1 %v962_v45  ;;  %v1124_v44 = vld [vmem:[#allocation2 + $0x1498] sm:$0xff]  ;;  %v1121_v45 = vld [vmem:[#allocation2 + $0x1480] sm:$0xff] }
 0x2a4   :  { %1911 = vmatpush1.bf16.msra.mxu0 %v959_v46  ;;  %2040 = vmatpush1.bf16.msra.mxu1 %v961_v47  ;;  %v1123_v46 = vld [vmem:[#allocation2 + $0x1490] sm:$0xff]  ;;  %v1140_v47 = vld [vmem:[#allocation2 + $0x1518] sm:$0xff] }
 0x2a5   :  { %1912 = vmatprep.subr.bf16.mxu0 %v978_v48  ;;  %2041 = vmatprep.subr.bf16.mxu1 %v980_v49  ;;  %v1142_v48 = vld [vmem:[#allocation2 + $0x1528] sm:$0xff]  ;;  %v1139_v49 = vld [vmem:[#allocation2 + $0x1510] sm:$0xff] }
 0x2a8   :  { %1913 = vmatpush1.bf16.msra.mxu0 %v977_v50  ;;  %2042 = vmatpush1.bf16.msra.mxu1 %v979_v51  ;;  %v1141_v50 = vld [vmem:[#allocation2 + $0x1520] sm:$0xff]  ;;  %v1158_v51 = vld [vmem:[#allocation2 + $0x15a8] sm:$0xff] }
 0x2a9   :  { %1914 = vmatprep.subr.bf16.mxu0 %v996_v52  ;;  %2043 = vmatprep.subr.bf16.mxu1 %v998_v53  ;;  %v1160_v52 = vld [vmem:[#allocation2 + $0x15b8] sm:$0xff]  ;;  %v1157_v53 = vld [vmem:[#allocation2 + $0x15a0] sm:$0xff] }
 0x2ac   :  { %1915 = vmatpush1.bf16.msra.mxu0 %v995_v54  ;;  %2044 = vmatpush1.bf16.msra.mxu1 %v997_v55  ;;  %v1159_v54 = vld [vmem:[#allocation2 + $0x15b0] sm:$0xff]  ;;  %v1176_v55 = vld [vmem:[#allocation2 + $0x1638] sm:$0xff] }
 0x2ad   :  { %1916 = vmatprep.subr.bf16.mxu0 %v1014_v56  ;;  %2045 = vmatprep.subr.bf16.mxu1 %v1016_v57  ;;  %v1178_v56 = vld [vmem:[#allocation2 + $0x1648] sm:$0xff]  ;;  %v1175_v57 = vld [vmem:[#allocation2 + $0x1630] sm:$0xff] }
 0x2b0   :  { %1917 = vmatpush1.bf16.msra.mxu0 %v1013_v58  ;;  %2046 = vmatpush1.bf16.msra.mxu1 %v1015_v59  ;;  %v1177_v58 = vld [vmem:[#allocation2 + $0x1640] sm:$0xff]  ;;  %v1194_v59 = vld [vmem:[#allocation2 + $0x16c8] sm:$0xff] }
 0x2b1   :  { %1918 = vmatprep.subr.bf16.mxu0 %v1032_v60  ;;  %2047 = vmatprep.subr.bf16.mxu1 %v1034_v61  ;;  %v1196_v60 = vld [vmem:[#allocation2 + $0x16d8] sm:$0xff]  ;;  %v1193_v61 = vld [vmem:[#allocation2 + $0x16c0] sm:$0xff] }
 0x2b4   :  { %1919 = vmatpush1.bf16.msra.mxu0 %v1031_v5  ;;  %2048 = vmatpush1.bf16.msra.mxu1 %v1033_v6  ;;  %v1195_v5 = vld [vmem:[#allocation2 + $0x16d0] sm:$0xff]  ;;  %v1212_v6 = vld [vmem:[#allocation2 + $0x1758] sm:$0xff] }
 0x2b5   :  { %1931 = vmatprep.subr.bf16.mxu0 %v1050_v7  ;;  %2060 = vmatprep.subr.bf16.mxu1 %v1052_v8  ;;  %v1214_v7 = vld [vmem:[#allocation2 + $0x1768] sm:$0xff]  ;;  %v1211_v8 = vld [vmem:[#allocation2 + $0x1750] sm:$0xff] }
 0x2b7   :  { %1921 = vmatmul.mubr.bf16.vlgmr.msra.gmra.mrb[8].mxu0 %v7865_v19  ;;  %2050 = vmatmul.mubr.bf16.vlgmr.msra.gmra.mrb[8].mxu1 %v7865_v19 }
 0x2b8   :  { %1932 = vmatpush1.bf16.msra.mxu0 %v1049_v12  ;;  %2061 = vmatpush1.bf16.msra.mxu1 %v1051_v13  ;;  %v1213_v12 = vld [vmem:[#allocation2 + $0x1760] sm:$0xff]  ;;  %v1230_v13 = vld [vmem:[#allocation2 + $0x17e8] sm:$0xff] }
 0x2b9   :  { %1933 = vmatprep.subr.bf16.mxu0 %v1068_v23  ;;  %2062 = vmatprep.subr.bf16.mxu1 %v1070_v24  ;;  %v1232_v23 = vld [vmem:[#allocation2 + $0x17f8] sm:$0xff]  ;;  %v1229_v24 = vld [vmem:[#allocation2 + $0x17e0] sm:$0xff] }
 0x2ba   :  { %1963 = vmatprep.mubr.bf16.mxu0 %v7877_v22  ;;  %2092 = vmatprep.mubr.bf16.mxu1 %v7877_v22 }
 0x2bc   :  { %1934 = vmatpush1.bf16.msra.mxu0 %v1067_v25  ;;  %2063 = vmatpush1.bf16.msra.mxu1 %v1069_v28  ;;  %v1231_v25 = vld [vmem:[#allocation2 + $0x17f0] sm:$0xff]  ;;  %v1248_v28 = vld [vmem:[#allocation2 + $0x1878] sm:$0xff] }
 0x2bd   :  { %1935 = vmatprep.subr.bf16.mxu0 %v1086_v31  ;;  %2064 = vmatprep.subr.bf16.mxu1 %v1088_v36  ;;  %v1250_v31 = vld [vmem:[#allocation2 + $0x1888] sm:$0xff]  ;;  %v1247_v36 = vld [vmem:[#allocation2 + $0x1870] sm:$0xff] }
 0x2c0   :  { %1936 = vmatpush1.bf16.msra.mxu0 %v1085_v37  ;;  %2065 = vmatpush1.bf16.msra.mxu1 %v1087_v38  ;;  %v1249_v37 = vld [vmem:[#allocation2 + $0x1880] sm:$0xff]  ;;  %v1266_v38 = vld [vmem:[#allocation2 + $0x1908] sm:$0xff] }
 0x2c1   :  { %1937 = vmatprep.subr.bf16.mxu0 %v1104_v39  ;;  %2066 = vmatprep.subr.bf16.mxu1 %v1106_v40  ;;  %v1268_v39 = vld [vmem:[#allocation2 + $0x1918] sm:$0xff]  ;;  %v1265_v40 = vld [vmem:[#allocation2 + $0x1900] sm:$0xff] }
 0x2c4   :  { %1938 = vmatpush1.bf16.msra.mxu0 %v1103_v41  ;;  %2067 = vmatpush1.bf16.msra.mxu1 %v1105_v42  ;;  %v1267_v41 = vld [vmem:[#allocation2 + $0x1910] sm:$0xff]  ;;  %v1284_v42 = vld [vmem:[#allocation2 + $0x1998] sm:$0xff] }
 0x2c5   :  { %1939 = vmatprep.subr.bf16.mxu0 %v1122_v43  ;;  %2068 = vmatprep.subr.bf16.mxu1 %v1124_v44  ;;  %v1286_v43 = vld [vmem:[#allocation2 + $0x19a8] sm:$0xff]  ;;  %v1283_v44 = vld [vmem:[#allocation2 + $0x1990] sm:$0xff] }
 0x2c8   :  { %1940 = vmatpush1.bf16.msra.mxu0 %v1121_v45  ;;  %2069 = vmatpush1.bf16.msra.mxu1 %v1123_v46  ;;  %v1285_v45 = vld [vmem:[#allocation2 + $0x19a0] sm:$0xff]  ;;  %v1302_v46 = vld [vmem:[#allocation2 + $0x1a28] sm:$0xff] }
 0x2c9   :  { %1941 = vmatprep.subr.bf16.mxu0 %v1140_v47  ;;  %2070 = vmatprep.subr.bf16.mxu1 %v1142_v48  ;;  %v1304_v47 = vld [vmem:[#allocation2 + $0x1a38] sm:$0xff]  ;;  %v1301_v48 = vld [vmem:[#allocation2 + $0x1a20] sm:$0xff] }
 0x2cc   :  { %1942 = vmatpush1.bf16.msra.mxu0 %v1139_v49  ;;  %2071 = vmatpush1.bf16.msra.mxu1 %v1141_v50  ;;  %v1303_v49 = vld [vmem:[#allocation2 + $0x1a30] sm:$0xff]  ;;  %v1320_v50 = vld [vmem:[#allocation2 + $0x1ab8] sm:$0xff] }
 0x2cd   :  { %1943 = vmatprep.subr.bf16.mxu0 %v1158_v51  ;;  %2072 = vmatprep.subr.bf16.mxu1 %v1160_v52  ;;  %v1322_v51 = vld [vmem:[#allocation2 + $0x1ac8] sm:$0xff]  ;;  %v1319_v52 = vld [vmem:[#allocation2 + $0x1ab0] sm:$0xff] }
 0x2d0   :  { %1944 = vmatpush1.bf16.msra.mxu0 %v1157_v53  ;;  %2073 = vmatpush1.bf16.msra.mxu1 %v1159_v54  ;;  %v1321_v53 = vld [vmem:[#allocation2 + $0x1ac0] sm:$0xff]  ;;  %v478_v54 = vld [vmem:[#allocation2 + $0x68] sm:$0xff] }
 0x2d1   :  { %1945 = vmatprep.subr.bf16.mxu0 %v1176_v55  ;;  %2074 = vmatprep.subr.bf16.mxu1 %v1178_v56  ;;  %v480_v55 = vld [vmem:[#allocation2 + $0x78] sm:$0xff]  ;;  %v477_v56 = vld [vmem:[#allocation2 + $0x60] sm:$0xff] }
 0x2d4   :  { %1946 = vmatpush1.bf16.msra.mxu0 %v1175_v57  ;;  %2075 = vmatpush1.bf16.msra.mxu1 %v1177_v58  ;;  %v479_v57 = vld [vmem:[#allocation2 + $0x70] sm:$0xff]  ;;  %v496_v58 = vld [vmem:[#allocation2 + $0xf8] sm:$0xff] }
 0x2d5   :  { %1947 = vmatprep.subr.bf16.mxu0 %v1194_v59  ;;  %2076 = vmatprep.subr.bf16.mxu1 %v1196_v60  ;;  %v498_v59 = vld [vmem:[#allocation2 + $0x108] sm:$0xff]  ;;  %v495_v60 = vld [vmem:[#allocation2 + $0xf0] sm:$0xff] }
 0x2d8   :  { %1948 = vmatpush1.bf16.msra.mxu0 %v1193_v61  ;;  %2077 = vmatpush1.bf16.msra.mxu1 %v1195_v5  ;;  %v497_v61 = vld [vmem:[#allocation2 + $0x100] sm:$0xff]  ;;  %v514_v5 = vld [vmem:[#allocation2 + $0x188] sm:$0xff] }
 0x2d9   :  { %1949 = vmatprep.subr.bf16.mxu0 %v1212_v6  ;;  %2078 = vmatprep.subr.bf16.mxu1 %v1214_v7  ;;  %v516_v6 = vld [vmem:[#allocation2 + $0x198] sm:$0xff]  ;;  %v513_v7 = vld [vmem:[#allocation2 + $0x180] sm:$0xff] }
 0x2dc   :  { %1950 = vmatpush1.bf16.msra.mxu0 %v1211_v8  ;;  %2079 = vmatpush1.bf16.msra.mxu1 %v1213_v12  ;;  %v515_v8 = vld [vmem:[#allocation2 + $0x190] sm:$0xff]  ;;  %v532_v12 = vld [vmem:[#allocation2 + $0x218] sm:$0xff] }
 0x2dd   :  { %1951 = vmatprep.subr.bf16.mxu0 %v1230_v13  ;;  %2080 = vmatprep.subr.bf16.mxu1 %v1232_v23  ;;  %v534_v13 = vld [vmem:[#allocation2 + $0x228] sm:$0xff]  ;;  %v531_v23 = vld [vmem:[#allocation2 + $0x210] sm:$0xff] }
 0x2e0   :  { %1952 = vmatpush1.bf16.msra.mxu0 %v1229_v24  ;;  %2081 = vmatpush1.bf16.msra.mxu1 %v1231_v25  ;;  %v533_v24 = vld [vmem:[#allocation2 + $0x220] sm:$0xff]  ;;  %v550_v25 = vld [vmem:[#allocation2 + $0x2a8] sm:$0xff] }
 0x2e1   :  { %1953 = vmatprep.subr.bf16.mxu0 %v1248_v28  ;;  %2082 = vmatprep.subr.bf16.mxu1 %v1250_v31  ;;  %v552_v28 = vld [vmem:[#allocation2 + $0x2b8] sm:$0xff]  ;;  %v549_v31 = vld [vmem:[#allocation2 + $0x2a0] sm:$0xff] }
 0x2e4   :  { %1954 = vmatpush1.bf16.msra.mxu0 %v1247_v36  ;;  %2083 = vmatpush1.bf16.msra.mxu1 %v1249_v37  ;;  %v551_v36 = vld [vmem:[#allocation2 + $0x2b0] sm:$0xff]  ;;  %v568_v37 = vld [vmem:[#allocation2 + $0x338] sm:$0xff] }
 0x2e5   :  { %1955 = vmatprep.subr.bf16.mxu0 %v1266_v38  ;;  %2084 = vmatprep.subr.bf16.mxu1 %v1268_v39  ;;  %v570_v38 = vld [vmem:[#allocation2 + $0x348] sm:$0xff]  ;;  %v567_v39 = vld [vmem:[#allocation2 + $0x330] sm:$0xff] }
 0x2e8   :  { %1956 = vmatpush1.bf16.msra.mxu0 %v1265_v40  ;;  %2085 = vmatpush1.bf16.msra.mxu1 %v1267_v41  ;;  %v569_v40 = vld [vmem:[#allocation2 + $0x340] sm:$0xff] }
 0x2e9   :  { %1957 = vmatprep.subr.bf16.mxu0 %v1284_v42  ;;  %2086 = vmatprep.subr.bf16.mxu1 %v1286_v43  ;;  %v586_v43 = vld [vmem:[#allocation2 + $0x3c8] sm:$0xff] }
 0x2ec   :  { %1958 = vmatpush1.bf16.msra.mxu0 %v1283_v44  ;;  %2087 = vmatpush1.bf16.msra.mxu1 %v1285_v45 }
 0x2ed   :  { %1959 = vmatprep.subr.bf16.mxu0 %v1302_v46  ;;  %2088 = vmatprep.subr.bf16.mxu1 %v1304_v47  ;;  %v588_v46 = vld [vmem:[#allocation2 + $0x3d8] sm:$0xff] }
 0x2f0   :  { %1960 = vmatpush1.bf16.msra.mxu0 %v1301_v48  ;;  %2089 = vmatpush1.bf16.msra.mxu1 %v1303_v49 }
 0x2f1   :  { %1961 = vmatprep.subr.bf16.mxu0 %v1320_v50  ;;  %2090 = vmatprep.subr.bf16.mxu1 %v1322_v51  ;;  %v585_v51 = vld [vmem:[#allocation2 + $0x3c0] sm:$0xff] }
 0x2f4   :  { %1962 = vmatpush1.bf16.msra.mxu0 %v1319_v52  ;;  %2091 = vmatpush1.bf16.msra.mxu1 %v1321_v53  ;;  %v587_v52 = vld [vmem:[#allocation2 + $0x3d0] sm:$0xff]  ;;  %v604_v53 = vld [vmem:[#allocation2 + $0x458] sm:$0xff] }
 0x2f5   :  { %2103 = vmatprep.subr.bf16.mxu0 %v478_v54  ;;  %2232 = vmatprep.subr.bf16.mxu1 %v480_v55  ;;  %v606_v54 = vld [vmem:[#allocation2 + $0x468] sm:$0xff]  ;;  %v603_v55 = vld [vmem:[#allocation2 + $0x450] sm:$0xff] }
 0x2f7   :  { %1964 = vmatmul.mubr.bf16.vlgmr.msra.gmra.mrb[8].mxu0 %v7873_v21  ;;  %2093 = vmatmul.mubr.bf16.vlgmr.msra.gmra.mrb[8].mxu1 %v7873_v21 }
 0x2f8   :  { %2104 = vmatpush1.bf16.msra.mxu0 %v477_v56  ;;  %2233 = vmatpush1.bf16.msra.mxu1 %v479_v57  ;;  %v605_v56 = vld [vmem:[#allocation2 + $0x460] sm:$0xff]  ;;  %v622_v57 = vld [vmem:[#allocation2 + $0x4e8] sm:$0xff] }
 0x2f9   :  { %2105 = vmatprep.subr.bf16.mxu0 %v496_v58  ;;  %2234 = vmatprep.subr.bf16.mxu1 %v498_v59  ;;  %v624_v58 = vld [vmem:[#allocation2 + $0x4f8] sm:$0xff]  ;;  %v621_v59 = vld [vmem:[#allocation2 + $0x4e0] sm:$0xff] }
 0x2fa   :  { %2135 = vmatprep.mubr.bf16.mxu0 %v7861_v18  ;;  %2264 = vmatprep.mubr.bf16.mxu1 %v7861_v18 }
 0x2fc   :  { %2106 = vmatpush1.bf16.msra.mxu0 %v495_v60  ;;  %2235 = vmatpush1.bf16.msra.mxu1 %v497_v61  ;;  %v623_v60 = vld [vmem:[#allocation2 + $0x4f0] sm:$0xff]  ;;  %v640_v61 = vld [vmem:[#allocation2 + $0x578] sm:$0xff] }
 0x2fd   :  { %2107 = vmatprep.subr.bf16.mxu0 %v514_v5  ;;  %2236 = vmatprep.subr.bf16.mxu1 %v516_v6  ;;  %v642_v5 = vld [vmem:[#allocation2 + $0x588] sm:$0xff]  ;;  %v639_v6 = vld [vmem:[#allocation2 + $0x570] sm:$0xff] }
 0x300   :  { %2108 = vmatpush1.bf16.msra.mxu0 %v513_v7  ;;  %2237 = vmatpush1.bf16.msra.mxu1 %v515_v8  ;;  %v641_v7 = vld [vmem:[#allocation2 + $0x580] sm:$0xff]  ;;  %v658_v8 = vld [vmem:[#allocation2 + $0x608] sm:$0xff] }
 0x301   :  { %2109 = vmatprep.subr.bf16.mxu0 %v532_v12  ;;  %2238 = vmatprep.subr.bf16.mxu1 %v534_v13  ;;  %v660_v12 = vld [vmem:[#allocation2 + $0x618] sm:$0xff]  ;;  %v657_v13 = vld [vmem:[#allocation2 + $0x600] sm:$0xff] }
 0x304   :  { %2110 = vmatpush1.bf16.msra.mxu0 %v531_v23  ;;  %2239 = vmatpush1.bf16.msra.mxu1 %v533_v24  ;;  %v659_v23 = vld [vmem:[#allocation2 + $0x610] sm:$0xff]  ;;  %v676_v24 = vld [vmem:[#allocation2 + $0x698] sm:$0xff] }
 0x305   :  { %2111 = vmatprep.subr.bf16.mxu0 %v550_v25  ;;  %2240 = vmatprep.subr.bf16.mxu1 %v552_v28  ;;  %v678_v25 = vld [vmem:[#allocation2 + $0x6a8] sm:$0xff]  ;;  %v675_v28 = vld [vmem:[#allocation2 + $0x690] sm:$0xff] }
 0x308   :  { %2112 = vmatpush1.bf16.msra.mxu0 %v549_v31  ;;  %2241 = vmatpush1.bf16.msra.mxu1 %v551_v36  ;;  %v677_v31 = vld [vmem:[#allocation2 + $0x6a0] sm:$0xff]  ;;  %v694_v36 = vld [vmem:[#allocation2 + $0x728] sm:$0xff] }
 0x309   :  { %2113 = vmatprep.subr.bf16.mxu0 %v568_v37  ;;  %2242 = vmatprep.subr.bf16.mxu1 %v570_v38  ;;  %v696_v37 = vld [vmem:[#allocation2 + $0x738] sm:$0xff]  ;;  %v693_v38 = vld [vmem:[#allocation2 + $0x720] sm:$0xff] }
 0x30a   :  { %v7933_v41 = vpop.f32.mrb[4].mxu0  ;;  %v7935_v42 = vpop.f32.mrb[4].mxu1 }
 0x30b   :  { %v7937_v44 = vpop.f32.mrb[5].mxu0  ;;  %v7939_v45 = vpop.f32.mrb[5].mxu1 }
 0x30c   :  { %v7941_v47 = vpop.f32.mrb[6].mxu0  ;;  %v7943_v48 = vpop.f32.mrb[6].mxu1  ;;  %2114 = vmatpush1.bf16.msra.mxu0 %v567_v39  ;;  %2243 = vmatpush1.bf16.msra.mxu1 %v569_v40  ;;  %v695_v39 = vld [vmem:[#allocation2 + $0x730] sm:$0xff]  ;;  %v712_v40 = vld [vmem:[#allocation2 + $0x7b8] sm:$0xff] }
 0x30d   :  { %v7945_v49 = vpop.f32.mrb[7].mxu0  ;;  %v7947_v50 = vpop.f32.mrb[7].mxu1  ;;  %2115 = vmatprep.subr.bf16.mxu0 %v586_v43  ;;  %2244 = vmatprep.subr.bf16.mxu1 %v588_v46  ;;  %v714_v43 = vld [vmem:[#allocation2 + $0x7c8] sm:$0xff]  ;;  %v711_v46 = vld [vmem:[#allocation2 + $0x7b0] sm:$0xff] }
 0x310   :  { %2116 = vmatpush1.bf16.msra.mxu0 %v585_v51  ;;  %2245 = vmatpush1.bf16.msra.mxu1 %v587_v52  ;;  %v713_v51 = vld [vmem:[#allocation2 + $0x7c0] sm:$0xff]  ;;  %v730_v52 = vld [vmem:[#allocation2 + $0x848] sm:$0xff] }
 0x311   :  { %2117 = vmatprep.subr.bf16.mxu0 %v604_v53  ;;  %2246 = vmatprep.subr.bf16.mxu1 %v606_v54  ;;  %v732_v53 = vld [vmem:[#allocation2 + $0x858] sm:$0xff]  ;;  %v729_v54 = vld [vmem:[#allocation2 + $0x840] sm:$0xff] }
 0x314   :  { %2118 = vmatpush1.bf16.msra.mxu0 %v603_v55  ;;  %2247 = vmatpush1.bf16.msra.mxu1 %v605_v56  ;;  %v731_v55 = vld [vmem:[#allocation2 + $0x850] sm:$0xff]  ;;  %v748_v56 = vld [vmem:[#allocation2 + $0x8d8] sm:$0xff] }
 0x315   :  { %2119 = vmatprep.subr.bf16.mxu0 %v622_v57  ;;  %2248 = vmatprep.subr.bf16.mxu1 %v624_v58  ;;  %v750_v57 = vld [vmem:[#allocation2 + $0x8e8] sm:$0xff]  ;;  %v747_v58 = vld [vmem:[#allocation2 + $0x8d0] sm:$0xff] }
 0x318   :  { %2120 = vmatpush1.bf16.msra.mxu0 %v621_v59  ;;  %2249 = vmatpush1.bf16.msra.mxu1 %v623_v60  ;;  %v749_v59 = vld [vmem:[#allocation2 + $0x8e0] sm:$0xff]  ;;  %v766_v60 = vld [vmem:[#allocation2 + $0x968] sm:$0xff] }
 0x319   :  { %2121 = vmatprep.subr.bf16.mxu0 %v640_v61  ;;  %2250 = vmatprep.subr.bf16.mxu1 %v642_v5  ;;  %v768_v61 = vld [vmem:[#allocation2 + $0x978] sm:$0xff]  ;;  %v765_v5 = vld [vmem:[#allocation2 + $0x960] sm:$0xff] }
 0x31c   :  { %2122 = vmatpush1.bf16.msra.mxu0 %v639_v6  ;;  %2251 = vmatpush1.bf16.msra.mxu1 %v641_v7  ;;  %v767_v6 = vld [vmem:[#allocation2 + $0x970] sm:$0xff]  ;;  %v784_v7 = vld [vmem:[#allocation2 + $0x9f8] sm:$0xff] }
 0x31d   :  { %2123 = vmatprep.subr.bf16.mxu0 %v658_v8  ;;  %2252 = vmatprep.subr.bf16.mxu1 %v660_v12  ;;  %v786_v8 = vld [vmem:[#allocation2 + $0xa08] sm:$0xff]  ;;  %v783_v12 = vld [vmem:[#allocation2 + $0x9f0] sm:$0xff] }
 0x320   :  { %2124 = vmatpush1.bf16.msra.mxu0 %v657_v13  ;;  %2253 = vmatpush1.bf16.msra.mxu1 %v659_v23  ;;  %v785_v13 = vld [vmem:[#allocation2 + $0xa00] sm:$0xff]  ;;  %v802_v23 = vld [vmem:[#allocation2 + $0xa88] sm:$0xff] }
 0x321   :  { %2125 = vmatprep.subr.bf16.mxu0 %v676_v24  ;;  %2254 = vmatprep.subr.bf16.mxu1 %v678_v25  ;;  %v804_v24 = vld [vmem:[#allocation2 + $0xa98] sm:$0xff]  ;;  %v801_v25 = vld [vmem:[#allocation2 + $0xa80] sm:$0xff] }
 0x324   :  { %2126 = vmatpush1.bf16.msra.mxu0 %v675_v28  ;;  %2255 = vmatpush1.bf16.msra.mxu1 %v677_v31  ;;  %v803_v28 = vld [vmem:[#allocation2 + $0xa90] sm:$0xff]  ;;  %v820_v31 = vld [vmem:[#allocation2 + $0xb18] sm:$0xff] }
 0x325   :  { %2127 = vmatprep.subr.bf16.mxu0 %v694_v36  ;;  %2256 = vmatprep.subr.bf16.mxu1 %v696_v37  ;;  %v822_v36 = vld [vmem:[#allocation2 + $0xb28] sm:$0xff]  ;;  %v819_v37 = vld [vmem:[#allocation2 + $0xb10] sm:$0xff] }
 0x328   :  { %2128 = vmatpush1.bf16.msra.mxu0 %v693_v38  ;;  %2257 = vmatpush1.bf16.msra.mxu1 %v695_v39  ;;  %v821_v38 = vld [vmem:[#allocation2 + $0xb20] sm:$0xff]  ;;  %v838_v39 = vld [vmem:[#allocation2 + $0xba8] sm:$0xff] }
 0x329   :  { %2129 = vmatprep.subr.bf16.mxu0 %v712_v40  ;;  %2258 = vmatprep.subr.bf16.mxu1 %v714_v43  ;;  %v840_v40 = vld [vmem:[#allocation2 + $0xbb8] sm:$0xff]  ;;  %v837_v43 = vld [vmem:[#allocation2 + $0xba0] sm:$0xff] }
 0x32c   :  { %2130 = vmatpush1.bf16.msra.mxu0 %v711_v46  ;;  %2259 = vmatpush1.bf16.msra.mxu1 %v713_v51  ;;  %v839_v46 = vld [vmem:[#allocation2 + $0xbb0] sm:$0xff]  ;;  %v856_v51 = vld [vmem:[#allocation2 + $0xc38] sm:$0xff] }
 0x32d   :  { %2131 = vmatprep.subr.bf16.mxu0 %v730_v52  ;;  %2260 = vmatprep.subr.bf16.mxu1 %v732_v53  ;;  %v858_v52 = vld [vmem:[#allocation2 + $0xc48] sm:$0xff]  ;;  %v855_v53 = vld [vmem:[#allocation2 + $0xc30] sm:$0xff] }
 0x330   :  { %2132 = vmatpush1.bf16.msra.mxu0 %v729_v54  ;;  %2261 = vmatpush1.bf16.msra.mxu1 %v731_v55  ;;  %v857_v54 = vld [vmem:[#allocation2 + $0xc40] sm:$0xff]  ;;  %v874_v55 = vld [vmem:[#allocation2 + $0xcc8] sm:$0xff] }
 0x331   :  { %2133 = vmatprep.subr.bf16.mxu0 %v748_v56  ;;  %2262 = vmatprep.subr.bf16.mxu1 %v750_v57  ;;  %v876_v56 = vld [vmem:[#allocation2 + $0xcd8] sm:$0xff]  ;;  %v873_v57 = vld [vmem:[#allocation2 + $0xcc0] sm:$0xff] }
 0x334   :  { %2134 = vmatpush1.bf16.msra.mxu0 %v747_v58  ;;  %2263 = vmatpush1.bf16.msra.mxu1 %v749_v59  ;;  %v875_v58 = vld [vmem:[#allocation2 + $0xcd0] sm:$0xff]  ;;  %v892_v59 = vld [vmem:[#allocation2 + $0xd58] sm:$0xff] }
 0x335   :  { %2146 = vmatprep.subr.bf16.mxu0 %v766_v60  ;;  %2275 = vmatprep.subr.bf16.mxu1 %v768_v61  ;;  %v894_v60 = vld [vmem:[#allocation2 + $0xd68] sm:$0xff]  ;;  %v891_v61 = vld [vmem:[#allocation2 + $0xd50] sm:$0xff] }
 0x337   :  { %2136 = vmatmul.mubr.bf16.vlgmr.msra.gmra.mrb[12].mxu0 %v7857_v17  ;;  %2265 = vmatmul.mubr.bf16.vlgmr.msra.gmra.mrb[12].mxu1 %v7857_v17 }
 0x338   :  { %2147 = vmatpush1.bf16.msra.mxu0 %v765_v5  ;;  %2276 = vmatpush1.bf16.msra.mxu1 %v767_v6  ;;  %v893_v5 = vld [vmem:[#allocation2 + $0xd60] sm:$0xff]  ;;  %v910_v6 = vld [vmem:[#allocation2 + $0xde8] sm:$0xff] }
 0x339   :  { %2148 = vmatprep.subr.bf16.mxu0 %v784_v7  ;;  %2277 = vmatprep.subr.bf16.mxu1 %v786_v8  ;;  %v912_v7 = vld [vmem:[#allocation2 + $0xdf8] sm:$0xff]  ;;  %v909_v8 = vld [vmem:[#allocation2 + $0xde0] sm:$0xff] }
 0x33a   :  { %2178 = vmatprep.mubr.bf16.mxu0 %v7869_v20  ;;  %2307 = vmatprep.mubr.bf16.mxu1 %v7869_v20 }
 0x33c   :  { %2149 = vmatpush1.bf16.msra.mxu0 %v783_v12  ;;  %2278 = vmatpush1.bf16.msra.mxu1 %v785_v13  ;;  %v911_v12 = vld [vmem:[#allocation2 + $0xdf0] sm:$0xff]  ;;  %v928_v13 = vld [vmem:[#allocation2 + $0xe78] sm:$0xff] }
 0x33d   :  { %2150 = vmatprep.subr.bf16.mxu0 %v802_v23  ;;  %2279 = vmatprep.subr.bf16.mxu1 %v804_v24  ;;  %v930_v23 = vld [vmem:[#allocation2 + $0xe88] sm:$0xff]  ;;  %v927_v24 = vld [vmem:[#allocation2 + $0xe70] sm:$0xff] }
 0x340   :  { %2151 = vmatpush1.bf16.msra.mxu0 %v801_v25  ;;  %2280 = vmatpush1.bf16.msra.mxu1 %v803_v28  ;;  %v929_v25 = vld [vmem:[#allocation2 + $0xe80] sm:$0xff]  ;;  %v946_v28 = vld [vmem:[#allocation2 + $0xf08] sm:$0xff] }
 0x341   :  { %2152 = vmatprep.subr.bf16.mxu0 %v820_v31  ;;  %2281 = vmatprep.subr.bf16.mxu1 %v822_v36  ;;  %v948_v31 = vld [vmem:[#allocation2 + $0xf18] sm:$0xff]  ;;  %v945_v36 = vld [vmem:[#allocation2 + $0xf00] sm:$0xff] }
 0x344   :  { %2153 = vmatpush1.bf16.msra.mxu0 %v819_v37  ;;  %2282 = vmatpush1.bf16.msra.mxu1 %v821_v38  ;;  %v947_v37 = vld [vmem:[#allocation2 + $0xf10] sm:$0xff]  ;;  %v964_v38 = vld [vmem:[#allocation2 + $0xf98] sm:$0xff] }
 0x345   :  { %2154 = vmatprep.subr.bf16.mxu0 %v838_v39  ;;  %2283 = vmatprep.subr.bf16.mxu1 %v840_v40  ;;  %v966_v39 = vld [vmem:[#allocation2 + $0xfa8] sm:$0xff]  ;;  %v963_v40 = vld [vmem:[#allocation2 + $0xf90] sm:$0xff] }
 0x348   :  { %2155 = vmatpush1.bf16.msra.mxu0 %v837_v43  ;;  %2284 = vmatpush1.bf16.msra.mxu1 %v839_v46  ;;  %v965_v43 = vld [vmem:[#allocation2 + $0xfa0] sm:$0xff]  ;;  %v982_v46 = vld [vmem:[#allocation2 + $0x1028] sm:$0xff] }
 0x349   :  { %2156 = vmatprep.subr.bf16.mxu0 %v856_v51  ;;  %2285 = vmatprep.subr.bf16.mxu1 %v858_v52  ;;  %v984_v51 = vld [vmem:[#allocation2 + $0x1038] sm:$0xff]  ;;  %v981_v52 = vld [vmem:[#allocation2 + $0x1020] sm:$0xff] }
 0x34c   :  { %2157 = vmatpush1.bf16.msra.mxu0 %v855_v53  ;;  %2286 = vmatpush1.bf16.msra.mxu1 %v857_v54  ;;  %v983_v53 = vld [vmem:[#allocation2 + $0x1030] sm:$0xff]  ;;  %v1000_v54 = vld [vmem:[#allocation2 + $0x10b8] sm:$0xff] }
 0x34d   :  { %2158 = vmatprep.subr.bf16.mxu0 %v874_v55  ;;  %2287 = vmatprep.subr.bf16.mxu1 %v876_v56  ;;  %v1002_v55 = vld [vmem:[#allocation2 + $0x10c8] sm:$0xff]  ;;  %v999_v56 = vld [vmem:[#allocation2 + $0x10b0] sm:$0xff] }
 0x350   :  { %2159 = vmatpush1.bf16.msra.mxu0 %v873_v57  ;;  %2288 = vmatpush1.bf16.msra.mxu1 %v875_v58  ;;  %v1001_v57 = vld [vmem:[#allocation2 + $0x10c0] sm:$0xff]  ;;  %v1018_v58 = vld [vmem:[#allocation2 + $0x1148] sm:$0xff] }
 0x351   :  { %2160 = vmatprep.subr.bf16.mxu0 %v892_v59  ;;  %2289 = vmatprep.subr.bf16.mxu1 %v894_v60  ;;  %v1020_v59 = vld [vmem:[#allocation2 + $0x1158] sm:$0xff]  ;;  %v1017_v60 = vld [vmem:[#allocation2 + $0x1140] sm:$0xff] }
 0x354   :  { %2161 = vmatpush1.bf16.msra.mxu0 %v891_v61  ;;  %2290 = vmatpush1.bf16.msra.mxu1 %v893_v5  ;;  %v1019_v61 = vld [vmem:[#allocation2 + $0x1150] sm:$0xff]  ;;  %v1036_v5 = vld [vmem:[#allocation2 + $0x11d8] sm:$0xff] }
 0x355   :  { %2162 = vmatprep.subr.bf16.mxu0 %v910_v6  ;;  %2291 = vmatprep.subr.bf16.mxu1 %v912_v7  ;;  %v1038_v6 = vld [vmem:[#allocation2 + $0x11e8] sm:$0xff]  ;;  %v1035_v7 = vld [vmem:[#allocation2 + $0x11d0] sm:$0xff] }
 0x358   :  { %2163 = vmatpush1.bf16.msra.mxu0 %v909_v8  ;;  %2292 = vmatpush1.bf16.msra.mxu1 %v911_v12  ;;  %v1037_v8 = vld [vmem:[#allocation2 + $0x11e0] sm:$0xff]  ;;  %v1054_v12 = vld [vmem:[#allocation2 + $0x1268] sm:$0xff] }
 0x359   :  { %2164 = vmatprep.subr.bf16.mxu0 %v928_v13  ;;  %2293 = vmatprep.subr.bf16.mxu1 %v930_v23  ;;  %v1056_v13 = vld [vmem:[#allocation2 + $0x1278] sm:$0xff]  ;;  %v1053_v23 = vld [vmem:[#allocation2 + $0x1260] sm:$0xff] }
 0x35c   :  { %2165 = vmatpush1.bf16.msra.mxu0 %v927_v24  ;;  %2294 = vmatpush1.bf16.msra.mxu1 %v929_v25  ;;  %v1055_v24 = vld [vmem:[#allocation2 + $0x1270] sm:$0xff]  ;;  %v1072_v25 = vld [vmem:[#allocation2 + $0x12f8] sm:$0xff] }
 0x35d   :  { %2166 = vmatprep.subr.bf16.mxu0 %v946_v28  ;;  %2295 = vmatprep.subr.bf16.mxu1 %v948_v31  ;;  %v1074_v28 = vld [vmem:[#allocation2 + $0x1308] sm:$0xff]  ;;  %v1071_v31 = vld [vmem:[#allocation2 + $0x12f0] sm:$0xff] }
 0x360   :  { %2167 = vmatpush1.bf16.msra.mxu0 %v945_v36  ;;  %2296 = vmatpush1.bf16.msra.mxu1 %v947_v37  ;;  %v1073_v36 = vld [vmem:[#allocation2 + $0x1300] sm:$0xff]  ;;  %v1090_v37 = vld [vmem:[#allocation2 + $0x1388] sm:$0xff] }
 0x361   :  { %2168 = vmatprep.subr.bf16.mxu0 %v964_v38  ;;  %2297 = vmatprep.subr.bf16.mxu1 %v966_v39  ;;  %v1092_v38 = vld [vmem:[#allocation2 + $0x1398] sm:$0xff]  ;;  %v1089_v39 = vld [vmem:[#allocation2 + $0x1380] sm:$0xff] }
 0x364   :  { %2169 = vmatpush1.bf16.msra.mxu0 %v963_v40  ;;  %2298 = vmatpush1.bf16.msra.mxu1 %v965_v43  ;;  %v1091_v40 = vld [vmem:[#allocation2 + $0x1390] sm:$0xff]  ;;  %v1108_v43 = vld [vmem:[#allocation2 + $0x1418] sm:$0xff] }
 0x365   :  { %2170 = vmatprep.subr.bf16.mxu0 %v982_v46  ;;  %2299 = vmatprep.subr.bf16.mxu1 %v984_v51  ;;  %v1110_v46 = vld [vmem:[#allocation2 + $0x1428] sm:$0xff]  ;;  %v1107_v51 = vld [vmem:[#allocation2 + $0x1410] sm:$0xff] }
 0x368   :  { %2171 = vmatpush1.bf16.msra.mxu0 %v981_v52  ;;  %2300 = vmatpush1.bf16.msra.mxu1 %v983_v53  ;;  %v1109_v52 = vld [vmem:[#allocation2 + $0x1420] sm:$0xff]  ;;  %v1126_v53 = vld [vmem:[#allocation2 + $0x14a8] sm:$0xff] }
 0x369   :  { %2172 = vmatprep.subr.bf16.mxu0 %v1000_v54  ;;  %2301 = vmatprep.subr.bf16.mxu1 %v1002_v55  ;;  %v1128_v54 = vld [vmem:[#allocation2 + $0x14b8] sm:$0xff]  ;;  %v1125_v55 = vld [vmem:[#allocation2 + $0x14a0] sm:$0xff] }
 0x36c   :  { %2173 = vmatpush1.bf16.msra.mxu0 %v999_v56  ;;  %2302 = vmatpush1.bf16.msra.mxu1 %v1001_v57  ;;  %v1127_v56 = vld [vmem:[#allocation2 + $0x14b0] sm:$0xff]  ;;  %v1144_v57 = vld [vmem:[#allocation2 + $0x1538] sm:$0xff] }
 0x36d   :  { %2174 = vmatprep.subr.bf16.mxu0 %v1018_v58  ;;  %2303 = vmatprep.subr.bf16.mxu1 %v1020_v59  ;;  %v1146_v58 = vld [vmem:[#allocation2 + $0x1548] sm:$0xff]  ;;  %v1143_v59 = vld [vmem:[#allocation2 + $0x1530] sm:$0xff] }
 0x370   :  { %2175 = vmatpush1.bf16.msra.mxu0 %v1017_v60  ;;  %2304 = vmatpush1.bf16.msra.mxu1 %v1019_v61  ;;  %v1145_v60 = vld [vmem:[#allocation2 + $0x1540] sm:$0xff]  ;;  %v1162_v61 = vld [vmem:[#allocation2 + $0x15c8] sm:$0xff] }
 0x371   :  { %2176 = vmatprep.subr.bf16.mxu0 %v1036_v5  ;;  %2305 = vmatprep.subr.bf16.mxu1 %v1038_v6  ;;  %v1164_v5 = vld [vmem:[#allocation2 + $0x15d8] sm:$0xff]  ;;  %v1161_v6 = vld [vmem:[#allocation2 + $0x15c0] sm:$0xff] }
 0x374   :  { %2177 = vmatpush1.bf16.msra.mxu0 %v1035_v7  ;;  %2306 = vmatpush1.bf16.msra.mxu1 %v1037_v8  ;;  %v1163_v7 = vld [vmem:[#allocation2 + $0x15d0] sm:$0xff]  ;;  %v1180_v8 = vld [vmem:[#allocation2 + $0x1658] sm:$0xff] }
 0x375   :  { %2189 = vmatprep.subr.bf16.mxu0 %v1054_v12  ;;  %2318 = vmatprep.subr.bf16.mxu1 %v1056_v13  ;;  %v1182_v12 = vld [vmem:[#allocation2 + $0x1668] sm:$0xff]  ;;  %v1179_v13 = vld [vmem:[#allocation2 + $0x1650] sm:$0xff] }
 0x377   :  { %2179 = vmatmul.mubr.bf16.vlgmr.msra.gmra.mrb[12].mxu0 %v7865_v19  ;;  %2308 = vmatmul.mubr.bf16.vlgmr.msra.gmra.mrb[12].mxu1 %v7865_v19 }
 0x378   :  { %2190 = vmatpush1.bf16.msra.mxu0 %v1053_v23  ;;  %2319 = vmatpush1.bf16.msra.mxu1 %v1055_v24  ;;  %v1181_v23 = vld [vmem:[#allocation2 + $0x1660] sm:$0xff]  ;;  %v1198_v24 = vld [vmem:[#allocation2 + $0x16e8] sm:$0xff] }
 0x379   :  { %2191 = vmatprep.subr.bf16.mxu0 %v1072_v25  ;;  %2320 = vmatprep.subr.bf16.mxu1 %v1074_v28  ;;  %v1200_v25 = vld [vmem:[#allocation2 + $0x16f8] sm:$0xff]  ;;  %v1197_v28 = vld [vmem:[#allocation2 + $0x16e0] sm:$0xff] }
 0x37a   :  { %2221 = vmatprep.mubr.bf16.mxu0 %v7877_v22  ;;  %2350 = vmatprep.mubr.bf16.mxu1 %v7877_v22 }
 0x37c   :  { %2192 = vmatpush1.bf16.msra.mxu0 %v1071_v31  ;;  %2321 = vmatpush1.bf16.msra.mxu1 %v1073_v36  ;;  %v1199_v31 = vld [vmem:[#allocation2 + $0x16f0] sm:$0xff]  ;;  %v1216_v36 = vld [vmem:[#allocation2 + $0x1778] sm:$0xff] }
 0x37d   :  { %2193 = vmatprep.subr.bf16.mxu0 %v1090_v37  ;;  %2322 = vmatprep.subr.bf16.mxu1 %v1092_v38  ;;  %v1218_v37 = vld [vmem:[#allocation2 + $0x1788] sm:$0xff]  ;;  %v1215_v38 = vld [vmem:[#allocation2 + $0x1770] sm:$0xff] }
 0x380   :  { %2194 = vmatpush1.bf16.msra.mxu0 %v1089_v39  ;;  %2323 = vmatpush1.bf16.msra.mxu1 %v1091_v40  ;;  %v1217_v39 = vld [vmem:[#allocation2 + $0x1780] sm:$0xff]  ;;  %v1234_v40 = vld [vmem:[#allocation2 + $0x1808] sm:$0xff] }
 0x381   :  { %2195 = vmatprep.subr.bf16.mxu0 %v1108_v43  ;;  %2324 = vmatprep.subr.bf16.mxu1 %v1110_v46  ;;  %v1236_v43 = vld [vmem:[#allocation2 + $0x1818] sm:$0xff]  ;;  %v1233_v46 = vld [vmem:[#allocation2 + $0x1800] sm:$0xff] }
 0x384   :  { %2196 = vmatpush1.bf16.msra.mxu0 %v1107_v51  ;;  %2325 = vmatpush1.bf16.msra.mxu1 %v1109_v52  ;;  %v1235_v51 = vld [vmem:[#allocation2 + $0x1810] sm:$0xff]  ;;  %v1252_v52 = vld [vmem:[#allocation2 + $0x1898] sm:$0xff] }
 0x385   :  { %2197 = vmatprep.subr.bf16.mxu0 %v1126_v53  ;;  %2326 = vmatprep.subr.bf16.mxu1 %v1128_v54  ;;  %v1254_v53 = vld [vmem:[#allocation2 + $0x18a8] sm:$0xff]  ;;  %v1251_v54 = vld [vmem:[#allocation2 + $0x1890] sm:$0xff] }
 0x388   :  { %2198 = vmatpush1.bf16.msra.mxu0 %v1125_v55  ;;  %2327 = vmatpush1.bf16.msra.mxu1 %v1127_v56  ;;  %v1253_v55 = vld [vmem:[#allocation2 + $0x18a0] sm:$0xff]  ;;  %v1270_v56 = vld [vmem:[#allocation2 + $0x1928] sm:$0xff] }
 0x389   :  { %2199 = vmatprep.subr.bf16.mxu0 %v1144_v57  ;;  %2328 = vmatprep.subr.bf16.mxu1 %v1146_v58  ;;  %v1272_v57 = vld [vmem:[#allocation2 + $0x1938] sm:$0xff] }
 0x38a   :  { %v2537_v58 = vld [vmem:[#allocation14 + $0x1] ss:$8 sm:$0xf] }
 0x38c   :  { %2200 = vmatpush1.bf16.msra.mxu0 %v1143_v59  ;;  %2329 = vmatpush1.bf16.msra.mxu1 %v1145_v60  ;;  %v2538_v59 = vld [vmem:[#allocation14 + $0x1] ss:$8 sm:$0x30]  ;;  %v7958_v60 = vshrl.u32 %v194_v0, 7 }
 0x38d   :  { %2201 = vmatprep.subr.bf16.mxu0 %v1162_v61  ;;  %2330 = vmatprep.subr.bf16.mxu1 %v1164_v5  ;;  %v1269_v61 = vld [vmem:[#allocation2 + $0x1920] sm:$0xff]  ;;  %v1271_v5 = vld [vmem:[#allocation2 + $0x1930] sm:$0xff] }
 0x38e   :  { %v1289_v0 = vld [vmem:[#allocation2 + $0x19c0] sm:$0xff] }
 0x390   :  { %2202 = vmatpush1.bf16.msra.mxu0 %v1161_v6  ;;  %2331 = vmatpush1.bf16.msra.mxu1 %v1163_v7  ;;  %v1288_v6 = vld [vmem:[#allocation2 + $0x19b8] sm:$0xff]  ;;  %v1290_v7 = vld [vmem:[#allocation2 + $0x19c8] sm:$0xff] }
 0x391   :  { %2203 = vmatprep.subr.bf16.mxu0 %v1180_v8  ;;  %2332 = vmatprep.subr.bf16.mxu1 %v1182_v12  ;;  %v2490_v8 = vld [vmem:[#allocation14] ss:$8 sm:$0xf] }
 0x392   :  { %v2491_v12 = vld [vmem:[#allocation14] ss:$8 sm:$0x30] }
 0x394   :  { %2204 = vmatpush1.bf16.msra.mxu0 %v1179_v13  ;;  %2333 = vmatpush1.bf16.msra.mxu1 %v1181_v23  ;;  %v7960_v13 = vor.u32 %v2538_v59, %v2537_v58  ;;  %v7963_v23 = vsub.s32 1, %v7958_v60  ;;  %v500_v59 = vld [vmem:[#allocation2 + $0x118] sm:$0xff] }
 0x395   :  { %2205 = vmatprep.subr.bf16.mxu0 %v1198_v24  ;;  %2334 = vmatprep.subr.bf16.mxu1 %v1200_v25  ;;  %v1287_v24 = vld [vmem:[#allocation2 + $0x19b0] sm:$0xff]  ;;  %v7965_v25 = vor.u32 %v2491_v12, %v2490_v8  ;;  %v517_v12 = vld [vmem:[#allocation2 + $0x1a0] sm:$0xff] }
 0x398   :  { %2206 = vmatpush1.bf16.msra.mxu0 %v1197_v28  ;;  %2335 = vmatpush1.bf16.msra.mxu1 %v1199_v31  ;;  %v1306_v28 = vld [vmem:[#allocation2 + $0x1a48] sm:$0xff]  ;;  %v1308_v31 = vld [vmem:[#allocation2 + $0x1a58] sm:$0xff] }
 0x399   :  { %2207 = vmatprep.subr.bf16.mxu0 %v1216_v36  ;;  %2336 = vmatprep.subr.bf16.mxu1 %v1218_v37  ;;  %v7969_v36 = vrot.slane %v7960_v13, %v7963_v23  ;;  %v1305_v37 = vld [vmem:[#allocation2 + $0x1a40] sm:$0xff] }
 0x39c   :  { %2208 = vmatpush1.bf16.msra.mxu0 %v1215_v38  ;;  %2337 = vmatpush1.bf16.msra.mxu1 %v1217_v39  ;;  %v1307_v38 = vld [vmem:[#allocation2 + $0x1a50] sm:$0xff]  ;;  %v7973_v39 = vrot.slane %v7965_v25, %v7963_v23 }
 0x39d   :  { %2209 = vmatprep.subr.bf16.mxu0 %v1234_v40  ;;  %2338 = vmatprep.subr.bf16.mxu1 %v1236_v43  ;;  %v1324_v40 = vld [vmem:[#allocation2 + $0x1ad8] sm:$0xff]  ;;  %v1326_v43 = vld [vmem:[#allocation2 + $0x1ae8] sm:$0xff] }
 0x3a0   :  { %2210 = vmatpush1.bf16.msra.mxu0 %v1233_v46  ;;  %2339 = vmatpush1.bf16.msra.mxu1 %v1235_v51  ;;  %v2572_v46 = vadd.f32 %v7969_v36, %v7939_v45  ;;  %v7978_v51 = vsub.s32 0, %v7958_v60  ;;  %v481_v45 = vld [vmem:[#allocation2 + $0x80] sm:$0xff] }
 0x3a1   :  { %2211 = vmatprep.subr.bf16.mxu0 %v1252_v52  ;;  %2340 = vmatprep.subr.bf16.mxu1 %v1254_v53  ;;  %v1323_v52 = vld [vmem:[#allocation2 + $0x1ad0] sm:$0xff]  ;;  %v1325_v53 = vld [vmem:[#allocation2 + $0x1ae0] sm:$0xff] }
 0x3a4   :  { %2212 = vmatpush1.bf16.msra.mxu0 %v1251_v54  ;;  %2341 = vmatpush1.bf16.msra.mxu1 %v1253_v55  ;;  %v2525_v54 = vadd.f32 %v7973_v39, %v7909_v29  ;;  %v482_v55 = vld [vmem:[#allocation2 + $0x88] sm:$0xff]  ;;  %v499_v29 = vld [vmem:[#allocation2 + $0x110] sm:$0xff] }
 0x3a5   :  { %2213 = vmatprep.subr.bf16.mxu0 %v1270_v56  ;;  %2342 = vmatprep.subr.bf16.mxu1 %v1272_v57  ;;  %v7984_v56 = vrot.slane %v7960_v13, %v7978_v51  ;;  %v2643_v57 = vpack.c.bf16 %v2572_v46, %v2572_v46  ;;  %v572_v46 = vld [vmem:[#allocation2 + $0x358] sm:$0xff] }
 0x3a6   :  { %v2631_v58 = vpack.c.bf16 %v2525_v54, %v2525_v54  ;;  %v571_v54 = vld [vmem:[#allocation2 + $0x350] sm:$0xff] }
 0x3a8   :  { %2214 = vmatpush1.bf16.msra.mxu0 %v1269_v61  ;;  %2343 = vmatpush1.bf16.msra.mxu1 %v1271_v5  ;;  %v7987_v61 = vsub.s32 3, %v7958_v60  ;;  %v2571_v5 = vadd.f32 %v7984_v56, %v7935_v42 }
 0x3a9   :  { %2215 = vmatprep.subr.bf16.mxu0 %v1288_v6  ;;  %2344 = vmatprep.subr.bf16.mxu1 %v1290_v7  ;;  %v7996_v6 = vrot.slane %v7965_v25, %v7978_v51  ;;  %v518_v7 = vld [vmem:[#allocation2 + $0x1a8] sm:$0xff] }
 0x3aa   :  { %v8000_v8 = vrot.slane %v7965_v25, %v7987_v61  ;;  %v2642_v42 = vpack.c.bf16 %v2571_v5, %v2571_v5 }
 0x3ac   :  { %2216 = vmatpush1.bf16.msra.mxu0 %v1287_v24  ;;  %2345 = vmatpush1.bf16.msra.mxu1 %v1289_v0  ;;  %v2524_v24 = vadd.f32 %v7996_v6, %v7905_v26  ;;  %v536_v0 = vld [vmem:[#allocation2 + $0x238] sm:$0xff]  ;;  %v8010_v26 = vsub.s32 5, %v7958_v60 }
 0x3ad   :  { %2217 = vmatprep.subr.bf16.mxu0 %v1306_v28  ;;  %2346 = vmatprep.subr.bf16.mxu1 %v1308_v31  ;;  %v535_v28 = vld [vmem:[#allocation2 + $0x230] sm:$0xff] }
 0x3ae   :  { %v2630_v31 = vpack.c.bf16 %v2524_v24, %v2524_v24  ;;  %v8032_v24 = vsub.s32 4, %v7958_v60 }
 0x3b0   :  { %2218 = vmatpush1.bf16.msra.mxu0 %v1305_v37  ;;  %2347 = vmatpush1.bf16.msra.mxu1 %v1307_v38  ;;  %v554_v37 = vld [vmem:[#allocation2 + $0x2c8] sm:$0xff] }
 0x3b1   :  { %2219 = vmatprep.subr.bf16.mxu0 %v1324_v40  ;;  %2348 = vmatprep.subr.bf16.mxu1 %v1326_v43  ;;  %v8007_v40 = vsub.s32 2, %v7958_v60  ;;  %v553_v43 = vld [vmem:[#allocation2 + $0x2c0] sm:$0xff] }
 0x3b4   :  { %2220 = vmatpush1.bf16.msra.mxu0 %v1323_v52  ;;  %2349 = vmatpush1.bf16.msra.mxu1 %v1325_v53  ;;  %v8018_v52 = vrot.slane %v7960_v13, %v7987_v61  ;;  %v8022_v53 = vrot.slane %v7960_v13, %v8010_v26 }
 0x3b5   :  { %2654 = vmatprep.subr.bf16.mxu1 %v2643_v57  ;;  %2361 = vmatprep.subr.bf16.mxu0 %v482_v55 }
 0x3b7   :  { %2222 = vmatmul.mubr.bf16.vlgmr.msra.gmra.mrb[12].mxu0 %v7873_v21  ;;  %2351 = vmatmul.mubr.bf16.vlgmr.msra.gmra.mrb[12].mxu1 %v7873_v21 }
 0x3b8   :  { %2686 = vmatprep.mubr.bf16.mxu1 %v2631_v58  ;;  %2362 = vmatpush1.bf16.msra.mxu0 %v481_v45  ;;  %v590_v45 = vld [vmem:[#allocation2 + $0x3e8] sm:$0xff] }
 0x3b9   :  { %2363 = vmatprep.subr.bf16.mxu0 %v500_v59  ;;  %2393 = vmatprep.mubr.bf16.mxu0 %v7861_v18  ;;  %v2527_v18 = vadd.f32 %v8000_v8, %v7911_v30  ;;  %v8014_v30 = vrot.slane %v7960_v13, %v8007_v40 }
 0x3bb   :  { %v2633_v38 = vpack.c.bf16 %v2527_v18, %v2527_v18 }
 0x3bc   :  { %2364 = vmatpush1.bf16.msra.mxu0 %v499_v29 }
 0x3bd   :  { %2655 = vmatpush1.bf16.xpose.msra.mxu1 %v2642_v42  ;;  %2365 = vmatprep.subr.bf16.mxu0 %v518_v7 }
 0x3c0   :  { %2366 = vmatpush1.bf16.msra.mxu0 %v517_v12 }
 0x3c1   :  { %2367 = vmatprep.subr.bf16.mxu0 %v536_v0 }
 0x3c4   :  { %2687 = vmatmul.mubr.bf16.vlgmr.msra.gmra.mrb[16].mxu1 %v2630_v31  ;;  %2368 = vmatpush1.bf16.msra.mxu0 %v535_v28  ;;  %v589_v28 = vld [vmem:[#allocation2 + $0x3e0] sm:$0xff]  ;;  %v8038_v31 = vrot.slane %v7965_v25, %v8007_v40 }
 0x3c5   :  { %2726 = vmatprep.mubr.bf16.mxu1 %v2633_v38  ;;  %2369 = vmatprep.subr.bf16.mxu0 %v554_v37  ;;  %v608_v38 = vld [vmem:[#allocation2 + $0x478] sm:$0xff] }
 0x3c8   :  { %2370 = vmatpush1.bf16.msra.mxu0 %v553_v43  ;;  %v8042_v43 = vrot.slane %v7965_v25, %v8010_v26 }
 0x3c9   :  { %2371 = vmatprep.subr.bf16.mxu0 %v572_v46 }
 0x3ca   :  { %v1965_v55 = vpop.f32.mrb[8].mxu0  ;;  %v2094_v57 = vpop.f32.mrb[8].mxu1 }
 0x3cb   :  { %v2573_v58 = vadd.f32 %v8014_v30, %v1965_v55  ;;  %v1967_v59 = vpop.f32.mrb[9].mxu0  ;;  %v2096_v5 = vpop.f32.mrb[9].mxu1 }
 0x3cc   :  { %v2574_v29 = vadd.f32 %v8018_v52, %v1967_v59  ;;  %v2576_v7 = vadd.f32 %v8022_v53, %v2096_v5  ;;  %v8027_v42 = vpop.f32.mrb[10].mxu0  ;;  %v8029_v12 = vpop.f32.mrb[10].mxu1  ;;  %2372 = vmatpush1.bf16.msra.mxu0 %v571_v54  ;;  %v8046_v54 = vrot.slane %v7960_v13, %v8032_v24  ;;  %v2526_v59 = vadd.f32 %v8038_v31, %v7907_v27  ;;  %v626_v5 = vld [vmem:[#allocation2 + $0x508] sm:$0xff]  ;;  %v643_v27 = vld [vmem:[#allocation2 + $0x590] sm:$0xff] }
 0x3cd   :  { %v1971_v0 = vpop.f32.mrb[11].mxu0  ;;  %v8034_v18 = vpop.f32.mrb[11].mxu1  ;;  %2373 = vmatprep.subr.bf16.mxu0 %v590_v45  ;;  %v2644_v46 = vpack.c.bf16 %v2573_v58, %v2573_v58  ;;  %v607_v45 = vld [vmem:[#allocation2 + $0x470] sm:$0xff]  ;;  %v2578_v13 = vadd.f32 %v7969_v36, %v7947_v50  ;;  %v662_v50 = vld [vmem:[#allocation2 + $0x628] sm:$0xff]  ;;  %v661_v36 = vld [vmem:[#allocation2 + $0x620] sm:$0xff] }
 0x3ce   :  { %v2645_v37 = vpack.c.bf16 %v2574_v29, %v2574_v29  ;;  %v2647_v55 = vpack.c.bf16 %v2576_v7, %v2576_v7  ;;  %v2529_v29 = vadd.f32 %v8042_v43, %v7937_v44  ;;  %v2575_v58 = vadd.f32 %v8046_v54, %v2094_v57  ;;  %v625_v7 = vld [vmem:[#allocation2 + $0x500] sm:$0xff] }
 0x3cf   :  { %v2649_v4 = vpack.c.bf16 %v2578_v13, %v2578_v13  ;;  %v8057_v44 = vrot.slane %v7965_v25, %v8032_v24  ;;  %v698_v13 = vld [vmem:[#allocation2 + $0x748] sm:$0xff] }
 0x3d0   :  { %2694 = vmatprep.subr.bf16.mxu1 %v2645_v37  ;;  %2374 = vmatpush1.bf16.msra.mxu0 %v589_v28  ;;  %v2632_v28 = vpack.c.bf16 %v2526_v59, %v2526_v59  ;;  %v2635_v37 = vpack.c.bf16 %v2529_v29, %v2529_v29  ;;  %v2577_v59 = vadd.f32 %v7984_v56, %v7943_v48  ;;  %v716_v48 = vld [vmem:[#allocation2 + $0x7d8] sm:$0xff] }
 0x3d1   :  { %2695 = vmatpush1.bf16.xpose.msra.mxu1 %v2644_v46  ;;  %2375 = vmatprep.subr.bf16.mxu0 %v608_v38  ;;  %v2646_v38 = vpack.c.bf16 %v2575_v58, %v2575_v58  ;;  %v644_v46 = vld [vmem:[#allocation2 + $0x598] sm:$0xff]  ;;  %v2528_v57 = vadd.f32 %v8057_v44, %v7933_v41  ;;  %v697_v41 = vld [vmem:[#allocation2 + $0x740] sm:$0xff]  ;;  %v2579_v56 = vadd.f32 %v8014_v30, %v8027_v42 }
 0x3d2   :  { %2734 = vmatprep.subr.bf16.mxu1 %v2647_v55  ;;  %v680_v55 = vld [vmem:[#allocation2 + $0x6b8] sm:$0xff]  ;;  %v2648_v58 = vpack.c.bf16 %v2577_v59, %v2577_v59  ;;  %v2532_v30 = vadd.f32 %v8038_v31, %v7915_v33  ;;  %v2535_v42 = vadd.f32 %v8042_v43, %v7945_v49  ;;  %v787_v33 = vld [vmem:[#allocation2 + $0xa10] sm:$0xff]  ;;  %v806_v31 = vld [vmem:[#allocation2 + $0xaa8] sm:$0xff] }
 0x3d3   :  { %v2634_v25 = vpack.c.bf16 %v2528_v57, %v2528_v57  ;;  %v805_v49 = vld [vmem:[#allocation2 + $0xaa0] sm:$0xff]  ;;  %v824_v43 = vld [vmem:[#allocation2 + $0xb38] sm:$0xff] }
 0x3d4   :  { %2376 = vmatpush1.bf16.msra.mxu0 %v607_v45  ;;  %v2531_v45 = vadd.f32 %v7973_v39, %v7917_v34  ;;  %v2530_v34 = vadd.f32 %v7996_v6, %v7913_v32  ;;  %v2533_v39 = vadd.f32 %v8000_v8, %v7919_v35  ;;  %v733_v6 = vld [vmem:[#allocation2 + $0x860] sm:$0xff]  ;;  %v752_v35 = vld [vmem:[#allocation2 + $0x8f8] sm:$0xff]  ;;  %v751_v8 = vld [vmem:[#allocation2 + $0x8f0] sm:$0xff] }
 0x3d5   :  { %2377 = vmatprep.subr.bf16.mxu0 %v626_v5  ;;  %v2580_v5 = vadd.f32 %v8018_v52, %v1971_v0  ;;  %v2582_v52 = vadd.f32 %v8022_v53, %v8034_v18  ;;  %v715_v0 = vld [vmem:[#allocation2 + $0x7d0] sm:$0xff]  ;;  %v770_v53 = vld [vmem:[#allocation2 + $0x988] sm:$0xff]  ;;  %v2581_v18 = vadd.f32 %v8046_v54, %v8029_v12  ;;  %v2534_v12 = vadd.f32 %v8057_v44, %v7941_v47  ;;  %v841_v59 = vld [vmem:[#allocation2 + $0xbc0] sm:$0xff] }
 0x3d6   :  { %v2637_v29 = vpack.c.bf16 %v2531_v45, %v2531_v45  ;;  %v842_v45 = vld [vmem:[#allocation2 + $0xbc8] sm:$0xff]  ;;  %v895_v47 = vld [vmem:[#allocation2 + $0xd70] sm:$0xff] }
 0x3d7   :  { %v2653_v32 = vpack.c.bf16 %v2582_v52, %v2582_v52  ;;  %v2652_v57 = vpack.c.bf16 %v2581_v18, %v2581_v18  ;;  %v2640_v54 = vpack.c.bf16 %v2534_v12, %v2534_v12  ;;  %v914_v44 = vld [vmem:[#allocation2 + $0xe08] sm:$0xff]  ;;  %v985_v52 = vld [vmem:[#allocation2 + $0x1040] sm:$0xff]  ;;  %v1112_v18 = vld [vmem:[#allocation2 + $0x1438] sm:$0xff] }
 0x3d8   :  { %2727 = vmatmul.mubr.bf16.vlgmr.msra.gmra.mrb[16].mxu1 %v2632_v28  ;;  %2378 = vmatpush1.bf16.msra.mxu0 %v625_v7  ;;  %v2651_v7 = vpack.c.bf16 %v2580_v5, %v2580_v5  ;;  %v2636_v28 = vpack.c.bf16 %v2530_v34, %v2530_v34  ;;  %v860_v5 = vld [vmem:[#allocation2 + $0xc58] sm:$0xff]  ;;  %v949_v34 = vld [vmem:[#allocation2 + $0xf20] sm:$0xff] }
 0x3d9   :  { %2735 = vmatpush1.bf16.xpose.msra.mxu1 %v2646_v38  ;;  %2766 = vmatprep.mubr.bf16.mxu1 %v2635_v37  ;;  %v2639_v37 = vpack.c.bf16 %v2533_v39, %v2533_v39  ;;  %v2650_v38 = vpack.c.bf16 %v2579_v56, %v2579_v56  ;;  %v967_v39 = vld [vmem:[#allocation2 + $0xfb0] sm:$0xff]  ;;  %v986_v56 = vld [vmem:[#allocation2 + $0x1048] sm:$0xff]  ;;  %v1201_v12 = vld [vmem:[#allocation2 + $0x1700] sm:$0xff] }
 0x3da   :  { %2774 = vmatprep.subr.bf16.mxu1 %v2649_v4  ;;  %2379 = vmatprep.subr.bf16.mxu0 %v644_v46  ;;  %v679_v4 = vld [vmem:[#allocation2 + $0x6b0] sm:$0xff]  ;;  %v734_v46 = vld [vmem:[#allocation2 + $0x868] sm:$0xff] }
 0x3dc   :  { %2380 = vmatpush1.bf16.msra.mxu0 %v643_v27  ;;  %v769_v27 = vld [vmem:[#allocation2 + $0x980] sm:$0xff] }
 0x3dd   :  { %2381 = vmatprep.subr.bf16.mxu0 %v662_v50  ;;  %v2638_v50 = vpack.c.bf16 %v2532_v30, %v2532_v30  ;;  %v1075_v30 = vld [vmem:[#allocation2 + $0x1310] sm:$0xff] }
 0x3e0   :  { %2382 = vmatpush1.bf16.msra.mxu0 %v661_v36  ;;  %v2641_v36 = vpack.c.bf16 %v2535_v42, %v2535_v42  ;;  %v1093_v42 = vld [vmem:[#allocation2 + $0x13a0] sm:$0xff] }
 0x3e1   :  { %2383 = vmatprep.subr.bf16.mxu0 %v680_v55  ;;  %v788_v55 = vld [vmem:[#allocation2 + $0xa18] sm:$0xff] }
 0x3e4   :  { %2767 = vmatmul.mubr.bf16.vlgmr.msra.gmra.mrb[16].mxu1 %v2634_v25  ;;  %2384 = vmatpush1.bf16.msra.mxu0 %v679_v4  ;;  %v878_v4 = vld [vmem:[#allocation2 + $0xce8] sm:$0xff]  ;;  %v877_v25 = vld [vmem:[#allocation2 + $0xce0] sm:$0xff] }
 0x3e5   :  { %2775 = vmatpush1.bf16.xpose.msra.mxu1 %v2648_v58  ;;  %2806 = vmatprep.mubr.bf16.mxu1 %v2637_v29  ;;  %v896_v29 = vld [vmem:[#allocation2 + $0xd78] sm:$0xff]  ;;  %v913_v58 = vld [vmem:[#allocation2 + $0xe00] sm:$0xff] }
 0x3e6   :  { %2814 = vmatprep.subr.bf16.mxu1 %v2651_v7  ;;  %2385 = vmatprep.subr.bf16.mxu0 %v698_v13  ;;  %v932_v13 = vld [vmem:[#allocation2 + $0xe98] sm:$0xff]  ;;  %v931_v7 = vld [vmem:[#allocation2 + $0xe90] sm:$0xff] }
 0x3e8   :  { %2386 = vmatpush1.bf16.msra.mxu0 %v697_v41  ;;  %v950_v41 = vld [vmem:[#allocation2 + $0xf28] sm:$0xff] }
 0x3e9   :  { %2387 = vmatprep.subr.bf16.mxu0 %v716_v48  ;;  %v968_v48 = vld [vmem:[#allocation2 + $0xfb8] sm:$0xff] }
 0x3ec   :  { %2807 = vmatmul.mubr.bf16.vlgmr.msra.gmra.mrb[20].mxu1 %v2636_v28  ;;  %2388 = vmatpush1.bf16.msra.mxu0 %v715_v0  ;;  %v1004_v0 = vld [vmem:[#allocation2 + $0x10d8] sm:$0xff]  ;;  %v1003_v28 = vld [vmem:[#allocation2 + $0x10d0] sm:$0xff] }
 0x3ed   :  { %2815 = vmatpush1.bf16.xpose.msra.mxu1 %v2650_v38  ;;  %2846 = vmatprep.mubr.bf16.mxu1 %v2639_v37  ;;  %v1022_v37 = vld [vmem:[#allocation2 + $0x1168] sm:$0xff]  ;;  %v1021_v38 = vld [vmem:[#allocation2 + $0x1160] sm:$0xff] }
 0x3ee   :  { %2854 = vmatprep.subr.bf16.mxu1 %v2653_v32  ;;  %2389 = vmatprep.subr.bf16.mxu0 %v734_v46  ;;  %v1040_v46 = vld [vmem:[#allocation2 + $0x11f8] sm:$0xff]  ;;  %v1039_v32 = vld [vmem:[#allocation2 + $0x11f0] sm:$0xff] }
 0x3f0   :  { %2390 = vmatpush1.bf16.msra.mxu0 %v733_v6  ;;  %v1058_v6 = vld [vmem:[#allocation2 + $0x1288] sm:$0xff] }
 0x3f1   :  { %2391 = vmatprep.subr.bf16.mxu0 %v752_v35  ;;  %v1057_v35 = vld [vmem:[#allocation2 + $0x1280] sm:$0xff] }
 0x3f4   :  { %2392 = vmatpush1.bf16.msra.mxu0 %v751_v8  ;;  %v1076_v8 = vld [vmem:[#allocation2 + $0x1318] sm:$0xff] }
 0x3f5   :  { %2404 = vmatprep.subr.bf16.mxu0 %v770_v53  ;;  %v1094_v53 = vld [vmem:[#allocation2 + $0x13a8] sm:$0xff] }
 0x3f7   :  { %2394 = vmatmul.mubr.bf16.vlgmr.msra.gmra.mrb[16].mxu0 %v7857_v17  ;;  %v823_v17 = vld [vmem:[#allocation2 + $0xb30] sm:$0xff] }
 0x3f8   :  { %2847 = vmatmul.mubr.bf16.vlgmr.msra.gmra.mrb[20].mxu1 %v2638_v50  ;;  %2405 = vmatpush1.bf16.msra.mxu0 %v769_v27  ;;  %v1111_v27 = vld [vmem:[#allocation2 + $0x1430] sm:$0xff]  ;;  %v1130_v50 = vld [vmem:[#allocation2 + $0x14c8] sm:$0xff] }
 0x3f9   :  { %2855 = vmatpush1.bf16.xpose.msra.mxu1 %v2652_v57  ;;  %2886 = vmatprep.mubr.bf16.mxu1 %v2641_v36  ;;  %v1129_v36 = vld [vmem:[#allocation2 + $0x14c0] sm:$0xff]  ;;  %v1148_v57 = vld [vmem:[#allocation2 + $0x1558] sm:$0xff] }
 0x3fa   :  { %2406 = vmatprep.subr.bf16.mxu0 %v788_v55  ;;  %2436 = vmatprep.mubr.bf16.mxu0 %v7869_v20  ;;  %v859_v20 = vld [vmem:[#allocation2 + $0xc50] sm:$0xff]  ;;  %v1166_v55 = vld [vmem:[#allocation2 + $0x15e8] sm:$0xff] }
 0x3fc   :  { %2407 = vmatpush1.bf16.msra.mxu0 %v787_v33  ;;  %v1184_v33 = vld [vmem:[#allocation2 + $0x1678] sm:$0xff] }
 0x3fd   :  { %2408 = vmatprep.subr.bf16.mxu0 %v806_v31  ;;  %v1183_v31 = vld [vmem:[#allocation2 + $0x1670] sm:$0xff] }
 0x400   :  { %2409 = vmatpush1.bf16.msra.mxu0 %v805_v49  ;;  %v1202_v49 = vld [vmem:[#allocation2 + $0x1708] sm:$0xff] }
 0x401   :  { %2410 = vmatprep.subr.bf16.mxu0 %v824_v43  ;;  %v1220_v43 = vld [vmem:[#allocation2 + $0x1798] sm:$0xff] }
 0x404   :  { %2887 = vmatmul.mubr.bf16.vlgmr.msra.gmra.mrb[20].mxu1 %v2640_v54  ;;  %2411 = vmatpush1.bf16.msra.mxu0 %v823_v17  ;;  %v1219_v17 = vld [vmem:[#allocation2 + $0x1790] sm:$0xff]  ;;  %v1238_v54 = vld [vmem:[#allocation2 + $0x1828] sm:$0xff] }
 0x405   :  { %2412 = vmatprep.subr.bf16.mxu0 %v842_v45  ;;  %v1237_v45 = vld [vmem:[#allocation2 + $0x1820] sm:$0xff] }
 0x408   :  { %2413 = vmatpush1.bf16.msra.mxu0 %v841_v59  ;;  %v1256_v59 = vld [vmem:[#allocation2 + $0x18b8] sm:$0xff] }
 0x409   :  { %2414 = vmatprep.subr.bf16.mxu0 %v860_v5  ;;  %v1255_v5 = vld [vmem:[#allocation2 + $0x18b0] sm:$0xff] }
 0x40c   :  { %2415 = vmatpush1.bf16.msra.mxu0 %v859_v20  ;;  %v1274_v20 = vld [vmem:[#allocation2 + $0x1948] sm:$0xff] }
 0x40d   :  { %2416 = vmatprep.subr.bf16.mxu0 %v878_v4  ;;  %v1273_v4 = vld [vmem:[#allocation2 + $0x1940] sm:$0xff] }
 0x410   :  { %2417 = vmatpush1.bf16.msra.mxu0 %v877_v25  ;;  %v1292_v25 = vld [vmem:[#allocation2 + $0x19d8] sm:$0xff] }
 0x411   :  { %2418 = vmatprep.subr.bf16.mxu0 %v896_v29  ;;  %v1291_v29 = vld [vmem:[#allocation2 + $0x19d0] sm:$0xff] }
 0x414   :  { %2419 = vmatpush1.bf16.msra.mxu0 %v895_v47  ;;  %v1310_v47 = vld [vmem:[#allocation2 + $0x1a68] sm:$0xff] }
 0x415   :  { %2420 = vmatprep.subr.bf16.mxu0 %v914_v44  ;;  %v1309_v44 = vld [vmem:[#allocation2 + $0x1a60] sm:$0xff] }
 0x418   :  { %2421 = vmatpush1.bf16.msra.mxu0 %v913_v58  ;;  %v1328_v58 = vld [vmem:[#allocation2 + $0x1af8] sm:$0xff] }
 0x419   :  { %2422 = vmatprep.subr.bf16.mxu0 %v932_v13  ;;  %v1327_v13 = vld [vmem:[#allocation2 + $0x1af0] sm:$0xff] }
 0x41c   :  { %2423 = vmatpush1.bf16.msra.mxu0 %v931_v7  ;;  %v2584_v7 = vld [vmem:[#allocation14 + $0x2] ss:$8 sm:$0xf] }
 0x41d   :  { %2424 = vmatprep.subr.bf16.mxu0 %v950_v41  ;;  %v2585_v41 = vld [vmem:[#allocation14 + $0x2] ss:$8 sm:$0x30] }
 0x420   :  { %2425 = vmatpush1.bf16.msra.mxu0 %v949_v34  ;;  %v8087_v34 = vor.u32 %v2585_v41, %v2584_v7 }
 0x421   :  { %2426 = vmatprep.subr.bf16.mxu0 %v968_v48 }
 0x422   :  { %v2591_v48 = vrot.slane %v8087_v34, %v7978_v51 }
 0x424   :  { %2427 = vmatpush1.bf16.msra.mxu0 %v967_v39  ;;  %v2595_v39 = vrot.slane %v8087_v34, %v7963_v23 }
 0x425   :  { %2428 = vmatprep.subr.bf16.mxu0 %v986_v56  ;;  %v2603_v56 = vrot.slane %v8087_v34, %v7987_v61 }
 0x428   :  { %2429 = vmatpush1.bf16.msra.mxu0 %v985_v52 }
 0x429   :  { %2430 = vmatprep.subr.bf16.mxu0 %v1004_v0 }
 0x42c   :  { %2431 = vmatpush1.bf16.msra.mxu0 %v1003_v28 }
 0x42d   :  { %2432 = vmatprep.subr.bf16.mxu0 %v1022_v37 }
 0x430   :  { %2433 = vmatpush1.bf16.msra.mxu0 %v1021_v38 }
 0x431   :  { %2434 = vmatprep.subr.bf16.mxu0 %v1040_v46 }
 0x434   :  { %2435 = vmatpush1.bf16.msra.mxu0 %v1039_v32 }
 0x435   :  { %2447 = vmatprep.subr.bf16.mxu0 %v1058_v6 }
 0x437   :  { %2437 = vmatmul.mubr.bf16.vlgmr.msra.gmra.mrb[16].mxu0 %v7865_v19  ;;  %v1147_v19 = vld [vmem:[#allocation2 + $0x1550] sm:$0xff] }
 0x438   :  { %2448 = vmatpush1.bf16.msra.mxu0 %v1057_v35  ;;  %2479 = vmatprep.mubr.bf16.mxu0 %v7877_v22  ;;  %v1165_v22 = vld [vmem:[#allocation2 + $0x15e0] sm:$0xff] }
 0x439   :  { %2449 = vmatprep.subr.bf16.mxu0 %v1076_v8 }
 0x43c   :  { %2450 = vmatpush1.bf16.msra.mxu0 %v1075_v30 }
 0x43d   :  { %2451 = vmatprep.subr.bf16.mxu0 %v1094_v53 }
 0x440   :  { %2452 = vmatpush1.bf16.msra.mxu0 %v1093_v42 }
 0x441   :  { %2453 = vmatprep.subr.bf16.mxu0 %v1112_v18 }
 0x444   :  { %2454 = vmatpush1.bf16.msra.mxu0 %v1111_v27 }
 0x445   :  { %2455 = vmatprep.subr.bf16.mxu0 %v1130_v50 }
 0x448   :  { %2456 = vmatpush1.bf16.msra.mxu0 %v1129_v36 }
 0x449   :  { %2457 = vmatprep.subr.bf16.mxu0 %v1148_v57  ;;  %v7597_v57 = vmov 1966171168  }
 0x44c   :  { %2458 = vmatpush1.bf16.msra.mxu0 %v1147_v19  ;;  %v2907_v19 = vunpack.c.l.s4 %v7597_v57 }
 0x44d   :  { %2459 = vmatprep.subr.bf16.mxu0 %v1166_v55 }
 0x44e   :  { %v2908_v55 = vunpack.c.0.s8 %v2907_v19 }
 0x450   :  { %2460 = vmatpush1.bf16.msra.mxu0 %v1165_v22  ;;  %v2911_v22 = vsub.s32 %v2908_v55, %v7958_v60  ;;  %v2607_v55 = vrot.slane %v8087_v34, %v8032_v24 }
 0x451   :  { %2461 = vmatprep.subr.bf16.mxu0 %v1184_v33  ;;  %v7100_v33 = vld.sshfl [vmem:[%s8780_s1] sm:$0x11 pattern:$0x75316420] }
 0x454   :  { %2462 = vmatpush1.bf16.msra.mxu0 %v1183_v31  ;;  %v2912_v31 = vrot.slane %v7100_v33, %v2911_v22 }
 0x455   :  { %2463 = vmatprep.subr.bf16.mxu0 %v1202_v49 }
 0x458   :  { %2464 = vmatpush1.bf16.msra.mxu0 %v1201_v12 }
 0x459   :  { %2465 = vmatprep.subr.bf16.mxu0 %v1220_v43 }
 0x45c   :  { %2466 = vmatpush1.bf16.msra.mxu0 %v1219_v17 }
 0x45d   :  { %2467 = vmatprep.subr.bf16.mxu0 %v1238_v54 }
 0x460   :  { %2468 = vmatpush1.bf16.msra.mxu0 %v1237_v45 }
 0x461   :  { %2469 = vmatprep.subr.bf16.mxu0 %v1256_v59 }
 0x464   :  { %2470 = vmatpush1.bf16.msra.mxu0 %v1255_v5  ;;  %v2905_v5 = vcombine.high %v7100_v33, %v7100_v33 }
 0x465   :  { %2471 = vmatprep.subr.bf16.mxu0 %v1274_v20 }
 0x466   :  { %v2919_v20 = vrot.slane %v2905_v5, %v2911_v22 }
 0x468   :  { %2472 = vmatpush1.bf16.msra.mxu0 %v1273_v4 }
 0x469   :  { %2473 = vmatprep.subr.bf16.mxu0 %v1292_v25 }
 0x46c   :  { %2474 = vmatpush1.bf16.msra.mxu0 %v1291_v29 }
 0x46d   :  { %2475 = vmatprep.subr.bf16.mxu0 %v1310_v47 }
 0x470   :  { %2476 = vmatpush1.bf16.msra.mxu0 %v1309_v44 }
 0x471   :  { %2477 = vmatprep.subr.bf16.mxu0 %v1328_v58 }
 0x474   :  { %2478 = vmatpush1.bf16.msra.mxu0 %v1327_v13 }
 0x477   :  { %2480 = vmatmul.mubr.bf16.vlgmr.msra.gmra.mrb[16].mxu0 %v7873_v21 }
 0x48a   :  { %v2223_v52 = vpop.f32.mrb[12].mxu0  ;;  %v8095_v0 = vpop.f32.mrb[12].mxu1 }
 0x48b   :  { %v2618_v28 = vadd.f32 %v2591_v48, %v2223_v52  ;;  %v2225_v37 = vpop.f32.mrb[13].mxu0  ;;  %v2354_v38 = vpop.f32.mrb[13].mxu1 }
 0x48c   :  { %v2619_v21 = vadd.f32 %v2595_v39, %v2225_v37  ;;  %v2621_v46 = vadd.f32 %v2603_v56, %v2354_v38  ;;  %v8097_v32 = vpop.f32.mrb[14].mxu1  ;;  %v2227_v6 = vpop.f32.mrb[14].mxu0 }
 0x48d   :  { %v2949_v35 = vpack.c.bf16 %v2618_v28, %v2618_v28  ;;  %v2358_v8 = vpop.f32.mrb[15].mxu1  ;;  %v8099_v30 = vadd.f32 %v2591_v48, %v2227_v6  ;;  %v2229_v53 = vpop.f32.mrb[15].mxu0  ;;  %v7598_v6 = vmov 0  }
 0x48e   :  { %v2950_v42 = vpack.c.bf16 %v2619_v21, %v2619_v21  ;;  %v8101_v18 = vadd.f32 %v2603_v56, %v2358_v8  ;;  %v8103_v27 = vadd.f32 %v2595_v39, %v2229_v53  ;;  %v2952_v36 = vpack.c.bf16 %v2621_v46, %v2621_v46  ;;  %3016 = vmatprep.mubr.bf16.mxu1 %v7598_v6 }
 0x48f   :  { %v2967_v50 = vsel %vm2965_vm1, %v2949_v35, 0 }
 0x490   :  { %7101 = vmatprep.subr.msk.bf16.mxu1 %vm2965_vm1, %v2950_v42  ;;  %v2599_v42 = vrot.slane %v8087_v34, %v8007_v40 }
 0x491   :  { %2985 = vmatpush1.bf16.msra.mxu1 %v2967_v50 }
 0x492   :  { %7103 = vmatprep.subr.msk.bf16.mxu1 %vm2965_vm1, %v2952_v36  ;;  %v2620_v50 = vadd.f32 %v2599_v42, %v8095_v0  ;;  %v2611_v36 = vrot.slane %v8087_v34, %v8010_v26 }
 0x494   :  { %v2951_v19 = vpack.c.bf16 %v2620_v50, %v2620_v50 }
 0x4b7   :  { %v2768_v49 = vpop.f32.mrb[16].mxu1 }
 0x4b8   :  { %v2894_v12 = vmul.f32 0.03608439, %v2768_v49  ;;  %v2770_v43 = vpop.f32.mrb[17].mxu1  ;;  %v2973_v49 = vsel %vm2965_vm1, %v2951_v19, 0 }
 0x4b9   :  { %v2771_v17 = vpop.f32.mrb[18].mxu1 }
 0x4ba   :  { %v2772_v54 = vpop.f32.mrb[19].mxu1  ;;  %v2922_v45 = vadd.f32 %v2912_v31, %v2894_v12  ;;  %v2956_v17 = vpack.c.bf16 %v8103_v27, %v8103_v27  ;;  %v2626_v27 = vadd.f32 %v2599_v42, %v8097_v32 }
 0x4bb   :  { %v2955_v54 = vpack.c.bf16 %v8099_v30, %v8099_v30 }
 0x4bc   :  { %v2925_v59 = vsel %vm2924_vm2, %v2922_v45, -inf }
 0x4bd   :  { %2926 = vmax.xlane.f32.xlu0 %v2925_v59  ;;  %v3111_v59 = vsel %vm2965_vm1, %v2955_v54, 0 }
 0x4d7   :  { %v2888_v4 = vpop.f32.mrb[20].mxu1 }
 0x4d8   :  { %v2895_v25 = vmul.f32 0.03608439, %v2888_v4  ;;  %v2890_v60 = vpop.f32.mrb[21].mxu1  ;;  %v2957_v4 = vpack.c.bf16 %v2626_v27, %v2626_v27 }
 0x4d9   :  { %v2891_v29 = vpop.f32.mrb[22].mxu1 }
 0x4da   :  { %v2892_v47 = vpop.f32.mrb[23].mxu1  ;;  %v2923_v44 = vadd.f32 %v2919_v20, %v2895_v25  ;;  %v3117_v29 = vsel %vm2965_vm1, %v2957_v4, 0 }
 0x4dc   :  { %v2928_v58 = vsel %vm2924_vm2, %v2923_v44, -inf }
 0x4dd   :  { %2929 = vmax.xlane.f32.xlu0 %v2928_v58 }
 0x54a   :  { %v2927_v13 = vpop.xlane.xlu0 %2926  ;;  %v2481_v7 = vpop.f32.mrb[16].mxu0 }
 0x54b   :  { %v2931_v41 = vsub.f32 %v2922_v45, %v2927_v13  ;;  %v2483_v48 = vpop.f32.mrb[17].mxu0  ;;  %v2622_v12 = vadd.f32 %v2607_v55, %v2481_v7  ;;  %v2958_v45 = vpack.c.bf16 %v8101_v18, %v8101_v18 }
 0x54c   :  { %v2485_v39 = vpop.f32.mrb[18].mxu0  ;;  %v2623_v22 = vadd.f32 %v2611_v36, %v2483_v48 }
 0x54d   :  { %v2933_v56 = vmul.f32 1.442695, %v2931_v41  ;;  %v2487_v52 = vpop.f32.mrb[19].mxu0  ;;  %v2953_v0 = vpack.c.bf16 %v2622_v12, %v2622_v12  ;;  %v2628_v18 = vadd.f32 %v2607_v55, %v2485_v39 }
 0x54e   :  { %v2954_v43 = vpack.c.bf16 %v2623_v22, %v2623_v22  ;;  %v2629_v25 = vadd.f32 %v2611_v36, %v2487_v52 }
 0x54f   :  { %7420 = vpow2.f32 %v2933_v56  ;;  %v2979_v34 = vsel %vm2965_vm1, %v2953_v0, 0 }
 0x550   :  { %v2960_v47 = vpack.c.bf16 %v2629_v25, %v2629_v25 }
 0x559   :  { %v7421_v28 = vpop.eup %7420 }
 0x55a   :  { %v2937_v37 = vsel %vm2924_vm2, %v7421_v28, 0.0 }
 0x55b   :  { %2938 = vadd.xlane.f32.xlu1 %v2937_v37 }
 0x56a   :  { %v2930_v38 = vpop.xlane.xlu0 %2929 }
 0x56b   :  { %v2932_v21 = vsub.f32 %v2923_v44, %v2930_v38  ;;  %v2959_v44 = vpack.c.bf16 %v2628_v18, %v2628_v18 }
 0x56d   :  { %v2935_v46 = vmul.f32 1.442695, %v2932_v21  ;;  %v3123_v58 = vsel %vm2965_vm1, %v2959_v44, 0 }
 0x56f   :  { %7422 = vpow2.f32 %v2935_v46 }
 0x579   :  { %v7423_v35 = vpop.eup %7422 }
 0x57a   :  { %v2940_v8 = vsel %vm2924_vm2, %v7423_v35, 0.0 }
 0x57b   :  { %2941 = vadd.xlane.f32.xlu1 %v2940_v8 }
 0x5e8   :  { %v2939_v53 = vpop.xlane.xlu1 %2938 }
 0x5e9   :  { %7424 = vrcp.f32 %v2939_v53 }
 0x5f3   :  { %v7425_v57 = vpop.eup %7424 }
 0x5f4   :  { %v2944_v33 = vmul.f32 %v7425_v57, %v7421_v28 }
 0x5f6   :  { %v2947_v31 = vpack.c.bf16 %v2944_v33, %v2944_v33 }
 0x5f8   :  { %7102 = vmatmul.mubr.msk.bf16.vlgmr.msra.gmra.mrb[24].mxu1 %vm2961_vm3, %v2947_v31 }
 0x5f9   :  { %3026 = vmatpush1.bf16.msra.mxu1 %v2973_v49  ;;  %3057 = vmatprep.mubr.bf16.mxu1 %v7598_v6 }
 0x5fa   :  { %7105 = vmatprep.subr.msk.bf16.mxu1 %vm2965_vm1, %v2954_v43 }
 0x600   :  { %7104 = vmatmul.mubr.msk.bf16.vlgmr.msra.gmra.mrb[28].mxu1 %vm2961_vm3, %v2947_v31 }
 0x601   :  { %3067 = vmatpush1.bf16.msra.mxu1 %v2979_v34  ;;  %3098 = vmatprep.mubr.bf16.mxu1 %v7598_v6 }
 0x602   :  { %7107 = vmatprep.subr.msk.bf16.mxu1 %vm2965_vm1, %v2956_v17 }
 0x608   :  { %v2942_v5 = vpop.xlane.xlu1 %2941  ;;  %7106 = vmatmul.mubr.msk.bf16.vlgmr.msra.gmra.mrb[32].mxu1 %vm2961_vm3, %v2947_v31 }
 0x609   :  { %7426 = vrcp.f32 %v2942_v5  ;;  %3129 = vmatpush1.bf16.msra.mxu1 %v3111_v59  ;;  %3160 = vmatprep.mubr.bf16.mxu1 %v7598_v6 }
 0x60a   :  { %7109 = vmatprep.subr.msk.bf16.mxu1 %vm2965_vm1, %v2958_v45 }
 0x613   :  { %v7427_v20 = vpop.eup %7426 }
 0x614   :  { %v2946_v60 = vmul.f32 %v7427_v20, %v7423_v35 }
 0x616   :  { %v2948_v30 = vpack.c.bf16 %v2946_v60, %v2946_v60 }
 0x618   :  { %7108 = vmatmul.mubr.msk.bf16.vlgmr.msra.gmra.mrb[36].mxu1 %vm2961_vm3, %v2948_v30 }
 0x619   :  { %3170 = vmatpush1.bf16.msra.mxu1 %v3117_v29  ;;  %3201 = vmatprep.mubr.bf16.mxu1 %v7598_v6 }
 0x61a   :  { %7111 = vmatprep.subr.msk.bf16.mxu1 %vm2965_vm1, %v2960_v47 }
 0x620   :  { %7110 = vmatmul.mubr.msk.bf16.vlgmr.msra.gmra.mrb[40].mxu1 %vm2961_vm3, %v2948_v30 }
 0x621   :  { %3211 = vmatpush1.bf16.msra.mxu1 %v3123_v58  ;;  %3242 = vmatprep.mubr.bf16.mxu1 %v7598_v6 }
 0x628   :  { %7112 = vmatmul.mubr.msk.bf16.vlgmr.msra.gmra.mrb[44].mxu1 %vm2961_vm3, %v2948_v30 }
 0x6cb   :  { %v8145_v32 = vpop.f32.mrb[24].mxu1 }
 0x6cc   :  { %v3020_v13 = vpop.f32.mrb[25].mxu1 }
 0x6cd   :  { %v3022_v7 = vpop.f32.mrb[26].mxu1 }
 0x6ce   :  { %v3023_v41 = vpop.f32.mrb[27].mxu1 }
 0x6d3   :  { %v8147_v48 = vpop.f32.mrb[28].mxu1 }
 0x6d4   :  { %v8149_v39 = vpop.f32.mrb[29].mxu1 }
 0x6d5   :  { %v3063_v56 = vpop.f32.mrb[30].mxu1 }
 0x6d6   :  { %v3064_v52 = vpop.f32.mrb[31].mxu1 }
 0x6db   :  { %v8151_v28 = vpop.f32.mrb[32].mxu1 }
 0x6dc   :  { %v8153_v37 = vpop.f32.mrb[33].mxu1 }
 0x6dd   :  { %v3104_v38 = vpop.f32.mrb[34].mxu1 }
 0x6de   :  { %v3105_v21 = vpop.f32.mrb[35].mxu1 }
 0x6eb   :  { %v8155_v46 = vpop.f32.mrb[36].mxu1 }
 0x6ec   :  { %v3164_v6 = vpop.f32.mrb[37].mxu1 }
 0x6ed   :  { %v3166_v35 = vpop.f32.mrb[38].mxu1 }
 0x6ee   :  { %v3167_v8 = vpop.f32.mrb[39].mxu1 }
 0x6f3   :  { %v8157_v53 = vpop.f32.mrb[40].mxu1 }
 0x6f4   :  { %v8159_v42 = vpop.f32.mrb[41].mxu1 }
 0x6f5   :  { %v3207_v50 = vpop.f32.mrb[42].mxu1 }
 0x6f6   :  { %v3208_v36 = vpop.f32.mrb[43].mxu1 }
 0x6fb   :  { %v8161_v57 = vpop.f32.mrb[44].mxu1 }
 0x6fc   :  { %v8163_v19 = vpop.f32.mrb[45].mxu1 }
 0x6fd   :  { %v3248_v55 = vpop.f32.mrb[46].mxu1 }
 0x6fe   :  { %v3249_v22 = vpop.f32.mrb[47].mxu1 }
 0x6ff   :  { %7564 = dma.done.wait [#allocation6 + $0x1], 73728 }
 0x700   :  { %7565 = vsyncadd [#allocation6 + $0x1], 4294893568  ;;  %v3255_v33 = vpack.c.bf16 %v3020_v13, %v3020_v13  ;;  %v3261_v31 = vpack.c.bf16 %v3164_v6, %v3164_v6  ;;  %vm3614_vm4 = vcmask 1041409   ;;  %v3267_v17 = vld [vmem:[#allocation3 + $0x8] sm:$0xff]  ;;  %v3266_v34 = vld [vmem:[#allocation3] sm:$0xff]  ;;  %vm4081_vm5 = vcmask 1041408  }
 0x701   :  { %v3269_v54 = vld [vmem:[#allocation3 + $0x18] sm:$0xff]  ;;  %3638 = vmatprep.subr.bf16.mxu1 %v3267_v17  ;;  %v3273_v59 = vld [vmem:[#allocation3 + $0x68] sm:$0xff]  ;;  %v3268_v5 = vld [vmem:[#allocation3 + $0x10] sm:$0xff] }
 0x702   :  { %v3602_v49 = vunpack.c.l.b16 %v3255_v33  ;;  %v3608_v12 = vunpack.c.l.b16 %v3261_v31  ;;  %3761 = vmatprep.subr.bf16.mxu0 %v3269_v54  ;;  %3639 = vmatpush1.bf16.msra.mxu1 %v3266_v34  ;;  %v3275_v27 = vld [vmem:[#allocation3 + $0x78] sm:$0xff]  ;;  %v3272_v20 = vld [vmem:[#allocation3 + $0x60] sm:$0xff]  ;;  %v3274_v4 = vld [vmem:[#allocation3 + $0x70] sm:$0xff] }
 0x703   :  { %3762 = vmatpush1.bf16.msra.mxu0 %v3268_v5  ;;  %3640 = vmatprep.subr.bf16.mxu1 %v3273_v59  ;;  %v3279_v25 = vld [vmem:[#allocation3 + $0xc8] sm:$0xff]  ;;  %v3281_v60 = vld [vmem:[#allocation3 + $0xd8] sm:$0xff]  ;;  %v3278_v30 = vld [vmem:[#allocation3 + $0xc0] sm:$0xff] }
 0x704   :  { %v3616_v43 = vrot.slane %v3608_v12, 7  ;;  %3763 = vmatprep.subr.bf16.mxu0 %v3275_v27  ;;  %v3280_v29 = vld [vmem:[#allocation3 + $0xd0] sm:$0xff]  ;;  %v3285_v18 = vld [vmem:[#allocation3 + $0x128] sm:$0xff]  ;;  %v3287_v47 = vld [vmem:[#allocation3 + $0x138] sm:$0xff] }
 0x705   :  { %v3284_v44 = vld [vmem:[#allocation3 + $0x120] sm:$0xff]  ;;  %v3286_v58 = vld [vmem:[#allocation3 + $0x130] sm:$0xff]  ;;  %v3291_v13 = vld [vmem:[#allocation3 + $0x188] sm:$0xff] }
 0x706   :  { %v3617_v0 = vsel %vm3614_vm4, %v3616_v43, %v3602_v49  ;;  %3641 = vmatpush1.bf16.msra.mxu1 %v3272_v20  ;;  %v3293_v7 = vld [vmem:[#allocation3 + $0x198] sm:$0xff]  ;;  %v3290_v41 = vld [vmem:[#allocation3 + $0x180] sm:$0xff]  ;;  %v3292_v56 = vld [vmem:[#allocation3 + $0x190] sm:$0xff] }
 0x707   :  { %v8166_v45 = vpack.c.b16 %v3617_v0, %v3617_v0  ;;  %3764 = vmatpush1.bf16.msra.mxu0 %v3274_v4  ;;  %3642 = vmatprep.subr.bf16.mxu1 %v3279_v25  ;;  %v3297_v52 = vld [vmem:[#allocation3 + $0x1e8] sm:$0xff]  ;;  %v3299_v38 = vld [vmem:[#allocation3 + $0x1f8] sm:$0xff]  ;;  %v3296_v21 = vld [vmem:[#allocation3 + $0x1e0] sm:$0xff] }
 0x708   :  { %3765 = vmatprep.subr.bf16.mxu0 %v3281_v60  ;;  %v3298_v6 = vld [vmem:[#allocation3 + $0x1f0] sm:$0xff]  ;;  %v3303_v35 = vld [vmem:[#allocation3 + $0x248] sm:$0xff]  ;;  %v3305_v8 = vld [vmem:[#allocation3 + $0x258] sm:$0xff] }
 0x709   :  { %3670 = vmatprep.mubr.bf16.mxu1 %v8166_v45  ;;  %3793 = vmatprep.mubr.bf16.mxu0 %v8166_v45  ;;  %v3302_v50 = vld [vmem:[#allocation3 + $0x240] sm:$0xff]  ;;  %v3304_v36 = vld [vmem:[#allocation3 + $0x250] sm:$0xff]  ;;  %v3309_v55 = vld [vmem:[#allocation3 + $0x2a8] sm:$0xff] }
 0x70a   :  { %3643 = vmatpush1.bf16.msra.mxu1 %v3278_v30  ;;  %v3311_v22 = vld [vmem:[#allocation3 + $0x2b8] sm:$0xff]  ;;  %v3308_v33 = vld [vmem:[#allocation3 + $0x2a0] sm:$0xff]  ;;  %v3310_v31 = vld [vmem:[#allocation3 + $0x2b0] sm:$0xff] }
 0x70b   :  { %3766 = vmatpush1.bf16.msra.mxu0 %v3280_v29  ;;  %3644 = vmatprep.subr.bf16.mxu1 %v3285_v18  ;;  %v3315_v49 = vld [vmem:[#allocation3 + $0x308] sm:$0xff]  ;;  %v3317_v12 = vld [vmem:[#allocation3 + $0x318] sm:$0xff]  ;;  %v3314_v43 = vld [vmem:[#allocation3 + $0x300] sm:$0xff] }
 0x70c   :  { %3767 = vmatprep.subr.bf16.mxu0 %v3287_v47  ;;  %v3316_v0 = vld [vmem:[#allocation3 + $0x310] sm:$0xff]  ;;  %v3321_v17 = vld [vmem:[#allocation3 + $0x368] sm:$0xff]  ;;  %v3323_v34 = vld [vmem:[#allocation3 + $0x378] sm:$0xff] }
 0x70d   :  { %v3320_v54 = vld [vmem:[#allocation3 + $0x360] sm:$0xff]  ;;  %v3322_v59 = vld [vmem:[#allocation3 + $0x370] sm:$0xff]  ;;  %v3327_v5 = vld [vmem:[#allocation3 + $0x3c8] sm:$0xff] }
 0x70e   :  { %3645 = vmatpush1.bf16.msra.mxu1 %v3284_v44  ;;  %v3329_v27 = vld [vmem:[#allocation3 + $0x3d8] sm:$0xff]  ;;  %v3326_v20 = vld [vmem:[#allocation3 + $0x3c0] sm:$0xff]  ;;  %v3328_v4 = vld [vmem:[#allocation3 + $0x3d0] sm:$0xff]  ;;  %v3260_v44 = vpack.c.bf16 %v8155_v46, %v8155_v46 }
 0x70f   :  { %3768 = vmatpush1.bf16.msra.mxu0 %v3286_v58  ;;  %3646 = vmatprep.subr.bf16.mxu1 %v3291_v13  ;;  %v3333_v25 = vld [vmem:[#allocation3 + $0x428] sm:$0xff]  ;;  %v3335_v60 = vld [vmem:[#allocation3 + $0x438] sm:$0xff]  ;;  %v3332_v30 = vld [vmem:[#allocation3 + $0x420] sm:$0xff] }
 0x710   :  { %3769 = vmatprep.subr.bf16.mxu0 %v3293_v7  ;;  %v3334_v29 = vld [vmem:[#allocation3 + $0x430] sm:$0xff]  ;;  %v3339_v18 = vld [vmem:[#allocation3 + $0x488] sm:$0xff]  ;;  %v3341_v47 = vld [vmem:[#allocation3 + $0x498] sm:$0xff] }
 0x711   :  { %v3338_v58 = vld [vmem:[#allocation3 + $0x480] sm:$0xff]  ;;  %v3340_v13 = vld [vmem:[#allocation3 + $0x490] sm:$0xff]  ;;  %v3345_v7 = vld [vmem:[#allocation3 + $0x4e8] sm:$0xff] }
 0x712   :  { %3647 = vmatpush1.bf16.msra.mxu1 %v3290_v41  ;;  %v3347_v41 = vld [vmem:[#allocation3 + $0x4f8] sm:$0xff]  ;;  %v3351_v46 = vld [vmem:[#allocation3 + $0x548] sm:$0xff] }
 0x713   :  { %3770 = vmatpush1.bf16.msra.mxu0 %v3292_v56  ;;  %3648 = vmatprep.subr.bf16.mxu1 %v3297_v52  ;;  %v3263_v56 = vpack.c.bf16 %v8159_v42, %v8159_v42  ;;  %v3254_v52 = vpack.c.bf16 %v8145_v32, %v8145_v32  ;;  %v3357_v32 = vld [vmem:[#allocation3 + $0x5a8] sm:$0xff] }
 0x714   :  { %3771 = vmatprep.subr.bf16.mxu0 %v3299_v38  ;;  %v3607_v38 = vunpack.c.l.b16 %v3260_v44  ;;  %v3381_v44 = vld [vmem:[#allocation3 + $0x728] sm:$0xff] }
 0x716   :  { %3649 = vmatpush1.bf16.msra.mxu1 %v3296_v21  ;;  %v3344_v21 = vld [vmem:[#allocation3 + $0x4e0] sm:$0xff]  ;;  %v3613_v42 = vrot.slane %v3607_v38, 7  ;;  %v3388_v38 = vld [vmem:[#allocation3 + $0x790] sm:$0xff] }
 0x717   :  { %3772 = vmatpush1.bf16.msra.mxu0 %v3298_v6  ;;  %3650 = vmatprep.subr.bf16.mxu1 %v3303_v35  ;;  %v3346_v6 = vld [vmem:[#allocation3 + $0x4f0] sm:$0xff]  ;;  %v3353_v35 = vld [vmem:[#allocation3 + $0x558] sm:$0xff] }
 0x718   :  { %3773 = vmatprep.subr.bf16.mxu0 %v3305_v8  ;;  %v3257_v8 = vpack.c.bf16 %v8149_v39, %v8149_v39  ;;  %v3358_v39 = vld [vmem:[#allocation3 + $0x5b0] sm:$0xff] }
 0x71a   :  { %3651 = vmatpush1.bf16.msra.mxu1 %v3302_v50  ;;  %v3610_v50 = vunpack.c.l.b16 %v3263_v56  ;;  %v3389_v56 = vld [vmem:[#allocation3 + $0x798] sm:$0xff] }
 0x71b   :  { %3774 = vmatpush1.bf16.msra.mxu0 %v3304_v36  ;;  %3652 = vmatprep.subr.bf16.mxu1 %v3309_v55  ;;  %v3601_v36 = vunpack.c.l.b16 %v3254_v52  ;;  %v3350_v55 = vld [vmem:[#allocation3 + $0x540] sm:$0xff] }
 0x71c   :  { %3775 = vmatprep.subr.bf16.mxu0 %v3311_v22  ;;  %v3352_v22 = vld [vmem:[#allocation3 + $0x550] sm:$0xff]  ;;  %v3386_v52 = vld [vmem:[#allocation3 + $0x780] sm:$0xff] }
 0x71e   :  { %3653 = vmatpush1.bf16.msra.mxu1 %v3308_v33  ;;  %v3359_v33 = vld [vmem:[#allocation3 + $0x5b8] sm:$0xff] }
 0x71f   :  { %3776 = vmatpush1.bf16.msra.mxu0 %v3310_v31  ;;  %3654 = vmatprep.subr.bf16.mxu1 %v3315_v49  ;;  %v3604_v31 = vunpack.c.l.b16 %v3257_v8  ;;  %v3620_v49 = vrot.slane %v3610_v50, 7  ;;  %v3399_v8 = vld [vmem:[#allocation3 + $0x848] sm:$0xff]  ;;  %v3401_v50 = vld [vmem:[#allocation3 + $0x858] sm:$0xff] }
 0x720   :  { %3777 = vmatprep.subr.bf16.mxu0 %v3317_v12  ;;  %v3615_v12 = vsel %vm3614_vm4, %v3613_v42, %v3601_v36  ;;  %v3398_v36 = vld [vmem:[#allocation3 + $0x840] sm:$0xff]  ;;  %v3400_v42 = vld [vmem:[#allocation3 + $0x850] sm:$0xff] }
 0x722   :  { %3655 = vmatpush1.bf16.msra.mxu1 %v3314_v43  ;;  %v3356_v43 = vld [vmem:[#allocation3 + $0x5a0] sm:$0xff] }
 0x723   :  { %3778 = vmatpush1.bf16.msra.mxu0 %v3316_v0  ;;  %3656 = vmatprep.subr.bf16.mxu1 %v3321_v17  ;;  %v3363_v0 = vld [vmem:[#allocation3 + $0x608] sm:$0xff]  ;;  %v3365_v17 = vld [vmem:[#allocation3 + $0x618] sm:$0xff] }
 0x724   :  { %3779 = vmatprep.subr.bf16.mxu0 %v3323_v34  ;;  %v8179_v34 = vpack.c.b16 %v3615_v12, %v3615_v12  ;;  %v3410_v12 = vld [vmem:[#allocation3 + $0x900] sm:$0xff] }
 0x726   :  { %3657 = vmatpush1.bf16.msra.mxu1 %v3320_v54  ;;  %v3621_v54 = vsel %vm3614_vm4, %v3620_v49, %v3604_v31  ;;  %v3411_v31 = vld [vmem:[#allocation3 + $0x908] sm:$0xff]  ;;  %v3413_v49 = vld [vmem:[#allocation3 + $0x918] sm:$0xff] }
 0x727   :  { %3780 = vmatpush1.bf16.msra.mxu0 %v3322_v59  ;;  %3658 = vmatprep.subr.bf16.mxu1 %v3327_v5  ;;  %v3362_v59 = vld [vmem:[#allocation3 + $0x600] sm:$0xff]  ;;  %v3364_v5 = vld [vmem:[#allocation3 + $0x610] sm:$0xff] }
 0x728   :  { %3781 = vmatprep.subr.bf16.mxu0 %v3329_v27  ;;  %v3369_v27 = vld [vmem:[#allocation3 + $0x668] sm:$0xff] }
 0x72a   :  { %3659 = vmatpush1.bf16.msra.mxu1 %v3326_v20  ;;  %v3371_v20 = vld [vmem:[#allocation3 + $0x678] sm:$0xff] }
 0x72b   :  { %3782 = vmatpush1.bf16.msra.mxu0 %v3328_v4  ;;  %3660 = vmatprep.subr.bf16.mxu1 %v3333_v25  ;;  %v8182_v4 = vpack.c.b16 %v3621_v54, %v3621_v54  ;;  %v3368_v25 = vld [vmem:[#allocation3 + $0x660] sm:$0xff]  ;;  %v3418_v54 = vld [vmem:[#allocation3 + $0x970] sm:$0xff] }
 0x72c   :  { %3783 = vmatprep.subr.bf16.mxu0 %v3335_v60  ;;  %v3370_v60 = vld [vmem:[#allocation3 + $0x670] sm:$0xff] }
 0x72e   :  { %3661 = vmatpush1.bf16.msra.mxu1 %v3332_v30  ;;  %v3375_v30 = vld [vmem:[#allocation3 + $0x6c8] sm:$0xff] }
 0x72f   :  { %3784 = vmatpush1.bf16.msra.mxu0 %v3334_v29  ;;  %3662 = vmatprep.subr.bf16.mxu1 %v3339_v18  ;;  %v3377_v29 = vld [vmem:[#allocation3 + $0x6d8] sm:$0xff]  ;;  %v3374_v18 = vld [vmem:[#allocation3 + $0x6c0] sm:$0xff] }
 0x730   :  { %3785 = vmatprep.subr.bf16.mxu0 %v3341_v47  ;;  %v3376_v47 = vld [vmem:[#allocation3 + $0x6d0] sm:$0xff] }
 0x732   :  { %3663 = vmatpush1.bf16.msra.mxu1 %v3338_v58  ;;  %v3383_v58 = vld [vmem:[#allocation3 + $0x738] sm:$0xff] }
 0x733   :  { %3786 = vmatpush1.bf16.msra.mxu0 %v3340_v13  ;;  %3664 = vmatprep.subr.bf16.mxu1 %v3345_v7  ;;  %v3380_v13 = vld [vmem:[#allocation3 + $0x720] sm:$0xff]  ;;  %v3382_v7 = vld [vmem:[#allocation3 + $0x730] sm:$0xff] }
 0x734   :  { %3787 = vmatprep.subr.bf16.mxu0 %v3347_v41  ;;  %v3387_v41 = vld [vmem:[#allocation3 + $0x788] sm:$0xff] }
 0x736   :  { %3665 = vmatpush1.bf16.msra.mxu1 %v3344_v21  ;;  %v3393_v21 = vld [vmem:[#allocation3 + $0x7e8] sm:$0xff] }
 0x737   :  { %3788 = vmatpush1.bf16.msra.mxu0 %v3346_v6  ;;  %3666 = vmatprep.subr.bf16.mxu1 %v3351_v46  ;;  %v3395_v6 = vld [vmem:[#allocation3 + $0x7f8] sm:$0xff]  ;;  %v3392_v46 = vld [vmem:[#allocation3 + $0x7e0] sm:$0xff] }
 0x738   :  { %3789 = vmatprep.subr.bf16.mxu0 %v3353_v35  ;;  %v3394_v35 = vld [vmem:[#allocation3 + $0x7f0] sm:$0xff] }
 0x73a   :  { %3667 = vmatpush1.bf16.msra.mxu1 %v3350_v55  ;;  %v3405_v55 = vld [vmem:[#allocation3 + $0x8a8] sm:$0xff] }
 0x73b   :  { %3790 = vmatpush1.bf16.msra.mxu0 %v3352_v22  ;;  %3668 = vmatprep.subr.bf16.mxu1 %v3357_v32  ;;  %v3407_v22 = vld [vmem:[#allocation3 + $0x8b8] sm:$0xff]  ;;  %v3404_v32 = vld [vmem:[#allocation3 + $0x8a0] sm:$0xff] }
 0x73c   :  { %3791 = vmatprep.subr.bf16.mxu0 %v3359_v33  ;;  %v3406_v33 = vld [vmem:[#allocation3 + $0x8b0] sm:$0xff] }
 0x73e   :  { %3669 = vmatpush1.bf16.msra.mxu1 %v3356_v43  ;;  %v3412_v43 = vld [vmem:[#allocation3 + $0x910] sm:$0xff] }
 0x73f   :  { %3792 = vmatpush1.bf16.msra.mxu0 %v3358_v39  ;;  %3679 = vmatprep.subr.bf16.mxu1 %v3363_v0  ;;  %v3417_v39 = vld [vmem:[#allocation3 + $0x968] sm:$0xff]  ;;  %v3419_v0 = vld [vmem:[#allocation3 + $0x978] sm:$0xff] }
 0x740   :  { %3802 = vmatprep.subr.bf16.mxu0 %v3365_v17  ;;  %v3416_v17 = vld [vmem:[#allocation3 + $0x960] sm:$0xff] }
 0x741   :  { %3671 = vmatmul.mubr.bf16.vlgmr.msra.gmra.mrb[48].mxu1 %v8179_v34 }
 0x742   :  { %3794 = vmatmul.mubr.bf16.vlgmr.msra.gmra.mrb[20].mxu0 %v8179_v34  ;;  %3680 = vmatpush1.bf16.msra.mxu1 %v3362_v59  ;;  %v3423_v59 = vld [vmem:[#allocation3 + $0x9c8] sm:$0xff] }
 0x743   :  { %3803 = vmatpush1.bf16.msra.mxu0 %v3364_v5  ;;  %3681 = vmatprep.subr.bf16.mxu1 %v3369_v27  ;;  %v3425_v5 = vld [vmem:[#allocation3 + $0x9d8] sm:$0xff]  ;;  %v3422_v27 = vld [vmem:[#allocation3 + $0x9c0] sm:$0xff] }
 0x744   :  { %3804 = vmatprep.subr.bf16.mxu0 %v3371_v20  ;;  %3711 = vmatprep.mubr.bf16.mxu1 %v8182_v4  ;;  %v3424_v20 = vld [vmem:[#allocation3 + $0x9d0] sm:$0xff] }
 0x745   :  { %3834 = vmatprep.mubr.bf16.mxu0 %v8182_v4 }
 0x746   :  { %3682 = vmatpush1.bf16.msra.mxu1 %v3368_v25  ;;  %v3429_v25 = vld [vmem:[#allocation3 + $0xa28] sm:$0xff] }
 0x747   :  { %3805 = vmatpush1.bf16.msra.mxu0 %v3370_v60  ;;  %3683 = vmatprep.subr.bf16.mxu1 %v3375_v30  ;;  %v3431_v60 = vld [vmem:[#allocation3 + $0xa38] sm:$0xff]  ;;  %v3428_v30 = vld [vmem:[#allocation3 + $0xa20] sm:$0xff] }
 0x748   :  { %3806 = vmatprep.subr.bf16.mxu0 %v3377_v29  ;;  %v3430_v29 = vld [vmem:[#allocation3 + $0xa30] sm:$0xff] }
 0x74a   :  { %3684 = vmatpush1.bf16.msra.mxu1 %v3374_v18  ;;  %v3435_v18 = vld [vmem:[#allocation3 + $0xa88] sm:$0xff] }
 0x74b   :  { %3807 = vmatpush1.bf16.msra.mxu0 %v3376_v47  ;;  %3685 = vmatprep.subr.bf16.mxu1 %v3381_v44  ;;  %v3437_v47 = vld [vmem:[#allocation3 + $0xa98] sm:$0xff]  ;;  %v3262_v44 = vpack.c.bf16 %v8157_v53, %v8157_v53  ;;  %v3447_v53 = vld [vmem:[#allocation3 + $0xb48] sm:$0xff] }
 0x74c   :  { %3808 = vmatprep.subr.bf16.mxu0 %v3383_v58  ;;  %v3434_v58 = vld [vmem:[#allocation3 + $0xa80] sm:$0xff] }
 0x74e   :  { %3686 = vmatpush1.bf16.msra.mxu1 %v3380_v13  ;;  %v3436_v13 = vld [vmem:[#allocation3 + $0xa90] sm:$0xff] }
 0x74f   :  { %3809 = vmatpush1.bf16.msra.mxu0 %v3382_v7  ;;  %3687 = vmatprep.subr.bf16.mxu1 %v3387_v41  ;;  %v3441_v7 = vld [vmem:[#allocation3 + $0xae8] sm:$0xff]  ;;  %v3443_v41 = vld [vmem:[#allocation3 + $0xaf8] sm:$0xff] }
 0x750   :  { %3810 = vmatprep.subr.bf16.mxu0 %v3389_v56  ;;  %v3265_v56 = vpack.c.bf16 %v8163_v19, %v8163_v19 }
 0x752   :  { %3688 = vmatpush1.bf16.msra.mxu1 %v3386_v52  ;;  %v3256_v52 = vpack.c.bf16 %v8147_v48, %v8147_v48  ;;  %v3453_v48 = vld [vmem:[#allocation3 + $0xba8] sm:$0xff] }
 0x753   :  { %3811 = vmatpush1.bf16.msra.mxu0 %v3388_v38  ;;  %3689 = vmatprep.subr.bf16.mxu1 %v3393_v21  ;;  %v3609_v38 = vunpack.c.l.b16 %v3262_v44  ;;  %v3440_v21 = vld [vmem:[#allocation3 + $0xae0] sm:$0xff] }
 0x754   :  { %3812 = vmatprep.subr.bf16.mxu0 %v3395_v6  ;;  %v3442_v6 = vld [vmem:[#allocation3 + $0xaf0] sm:$0xff]  ;;  %v3476_v44 = vld [vmem:[#allocation3 + $0xd20] sm:$0xff] }
 0x755   :  { %v3618_v19 = vrot.slane %v3609_v38, 7  ;;  %v3491_v38 = vld [vmem:[#allocation3 + $0xdf8] sm:$0xff] }
 0x756   :  { %3690 = vmatpush1.bf16.msra.mxu1 %v3392_v46  ;;  %v3449_v46 = vld [vmem:[#allocation3 + $0xb58] sm:$0xff] }
 0x757   :  { %3813 = vmatpush1.bf16.msra.mxu0 %v3394_v35  ;;  %3691 = vmatprep.subr.bf16.mxu1 %v3399_v8  ;;  %v3259_v35 = vpack.c.bf16 %v8153_v37, %v8153_v37  ;;  %v3612_v8 = vunpack.c.l.b16 %v3265_v56  ;;  %v3454_v37 = vld [vmem:[#allocation3 + $0xbb0] sm:$0xff] }
 0x758   :  { %3814 = vmatprep.subr.bf16.mxu0 %v3401_v50  ;;  %v3603_v50 = vunpack.c.l.b16 %v3256_v52  ;;  %v3484_v56 = vld [vmem:[#allocation3 + $0xd90] sm:$0xff]  ;;  %v3489_v52 = vld [vmem:[#allocation3 + $0xde8] sm:$0xff] }
 0x75a   :  { %3692 = vmatpush1.bf16.msra.mxu1 %v3398_v36  ;;  %v3446_v36 = vld [vmem:[#allocation3 + $0xb40] sm:$0xff] }
 0x75b   :  { %3815 = vmatpush1.bf16.msra.mxu0 %v3400_v42  ;;  %3693 = vmatprep.subr.bf16.mxu1 %v3405_v55  ;;  %v3448_v42 = vld [vmem:[#allocation3 + $0xb50] sm:$0xff]  ;;  %v3455_v55 = vld [vmem:[#allocation3 + $0xbb8] sm:$0xff] }
 0x75c   :  { %3816 = vmatprep.subr.bf16.mxu0 %v3407_v22  ;;  %v3606_v22 = vunpack.c.l.b16 %v3259_v35  ;;  %v3494_v35 = vld [vmem:[#allocation3 + $0xe40] sm:$0xff] }
 0x75e   :  { %3694 = vmatpush1.bf16.msra.mxu1 %v3404_v32  ;;  %v3624_v32 = vrot.slane %v3612_v8, 7  ;;  %v3496_v8 = vld [vmem:[#allocation3 + $0xe50] sm:$0xff] }
 0x75f   :  { %3817 = vmatpush1.bf16.msra.mxu0 %v3406_v33  ;;  %3695 = vmatprep.subr.bf16.mxu1 %v3411_v31  ;;  %v3619_v33 = vsel %vm3614_vm4, %v3618_v19, %v3603_v50  ;;  %v3452_v31 = vld [vmem:[#allocation3 + $0xba0] sm:$0xff]  ;;  %v3501_v50 = vld [vmem:[#allocation3 + $0xea8] sm:$0xff]  ;;  %v3503_v19 = vld [vmem:[#allocation3 + $0xeb8] sm:$0xff] }
 0x760   :  { %3818 = vmatprep.subr.bf16.mxu0 %v3413_v49  ;;  %v3459_v49 = vld [vmem:[#allocation3 + $0xc08] sm:$0xff] }
 0x762   :  { %3696 = vmatpush1.bf16.msra.mxu1 %v3410_v12  ;;  %v3461_v12 = vld [vmem:[#allocation3 + $0xc18] sm:$0xff] }
 0x763   :  { %3819 = vmatpush1.bf16.msra.mxu0 %v3412_v43  ;;  %3697 = vmatprep.subr.bf16.mxu1 %v3417_v39  ;;  %v8197_v43 = vpack.c.b16 %v3619_v33, %v3619_v33  ;;  %v3625_v39 = vsel %vm3614_vm4, %v3624_v32, %v3606_v22  ;;  %v3506_v22 = vld [vmem:[#allocation3 + $0xf00] sm:$0xff]  ;;  %v3508_v32 = vld [vmem:[#allocation3 + $0xf10] sm:$0xff]  ;;  %v3513_v33 = vld [vmem:[#allocation3 + $0xf68] sm:$0xff] }
 0x764   :  { %3820 = vmatprep.subr.bf16.mxu0 %v3419_v0  ;;  %v3458_v0 = vld [vmem:[#allocation3 + $0xc00] sm:$0xff] }
 0x766   :  { %3698 = vmatpush1.bf16.msra.mxu1 %v3416_v17  ;;  %v3460_v17 = vld [vmem:[#allocation3 + $0xc10] sm:$0xff] }
 0x767   :  { %3821 = vmatpush1.bf16.msra.mxu0 %v3418_v54  ;;  %3699 = vmatprep.subr.bf16.mxu1 %v3423_v59  ;;  %v3465_v54 = vld [vmem:[#allocation3 + $0xc68] sm:$0xff]  ;;  %v3467_v59 = vld [vmem:[#allocation3 + $0xc78] sm:$0xff] }
 0x768   :  { %3822 = vmatprep.subr.bf16.mxu0 %v3425_v5  ;;  %v8200_v5 = vpack.c.b16 %v3625_v39, %v3625_v39  ;;  %v3521_v39 = vld [vmem:[#allocation3 + $0xfd8] sm:$0xff] }
 0x76a   :  { %3700 = vmatpush1.bf16.msra.mxu1 %v3422_v27  ;;  %v3464_v27 = vld [vmem:[#allocation3 + $0xc60] sm:$0xff] }
 0x76b   :  { %3823 = vmatpush1.bf16.msra.mxu0 %v3424_v20  ;;  %3701 = vmatprep.subr.bf16.mxu1 %v3429_v25  ;;  %v3466_v20 = vld [vmem:[#allocation3 + $0xc70] sm:$0xff]  ;;  %v3471_v25 = vld [vmem:[#allocation3 + $0xcc8] sm:$0xff] }
 0x76c   :  { %3824 = vmatprep.subr.bf16.mxu0 %v3431_v60  ;;  %v3473_v60 = vld [vmem:[#allocation3 + $0xcd8] sm:$0xff] }
 0x76e   :  { %3702 = vmatpush1.bf16.msra.mxu1 %v3428_v30  ;;  %v3470_v30 = vld [vmem:[#allocation3 + $0xcc0] sm:$0xff] }
 0x76f   :  { %3825 = vmatpush1.bf16.msra.mxu0 %v3430_v29  ;;  %3703 = vmatprep.subr.bf16.mxu1 %v3435_v18  ;;  %v3472_v29 = vld [vmem:[#allocation3 + $0xcd0] sm:$0xff]  ;;  %v3477_v18 = vld [vmem:[#allocation3 + $0xd28] sm:$0xff] }
 0x770   :  { %3826 = vmatprep.subr.bf16.mxu0 %v3437_v47  ;;  %v3479_v47 = vld [vmem:[#allocation3 + $0xd38] sm:$0xff] }
 0x772   :  { %3704 = vmatpush1.bf16.msra.mxu1 %v3434_v58  ;;  %v3478_v58 = vld [vmem:[#allocation3 + $0xd30] sm:$0xff] }
 0x773   :  { %3827 = vmatpush1.bf16.msra.mxu0 %v3436_v13  ;;  %3705 = vmatprep.subr.bf16.mxu1 %v3441_v7  ;;  %v3483_v13 = vld [vmem:[#allocation3 + $0xd88] sm:$0xff]  ;;  %v3485_v7 = vld [vmem:[#allocation3 + $0xd98] sm:$0xff] }
 0x774   :  { %3828 = vmatprep.subr.bf16.mxu0 %v3443_v41  ;;  %v3482_v41 = vld [vmem:[#allocation3 + $0xd80] sm:$0xff] }
 0x776   :  { %3706 = vmatpush1.bf16.msra.mxu1 %v3440_v21  ;;  %v3488_v21 = vld [vmem:[#allocation3 + $0xde0] sm:$0xff] }
 0x777   :  { %3829 = vmatpush1.bf16.msra.mxu0 %v3442_v6  ;;  %3707 = vmatprep.subr.bf16.mxu1 %v3447_v53  ;;  %v3490_v6 = vld [vmem:[#allocation3 + $0xdf0] sm:$0xff]  ;;  %v3495_v53 = vld [vmem:[#allocation3 + $0xe48] sm:$0xff] }
 0x778   :  { %3830 = vmatprep.subr.bf16.mxu0 %v3449_v46  ;;  %v3497_v46 = vld [vmem:[#allocation3 + $0xe58] sm:$0xff] }
 0x77a   :  { %3708 = vmatpush1.bf16.msra.mxu1 %v3446_v36  ;;  %v3500_v36 = vld [vmem:[#allocation3 + $0xea0] sm:$0xff] }
 0x77b   :  { %3831 = vmatpush1.bf16.msra.mxu0 %v3448_v42  ;;  %3709 = vmatprep.subr.bf16.mxu1 %v3453_v48  ;;  %v3502_v42 = vld [vmem:[#allocation3 + $0xeb0] sm:$0xff]  ;;  %v3507_v48 = vld [vmem:[#allocation3 + $0xf08] sm:$0xff] }
 0x77c   :  { %3832 = vmatprep.subr.bf16.mxu0 %v3455_v55  ;;  %v3509_v55 = vld [vmem:[#allocation3 + $0xf18] sm:$0xff] }
 0x77e   :  { %3710 = vmatpush1.bf16.msra.mxu1 %v3452_v31  ;;  %v3515_v31 = vld [vmem:[#allocation3 + $0xf78] sm:$0xff] }
 0x77f   :  { %3833 = vmatpush1.bf16.msra.mxu0 %v3454_v37  ;;  %3720 = vmatprep.subr.bf16.mxu1 %v3459_v49  ;;  %v3512_v37 = vld [vmem:[#allocation3 + $0xf60] sm:$0xff]  ;;  %v3514_v49 = vld [vmem:[#allocation3 + $0xf70] sm:$0xff] }
 0x780   :  { %3843 = vmatprep.subr.bf16.mxu0 %v3461_v12  ;;  %v3519_v12 = vld [vmem:[#allocation3 + $0xfc8] sm:$0xff] }
 0x781   :  { %3712 = vmatmul.mubr.bf16.vlgmr.msra.gmra.mrb[48].mxu1 %v8197_v43 }
 0x782   :  { %3835 = vmatmul.mubr.bf16.vlgmr.msra.gmra.mrb[20].mxu0 %v8197_v43  ;;  %3721 = vmatpush1.bf16.msra.mxu1 %v3458_v0  ;;  %v3518_v0 = vld [vmem:[#allocation3 + $0xfc0] sm:$0xff] }
 0x783   :  { %3844 = vmatpush1.bf16.msra.mxu0 %v3460_v17  ;;  %3722 = vmatprep.subr.bf16.mxu1 %v3465_v54  ;;  %v3520_v17 = vld [vmem:[#allocation3 + $0xfd0] sm:$0xff]  ;;  %v3525_v54 = vld [vmem:[#allocation3 + $0x1028] sm:$0xff] }
 0x784   :  { %3845 = vmatprep.subr.bf16.mxu0 %v3467_v59  ;;  %3752 = vmatprep.mubr.bf16.mxu1 %v8200_v5  ;;  %v3527_v59 = vld [vmem:[#allocation3 + $0x1038] sm:$0xff] }
 0x785   :  { %3875 = vmatprep.mubr.bf16.mxu0 %v8200_v5 }
 0x786   :  { %3723 = vmatpush1.bf16.msra.mxu1 %v3464_v27  ;;  %v3524_v27 = vld [vmem:[#allocation3 + $0x1020] sm:$0xff] }
 0x787   :  { %3846 = vmatpush1.bf16.msra.mxu0 %v3466_v20  ;;  %3724 = vmatprep.subr.bf16.mxu1 %v3471_v25  ;;  %v3526_v20 = vld [vmem:[#allocation3 + $0x1030] sm:$0xff]  ;;  %v3531_v25 = vld [vmem:[#allocation3 + $0x1088] sm:$0xff] }
 0x788   :  { %3847 = vmatprep.subr.bf16.mxu0 %v3473_v60  ;;  %v3533_v60 = vld [vmem:[#allocation3 + $0x1098] sm:$0xff] }
 0x78a   :  { %3725 = vmatpush1.bf16.msra.mxu1 %v3470_v30  ;;  %v3264_v30 = vpack.c.bf16 %v8161_v57, %v8161_v57 }
 0x78b   :  { %3848 = vmatpush1.bf16.msra.mxu0 %v3472_v29  ;;  %3726 = vmatprep.subr.bf16.mxu1 %v3477_v18  ;;  %v3530_v29 = vld [vmem:[#allocation3 + $0x1080] sm:$0xff]  ;;  %v3532_v18 = vld [vmem:[#allocation3 + $0x1090] sm:$0xff] }
 0x78c   :  { %3849 = vmatprep.subr.bf16.mxu0 %v3479_v47  ;;  %v3537_v47 = vld [vmem:[#allocation3 + $0x10e8] sm:$0xff] }
 0x78e   :  { %3727 = vmatpush1.bf16.msra.mxu1 %v3476_v44  ;;  %v3539_v44 = vld [vmem:[#allocation3 + $0x10f8] sm:$0xff] }
 0x78f   :  { %3850 = vmatpush1.bf16.msra.mxu0 %v3478_v58  ;;  %3728 = vmatprep.subr.bf16.mxu1 %v3483_v13  ;;  %v3258_v58 = vpack.c.bf16 %v8151_v28, %v8151_v28  ;;  %v3611_v13 = vunpack.c.l.b16 %v3264_v30  ;;  %v3337_v30 = vld [vmem:[#allocation3 + $0x448] sm:$0xff] }
 0x790   :  { %3851 = vmatprep.subr.bf16.mxu0 %v3485_v7  ;;  %v3536_v7 = vld [vmem:[#allocation3 + $0x10e0] sm:$0xff] }
 0x791   :  { %v3605_v57 = vunpack.c.l.b16 %v3258_v58  ;;  %v3348_v58 = vld [vmem:[#allocation3 + $0x500] sm:$0xff] }
 0x792   :  { %3729 = vmatpush1.bf16.msra.mxu1 %v3482_v41  ;;  %v3538_v41 = vld [vmem:[#allocation3 + $0x10f0] sm:$0xff] }
 0x793   :  { %3852 = vmatpush1.bf16.msra.mxu0 %v3484_v56  ;;  %3730 = vmatprep.subr.bf16.mxu1 %v3489_v52  ;;  %v3543_v56 = vld [vmem:[#allocation3 + $0x1148] sm:$0xff]  ;;  %v3545_v52 = vld [vmem:[#allocation3 + $0x1158] sm:$0xff] }
 0x794   :  { %3853 = vmatprep.subr.bf16.mxu0 %v3491_v38  ;;  %v3622_v38 = vrot.slane %v3611_v13, 7  ;;  %v3355_v13 = vld [vmem:[#allocation3 + $0x568] sm:$0xff] }
 0x796   :  { %3731 = vmatpush1.bf16.msra.mxu1 %v3488_v21  ;;  %v3542_v21 = vld [vmem:[#allocation3 + $0x1140] sm:$0xff]  ;;  %v3623_v28 = vsel %vm3614_vm4, %v3622_v38, %v3605_v57  ;;  %v3373_v38 = vld [vmem:[#allocation3 + $0x688] sm:$0xff] }
 0x797   :  { %3854 = vmatpush1.bf16.msra.mxu0 %v3490_v6  ;;  %3732 = vmatprep.subr.bf16.mxu1 %v3495_v53  ;;  %v3544_v6 = vld [vmem:[#allocation3 + $0x1150] sm:$0xff]  ;;  %v3549_v53 = vld [vmem:[#allocation3 + $0x11a8] sm:$0xff]  ;;  %v3366_v57 = vld [vmem:[#allocation3 + $0x620] sm:$0xff] }
 0x798   :  { %3855 = vmatprep.subr.bf16.mxu0 %v3497_v46  ;;  %v3551_v46 = vld [vmem:[#allocation3 + $0x11b8] sm:$0xff] }
 0x79a   :  { %3733 = vmatpush1.bf16.msra.mxu1 %v3494_v35  ;;  %v3548_v35 = vld [vmem:[#allocation3 + $0x11a0] sm:$0xff] }
 0x79b   :  { %3856 = vmatpush1.bf16.msra.mxu0 %v3496_v8  ;;  %3734 = vmatprep.subr.bf16.mxu1 %v3501_v50  ;;  %v3550_v8 = vld [vmem:[#allocation3 + $0x11b0] sm:$0xff]  ;;  %v3271_v50 = vld [vmem:[#allocation3 + $0x28] sm:$0xff] }
 0x79c   :  { %3857 = vmatprep.subr.bf16.mxu0 %v3503_v19  ;;  %v8211_v19 = vpack.c.b16 %v3623_v28, %v3623_v28  ;;  %v3384_v28 = vld [vmem:[#allocation3 + $0x740] sm:$0xff] }
 0x79e   :  { %3735 = vmatpush1.bf16.msra.mxu1 %v3500_v36  ;;  %v3270_v36 = vld [vmem:[#allocation3 + $0x20] sm:$0xff] }
 0x79f   :  { %3858 = vmatpush1.bf16.msra.mxu0 %v3502_v42  ;;  %3736 = vmatprep.subr.bf16.mxu1 %v3507_v48  ;;  %v3277_v42 = vld [vmem:[#allocation3 + $0x88] sm:$0xff]  ;;  %v3276_v48 = vld [vmem:[#allocation3 + $0x80] sm:$0xff] }
 0x7a0   :  { %3859 = vmatprep.subr.bf16.mxu0 %v3509_v55  ;;  %v3283_v55 = vld [vmem:[#allocation3 + $0xe8] sm:$0xff] }
 0x7a2   :  { %3737 = vmatpush1.bf16.msra.mxu1 %v3506_v22  ;;  %v3282_v22 = vld [vmem:[#allocation3 + $0xe0] sm:$0xff] }
 0x7a3   :  { %3860 = vmatpush1.bf16.msra.mxu0 %v3508_v32  ;;  %3738 = vmatprep.subr.bf16.mxu1 %v3513_v33  ;;  %v3289_v32 = vld [vmem:[#allocation3 + $0x148] sm:$0xff]  ;;  %v3288_v33 = vld [vmem:[#allocation3 + $0x140] sm:$0xff] }
 0x7a4   :  { %3861 = vmatprep.subr.bf16.mxu0 %v3515_v31  ;;  %v3295_v31 = vld [vmem:[#allocation3 + $0x1a8] sm:$0xff] }
 0x7a6   :  { %3739 = vmatpush1.bf16.msra.mxu1 %v3512_v37  ;;  %v3294_v37 = vld [vmem:[#allocation3 + $0x1a0] sm:$0xff] }
 0x7a7   :  { %3862 = vmatpush1.bf16.msra.mxu0 %v3514_v49  ;;  %3740 = vmatprep.subr.bf16.mxu1 %v3519_v12  ;;  %v3301_v49 = vld [vmem:[#allocation3 + $0x208] sm:$0xff]  ;;  %v3300_v12 = vld [vmem:[#allocation3 + $0x200] sm:$0xff] }
 0x7a8   :  { %3863 = vmatprep.subr.bf16.mxu0 %v3521_v39  ;;  %v3307_v39 = vld [vmem:[#allocation3 + $0x268] sm:$0xff] }
 0x7aa   :  { %3741 = vmatpush1.bf16.msra.mxu1 %v3518_v0  ;;  %v3313_v0 = vld [vmem:[#allocation3 + $0x2c8] sm:$0xff] }
 0x7ab   :  { %3864 = vmatpush1.bf16.msra.mxu0 %v3520_v17  ;;  %3742 = vmatprep.subr.bf16.mxu1 %v3525_v54  ;;  %v3312_v17 = vld [vmem:[#allocation3 + $0x2c0] sm:$0xff]  ;;  %v3319_v54 = vld [vmem:[#allocation3 + $0x328] sm:$0xff] }
 0x7ac   :  { %3865 = vmatprep.subr.bf16.mxu0 %v3527_v59  ;;  %v3318_v59 = vld [vmem:[#allocation3 + $0x320] sm:$0xff] }
 0x7ae   :  { %3743 = vmatpush1.bf16.msra.mxu1 %v3524_v27  ;;  %v3325_v27 = vld [vmem:[#allocation3 + $0x388] sm:$0xff] }
 0x7af   :  { %3866 = vmatpush1.bf16.msra.mxu0 %v3526_v20  ;;  %3744 = vmatprep.subr.bf16.mxu1 %v3531_v25  ;;  %v3324_v20 = vld [vmem:[#allocation3 + $0x380] sm:$0xff]  ;;  %v3331_v25 = vld [vmem:[#allocation3 + $0x3e8] sm:$0xff] }
 0x7b0   :  { %3867 = vmatprep.subr.bf16.mxu0 %v3533_v60  ;;  %v3330_v60 = vld [vmem:[#allocation3 + $0x3e0] sm:$0xff] }
 0x7b2   :  { %3745 = vmatpush1.bf16.msra.mxu1 %v3530_v29  ;;  %v3336_v29 = vld [vmem:[#allocation3 + $0x440] sm:$0xff] }
 0x7b3   :  { %3868 = vmatpush1.bf16.msra.mxu0 %v3532_v18  ;;  %3746 = vmatprep.subr.bf16.mxu1 %v3537_v47  ;;  %v3343_v18 = vld [vmem:[#allocation3 + $0x4a8] sm:$0xff]  ;;  %v3342_v47 = vld [vmem:[#allocation3 + $0x4a0] sm:$0xff] }
 0x7b4   :  { %3869 = vmatprep.subr.bf16.mxu0 %v3539_v44  ;;  %v3349_v44 = vld [vmem:[#allocation3 + $0x508] sm:$0xff] }
 0x7b6   :  { %3747 = vmatpush1.bf16.msra.mxu1 %v3536_v7  ;;  %v3354_v7 = vld [vmem:[#allocation3 + $0x560] sm:$0xff] }
 0x7b7   :  { %3870 = vmatpush1.bf16.msra.mxu0 %v3538_v41  ;;  %3748 = vmatprep.subr.bf16.mxu1 %v3543_v56  ;;  %v3361_v41 = vld [vmem:[#allocation3 + $0x5c8] sm:$0xff]  ;;  %v3360_v56 = vld [vmem:[#allocation3 + $0x5c0] sm:$0xff] }
 0x7b8   :  { %3871 = vmatprep.subr.bf16.mxu0 %v3545_v52  ;;  %v3367_v52 = vld [vmem:[#allocation3 + $0x628] sm:$0xff] }
 0x7ba   :  { %3749 = vmatpush1.bf16.msra.mxu1 %v3542_v21  ;;  %v3372_v21 = vld [vmem:[#allocation3 + $0x680] sm:$0xff] }
 0x7bb   :  { %3872 = vmatpush1.bf16.msra.mxu0 %v3544_v6  ;;  %3750 = vmatprep.subr.bf16.mxu1 %v3549_v53  ;;  %v3379_v6 = vld [vmem:[#allocation3 + $0x6e8] sm:$0xff]  ;;  %v3378_v53 = vld [vmem:[#allocation3 + $0x6e0] sm:$0xff] }
 0x7bc   :  { %3873 = vmatprep.subr.bf16.mxu0 %v3551_v46  ;;  %v3385_v46 = vld [vmem:[#allocation3 + $0x748] sm:$0xff] }
 0x7be   :  { %3751 = vmatpush1.bf16.msra.mxu1 %v3548_v35  ;;  %v3391_v35 = vld [vmem:[#allocation3 + $0x7a8] sm:$0xff] }
 0x7bf   :  { %3874 = vmatpush1.bf16.msra.mxu0 %v3550_v8  ;;  %3884 = vmatprep.subr.bf16.mxu1 %v3271_v50  ;;  %v3390_v8 = vld [vmem:[#allocation3 + $0x7a0] sm:$0xff]  ;;  %v3397_v50 = vld [vmem:[#allocation3 + $0x808] sm:$0xff] }
 0x7c1   :  { %3753 = vmatmul.mubr.bf16.vlgmr.msra.gmra.mrb[48].mxu1 %v8211_v19 }
 0x7c2   :  { %3876 = vmatmul.mubr.bf16.vlgmr.msra.gmra.mrb[20].mxu0 %v8211_v19  ;;  %3885 = vmatpush1.bf16.msra.mxu1 %v3270_v36  ;;  %v3403_v36 = vld [vmem:[#allocation3 + $0x868] sm:$0xff] }
 0x7c3   :  { %3916 = vmatprep.mubr.bf16.mxu1 %v8166_v45  ;;  %3886 = vmatprep.subr.bf16.mxu1 %v3277_v42  ;;  %v3306_v45 = vld [vmem:[#allocation3 + $0x260] sm:$0xff]  ;;  %v3409_v42 = vld [vmem:[#allocation3 + $0x8c8] sm:$0xff] }
 0x7c6   :  { %3887 = vmatpush1.bf16.msra.mxu1 %v3276_v48  ;;  %v3408_v48 = vld [vmem:[#allocation3 + $0x8c0] sm:$0xff] }
 0x7c7   :  { %3888 = vmatprep.subr.bf16.mxu1 %v3283_v55  ;;  %v3415_v55 = vld [vmem:[#allocation3 + $0x928] sm:$0xff] }
 0x7ca   :  { %3889 = vmatpush1.bf16.msra.mxu1 %v3282_v22  ;;  %v3414_v22 = vld [vmem:[#allocation3 + $0x920] sm:$0xff] }
 0x7cb   :  { %3890 = vmatprep.subr.bf16.mxu1 %v3289_v32  ;;  %v3421_v32 = vld [vmem:[#allocation3 + $0x988] sm:$0xff] }
 0x7ce   :  { %3891 = vmatpush1.bf16.msra.mxu1 %v3288_v33  ;;  %v3420_v33 = vld [vmem:[#allocation3 + $0x980] sm:$0xff] }
 0x7cf   :  { %3892 = vmatprep.subr.bf16.mxu1 %v3295_v31  ;;  %v3427_v31 = vld [vmem:[#allocation3 + $0x9e8] sm:$0xff] }
 0x7d2   :  { %3893 = vmatpush1.bf16.msra.mxu1 %v3294_v37  ;;  %v3426_v37 = vld [vmem:[#allocation3 + $0x9e0] sm:$0xff] }
 0x7d3   :  { %3894 = vmatprep.subr.bf16.mxu1 %v3301_v49  ;;  %v3433_v49 = vld [vmem:[#allocation3 + $0xa48] sm:$0xff] }
 0x7d6   :  { %3895 = vmatpush1.bf16.msra.mxu1 %v3300_v12  ;;  %v3432_v12 = vld [vmem:[#allocation3 + $0xa40] sm:$0xff] }
 0x7d7   :  { %3896 = vmatprep.subr.bf16.mxu1 %v3307_v39  ;;  %v3439_v39 = vld [vmem:[#allocation3 + $0xaa8] sm:$0xff] }
 0x7da   :  { %3897 = vmatpush1.bf16.msra.mxu1 %v3306_v45  ;;  %v3438_v45 = vld [vmem:[#allocation3 + $0xaa0] sm:$0xff] }
 0x7db   :  { %3898 = vmatprep.subr.bf16.mxu1 %v3313_v0  ;;  %v3445_v0 = vld [vmem:[#allocation3 + $0xb08] sm:$0xff] }
 0x7de   :  { %3899 = vmatpush1.bf16.msra.mxu1 %v3312_v17  ;;  %v3444_v17 = vld [vmem:[#allocation3 + $0xb00] sm:$0xff] }
 0x7df   :  { %3900 = vmatprep.subr.bf16.mxu1 %v3319_v54  ;;  %v3451_v54 = vld [vmem:[#allocation3 + $0xb68] sm:$0xff] }
 0x7e2   :  { %3901 = vmatpush1.bf16.msra.mxu1 %v3318_v59  ;;  %v3450_v59 = vld [vmem:[#allocation3 + $0xb60] sm:$0xff] }
 0x7e3   :  { %3902 = vmatprep.subr.bf16.mxu1 %v3325_v27  ;;  %v3457_v27 = vld [vmem:[#allocation3 + $0xbc8] sm:$0xff] }
 0x7e6   :  { %3903 = vmatpush1.bf16.msra.mxu1 %v3324_v20  ;;  %v3456_v20 = vld [vmem:[#allocation3 + $0xbc0] sm:$0xff] }
 0x7e7   :  { %3904 = vmatprep.subr.bf16.mxu1 %v3331_v25  ;;  %v3463_v25 = vld [vmem:[#allocation3 + $0xc28] sm:$0xff] }
 0x7ea   :  { %3905 = vmatpush1.bf16.msra.mxu1 %v3330_v60  ;;  %v3462_v60 = vld [vmem:[#allocation3 + $0xc20] sm:$0xff] }
 0x7eb   :  { %3906 = vmatprep.subr.bf16.mxu1 %v3337_v30  ;;  %v3469_v30 = vld [vmem:[#allocation3 + $0xc88] sm:$0xff] }
 0x7ee   :  { %3907 = vmatpush1.bf16.msra.mxu1 %v3336_v29  ;;  %v3468_v29 = vld [vmem:[#allocation3 + $0xc80] sm:$0xff] }
 0x7ef   :  { %3908 = vmatprep.subr.bf16.mxu1 %v3343_v18  ;;  %v3475_v18 = vld [vmem:[#allocation3 + $0xce8] sm:$0xff] }
 0x7f2   :  { %3909 = vmatpush1.bf16.msra.mxu1 %v3342_v47  ;;  %v3474_v47 = vld [vmem:[#allocation3 + $0xce0] sm:$0xff] }
 0x7f3   :  { %3910 = vmatprep.subr.bf16.mxu1 %v3349_v44  ;;  %v3481_v44 = vld [vmem:[#allocation3 + $0xd48] sm:$0xff] }
 0x7f6   :  { %3911 = vmatpush1.bf16.msra.mxu1 %v3348_v58  ;;  %v3480_v58 = vld [vmem:[#allocation3 + $0xd40] sm:$0xff] }
 0x7f7   :  { %3912 = vmatprep.subr.bf16.mxu1 %v3355_v13  ;;  %v3487_v13 = vld [vmem:[#allocation3 + $0xda8] sm:$0xff] }
 0x7fa   :  { %3913 = vmatpush1.bf16.msra.mxu1 %v3354_v7  ;;  %v3486_v7 = vld [vmem:[#allocation3 + $0xda0] sm:$0xff] }
 0x7fb   :  { %3914 = vmatprep.subr.bf16.mxu1 %v3361_v41  ;;  %v3493_v41 = vld [vmem:[#allocation3 + $0xe08] sm:$0xff] }
 0x7fe   :  { %3915 = vmatpush1.bf16.msra.mxu1 %v3360_v56  ;;  %v3499_v56 = vld [vmem:[#allocation3 + $0xe68] sm:$0xff] }
 0x7ff   :  { %3925 = vmatprep.subr.bf16.mxu1 %v3367_v52  ;;  %v3505_v52 = vld [vmem:[#allocation3 + $0xec8] sm:$0xff] }
 0x801   :  { %3917 = vmatmul.mubr.bf16.vlgmr.msra.gmra.mrb[52].mxu1 %v8179_v34  ;;  %v3396_v34 = vld [vmem:[#allocation3 + $0x800] sm:$0xff] }
 0x802   :  { %3926 = vmatpush1.bf16.msra.mxu1 %v3366_v57  ;;  %3957 = vmatprep.mubr.bf16.mxu1 %v8182_v4  ;;  %v3402_v4 = vld [vmem:[#allocation3 + $0x860] sm:$0xff] }
 0x803   :  { %3927 = vmatprep.subr.bf16.mxu1 %v3373_v38  ;;  %v3504_v57 = vld [vmem:[#allocation3 + $0xec0] sm:$0xff]  ;;  %v3511_v38 = vld [vmem:[#allocation3 + $0xf28] sm:$0xff] }
 0x806   :  { %3928 = vmatpush1.bf16.msra.mxu1 %v3372_v21  ;;  %v3510_v21 = vld [vmem:[#allocation3 + $0xf20] sm:$0xff] }
 0x807   :  { %3929 = vmatprep.subr.bf16.mxu1 %v3379_v6  ;;  %v3517_v6 = vld [vmem:[#allocation3 + $0xf88] sm:$0xff] }
 0x80a   :  { %3930 = vmatpush1.bf16.msra.mxu1 %v3378_v53  ;;  %v3516_v53 = vld [vmem:[#allocation3 + $0xf80] sm:$0xff] }
 0x80b   :  { %3931 = vmatprep.subr.bf16.mxu1 %v3385_v46  ;;  %v3523_v46 = vld [vmem:[#allocation3 + $0xfe8] sm:$0xff] }
 0x80e   :  { %3932 = vmatpush1.bf16.msra.mxu1 %v3384_v28  ;;  %v3522_v28 = vld [vmem:[#allocation3 + $0xfe0] sm:$0xff] }
 0x80f   :  { %3933 = vmatprep.subr.bf16.mxu1 %v3391_v35  ;;  %v3529_v35 = vld [vmem:[#allocation3 + $0x1048] sm:$0xff] }
 0x812   :  { %3934 = vmatpush1.bf16.msra.mxu1 %v3390_v8  ;;  %v3528_v8 = vld [vmem:[#allocation3 + $0x1040] sm:$0xff] }
 0x813   :  { %3935 = vmatprep.subr.bf16.mxu1 %v3397_v50  ;;  %v3535_v50 = vld [vmem:[#allocation3 + $0x10a8] sm:$0xff] }
 0x816   :  { %3936 = vmatpush1.bf16.msra.mxu1 %v3396_v34  ;;  %v3534_v34 = vld [vmem:[#allocation3 + $0x10a0] sm:$0xff] }
 0x817   :  { %3937 = vmatprep.subr.bf16.mxu1 %v3403_v36  ;;  %v3541_v36 = vld [vmem:[#allocation3 + $0x1108] sm:$0xff] }
 0x81a   :  { %3938 = vmatpush1.bf16.msra.mxu1 %v3402_v4  ;;  %v3540_v4 = vld [vmem:[#allocation3 + $0x1100] sm:$0xff] }
 0x81b   :  { %3939 = vmatprep.subr.bf16.mxu1 %v3409_v42  ;;  %v3547_v42 = vld [vmem:[#allocation3 + $0x1168] sm:$0xff] }
 0x81e   :  { %3940 = vmatpush1.bf16.msra.mxu1 %v3408_v48  ;;  %v3546_v48 = vld [vmem:[#allocation3 + $0x1160] sm:$0xff] }
 0x81f   :  { %3941 = vmatprep.subr.bf16.mxu1 %v3415_v55  ;;  %v3553_v55 = vld [vmem:[#allocation3 + $0x11c8] sm:$0xff] }
 0x822   :  { %3942 = vmatpush1.bf16.msra.mxu1 %v3414_v22  ;;  %v3552_v22 = vld [vmem:[#allocation3 + $0x11c0] sm:$0xff] }
 0x823   :  { %3943 = vmatprep.subr.bf16.mxu1 %v3421_v32 }
 0x826   :  { %3944 = vmatpush1.bf16.msra.mxu1 %v3420_v33 }
 0x827   :  { %3945 = vmatprep.subr.bf16.mxu1 %v3427_v31 }
 0x82a   :  { %3946 = vmatpush1.bf16.msra.mxu1 %v3426_v37 }
 0x82b   :  { %3947 = vmatprep.subr.bf16.mxu1 %v3433_v49 }
 0x82e   :  { %3948 = vmatpush1.bf16.msra.mxu1 %v3432_v12 }
 0x82f   :  { %3949 = vmatprep.subr.bf16.mxu1 %v3439_v39 }
 0x832   :  { %3950 = vmatpush1.bf16.msra.mxu1 %v3438_v45 }
 0x833   :  { %3951 = vmatprep.subr.bf16.mxu1 %v3445_v0  ;;  %v3555_v0 = vld [vmem:[#allocation14 + $0x3] ss:$8 sm:$0xf] }
 0x836   :  { %3952 = vmatpush1.bf16.msra.mxu1 %v3444_v17  ;;  %v3556_v17 = vld [vmem:[#allocation14 + $0x3] ss:$8 sm:$0x30] }
 0x837   :  { %3953 = vmatprep.subr.bf16.mxu1 %v3451_v54  ;;  %v3557_v54 = vor.u32 %v3556_v17, %v3555_v0 }
 0x83a   :  { %3954 = vmatpush1.bf16.msra.mxu1 %v3450_v59  ;;  %v3562_v59 = vrot.slane %v3557_v54, %v7978_v51 }
 0x83b   :  { %3955 = vmatprep.subr.bf16.mxu1 %v3457_v27  ;;  %v3566_v27 = vrot.slane %v3557_v54, %v7963_v23 }
 0x83e   :  { %3956 = vmatpush1.bf16.msra.mxu1 %v3456_v20 }
 0x83f   :  { %3966 = vmatprep.subr.bf16.mxu1 %v3463_v25 }
 0x841   :  { %3958 = vmatmul.mubr.bf16.vlgmr.msra.gmra.mrb[52].mxu1 %v8197_v43  ;;  %v3492_v43 = vld [vmem:[#allocation3 + $0xe00] sm:$0xff] }
 0x842   :  { %3967 = vmatpush1.bf16.msra.mxu1 %v3462_v60  ;;  %3998 = vmatprep.mubr.bf16.mxu1 %v8200_v5  ;;  %v3498_v5 = vld [vmem:[#allocation3 + $0xe60] sm:$0xff]  ;;  %v3570_v60 = vrot.slane %v3557_v54, %v8007_v40 }
 0x843   :  { %3968 = vmatprep.subr.bf16.mxu1 %v3469_v30 }
 0x846   :  { %3969 = vmatpush1.bf16.msra.mxu1 %v3468_v29 }
 0x847   :  { %3970 = vmatprep.subr.bf16.mxu1 %v3475_v18  ;;  %v3574_v18 = vrot.slane %v3557_v54, %v7987_v61 }
 0x84a   :  { %3971 = vmatpush1.bf16.msra.mxu1 %v3474_v47 }
 0x84b   :  { %3972 = vmatprep.subr.bf16.mxu1 %v3481_v44 }
 0x84e   :  { %3973 = vmatpush1.bf16.msra.mxu1 %v3480_v58 }
 0x84f   :  { %3974 = vmatprep.subr.bf16.mxu1 %v3487_v13 }
 0x852   :  { %3975 = vmatpush1.bf16.msra.mxu1 %v3486_v7 }
 0x853   :  { %3976 = vmatprep.subr.bf16.mxu1 %v3493_v41 }
 0x856   :  { %3977 = vmatpush1.bf16.msra.mxu1 %v3492_v43 }
 0x857   :  { %3978 = vmatprep.subr.bf16.mxu1 %v3499_v56 }
 0x85a   :  { %3979 = vmatpush1.bf16.msra.mxu1 %v3498_v5 }
 0x85b   :  { %3980 = vmatprep.subr.bf16.mxu1 %v3505_v52 }
 0x85e   :  { %3981 = vmatpush1.bf16.msra.mxu1 %v3504_v57 }
 0x85f   :  { %3982 = vmatprep.subr.bf16.mxu1 %v3511_v38 }
 0x862   :  { %3983 = vmatpush1.bf16.msra.mxu1 %v3510_v21 }
 0x863   :  { %3984 = vmatprep.subr.bf16.mxu1 %v3517_v6 }
 0x866   :  { %3985 = vmatpush1.bf16.msra.mxu1 %v3516_v53 }
 0x867   :  { %3986 = vmatprep.subr.bf16.mxu1 %v3523_v46 }
 0x86a   :  { %3987 = vmatpush1.bf16.msra.mxu1 %v3522_v28 }
 0x86b   :  { %3988 = vmatprep.subr.bf16.mxu1 %v3529_v35 }
 0x86e   :  { %3989 = vmatpush1.bf16.msra.mxu1 %v3528_v8 }
 0x86f   :  { %3990 = vmatprep.subr.bf16.mxu1 %v3535_v50 }
 0x872   :  { %3991 = vmatpush1.bf16.msra.mxu1 %v3534_v34 }
 0x873   :  { %3992 = vmatprep.subr.bf16.mxu1 %v3541_v36 }
 0x876   :  { %3993 = vmatpush1.bf16.msra.mxu1 %v3540_v4 }
 0x877   :  { %3994 = vmatprep.subr.bf16.mxu1 %v3547_v42 }
 0x87a   :  { %3995 = vmatpush1.bf16.msra.mxu1 %v3546_v48 }
 0x87b   :  { %3996 = vmatprep.subr.bf16.mxu1 %v3553_v55 }
 0x87e   :  { %3997 = vmatpush1.bf16.msra.mxu1 %v3552_v22 }
 0x881   :  { %3999 = vmatmul.mubr.bf16.vlgmr.msra.gmra.mrb[52].mxu1 %v8211_v19 }
 0x894   :  { %v3754_v32 = vpop.f32.mrb[48].mxu1 }
 0x895   :  { %v3877_v33 = vpop.f32.mrb[20].mxu0  ;;  %v3756_v31 = vpop.f32.mrb[49].mxu1  ;;  %v7182_v20 = vadd.f32 %v3754_v32, %v3562_v59  ;;  %v4286_v59 = vld [vmem:[#allocation3 + $0x38] sm:$0xff] }
 0x896   :  { %v3879_v37 = vpop.f32.mrb[21].mxu0  ;;  %v3758_v49 = vpop.f32.mrb[50].mxu1  ;;  %v7183_v25 = vadd.f32 %v3756_v31, %v3566_v27  ;;  %v7184_v29 = vadd.f32 %v3877_v33, %v3570_v60  ;;  %v4288_v27 = vld [vmem:[#allocation3 + $0x48] sm:$0xff]  ;;  %4656 = vmatprep.subr.bf16.mxu0 %v4286_v59  ;;  %v4292_v60 = vld [vmem:[#allocation3 + $0x98] sm:$0xff] }
 0x897   :  { %v3881_v12 = vpop.f32.mrb[22].mxu0  ;;  %v3759_v39 = vpop.f32.mrb[51].mxu1  ;;  %v4013_v19 = vrot.slane %v7182_v20, 1  ;;  %v7185_v13 = vadd.f32 %v3879_v37, %v3574_v18  ;;  %v8237_v5 = vadd.f32 %v7182_v20, %v7831_v62  ;;  %v3578_v62 = vrot.slane %v3557_v54, %v8032_v24  ;;  %v8792_v49 = vld [vmem:[#allocation29_spill] sm:$0xff]  ;;  %v4285_v20 = vld [vmem:[#allocation3 + $0x30] sm:$0xff]  ;;  %4779 = vmatprep.subr.bf16.mxu1 %v4288_v27  ;;  %v4298_v18 = vld [vmem:[#allocation3 + $0xf8] sm:$0xff] }
 0x898   :  { %v3882_v45 = vpop.f32.mrb[23].mxu0  ;;  %v4014_v30 = vrot.slane %v7183_v25, 1  ;;  %v4015_v58 = vrot.slane %v7184_v29, 1  ;;  %v8240_v52 = vadd.f32 %v7183_v25, %v7833_v63  ;;  %v4287_v25 = vld [vmem:[#allocation3 + $0x40] sm:$0xff]  ;;  %4657 = vmatpush1.bf16.msra.mxu0 %v4285_v20 }
 0x899   :  { %v8226_v47 = vadd.f32 %v4013_v19, %v7843_v9  ;;  %v4016_v56 = vrot.slane %v7185_v13, 1  ;;  %v8243_v9 = vadd.f32 %v7184_v29, %v7835_v2  ;;  %v3582_v2 = vrot.slane %v3557_v54, %v8010_v26  ;;  %v4294_v19 = vld [vmem:[#allocation3 + $0xa8] sm:$0xff]  ;;  %4780 = vmatpush1.bf16.msra.mxu1 %v4287_v25  ;;  %4658 = vmatprep.subr.bf16.mxu0 %v4292_v60  ;;  %v4293_v29 = vld [vmem:[#allocation3 + $0xa0] sm:$0xff] }
 0x89a   :  { %v8229_v44 = vadd.f32 %v4014_v30, %v7845_v10  ;;  %v8234_v43 = vadd.f32 %v4015_v58, %v7847_v11  ;;  %v8260_v53 = vadd.f32 %v7185_v13, %v7837_v1  ;;  %4781 = vmatprep.subr.bf16.mxu1 %v4294_v19  ;;  %v4291_v30 = vld [vmem:[#allocation3 + $0x90] sm:$0xff]  ;;  %v4300_v58 = vld [vmem:[#allocation3 + $0x108] sm:$0xff] }
 0x89b   :  { %v4063_v7 = vrot.slane %v8226_v47, 7  ;;  %v8251_v38 = vadd.f32 %v4016_v56, %v7849_v14  ;;  %v4297_v13 = vld [vmem:[#allocation3 + $0xf0] sm:$0xff]  ;;  %v4306_v56 = vld [vmem:[#allocation3 + $0x168] sm:$0xff] }
 0x89c   :  { %v4065_v41 = vrot.slane %v8229_v44, 7  ;;  %v4067_v11 = vrot.slane %v8234_v43, 7  ;;  %4659 = vmatpush1.bf16.msra.mxu0 %v4291_v30 }
 0x89d   :  { %v4064_v10 = vsel %vm3614_vm4, %v4063_v7, %v8237_v5  ;;  %v4069_v46 = vrot.slane %v8251_v38, 7  ;;  %4782 = vmatpush1.bf16.msra.mxu1 %v4293_v29  ;;  %4660 = vmatprep.subr.bf16.mxu0 %v4298_v18  ;;  %v4299_v7 = vld [vmem:[#allocation3 + $0x100] sm:$0xff] }
 0x89e   :  { %v4066_v57 = vsel %vm3614_vm4, %v4065_v41, %v8240_v52  ;;  %v4082_v63 = vsel %vm4081_vm5, %v4064_v10, 0.0  ;;  %v4068_v6 = vsel %vm3614_vm4, %v4067_v11, %v8243_v9  ;;  %4783 = vmatprep.subr.bf16.mxu1 %v4300_v58  ;;  %v4304_v41 = vld [vmem:[#allocation3 + $0x158] sm:$0xff]  ;;  %v4303_v10 = vld [vmem:[#allocation3 + $0x150] sm:$0xff] }
 0x89f   :  { %v4083_v21 = vsel %vm4081_vm5, %v4066_v57, 0.0  ;;  %v4085_v36 = vsel %vm4081_vm5, %v4068_v6, 0.0  ;;  %v4070_v48 = vsel %vm3614_vm4, %v4069_v46, %v8260_v53  ;;  %v4305_v57 = vld [vmem:[#allocation3 + $0x160] sm:$0xff]  ;;  %v4310_v11 = vld [vmem:[#allocation3 + $0x1b8] sm:$0xff]  ;;  %v4318_v6 = vld [vmem:[#allocation3 + $0x228] sm:$0xff] }
 0x8a0   :  { %v4084_v8 = vadd.f32 %v4083_v21, %v4082_v63  ;;  %v4087_v33 = vsel %vm4081_vm5, %v4070_v48, 0.0  ;;  %4661 = vmatpush1.bf16.msra.mxu0 %v4297_v13  ;;  %v4309_v63 = vld [vmem:[#allocation3 + $0x1b0] sm:$0xff]  ;;  %v4311_v21 = vld [vmem:[#allocation3 + $0x1c0] sm:$0xff] }
 0x8a1   :  { %4784 = vmatpush1.bf16.msra.mxu1 %v4299_v7  ;;  %4662 = vmatprep.subr.bf16.mxu0 %v4304_v41  ;;  %v4315_v46 = vld [vmem:[#allocation3 + $0x210] sm:$0xff] }
 0x8a2   :  { %v4086_v1 = vadd.f32 %v4085_v36, %v4084_v8  ;;  %4785 = vmatprep.subr.bf16.mxu1 %v4306_v56  ;;  %v4321_v8 = vld [vmem:[#allocation3 + $0x270] sm:$0xff]  ;;  %v4330_v36 = vld [vmem:[#allocation3 + $0x2e8] sm:$0xff] }
 0x8a4   :  { %v4088_v45 = vadd.f32 %v4087_v33, %v4086_v1  ;;  %4663 = vmatpush1.bf16.msra.mxu0 %v4303_v10 }
 0x8a5   :  { %4786 = vmatpush1.bf16.msra.mxu1 %v4305_v57  ;;  %4664 = vmatprep.subr.bf16.mxu0 %v4310_v11 }
 0x8a8   :  { %4665 = vmatpush1.bf16.msra.mxu0 %v4309_v63 }
 0x954   :  { %v4000_v28 = vpop.f32.mrb[52].mxu1 }
 0x955   :  { %v7186_v35 = vadd.f32 %v4000_v28, %v3578_v62  ;;  %v4002_v14 = vpop.f32.mrb[53].mxu1  ;;  %v4312_v62 = vld [vmem:[#allocation3 + $0x1c8] sm:$0xff]  ;;  %v4317_v28 = vld [vmem:[#allocation3 + $0x220] sm:$0xff] }
 0x956   :  { %v7187_v50 = vadd.f32 %v4002_v14, %v3582_v2  ;;  %v4004_v34 = vpop.f32.mrb[54].mxu1  ;;  %4787 = vmatprep.subr.bf16.mxu1 %v4312_v62  ;;  %v4316_v2 = vld [vmem:[#allocation3 + $0x218] sm:$0xff]  ;;  %v4324_v14 = vld [vmem:[#allocation3 + $0x288] sm:$0xff] }
 0x957   :  { %v4017_v4 = vrot.slane %v7186_v35, 1  ;;  %v4005_v42 = vpop.f32.mrb[55].mxu1  ;;  %v8274_v31 = vadd.f32 %v7186_v35, %v7839_v3  ;;  %4788 = vmatpush1.bf16.msra.mxu1 %v4311_v21  ;;  %4666 = vmatprep.subr.bf16.mxu0 %v4316_v2  ;;  %v4322_v35 = vld [vmem:[#allocation3 + $0x278] sm:$0xff] }
 0x958   :  { %v4018_v55 = vrot.slane %v7187_v50, 1  ;;  %v8278_v12 = vadd.f32 %v7187_v50, %v8792_v49  ;;  %4789 = vmatprep.subr.bf16.mxu1 %v4318_v6  ;;  %4667 = vmatpush1.bf16.msra.mxu0 %v4315_v46  ;;  %v4323_v50 = vld [vmem:[#allocation3 + $0x280] sm:$0xff]  ;;  %v4328_v34 = vld [vmem:[#allocation3 + $0x2d8] sm:$0xff] }
 0x959   :  { %v8267_v22 = vadd.f32 %v4017_v4, %v7851_v15  ;;  %4668 = vmatprep.subr.bf16.mxu0 %v4322_v35  ;;  %v4327_v4 = vld [vmem:[#allocation3 + $0x2d0] sm:$0xff]  ;;  %v4329_v42 = vld [vmem:[#allocation3 + $0x2e0] sm:$0xff]  ;;  %v4334_v35 = vld [vmem:[#allocation3 + $0x338] sm:$0xff] }
 0x95a   :  { %v8270_v32 = vadd.f32 %v4018_v55, %v7853_v16 }
 0x95b   :  { %v4071_v37 = vrot.slane %v8267_v22, 7  ;;  %4790 = vmatpush1.bf16.msra.mxu1 %v4317_v28 }
 0x95c   :  { %v4073_v39 = vrot.slane %v8270_v32, 7  ;;  %4791 = vmatprep.subr.bf16.mxu1 %v4324_v14  ;;  %4669 = vmatpush1.bf16.msra.mxu0 %v4321_v8  ;;  %v4336_v14 = vld [vmem:[#allocation3 + $0x348] sm:$0xff]  ;;  %v4333_v8 = vld [vmem:[#allocation3 + $0x330] sm:$0xff] }
 0x95d   :  { %v4072_v15 = vsel %vm3614_vm4, %v4071_v37, %v8274_v31  ;;  %4670 = vmatprep.subr.bf16.mxu0 %v4328_v34  ;;  %v4340_v34 = vld [vmem:[#allocation3 + $0x398] sm:$0xff] }
 0x95e   :  { %v4074_v16 = vsel %vm3614_vm4, %v4073_v39, %v8278_v12  ;;  %v4089_v0 = vsel %vm4081_vm5, %v4072_v15, 0.0 }
 0x95f   :  { %v4090_v17 = vadd.f32 %v4089_v0, %v4088_v45  ;;  %v4091_v3 = vsel %vm4081_vm5, %v4074_v16, 0.0  ;;  %4792 = vmatpush1.bf16.msra.mxu1 %v4323_v50  ;;  %v4335_v50 = vld [vmem:[#allocation3 + $0x340] sm:$0xff] }
 0x960   :  { %4793 = vmatprep.subr.bf16.mxu1 %v4330_v36  ;;  %4671 = vmatpush1.bf16.msra.mxu0 %v4327_v4  ;;  %v4342_v36 = vld [vmem:[#allocation3 + $0x3a8] sm:$0xff]  ;;  %v4339_v4 = vld [vmem:[#allocation3 + $0x390] sm:$0xff] }
 0x961   :  { %v4092_v54 = vadd.f32 %v4091_v3, %v4090_v17  ;;  %4672 = vmatprep.subr.bf16.mxu0 %v4334_v35 }
 0x963   :  { %4093 = vadd.xlane.f32.xlu0 %v4092_v54  ;;  %4794 = vmatpush1.bf16.msra.mxu1 %v4329_v42  ;;  %v4341_v42 = vld [vmem:[#allocation3 + $0x3a0] sm:$0xff] }
 0x964   :  { %4795 = vmatprep.subr.bf16.mxu1 %v4336_v14  ;;  %4673 = vmatpush1.bf16.msra.mxu0 %v4333_v8 }
 0x965   :  { %4674 = vmatprep.subr.bf16.mxu0 %v4340_v34 }
 0x967   :  { %4796 = vmatpush1.bf16.msra.mxu1 %v4335_v50 }
 0x968   :  { %4797 = vmatprep.subr.bf16.mxu1 %v4342_v36  ;;  %4675 = vmatpush1.bf16.msra.mxu0 %v4339_v4 }
 0x96b   :  { %4798 = vmatpush1.bf16.msra.mxu1 %v4341_v42 }
 0x9f0   :  { %v4094_v48 = vpop.xlane.xlu0 %4093 }
 0x9f1   :  { %v4096_v55 = vmul.f32 0.0013020834, %v4094_v48  ;;  %v4346_v48 = vld [vmem:[#allocation3 + $0x3f8] sm:$0xff] }
 0x9f2   :  { %4676 = vmatprep.subr.bf16.mxu0 %v4346_v48 }
 0x9f3   :  { %v4098_v1 = vrot.slane %v4096_v55, 1  ;;  %v8288_v33 = vsub.f32 %v8237_v5, %v4096_v55  ;;  %v8291_v37 = vsub.f32 %v8240_v52, %v4096_v55  ;;  %v8294_v49 = vsub.f32 %v8243_v9, %v4096_v55 }
 0x9f4   :  { %v8315_v9 = vsub.f32 %v8260_v53, %v4096_v55  ;;  %v8339_v20 = vsub.f32 %v8278_v12, %v4096_v55 }
 0x9f5   :  { %v8297_v39 = vsub.f32 %v8226_v47, %v4098_v1  ;;  %v8300_v15 = vsub.f32 %v8229_v44, %v4098_v1  ;;  %v8303_v45 = vsub.f32 %v8234_v43, %v4098_v1  ;;  %v8306_v16 = vsub.f32 %v8251_v38, %v4098_v1 }
 0x9f6   :  { %v8309_v5 = vsub.f32 %v8267_v22, %v4098_v1  ;;  %v8312_v52 = vsub.f32 %v8270_v32, %v4098_v1  ;;  %v8318_v47 = vsub.f32 %v8274_v31, %v4096_v55  ;;  %v4113_v44 = vmul.f32 %v8288_v33, %v8288_v33  ;;  %v4348_v55 = vld [vmem:[#allocation3 + $0x408] sm:$0xff]  ;;  %v4345_v1 = vld [vmem:[#allocation3 + $0x3f0] sm:$0xff] }
 0x9f7   :  { %v4119_v43 = vmul.f32 %v8297_v39, %v8297_v39  ;;  %v4120_v38 = vmul.f32 %v8300_v15, %v8300_v15  ;;  %v4121_v22 = vmul.f32 %v8303_v45, %v8303_v45  ;;  %v4122_v32 = vmul.f32 %v8306_v16, %v8306_v16  ;;  %4799 = vmatprep.subr.bf16.mxu1 %v4348_v55 }
 0x9f8   :  { %v4114_v53 = vmul.f32 %v8291_v37, %v8291_v37  ;;  %v4115_v31 = vmul.f32 %v8294_v49, %v8294_v49  ;;  %v4123_v0 = vmul.f32 %v8309_v5, %v8309_v5  ;;  %v4124_v17 = vmul.f32 %v8312_v52, %v8312_v52  ;;  %4677 = vmatpush1.bf16.msra.mxu0 %v4345_v1 }
 0x9f9   :  { %v4137_v3 = vrot.slane %v4119_v43, 7  ;;  %v4139_v54 = vrot.slane %v4120_v38, 7  ;;  %v4141_v59 = vrot.slane %v4121_v22, 7  ;;  %v4143_v27 = vrot.slane %v4122_v32, 7  ;;  %v4352_v43 = vld [vmem:[#allocation3 + $0x458] sm:$0xff]  ;;  %v4354_v38 = vld [vmem:[#allocation3 + $0x468] sm:$0xff] }
 0x9fa   :  { %v4116_v25 = vmul.f32 %v8315_v9, %v8315_v9  ;;  %v4145_v29 = vrot.slane %v4123_v0, 7  ;;  %v4117_v13 = vmul.f32 %v8318_v47, %v8318_v47  ;;  %v4147_v7 = vrot.slane %v4124_v17, 7  ;;  %4678 = vmatprep.subr.bf16.mxu0 %v4352_v43  ;;  %v4351_v22 = vld [vmem:[#allocation3 + $0x450] sm:$0xff]  ;;  %v4353_v32 = vld [vmem:[#allocation3 + $0x460] sm:$0xff] }
 0x9fb   :  { %v4138_v60 = vsel %vm3614_vm4, %v4137_v3, %v4113_v44  ;;  %v4140_v19 = vsel %vm3614_vm4, %v4139_v54, %v4114_v53  ;;  %v4142_v30 = vsel %vm3614_vm4, %v4141_v59, %v4115_v31  ;;  %v4118_v10 = vmul.f32 %v8339_v20, %v8339_v20  ;;  %v4347_v44 = vld [vmem:[#allocation3 + $0x400] sm:$0xff]  ;;  %v4358_v53 = vld [vmem:[#allocation3 + $0x4b8] sm:$0xff]  ;;  %v4360_v31 = vld [vmem:[#allocation3 + $0x4c8] sm:$0xff] }
 0x9fc   :  { %v4155_v18 = vsel %vm4081_vm5, %v4138_v60, 0.0  ;;  %v4156_v58 = vsel %vm4081_vm5, %v4140_v19, 0.0  ;;  %v4144_v12 = vsel %vm3614_vm4, %v4143_v27, %v4116_v25  ;;  %v4158_v56 = vsel %vm4081_vm5, %v4142_v30, 0.0  ;;  %4800 = vmatpush1.bf16.msra.mxu1 %v4347_v44  ;;  %4679 = vmatpush1.bf16.msra.mxu0 %v4351_v22  ;;  %v4357_v0 = vld [vmem:[#allocation3 + $0x4b0] sm:$0xff]  ;;  %v4359_v17 = vld [vmem:[#allocation3 + $0x4c0] sm:$0xff]  ;;  %v4364_v3 = vld [vmem:[#allocation3 + $0x518] sm:$0xff] }
 0x9fd   :  { %v4157_v41 = vadd.f32 %v4156_v58, %v4155_v18  ;;  %v4146_v57 = vsel %vm3614_vm4, %v4145_v29, %v4117_v13  ;;  %v4160_v62 = vsel %vm4081_vm5, %v4144_v12, 0.0  ;;  %v4148_v63 = vsel %vm3614_vm4, %v4147_v7, %v4118_v10  ;;  %4801 = vmatprep.subr.bf16.mxu1 %v4354_v38  ;;  %4680 = vmatprep.subr.bf16.mxu0 %v4358_v53  ;;  %v4366_v54 = vld [vmem:[#allocation3 + $0x528] sm:$0xff]  ;;  %v4363_v59 = vld [vmem:[#allocation3 + $0x510] sm:$0xff]  ;;  %v4365_v27 = vld [vmem:[#allocation3 + $0x520] sm:$0xff] }
 0x9fe   :  { %v4162_v2 = vsel %vm4081_vm5, %v4146_v57, 0.0  ;;  %v4164_v46 = vsel %vm4081_vm5, %v4148_v63, 0.0  ;;  %v4370_v25 = vld [vmem:[#allocation3 + $0x578] sm:$0xff]  ;;  %v4372_v60 = vld [vmem:[#allocation3 + $0x588] sm:$0xff]  ;;  %v4369_v19 = vld [vmem:[#allocation3 + $0x570] sm:$0xff] }
 0x9ff   :  { %v4159_v11 = vadd.f32 %v4158_v56, %v4157_v41  ;;  %v4371_v30 = vld [vmem:[#allocation3 + $0x580] sm:$0xff]  ;;  %v4376_v29 = vld [vmem:[#allocation3 + $0x5d8] sm:$0xff]  ;;  %v4378_v18 = vld [vmem:[#allocation3 + $0x5e8] sm:$0xff] }
 0xa00   :  { %4802 = vmatpush1.bf16.msra.mxu1 %v4353_v32  ;;  %4681 = vmatpush1.bf16.msra.mxu0 %v4357_v0  ;;  %v4375_v58 = vld [vmem:[#allocation3 + $0x5d0] sm:$0xff]  ;;  %v4377_v13 = vld [vmem:[#allocation3 + $0x5e0] sm:$0xff]  ;;  %v4382_v12 = vld [vmem:[#allocation3 + $0x638] sm:$0xff] }
 0xa01   :  { %v4161_v21 = vadd.f32 %v4160_v62, %v4159_v11  ;;  %4803 = vmatprep.subr.bf16.mxu1 %v4360_v31  ;;  %4682 = vmatprep.subr.bf16.mxu0 %v4364_v3  ;;  %v4384_v7 = vld [vmem:[#allocation3 + $0x648] sm:$0xff] }
 0xa02   :  { %v4044_v57 = vld [vmem:[#allocation14 + $0x4] ss:$8 sm:$0xf]  ;;  %v4048_v62 = vld [vmem:[#allocation14 + $0x5] ss:$8 sm:$0xf] }
 0xa03   :  { %v4163_v6 = vadd.f32 %v4162_v2, %v4161_v21  ;;  %v4045_v11 = vld [vmem:[#allocation14 + $0x4] ss:$8 sm:$0x30]  ;;  %v4049_v63 = vld [vmem:[#allocation14 + $0x5] ss:$8 sm:$0x30] }
 0xa04   :  { %4804 = vmatpush1.bf16.msra.mxu1 %v4359_v17  ;;  %4683 = vmatpush1.bf16.msra.mxu0 %v4363_v59  ;;  %v4046_v21 = vor.u32 %v4045_v11, %v4044_v57  ;;  %v4050_v2 = vor.u32 %v4049_v63, %v4048_v62 }
 0xa05   :  { %v4165_v28 = vadd.f32 %v4164_v46, %v4163_v6  ;;  %4805 = vmatprep.subr.bf16.mxu1 %v4366_v54  ;;  %4684 = vmatprep.subr.bf16.mxu0 %v4370_v25 }
 0xa06   :  { %v4195_v6 = vrot.slane %v4046_v21, %v7963_v23  ;;  %v4191_v46 = vrot.slane %v4046_v21, %v7978_v51  ;;  %v4238_v35 = vrot.slane %v4050_v2, %v7963_v23  ;;  %v4234_v14 = vrot.slane %v4050_v2, %v7978_v51 }
 0xa07   :  { %4166 = vadd.xlane.f32.xlu0 %v4165_v28  ;;  %v4203_v28 = vrot.slane %v4046_v21, %v7987_v61  ;;  %v4246_v8 = vrot.slane %v4050_v2, %v7987_v61  ;;  %v4199_v50 = vrot.slane %v4046_v21, %v8007_v40  ;;  %v4242_v36 = vrot.slane %v4050_v2, %v8007_v40 }
 0xa08   :  { %4806 = vmatpush1.bf16.msra.mxu1 %v4365_v27  ;;  %4685 = vmatpush1.bf16.msra.mxu0 %v4369_v19  ;;  %v4211_v4 = vrot.slane %v4046_v21, %v8010_v26  ;;  %v4254_v42 = vrot.slane %v4050_v2, %v8010_v26  ;;  %v4207_v48 = vrot.slane %v4046_v21, %v8032_v24 }
 0xa09   :  { %4807 = vmatprep.subr.bf16.mxu1 %v4372_v60  ;;  %4686 = vmatprep.subr.bf16.mxu0 %v4376_v29  ;;  %v4250_v53 = vrot.slane %v4050_v2, %v8032_v24 }
 0xa0c   :  { %4808 = vmatpush1.bf16.msra.mxu1 %v4371_v30  ;;  %4687 = vmatpush1.bf16.msra.mxu0 %v4375_v58 }
 0xa0d   :  { %4809 = vmatprep.subr.bf16.mxu1 %v4378_v18  ;;  %4697 = vmatprep.subr.bf16.mxu0 %v4382_v12 }
 0xa10   :  { %4810 = vmatpush1.bf16.msra.mxu1 %v4377_v13 }
 0xa11   :  { %4820 = vmatprep.subr.bf16.mxu1 %v4384_v7 }
 0xa94   :  { %v4167_v41 = vpop.xlane.xlu0 %4166 }
 0xa95   :  { %v4168_v56 = vmul.f32 0.0013020834, %v4167_v41 }
 0xa97   :  { %v4169_v10 = vadd.f32 1e-05, %v4168_v56 }
 0xa99   :  { %7428 = vrsqrt.f32 %v4169_v10 }
 0xaa3   :  { %v7429_v34 = vpop.eup %7428 }
 0xaa4   :  { %v4172_v55 = vrot.slane %v7429_v34, 1  ;;  %v4176_v1 = vmul.f32 %v7429_v34, %v8291_v37  ;;  %v4175_v44 = vmul.f32 %v7429_v34, %v8288_v33  ;;  %v4178_v43 = vmul.f32 %v7429_v34, %v8315_v9 }
 0xaa5   :  { %v4177_v38 = vmul.f32 %v7429_v34, %v8294_v49  ;;  %v4180_v22 = vmul.f32 %v7429_v34, %v8339_v20  ;;  %v4179_v32 = vmul.f32 %v7429_v34, %v8318_v47 }
 0xaa6   :  { %v4182_v31 = vmul.f32 %v4172_v55, %v8300_v15  ;;  %v4219_v0 = vmul.f32 %v4195_v6, %v4176_v1  ;;  %v4181_v17 = vmul.f32 %v4172_v55, %v8297_v39  ;;  %v4218_v3 = vmul.f32 %v4191_v46, %v4175_v44 }
 0xaa7   :  { %v4184_v37 = vmul.f32 %v4172_v55, %v8306_v16  ;;  %v4221_v54 = vmul.f32 %v4203_v28, %v4178_v43  ;;  %v4183_v33 = vmul.f32 %v4172_v55, %v8303_v45  ;;  %v4220_v9 = vmul.f32 %v4199_v50, %v4177_v38 }
 0xaa8   :  { %v4225_v59 = vmul.f32 %v4195_v6, %v4182_v31  ;;  %v8381_v49 = vadd.f32 %v4238_v35, %v4219_v0  ;;  %v4224_v20 = vmul.f32 %v4191_v46, %v4181_v17  ;;  %v8383_v27 = vadd.f32 %v4234_v14, %v4218_v3  ;;  %v4383_v0 = vld [vmem:[#allocation3 + $0x640] sm:$0xff] }
 0xaa9   :  { %v4227_v47 = vmul.f32 %v4203_v28, %v4184_v37  ;;  %v8385_v25 = vadd.f32 %v4246_v8, %v4221_v54  ;;  %v4226_v15 = vmul.f32 %v4199_v50, %v4183_v33  ;;  %v8387_v60 = vadd.f32 %v4242_v36, %v4220_v9  ;;  %v4388_v37 = vld [vmem:[#allocation3 + $0x698] sm:$0xff]  ;;  %v4390_v54 = vld [vmem:[#allocation3 + $0x6a8] sm:$0xff] }
 0xaaa   :  { %v8389_v39 = vadd.f32 %v4238_v35, %v4225_v59  ;;  %v4274_v16 = vpack.c.bf16 %v8381_v49, %v8381_v49  ;;  %v8393_v19 = vadd.f32 %v4234_v14, %v4224_v20  ;;  %v4273_v45 = vpack.c.bf16 %v8383_v27, %v8383_v27  ;;  %v4389_v20 = vld [vmem:[#allocation3 + $0x6a0] sm:$0xff] }
 0xaab   :  { %v8397_v30 = vadd.f32 %v4246_v8, %v4227_v47  ;;  %v4276_v29 = vpack.c.bf16 %v8385_v25, %v8385_v25  ;;  %v8401_v18 = vadd.f32 %v4242_v36, %v4226_v15  ;;  %v4275_v58 = vpack.c.bf16 %v8387_v60, %v8387_v60 }
 0xaac   :  { %v4280_v13 = vpack.c.bf16 %v8389_v39, %v8389_v39  ;;  %v4621_v12 = vunpack.c.l.b16 %v4274_v16  ;;  %v4279_v7 = vpack.c.bf16 %v8393_v19, %v8393_v19  ;;  %v4620_v41 = vunpack.c.l.b16 %v4273_v45  ;;  %v4394_v16 = vld [vmem:[#allocation3 + $0x6f8] sm:$0xff]  ;;  %v4396_v45 = vld [vmem:[#allocation3 + $0x708] sm:$0xff] }
 0xaad   :  { %v4282_v56 = vpack.c.bf16 %v8397_v30, %v8397_v30  ;;  %v4623_v10 = vunpack.c.l.b16 %v4276_v29  ;;  %v4281_v57 = vpack.c.bf16 %v8401_v18, %v8401_v18  ;;  %v4622_v11 = vunpack.c.l.b16 %v4275_v58 }
 0xaae   :  { %v4627_v62 = vunpack.c.l.b16 %v4280_v13  ;;  %v4626_v63 = vunpack.c.l.b16 %v4279_v7  ;;  %v4186_v21 = vmul.f32 %v4172_v55, %v8312_v52  ;;  %v4223_v2 = vmul.f32 %v4211_v4, %v4180_v22  ;;  %v4393_v7 = vld [vmem:[#allocation3 + $0x6f0] sm:$0xff] }
 0xaaf   :  { %v4629_v6 = vunpack.c.l.b16 %v4282_v56  ;;  %v4628_v46 = vunpack.c.l.b16 %v4281_v57  ;;  %v4185_v28 = vmul.f32 %v4172_v55, %v8309_v5  ;;  %v4222_v35 = vmul.f32 %v4207_v48, %v4179_v32  ;;  %v4381_v32 = vld [vmem:[#allocation3 + $0x630] sm:$0xff]  ;;  %v4400_v56 = vld [vmem:[#allocation3 + $0x758] sm:$0xff] }
 0xab0   :  { %v4634_v14 = vrot.slane %v4627_v62, 7  ;;  %v4632_v8 = vrot.slane %v4626_v63, 7  ;;  %v4229_v50 = vmul.f32 %v4211_v4, %v4186_v21  ;;  %v8415_v34 = vadd.f32 %v4254_v42, %v4223_v2  ;;  %v4401_v62 = vld [vmem:[#allocation3 + $0x760] sm:$0xff]  ;;  %v4406_v63 = vld [vmem:[#allocation3 + $0x7b8] sm:$0xff]  ;;  %v4408_v21 = vld [vmem:[#allocation3 + $0x7c8] sm:$0xff] }
 0xab1   :  { %v4638_v36 = vrot.slane %v4629_v6, 7  ;;  %v4636_v1 = vrot.slane %v4628_v46, 7  ;;  %v4228_v44 = vmul.f32 %v4207_v48, %v4185_v28  ;;  %v8417_v43 = vadd.f32 %v4250_v53, %v4222_v35  ;;  %v4405_v2 = vld [vmem:[#allocation3 + $0x7b0] sm:$0xff]  ;;  %v4407_v6 = vld [vmem:[#allocation3 + $0x7c0] sm:$0xff]  ;;  %v4412_v46 = vld [vmem:[#allocation3 + $0x818] sm:$0xff] }
 0xab2   :  { %v4635_v38 = vsel %vm3614_vm4, %v4634_v14, %v4621_v12  ;;  %v4633_v52 = vsel %vm3614_vm4, %v4632_v8, %v4620_v41  ;;  %v8421_v22 = vadd.f32 %v4254_v42, %v4229_v50  ;;  %v4278_v48 = vpack.c.bf16 %v8415_v34, %v8415_v34  ;;  %v4395_v41 = vld [vmem:[#allocation3 + $0x700] sm:$0xff]  ;;  %v4414_v28 = vld [vmem:[#allocation3 + $0x828] sm:$0xff]  ;;  %v4411_v35 = vld [vmem:[#allocation3 + $0x810] sm:$0xff] }
 0xab3   :  { %v8423_v31 = vpack.c.b16 %v4635_v38, %v4635_v38  ;;  %v8425_v5 = vpack.c.b16 %v4633_v52, %v4633_v52  ;;  %v4639_v55 = vsel %vm3614_vm4, %v4638_v36, %v4623_v10  ;;  %v8429_v4 = vsel %vm3614_vm4, %v4636_v1, %v4622_v11  ;;  %v4402_v10 = vld [vmem:[#allocation3 + $0x768] sm:$0xff]  ;;  %v4399_v11 = vld [vmem:[#allocation3 + $0x750] sm:$0xff]  ;;  %v4413_v14 = vld [vmem:[#allocation3 + $0x820] sm:$0xff] }
 0xab4   :  { %v4284_v17 = vpack.c.bf16 %v8421_v22, %v8421_v22  ;;  %v8437_v42 = vadd.f32 %v4250_v53, %v4228_v44  ;;  %v8441_v3 = vpack.c.b16 %v4639_v55, %v4639_v55  ;;  %v4277_v9 = vpack.c.bf16 %v8417_v43, %v8417_v43  ;;  %v4387_v53 = vld [vmem:[#allocation3 + $0x690] sm:$0xff]  ;;  %v4418_v8 = vld [vmem:[#allocation3 + $0x878] sm:$0xff]  ;;  %v4420_v50 = vld [vmem:[#allocation3 + $0x888] sm:$0xff] }
 0xab5   :  { %4688 = vmatprep.mubr.bf16.mxu0 %v8423_v31  ;;  %4811 = vmatprep.mubr.bf16.mxu1 %v8423_v31  ;;  %v4625_v47 = vunpack.c.l.b16 %v4278_v48  ;;  %v4417_v36 = vld [vmem:[#allocation3 + $0x870] sm:$0xff]  ;;  %v4419_v1 = vld [vmem:[#allocation3 + $0x880] sm:$0xff]  ;;  %v4424_v44 = vld [vmem:[#allocation3 + $0x8d8] sm:$0xff] }
 0xab6   :  { %4689 = vmatmul.mubr.bf16.vlgmr.msra.gmra.mrb[24].mxu0 %v8425_v5  ;;  %4812 = vmatmul.mubr.bf16.vlgmr.msra.gmra.mrb[56].mxu1 %v8425_v5  ;;  %v4631_v33 = vunpack.c.l.b16 %v4284_v17  ;;  %v4283_v59 = vpack.c.bf16 %v8437_v42, %v8437_v42  ;;  %v4624_v13 = vunpack.c.l.b16 %v4277_v9  ;;  %v4426_v38 = vld [vmem:[#allocation3 + $0x8e8] sm:$0xff]  ;;  %v4423_v52 = vld [vmem:[#allocation3 + $0x8d0] sm:$0xff]  ;;  %v4425_v55 = vld [vmem:[#allocation3 + $0x8e0] sm:$0xff] }
 0xab7   :  { %4698 = vmatpush1.bf16.msra.mxu0 %v4381_v32  ;;  %4821 = vmatpush1.bf16.msra.mxu1 %v4383_v0  ;;  %v4430_v32 = vld [vmem:[#allocation3 + $0x938] sm:$0xff]  ;;  %v4432_v0 = vld [vmem:[#allocation3 + $0x948] sm:$0xff]  ;;  %v4429_v48 = vld [vmem:[#allocation3 + $0x930] sm:$0xff] }
 0xab8   :  { %4729 = vmatprep.mubr.bf16.mxu0 %v8441_v3  ;;  %4852 = vmatprep.mubr.bf16.mxu1 %v8441_v3  ;;  %v4642_v15 = vrot.slane %v4631_v33, 7  ;;  %v4630_v29 = vunpack.c.l.b16 %v4283_v59  ;;  %v4431_v17 = vld [vmem:[#allocation3 + $0x940] sm:$0xff]  ;;  %v4435_v33 = vld [vmem:[#allocation3 + $0x990] sm:$0xff]  ;;  %v4442_v59 = vld [vmem:[#allocation3 + $0x9f8] sm:$0xff] }
 0xab9   :  { %4699 = vmatprep.subr.bf16.mxu0 %v4388_v37  ;;  %4822 = vmatprep.subr.bf16.mxu1 %v4390_v54  ;;  %v4436_v37 = vld [vmem:[#allocation3 + $0x998] sm:$0xff]  ;;  %v4438_v54 = vld [vmem:[#allocation3 + $0x9a8] sm:$0xff]  ;;  %v4437_v9 = vld [vmem:[#allocation3 + $0x9a0] sm:$0xff] }
 0xaba   :  { %v8450_v58 = vsel %vm3614_vm4, %v4642_v15, %v4625_v47  ;;  %v4640_v12 = vrot.slane %v4630_v29, 7  ;;  %v4443_v47 = vld [vmem:[#allocation3 + $0xa00] sm:$0xff]  ;;  %v4448_v15 = vld [vmem:[#allocation3 + $0xa58] sm:$0xff] }
 0xabb   :  { %4700 = vmatpush1.bf16.msra.mxu0 %v4387_v53  ;;  %4823 = vmatpush1.bf16.msra.mxu1 %v4389_v20  ;;  %v4444_v53 = vld [vmem:[#allocation3 + $0xa08] sm:$0xff]  ;;  %v4441_v20 = vld [vmem:[#allocation3 + $0x9f0] sm:$0xff]  ;;  %v4449_v29 = vld [vmem:[#allocation3 + $0xa60] sm:$0xff] }
 0xabc   :  { %4701 = vmatprep.subr.bf16.mxu0 %v4394_v16  ;;  %4824 = vmatprep.subr.bf16.mxu1 %v4396_v45  ;;  %v8453_v57 = vsel %vm3614_vm4, %v4640_v12, %v4624_v13  ;;  %v4450_v16 = vld [vmem:[#allocation3 + $0xa68] sm:$0xff]  ;;  %v4447_v45 = vld [vmem:[#allocation3 + $0xa50] sm:$0xff]  ;;  %v4454_v13 = vld [vmem:[#allocation3 + $0xab8] sm:$0xff] }
 0xabd   :  { %v4456_v12 = vld [vmem:[#allocation3 + $0xac8] sm:$0xff] }
 0xabf   :  { %4702 = vmatpush1.bf16.msra.mxu0 %v4393_v7  ;;  %4825 = vmatpush1.bf16.msra.mxu1 %v4395_v41  ;;  %v4453_v7 = vld [vmem:[#allocation3 + $0xab0] sm:$0xff]  ;;  %v4455_v41 = vld [vmem:[#allocation3 + $0xac0] sm:$0xff] }
 0xac0   :  { %4703 = vmatprep.subr.bf16.mxu0 %v4400_v56  ;;  %4826 = vmatprep.subr.bf16.mxu1 %v4402_v10  ;;  %v4460_v56 = vld [vmem:[#allocation3 + $0xb18] sm:$0xff]  ;;  %v4462_v10 = vld [vmem:[#allocation3 + $0xb28] sm:$0xff] }
 0xac3   :  { %4704 = vmatpush1.bf16.msra.mxu0 %v4399_v11  ;;  %4827 = vmatpush1.bf16.msra.mxu1 %v4401_v62  ;;  %v4459_v11 = vld [vmem:[#allocation3 + $0xb10] sm:$0xff]  ;;  %v4461_v62 = vld [vmem:[#allocation3 + $0xb20] sm:$0xff] }
 0xac4   :  { %4705 = vmatprep.subr.bf16.mxu0 %v4406_v63  ;;  %4828 = vmatprep.subr.bf16.mxu1 %v4408_v21  ;;  %v4466_v63 = vld [vmem:[#allocation3 + $0xb78] sm:$0xff]  ;;  %v4468_v21 = vld [vmem:[#allocation3 + $0xb88] sm:$0xff] }
 0xac7   :  { %4706 = vmatpush1.bf16.msra.mxu0 %v4405_v2  ;;  %4829 = vmatpush1.bf16.msra.mxu1 %v4407_v6  ;;  %v4465_v2 = vld [vmem:[#allocation3 + $0xb70] sm:$0xff]  ;;  %v4467_v6 = vld [vmem:[#allocation3 + $0xb80] sm:$0xff] }
 0xac8   :  { %4707 = vmatprep.subr.bf16.mxu0 %v4412_v46  ;;  %4830 = vmatprep.subr.bf16.mxu1 %v4414_v28  ;;  %v4472_v46 = vld [vmem:[#allocation3 + $0xbd8] sm:$0xff]  ;;  %v4474_v28 = vld [vmem:[#allocation3 + $0xbe8] sm:$0xff] }
 0xacb   :  { %4708 = vmatpush1.bf16.msra.mxu0 %v4411_v35  ;;  %4831 = vmatpush1.bf16.msra.mxu1 %v4413_v14  ;;  %v4471_v35 = vld [vmem:[#allocation3 + $0xbd0] sm:$0xff]  ;;  %v4473_v14 = vld [vmem:[#allocation3 + $0xbe0] sm:$0xff] }
 0xacc   :  { %4709 = vmatprep.subr.bf16.mxu0 %v4418_v8  ;;  %4832 = vmatprep.subr.bf16.mxu1 %v4420_v50  ;;  %v4478_v8 = vld [vmem:[#allocation3 + $0xc38] sm:$0xff]  ;;  %v4480_v50 = vld [vmem:[#allocation3 + $0xc48] sm:$0xff] }
 0xacf   :  { %4710 = vmatpush1.bf16.msra.mxu0 %v4417_v36  ;;  %4833 = vmatpush1.bf16.msra.mxu1 %v4419_v1  ;;  %v8457_v36 = vpack.c.b16 %v8429_v4, %v8429_v4  ;;  %v4477_v1 = vld [vmem:[#allocation3 + $0xc30] sm:$0xff] }
 0xad0   :  { %4711 = vmatprep.subr.bf16.mxu0 %v4424_v44  ;;  %4834 = vmatprep.subr.bf16.mxu1 %v4426_v38  ;;  %v8461_v44 = vpack.c.b16 %v8450_v58, %v8450_v58  ;;  %v4479_v38 = vld [vmem:[#allocation3 + $0xc40] sm:$0xff]  ;;  %v4483_v4 = vld [vmem:[#allocation3 + $0xc90] sm:$0xff]  ;;  %v4492_v58 = vld [vmem:[#allocation3 + $0xd08] sm:$0xff] }
 0xad3   :  { %4712 = vmatpush1.bf16.msra.mxu0 %v4423_v52  ;;  %4835 = vmatpush1.bf16.msra.mxu1 %v4425_v55  ;;  %v4484_v52 = vld [vmem:[#allocation3 + $0xc98] sm:$0xff]  ;;  %v4486_v55 = vld [vmem:[#allocation3 + $0xca8] sm:$0xff] }
 0xad4   :  { %4713 = vmatprep.subr.bf16.mxu0 %v4430_v32  ;;  %4836 = vmatprep.subr.bf16.mxu1 %v4432_v0  ;;  %v4485_v32 = vld [vmem:[#allocation3 + $0xca0] sm:$0xff]  ;;  %v4490_v0 = vld [vmem:[#allocation3 + $0xcf8] sm:$0xff] }
 0xad7   :  { %4714 = vmatpush1.bf16.msra.mxu0 %v4429_v48  ;;  %4837 = vmatpush1.bf16.msra.mxu1 %v4431_v17  ;;  %v4489_v48 = vld [vmem:[#allocation3 + $0xcf0] sm:$0xff]  ;;  %v4491_v17 = vld [vmem:[#allocation3 + $0xd00] sm:$0xff] }
 0xad8   :  { %4715 = vmatprep.subr.bf16.mxu0 %v4436_v37  ;;  %4838 = vmatprep.subr.bf16.mxu1 %v4438_v54  ;;  %v4496_v37 = vld [vmem:[#allocation3 + $0xd58] sm:$0xff]  ;;  %v4498_v54 = vld [vmem:[#allocation3 + $0xd68] sm:$0xff] }
 0xadb   :  { %4716 = vmatpush1.bf16.msra.mxu0 %v4435_v33  ;;  %4839 = vmatpush1.bf16.msra.mxu1 %v4437_v9  ;;  %v4495_v33 = vld [vmem:[#allocation3 + $0xd50] sm:$0xff]  ;;  %v4497_v9 = vld [vmem:[#allocation3 + $0xd60] sm:$0xff] }
 0xadc   :  { %4717 = vmatprep.subr.bf16.mxu0 %v4442_v59  ;;  %4840 = vmatprep.subr.bf16.mxu1 %v4444_v53  ;;  %v4502_v59 = vld [vmem:[#allocation3 + $0xdb8] sm:$0xff]  ;;  %v4504_v53 = vld [vmem:[#allocation3 + $0xdc8] sm:$0xff] }
 0xadf   :  { %4718 = vmatpush1.bf16.msra.mxu0 %v4441_v20  ;;  %4841 = vmatpush1.bf16.msra.mxu1 %v4443_v47  ;;  %v4501_v20 = vld [vmem:[#allocation3 + $0xdb0] sm:$0xff]  ;;  %v4503_v47 = vld [vmem:[#allocation3 + $0xdc0] sm:$0xff] }
 0xae0   :  { %4719 = vmatprep.subr.bf16.mxu0 %v4448_v15  ;;  %4842 = vmatprep.subr.bf16.mxu1 %v4450_v16  ;;  %v4508_v15 = vld [vmem:[#allocation3 + $0xe18] sm:$0xff]  ;;  %v4510_v16 = vld [vmem:[#allocation3 + $0xe28] sm:$0xff] }
 0xae3   :  { %4720 = vmatpush1.bf16.msra.mxu0 %v4447_v45  ;;  %4843 = vmatpush1.bf16.msra.mxu1 %v4449_v29  ;;  %v4507_v45 = vld [vmem:[#allocation3 + $0xe10] sm:$0xff]  ;;  %v4509_v29 = vld [vmem:[#allocation3 + $0xe20] sm:$0xff] }
 0xae4   :  { %4721 = vmatprep.subr.bf16.mxu0 %v4454_v13  ;;  %4844 = vmatprep.subr.bf16.mxu1 %v4456_v12  ;;  %v4514_v13 = vld [vmem:[#allocation3 + $0xe78] sm:$0xff]  ;;  %v4516_v12 = vld [vmem:[#allocation3 + $0xe88] sm:$0xff] }
 0xae7   :  { %4722 = vmatpush1.bf16.msra.mxu0 %v4453_v7  ;;  %4845 = vmatpush1.bf16.msra.mxu1 %v4455_v41  ;;  %v4513_v7 = vld [vmem:[#allocation3 + $0xe70] sm:$0xff]  ;;  %v4515_v41 = vld [vmem:[#allocation3 + $0xe80] sm:$0xff] }
 0xae8   :  { %4723 = vmatprep.subr.bf16.mxu0 %v4460_v56  ;;  %4846 = vmatprep.subr.bf16.mxu1 %v4462_v10  ;;  %v4520_v56 = vld [vmem:[#allocation3 + $0xed8] sm:$0xff]  ;;  %v4522_v10 = vld [vmem:[#allocation3 + $0xee8] sm:$0xff] }
 0xaeb   :  { %4724 = vmatpush1.bf16.msra.mxu0 %v4459_v11  ;;  %4847 = vmatpush1.bf16.msra.mxu1 %v4461_v62  ;;  %v4519_v11 = vld [vmem:[#allocation3 + $0xed0] sm:$0xff]  ;;  %v4521_v62 = vld [vmem:[#allocation3 + $0xee0] sm:$0xff] }
 0xaec   :  { %4725 = vmatprep.subr.bf16.mxu0 %v4466_v63  ;;  %4848 = vmatprep.subr.bf16.mxu1 %v4468_v21  ;;  %v4526_v63 = vld [vmem:[#allocation3 + $0xf38] sm:$0xff]  ;;  %v4528_v21 = vld [vmem:[#allocation3 + $0xf48] sm:$0xff] }
 0xaef   :  { %4726 = vmatpush1.bf16.msra.mxu0 %v4465_v2  ;;  %4849 = vmatpush1.bf16.msra.mxu1 %v4467_v6  ;;  %v4525_v2 = vld [vmem:[#allocation3 + $0xf30] sm:$0xff]  ;;  %v4527_v6 = vld [vmem:[#allocation3 + $0xf40] sm:$0xff] }
 0xaf0   :  { %4727 = vmatprep.subr.bf16.mxu0 %v4472_v46  ;;  %4850 = vmatprep.subr.bf16.mxu1 %v4474_v28  ;;  %v4532_v46 = vld [vmem:[#allocation3 + $0xf98] sm:$0xff]  ;;  %v4534_v28 = vld [vmem:[#allocation3 + $0xfa8] sm:$0xff] }
 0xaf3   :  { %4728 = vmatpush1.bf16.msra.mxu0 %v4471_v35  ;;  %4851 = vmatpush1.bf16.msra.mxu1 %v4473_v14  ;;  %v4531_v35 = vld [vmem:[#allocation3 + $0xf90] sm:$0xff]  ;;  %v4533_v14 = vld [vmem:[#allocation3 + $0xfa0] sm:$0xff] }
 0xaf4   :  { %4738 = vmatprep.subr.bf16.mxu0 %v4478_v8  ;;  %4861 = vmatprep.subr.bf16.mxu1 %v4480_v50  ;;  %v4538_v8 = vld [vmem:[#allocation3 + $0xff8] sm:$0xff]  ;;  %v4540_v50 = vld [vmem:[#allocation3 + $0x1008] sm:$0xff] }
 0xaf6   :  { %4730 = vmatmul.mubr.bf16.vlgmr.msra.gmra.mrb[24].mxu0 %v8457_v36  ;;  %4853 = vmatmul.mubr.bf16.vlgmr.msra.gmra.mrb[56].mxu1 %v8457_v36 }
 0xaf7   :  { %4739 = vmatpush1.bf16.msra.mxu0 %v4477_v1  ;;  %4770 = vmatprep.mubr.bf16.mxu0 %v8461_v44  ;;  %v4537_v1 = vld [vmem:[#allocation3 + $0xff0] sm:$0xff] }
 0xaf8   :  { %4862 = vmatpush1.bf16.msra.mxu1 %v4479_v38  ;;  %4893 = vmatprep.mubr.bf16.mxu1 %v8461_v44  ;;  %v4539_v38 = vld [vmem:[#allocation3 + $0x1000] sm:$0xff] }
 0xaf9   :  { %4740 = vmatprep.subr.bf16.mxu0 %v4484_v52  ;;  %4863 = vmatprep.subr.bf16.mxu1 %v4486_v55  ;;  %v4544_v52 = vld [vmem:[#allocation3 + $0x1058] sm:$0xff]  ;;  %v4546_v55 = vld [vmem:[#allocation3 + $0x1068] sm:$0xff] }
 0xafb   :  { %4741 = vmatpush1.bf16.msra.mxu0 %v4483_v4  ;;  %v4543_v4 = vld [vmem:[#allocation3 + $0x1050] sm:$0xff] }
 0xafc   :  { %4864 = vmatpush1.bf16.msra.mxu1 %v4485_v32  ;;  %4742 = vmatprep.subr.bf16.mxu0 %v4490_v0  ;;  %v4545_v32 = vld [vmem:[#allocation3 + $0x1060] sm:$0xff]  ;;  %v4550_v0 = vld [vmem:[#allocation3 + $0x10b8] sm:$0xff] }
 0xafd   :  { %4865 = vmatprep.subr.bf16.mxu1 %v4492_v58  ;;  %v4552_v58 = vld [vmem:[#allocation3 + $0x10c8] sm:$0xff] }
 0xaff   :  { %4743 = vmatpush1.bf16.msra.mxu0 %v4489_v48  ;;  %v4549_v48 = vld [vmem:[#allocation3 + $0x10b0] sm:$0xff] }
 0xb00   :  { %4866 = vmatpush1.bf16.msra.mxu1 %v4491_v17  ;;  %4744 = vmatprep.subr.bf16.mxu0 %v4496_v37  ;;  %v4551_v17 = vld [vmem:[#allocation3 + $0x10c0] sm:$0xff]  ;;  %v4556_v37 = vld [vmem:[#allocation3 + $0x1118] sm:$0xff] }
 0xb01   :  { %4867 = vmatprep.subr.bf16.mxu1 %v4498_v54  ;;  %v4558_v54 = vld [vmem:[#allocation3 + $0x1128] sm:$0xff] }
 0xb03   :  { %4745 = vmatpush1.bf16.msra.mxu0 %v4495_v33  ;;  %v4555_v33 = vld [vmem:[#allocation3 + $0x1110] sm:$0xff] }
 0xb04   :  { %4868 = vmatpush1.bf16.msra.mxu1 %v4497_v9  ;;  %4746 = vmatprep.subr.bf16.mxu0 %v4502_v59  ;;  %v4557_v9 = vld [vmem:[#allocation3 + $0x1120] sm:$0xff]  ;;  %v4562_v59 = vld [vmem:[#allocation3 + $0x1178] sm:$0xff] }
 0xb05   :  { %4869 = vmatprep.subr.bf16.mxu1 %v4504_v53  ;;  %v4564_v53 = vld [vmem:[#allocation3 + $0x1188] sm:$0xff] }
 0xb07   :  { %4747 = vmatpush1.bf16.msra.mxu0 %v4501_v20  ;;  %v4561_v20 = vld [vmem:[#allocation3 + $0x1170] sm:$0xff] }
 0xb08   :  { %4870 = vmatpush1.bf16.msra.mxu1 %v4503_v47  ;;  %4748 = vmatprep.subr.bf16.mxu0 %v4508_v15  ;;  %v4563_v47 = vld [vmem:[#allocation3 + $0x1180] sm:$0xff]  ;;  %v4568_v15 = vld [vmem:[#allocation3 + $0x11d8] sm:$0xff] }
 0xb09   :  { %4871 = vmatprep.subr.bf16.mxu1 %v4510_v16  ;;  %v4570_v16 = vld [vmem:[#allocation3 + $0x11e8] sm:$0xff] }
 0xb0b   :  { %4749 = vmatpush1.bf16.msra.mxu0 %v4507_v45  ;;  %v4567_v45 = vld [vmem:[#allocation3 + $0x11d0] sm:$0xff] }
 0xb0c   :  { %4872 = vmatpush1.bf16.msra.mxu1 %v4509_v29  ;;  %4750 = vmatprep.subr.bf16.mxu0 %v4514_v13  ;;  %v4569_v29 = vld [vmem:[#allocation3 + $0x11e0] sm:$0xff]  ;;  %v4290_v13 = vld [vmem:[#allocation3 + $0x58] sm:$0xff] }
 0xb0d   :  { %4873 = vmatprep.subr.bf16.mxu1 %v4516_v12  ;;  %v8469_v12 = vpack.c.b16 %v8453_v57, %v8453_v57  ;;  %v4307_v57 = vld [vmem:[#allocation3 + $0x170] sm:$0xff] }
 0xb0f   :  { %4751 = vmatpush1.bf16.msra.mxu0 %v4513_v7  ;;  %v4289_v7 = vld [vmem:[#allocation3 + $0x50] sm:$0xff] }
 0xb10   :  { %4874 = vmatpush1.bf16.msra.mxu1 %v4515_v41  ;;  %4752 = vmatprep.subr.bf16.mxu0 %v4520_v56  ;;  %v4296_v41 = vld [vmem:[#allocation3 + $0xb8] sm:$0xff]  ;;  %v4295_v56 = vld [vmem:[#allocation3 + $0xb0] sm:$0xff] }
 0xb11   :  { %4875 = vmatprep.subr.bf16.mxu1 %v4522_v10  ;;  %v4302_v10 = vld [vmem:[#allocation3 + $0x118] sm:$0xff] }
 0xb13   :  { %4753 = vmatpush1.bf16.msra.mxu0 %v4519_v11  ;;  %v4301_v11 = vld [vmem:[#allocation3 + $0x110] sm:$0xff] }
 0xb14   :  { %4876 = vmatpush1.bf16.msra.mxu1 %v4521_v62  ;;  %4754 = vmatprep.subr.bf16.mxu0 %v4526_v63  ;;  %v4308_v62 = vld [vmem:[#allocation3 + $0x178] sm:$0xff] }
 0xb15   :  { %4877 = vmatprep.subr.bf16.mxu1 %v4528_v21  ;;  %v4314_v63 = vld [vmem:[#allocation3 + $0x1d8] sm:$0xff]  ;;  %v4313_v21 = vld [vmem:[#allocation3 + $0x1d0] sm:$0xff] }
 0xb17   :  { %4755 = vmatpush1.bf16.msra.mxu0 %v4525_v2  ;;  %v4320_v2 = vld [vmem:[#allocation3 + $0x238] sm:$0xff] }
 0xb18   :  { %4878 = vmatpush1.bf16.msra.mxu1 %v4527_v6  ;;  %4756 = vmatprep.subr.bf16.mxu0 %v4532_v46  ;;  %v4319_v6 = vld [vmem:[#allocation3 + $0x230] sm:$0xff]  ;;  %v4326_v46 = vld [vmem:[#allocation3 + $0x298] sm:$0xff] }
 0xb19   :  { %4879 = vmatprep.subr.bf16.mxu1 %v4534_v28  ;;  %v4332_v28 = vld [vmem:[#allocation3 + $0x2f8] sm:$0xff] }
 0xb1b   :  { %4757 = vmatpush1.bf16.msra.mxu0 %v4531_v35  ;;  %v4331_v35 = vld [vmem:[#allocation3 + $0x2f0] sm:$0xff] }
 0xb1c   :  { %4880 = vmatpush1.bf16.msra.mxu1 %v4533_v14  ;;  %4758 = vmatprep.subr.bf16.mxu0 %v4538_v8  ;;  %v4338_v14 = vld [vmem:[#allocation3 + $0x358] sm:$0xff]  ;;  %v4337_v8 = vld [vmem:[#allocation3 + $0x350] sm:$0xff] }
 0xb1d   :  { %4881 = vmatprep.subr.bf16.mxu1 %v4540_v50  ;;  %v4344_v50 = vld [vmem:[#allocation3 + $0x3b8] sm:$0xff] }
 0xb1f   :  { %4759 = vmatpush1.bf16.msra.mxu0 %v4537_v1  ;;  %v4343_v1 = vld [vmem:[#allocation3 + $0x3b0] sm:$0xff] }
 0xb20   :  { %4882 = vmatpush1.bf16.msra.mxu1 %v4539_v38  ;;  %4760 = vmatprep.subr.bf16.mxu0 %v4544_v52  ;;  %v4350_v38 = vld [vmem:[#allocation3 + $0x418] sm:$0xff]  ;;  %v4349_v52 = vld [vmem:[#allocation3 + $0x410] sm:$0xff] }
 0xb21   :  { %4883 = vmatprep.subr.bf16.mxu1 %v4546_v55  ;;  %v4356_v55 = vld [vmem:[#allocation3 + $0x478] sm:$0xff] }
 0xb23   :  { %4761 = vmatpush1.bf16.msra.mxu0 %v4543_v4  ;;  %v4355_v4 = vld [vmem:[#allocation3 + $0x470] sm:$0xff] }
 0xb24   :  { %4884 = vmatpush1.bf16.msra.mxu1 %v4545_v32  ;;  %4762 = vmatprep.subr.bf16.mxu0 %v4550_v0  ;;  %v4362_v32 = vld [vmem:[#allocation3 + $0x4d8] sm:$0xff]  ;;  %v4361_v0 = vld [vmem:[#allocation3 + $0x4d0] sm:$0xff] }
 0xb25   :  { %4885 = vmatprep.subr.bf16.mxu1 %v4552_v58  ;;  %v4368_v58 = vld [vmem:[#allocation3 + $0x538] sm:$0xff] }
 0xb27   :  { %4763 = vmatpush1.bf16.msra.mxu0 %v4549_v48  ;;  %v4367_v48 = vld [vmem:[#allocation3 + $0x530] sm:$0xff] }
 0xb28   :  { %4886 = vmatpush1.bf16.msra.mxu1 %v4551_v17  ;;  %4764 = vmatprep.subr.bf16.mxu0 %v4556_v37  ;;  %v4374_v17 = vld [vmem:[#allocation3 + $0x598] sm:$0xff]  ;;  %v4373_v37 = vld [vmem:[#allocation3 + $0x590] sm:$0xff] }
 0xb29   :  { %4887 = vmatprep.subr.bf16.mxu1 %v4558_v54  ;;  %v4380_v54 = vld [vmem:[#allocation3 + $0x5f8] sm:$0xff] }
 0xb2b   :  { %4765 = vmatpush1.bf16.msra.mxu0 %v4555_v33  ;;  %v4379_v33 = vld [vmem:[#allocation3 + $0x5f0] sm:$0xff] }
 0xb2c   :  { %4888 = vmatpush1.bf16.msra.mxu1 %v4557_v9  ;;  %4766 = vmatprep.subr.bf16.mxu0 %v4562_v59  ;;  %v4386_v9 = vld [vmem:[#allocation3 + $0x658] sm:$0xff]  ;;  %v4385_v59 = vld [vmem:[#allocation3 + $0x650] sm:$0xff] }
 0xb2d   :  { %4889 = vmatprep.subr.bf16.mxu1 %v4564_v53  ;;  %v4392_v53 = vld [vmem:[#allocation3 + $0x6b8] sm:$0xff] }
 0xb2f   :  { %4767 = vmatpush1.bf16.msra.mxu0 %v4561_v20  ;;  %v4391_v20 = vld [vmem:[#allocation3 + $0x6b0] sm:$0xff] }
 0xb30   :  { %4890 = vmatpush1.bf16.msra.mxu1 %v4563_v47  ;;  %4768 = vmatprep.subr.bf16.mxu0 %v4568_v15  ;;  %v4398_v47 = vld [vmem:[#allocation3 + $0x718] sm:$0xff]  ;;  %v4397_v15 = vld [vmem:[#allocation3 + $0x710] sm:$0xff] }
 0xb31   :  { %4891 = vmatprep.subr.bf16.mxu1 %v4570_v16  ;;  %v4404_v16 = vld [vmem:[#allocation3 + $0x778] sm:$0xff] }
 0xb33   :  { %4769 = vmatpush1.bf16.msra.mxu0 %v4567_v45  ;;  %v4403_v45 = vld [vmem:[#allocation3 + $0x770] sm:$0xff] }
 0xb34   :  { %4892 = vmatpush1.bf16.msra.mxu1 %v4569_v29  ;;  %4902 = vmatprep.subr.bf16.mxu0 %v4290_v13  ;;  %v4410_v29 = vld [vmem:[#allocation3 + $0x7d8] sm:$0xff]  ;;  %v4409_v13 = vld [vmem:[#allocation3 + $0x7d0] sm:$0xff] }
 0xb36   :  { %4771 = vmatmul.mubr.bf16.vlgmr.msra.gmra.mrb[24].mxu0 %v8469_v12 }
 0xb37   :  { %4894 = vmatmul.mubr.bf16.vlgmr.msra.gmra.mrb[56].mxu1 %v8469_v12  ;;  %4903 = vmatpush1.bf16.msra.mxu0 %v4289_v7  ;;  %v4416_v7 = vld [vmem:[#allocation3 + $0x838] sm:$0xff] }
 0xb38   :  { %4934 = vmatprep.mubr.bf16.mxu0 %v8423_v31  ;;  %4904 = vmatprep.subr.bf16.mxu0 %v4296_v41  ;;  %v4325_v31 = vld [vmem:[#allocation3 + $0x290] sm:$0xff]  ;;  %v4422_v41 = vld [vmem:[#allocation3 + $0x898] sm:$0xff] }
 0xb3b   :  { %4905 = vmatpush1.bf16.msra.mxu0 %v4295_v56  ;;  %v4428_v56 = vld [vmem:[#allocation3 + $0x8f8] sm:$0xff] }
 0xb3c   :  { %4906 = vmatprep.subr.bf16.mxu0 %v4302_v10  ;;  %v4427_v10 = vld [vmem:[#allocation3 + $0x8f0] sm:$0xff] }
 0xb3f   :  { %4907 = vmatpush1.bf16.msra.mxu0 %v4301_v11  ;;  %v4434_v11 = vld [vmem:[#allocation3 + $0x958] sm:$0xff] }
 0xb40   :  { %4908 = vmatprep.subr.bf16.mxu0 %v4308_v62  ;;  %v4433_v62 = vld [vmem:[#allocation3 + $0x950] sm:$0xff] }
 0xb43   :  { %4909 = vmatpush1.bf16.msra.mxu0 %v4307_v57  ;;  %v4440_v57 = vld [vmem:[#allocation3 + $0x9b8] sm:$0xff] }
 0xb44   :  { %4910 = vmatprep.subr.bf16.mxu0 %v4314_v63  ;;  %v4439_v63 = vld [vmem:[#allocation3 + $0x9b0] sm:$0xff] }
 0xb47   :  { %4911 = vmatpush1.bf16.msra.mxu0 %v4313_v21  ;;  %v4446_v21 = vld [vmem:[#allocation3 + $0xa18] sm:$0xff] }
 0xb48   :  { %4912 = vmatprep.subr.bf16.mxu0 %v4320_v2  ;;  %v4445_v2 = vld [vmem:[#allocation3 + $0xa10] sm:$0xff] }
 0xb4b   :  { %4913 = vmatpush1.bf16.msra.mxu0 %v4319_v6  ;;  %v4452_v6 = vld [vmem:[#allocation3 + $0xa78] sm:$0xff] }
 0xb4c   :  { %4914 = vmatprep.subr.bf16.mxu0 %v4326_v46  ;;  %v4451_v46 = vld [vmem:[#allocation3 + $0xa70] sm:$0xff] }
 0xb4f   :  { %4915 = vmatpush1.bf16.msra.mxu0 %v4325_v31  ;;  %v4458_v31 = vld [vmem:[#allocation3 + $0xad8] sm:$0xff] }
 0xb50   :  { %4916 = vmatprep.subr.bf16.mxu0 %v4332_v28  ;;  %v4457_v28 = vld [vmem:[#allocation3 + $0xad0] sm:$0xff] }
 0xb53   :  { %4917 = vmatpush1.bf16.msra.mxu0 %v4331_v35  ;;  %v4464_v35 = vld [vmem:[#allocation3 + $0xb38] sm:$0xff] }
 0xb54   :  { %4918 = vmatprep.subr.bf16.mxu0 %v4338_v14  ;;  %v4463_v14 = vld [vmem:[#allocation3 + $0xb30] sm:$0xff] }
 0xb57   :  { %4919 = vmatpush1.bf16.msra.mxu0 %v4337_v8  ;;  %v4470_v8 = vld [vmem:[#allocation3 + $0xb98] sm:$0xff] }
 0xb58   :  { %4920 = vmatprep.subr.bf16.mxu0 %v4344_v50  ;;  %v4469_v50 = vld [vmem:[#allocation3 + $0xb90] sm:$0xff] }
 0xb5b   :  { %4921 = vmatpush1.bf16.msra.mxu0 %v4343_v1  ;;  %v4476_v1 = vld [vmem:[#allocation3 + $0xbf8] sm:$0xff] }
 0xb5c   :  { %4922 = vmatprep.subr.bf16.mxu0 %v4350_v38  ;;  %v4475_v38 = vld [vmem:[#allocation3 + $0xbf0] sm:$0xff] }
 0xb5f   :  { %4923 = vmatpush1.bf16.msra.mxu0 %v4349_v52  ;;  %v4482_v52 = vld [vmem:[#allocation3 + $0xc58] sm:$0xff] }
 0xb60   :  { %4924 = vmatprep.subr.bf16.mxu0 %v4356_v55  ;;  %v4481_v55 = vld [vmem:[#allocation3 + $0xc50] sm:$0xff] }
 0xb63   :  { %4925 = vmatpush1.bf16.msra.mxu0 %v4355_v4  ;;  %v4488_v4 = vld [vmem:[#allocation3 + $0xcb8] sm:$0xff] }
 0xb64   :  { %4926 = vmatprep.subr.bf16.mxu0 %v4362_v32  ;;  %v4487_v32 = vld [vmem:[#allocation3 + $0xcb0] sm:$0xff] }
 0xb67   :  { %4927 = vmatpush1.bf16.msra.mxu0 %v4361_v0  ;;  %v4494_v0 = vld [vmem:[#allocation3 + $0xd18] sm:$0xff] }
 0xb68   :  { %4928 = vmatprep.subr.bf16.mxu0 %v4368_v58  ;;  %v4493_v58 = vld [vmem:[#allocation3 + $0xd10] sm:$0xff] }
 0xb6b   :  { %4929 = vmatpush1.bf16.msra.mxu0 %v4367_v48  ;;  %v4500_v48 = vld [vmem:[#allocation3 + $0xd78] sm:$0xff] }
 0xb6c   :  { %4930 = vmatprep.subr.bf16.mxu0 %v4374_v17  ;;  %v4499_v17 = vld [vmem:[#allocation3 + $0xd70] sm:$0xff] }
 0xb6f   :  { %4931 = vmatpush1.bf16.msra.mxu0 %v4373_v37  ;;  %v4506_v37 = vld [vmem:[#allocation3 + $0xdd8] sm:$0xff] }
 0xb70   :  { %4932 = vmatprep.subr.bf16.mxu0 %v4380_v54  ;;  %v4505_v54 = vld [vmem:[#allocation3 + $0xdd0] sm:$0xff] }
 0xb73   :  { %4933 = vmatpush1.bf16.msra.mxu0 %v4379_v33  ;;  %v4512_v33 = vld [vmem:[#allocation3 + $0xe38] sm:$0xff] }
 0xb74   :  { %4943 = vmatprep.subr.bf16.mxu0 %v4386_v9  ;;  %v4518_v9 = vld [vmem:[#allocation3 + $0xe98] sm:$0xff] }
 0xb76   :  { %4935 = vmatmul.mubr.bf16.vlgmr.msra.gmra.mrb[28].mxu0 %v8425_v5  ;;  %v4415_v5 = vld [vmem:[#allocation3 + $0x830] sm:$0xff] }
 0xb77   :  { %4944 = vmatpush1.bf16.msra.mxu0 %v4385_v59  ;;  %4975 = vmatprep.mubr.bf16.mxu0 %v8441_v3  ;;  %v4421_v3 = vld [vmem:[#allocation3 + $0x890] sm:$0xff]  ;;  %v4524_v59 = vld [vmem:[#allocation3 + $0xef8] sm:$0xff] }
 0xb78   :  { %4945 = vmatprep.subr.bf16.mxu0 %v4392_v53  ;;  %v4523_v53 = vld [vmem:[#allocation3 + $0xef0] sm:$0xff] }
 0xb7b   :  { %4946 = vmatpush1.bf16.msra.mxu0 %v4391_v20  ;;  %v4530_v20 = vld [vmem:[#allocation3 + $0xf58] sm:$0xff] }
 0xb7c   :  { %4947 = vmatprep.subr.bf16.mxu0 %v4398_v47  ;;  %v4529_v47 = vld [vmem:[#allocation3 + $0xf50] sm:$0xff] }
 0xb7f   :  { %4948 = vmatpush1.bf16.msra.mxu0 %v4397_v15  ;;  %v4536_v15 = vld [vmem:[#allocation3 + $0xfb8] sm:$0xff] }
 0xb80   :  { %4949 = vmatprep.subr.bf16.mxu0 %v4404_v16  ;;  %v4535_v16 = vld [vmem:[#allocation3 + $0xfb0] sm:$0xff] }
 0xb83   :  { %4950 = vmatpush1.bf16.msra.mxu0 %v4403_v45  ;;  %v4542_v45 = vld [vmem:[#allocation3 + $0x1018] sm:$0xff] }
 0xb84   :  { %4951 = vmatprep.subr.bf16.mxu0 %v4410_v29  ;;  %v4541_v29 = vld [vmem:[#allocation3 + $0x1010] sm:$0xff] }
 0xb87   :  { %4952 = vmatpush1.bf16.msra.mxu0 %v4409_v13  ;;  %v4548_v13 = vld [vmem:[#allocation3 + $0x1078] sm:$0xff] }
 0xb88   :  { %4953 = vmatprep.subr.bf16.mxu0 %v4416_v7  ;;  %v4547_v7 = vld [vmem:[#allocation3 + $0x1070] sm:$0xff] }
 0xb8b   :  { %4954 = vmatpush1.bf16.msra.mxu0 %v4415_v5  ;;  %v4554_v5 = vld [vmem:[#allocation3 + $0x10d8] sm:$0xff] }
 0xb8c   :  { %4955 = vmatprep.subr.bf16.mxu0 %v4422_v41  ;;  %v4553_v41 = vld [vmem:[#allocation3 + $0x10d0] sm:$0xff] }
 0xb8f   :  { %4956 = vmatpush1.bf16.msra.mxu0 %v4421_v3  ;;  %v4560_v3 = vld [vmem:[#allocation3 + $0x1138] sm:$0xff] }
 0xb90   :  { %4957 = vmatprep.subr.bf16.mxu0 %v4428_v56  ;;  %v4559_v56 = vld [vmem:[#allocation3 + $0x1130] sm:$0xff] }
 0xb93   :  { %4958 = vmatpush1.bf16.msra.mxu0 %v4427_v10  ;;  %v4566_v10 = vld [vmem:[#allocation3 + $0x1198] sm:$0xff] }
 0xb94   :  { %4959 = vmatprep.subr.bf16.mxu0 %v4434_v11  ;;  %v4565_v11 = vld [vmem:[#allocation3 + $0x1190] sm:$0xff] }
 0xb97   :  { %4960 = vmatpush1.bf16.msra.mxu0 %v4433_v62  ;;  %v4572_v62 = vld [vmem:[#allocation3 + $0x11f8] sm:$0xff] }
 0xb98   :  { %4961 = vmatprep.subr.bf16.mxu0 %v4440_v57  ;;  %v4571_v57 = vld [vmem:[#allocation3 + $0x11f0] sm:$0xff] }
 0xb9b   :  { %4962 = vmatpush1.bf16.msra.mxu0 %v4439_v63  ;;  %v4574_v63 = vld [vmem:[#allocation14 + $0x6] ss:$8 sm:$0xf] }
 0xb9c   :  { %4963 = vmatprep.subr.bf16.mxu0 %v4446_v21  ;;  %v4575_v21 = vld [vmem:[#allocation14 + $0x6] ss:$8 sm:$0x30] }
 0xb9f   :  { %4964 = vmatpush1.bf16.msra.mxu0 %v4445_v2  ;;  %v8479_v2 = vor.u32 %v4575_v21, %v4574_v63 }
 0xba0   :  { %4965 = vmatprep.subr.bf16.mxu0 %v4452_v6 }
 0xba1   :  { %v4581_v6 = vrot.slane %v8479_v2, %v7978_v51 }
 0xba3   :  { %4966 = vmatpush1.bf16.msra.mxu0 %v4451_v46  ;;  %v4589_v46 = vrot.slane %v8479_v2, %v8007_v40 }
 0xba4   :  { %4967 = vmatprep.subr.bf16.mxu0 %v4458_v31  ;;  %v4585_v31 = vrot.slane %v8479_v2, %v7963_v23 }
 0xba7   :  { %4968 = vmatpush1.bf16.msra.mxu0 %v4457_v28  ;;  %v4593_v28 = vrot.slane %v8479_v2, %v7987_v61 }
 0xba8   :  { %4969 = vmatprep.subr.bf16.mxu0 %v4464_v35 }
 0xbab   :  { %4970 = vmatpush1.bf16.msra.mxu0 %v4463_v14 }
 0xbac   :  { %4971 = vmatprep.subr.bf16.mxu0 %v4470_v8 }
 0xbaf   :  { %4972 = vmatpush1.bf16.msra.mxu0 %v4469_v50 }
 0xbb0   :  { %4973 = vmatprep.subr.bf16.mxu0 %v4476_v1 }
 0xbb3   :  { %4974 = vmatpush1.bf16.msra.mxu0 %v4475_v38 }
 0xbb4   :  { %4984 = vmatprep.subr.bf16.mxu0 %v4482_v52 }
 0xbb6   :  { %4976 = vmatmul.mubr.bf16.vlgmr.msra.gmra.mrb[28].mxu0 %v8457_v36  ;;  %v4511_v36 = vld [vmem:[#allocation3 + $0xe30] sm:$0xff] }
 0xbb7   :  { %4985 = vmatpush1.bf16.msra.mxu0 %v4481_v55  ;;  %5016 = vmatprep.mubr.bf16.mxu0 %v8461_v44  ;;  %v4517_v44 = vld [vmem:[#allocation3 + $0xe90] sm:$0xff] }
 0xbb8   :  { %4986 = vmatprep.subr.bf16.mxu0 %v4488_v4 }
 0xbbb   :  { %4987 = vmatpush1.bf16.msra.mxu0 %v4487_v32 }
 0xbbc   :  { %4988 = vmatprep.subr.bf16.mxu0 %v4494_v0 }
 0xbbf   :  { %4989 = vmatpush1.bf16.msra.mxu0 %v4493_v58 }
 0xbc0   :  { %4990 = vmatprep.subr.bf16.mxu0 %v4500_v48 }
 0xbc3   :  { %4991 = vmatpush1.bf16.msra.mxu0 %v4499_v17 }
 0xbc4   :  { %4992 = vmatprep.subr.bf16.mxu0 %v4506_v37 }
 0xbc7   :  { %4993 = vmatpush1.bf16.msra.mxu0 %v4505_v54 }
 0xbc8   :  { %4994 = vmatprep.subr.bf16.mxu0 %v4512_v33 }
 0xbcb   :  { %4995 = vmatpush1.bf16.msra.mxu0 %v4511_v36 }
 0xbcc   :  { %4996 = vmatprep.subr.bf16.mxu0 %v4518_v9 }
 0xbcf   :  { %4997 = vmatpush1.bf16.msra.mxu0 %v4517_v44 }
 0xbd0   :  { %4998 = vmatprep.subr.bf16.mxu0 %v4524_v59 }
 0xbd3   :  { %4999 = vmatpush1.bf16.msra.mxu0 %v4523_v53 }
 0xbd4   :  { %5000 = vmatprep.subr.bf16.mxu0 %v4530_v20 }
 0xbd7   :  { %5001 = vmatpush1.bf16.msra.mxu0 %v4529_v47 }
 0xbd8   :  { %5002 = vmatprep.subr.bf16.mxu0 %v4536_v15 }
 0xbdb   :  { %5003 = vmatpush1.bf16.msra.mxu0 %v4535_v16 }
 0xbdc   :  { %5004 = vmatprep.subr.bf16.mxu0 %v4542_v45 }
 0xbdf   :  { %5005 = vmatpush1.bf16.msra.mxu0 %v4541_v29 }
 0xbe0   :  { %5006 = vmatprep.subr.bf16.mxu0 %v4548_v13 }
 0xbe3   :  { %5007 = vmatpush1.bf16.msra.mxu0 %v4547_v7 }
 0xbe4   :  { %5008 = vmatprep.subr.bf16.mxu0 %v4554_v5 }
 0xbe7   :  { %5009 = vmatpush1.bf16.msra.mxu0 %v4553_v41 }
 0xbe8   :  { %5010 = vmatprep.subr.bf16.mxu0 %v4560_v3 }
 0xbeb   :  { %5011 = vmatpush1.bf16.msra.mxu0 %v4559_v56 }
 0xbec   :  { %5012 = vmatprep.subr.bf16.mxu0 %v4566_v10 }
 0xbef   :  { %5013 = vmatpush1.bf16.msra.mxu0 %v4565_v11 }
 0xbf0   :  { %5014 = vmatprep.subr.bf16.mxu0 %v4572_v62 }
 0xbf3   :  { %5015 = vmatpush1.bf16.msra.mxu0 %v4571_v57 }
 0xbf6   :  { %5017 = vmatmul.mubr.bf16.vlgmr.msra.gmra.mrb[28].mxu0 %v8469_v12 }
 0xc09   :  { %v4772_v35 = vpop.f32.mrb[24].mxu0 }
 0xc0a   :  { %v7188_v14 = vadd.f32 %v4772_v35, %v4581_v6  ;;  %v4895_v8 = vpop.f32.mrb[56].mxu1  ;;  %v4774_v12 = vpop.f32.mrb[25].mxu0 }
 0xc0b   :  { %v7190_v50 = vadd.f32 %v4895_v8, %v4589_v46  ;;  %v7189_v1 = vadd.f32 %v4774_v12, %v4585_v31  ;;  %v4897_v38 = vpop.f32.mrb[57].mxu1  ;;  %v4776_v52 = vpop.f32.mrb[26].mxu0 }
 0xc0c   :  { %v5025_v55 = vmul.f32 %v7188_v14, %v7188_v14  ;;  %v7191_v4 = vadd.f32 %v4897_v38, %v4593_v28  ;;  %v4899_v32 = vpop.f32.mrb[58].mxu1  ;;  %v4777_v0 = vpop.f32.mrb[27].mxu0  ;;  %v4597_v38 = vrot.slane %v8479_v2, %v8032_v24  ;;  %v4601_v52 = vrot.slane %v8479_v2, %v8010_v26 }
 0xc0d   :  { %v5027_v58 = vmul.f32 %v7190_v50, %v7190_v50  ;;  %v5026_v48 = vmul.f32 %v7189_v1, %v7189_v1  ;;  %v4900_v17 = vpop.f32.mrb[59].mxu1 }
 0xc0e   :  { %v5031_v37 = vmul.f32 %v7188_v14, %v5025_v55  ;;  %v5028_v54 = vmul.f32 %v7191_v4, %v7191_v4 }
 0xc0f   :  { %v5033_v33 = vmul.f32 %v7190_v50, %v5027_v58  ;;  %v5032_v36 = vmul.f32 %v7189_v1, %v5026_v48 }
 0xc10   :  { %v5037_v9 = vmul.f32 0.044715, %v5031_v37  ;;  %v5034_v44 = vmul.f32 %v7191_v4, %v5028_v54 }
 0xc11   :  { %v5039_v59 = vmul.f32 0.044715, %v5033_v33  ;;  %v5038_v53 = vmul.f32 0.044715, %v5032_v36 }
 0xc12   :  { %v5043_v20 = vadd.f32 %v7188_v14, %v5037_v9  ;;  %v5040_v47 = vmul.f32 0.044715, %v5034_v44 }
 0xc13   :  { %v5045_v15 = vadd.f32 %v7190_v50, %v5039_v59  ;;  %v5044_v16 = vadd.f32 %v7189_v1, %v5038_v53 }
 0xc14   :  { %v5049_v45 = vmul.f32 0.7978846, %v5043_v20  ;;  %v5046_v29 = vadd.f32 %v7191_v4, %v5040_v47 }
 0xc15   :  { %v5051_v13 = vmul.f32 0.7978846, %v5045_v15  ;;  %v5050_v7 = vmul.f32 0.7978846, %v5044_v16 }
 0xc16   :  { %7430 = vtanh.f32 %v5049_v45  ;;  %v5052_v5 = vmul.f32 0.7978846, %v5046_v29 }
 0xc17   :  { %7432 = vtanh.f32 %v5051_v13 }
 0xc18   :  { %7434 = vtanh.f32 %v5050_v7 }
 0xc19   :  { %7436 = vtanh.f32 %v5052_v5 }
 0xc20   :  { %v7431_v41 = vpop.eup %7430 }
 0xc21   :  { %v7433_v3 = vpop.eup %7432  ;;  %v5061_v56 = vadd.f32 1.0, %v7431_v41 }
 0xc22   :  { %v7435_v10 = vpop.eup %7434  ;;  %v5063_v11 = vadd.f32 1.0, %v7433_v3 }
 0xc23   :  { %v7437_v62 = vpop.eup %7436  ;;  %v5067_v57 = vmul.f32 0.5, %v5061_v56  ;;  %v5062_v63 = vadd.f32 1.0, %v7435_v10 }
 0xc24   :  { %v5069_v21 = vmul.f32 0.5, %v5063_v11  ;;  %v5064_v6 = vadd.f32 1.0, %v7437_v62 }
 0xc25   :  { %v8489_v46 = vmul.f32 %v7188_v14, %v5067_v57  ;;  %v5068_v31 = vmul.f32 0.5, %v5062_v63 }
 0xc26   :  { %v8491_v28 = vmul.f32 %v7190_v50, %v5069_v21  ;;  %v5070_v35 = vmul.f32 0.5, %v5064_v6 }
 0xc27   :  { %v5074_v8 = vmul.f32 %v7189_v1, %v5068_v31 }
 0xc28   :  { %v8493_v12 = vmul.f32 %v7191_v4, %v5070_v35 }
 0xcc9   :  { %v5018_v55 = vpop.f32.mrb[28].mxu0 }
 0xcca   :  { %v7192_v32 = vadd.f32 %v5018_v55, %v4597_v38  ;;  %v5020_v0 = vpop.f32.mrb[29].mxu0 }
 0xccb   :  { %v7193_v58 = vadd.f32 %v5020_v0, %v4601_v52  ;;  %v5022_v48 = vpop.f32.mrb[30].mxu0 }
 0xccc   :  { %v5029_v14 = vmul.f32 %v7192_v32, %v7192_v32  ;;  %v5023_v17 = vpop.f32.mrb[31].mxu0 }
 0xccd   :  { %v5030_v37 = vmul.f32 %v7193_v58, %v7193_v58 }
 0xcce   :  { %v5035_v50 = vmul.f32 %v7192_v32, %v5029_v14 }
 0xccf   :  { %v5036_v54 = vmul.f32 %v7193_v58, %v5030_v37 }
 0xcd0   :  { %v5041_v33 = vmul.f32 0.044715, %v5035_v50 }
 0xcd1   :  { %v5042_v1 = vmul.f32 0.044715, %v5036_v54 }
 0xcd2   :  { %v5047_v4 = vadd.f32 %v7192_v32, %v5041_v33 }
 0xcd3   :  { %v5048_v36 = vadd.f32 %v7193_v58, %v5042_v1 }
 0xcd4   :  { %v5053_v9 = vmul.f32 0.7978846, %v5047_v4 }
 0xcd5   :  { %v5054_v44 = vmul.f32 0.7978846, %v5048_v36 }
 0xcd6   :  { %7438 = vtanh.f32 %v5053_v9 }
 0xcd7   :  { %7440 = vtanh.f32 %v5054_v44 }
 0xce0   :  { %v7439_v59 = vpop.eup %7438 }
 0xce1   :  { %v7441_v2 = vpop.eup %7440  ;;  %v5065_v53 = vadd.f32 1.0, %v7439_v59 }
 0xce2   :  { %v5066_v20 = vadd.f32 1.0, %v7441_v2 }
 0xce3   :  { %v5071_v47 = vmul.f32 0.5, %v5065_v53 }
 0xce4   :  { %v5072_v15 = vmul.f32 0.5, %v5066_v20 }
 0xce5   :  { %v8499_v16 = vmul.f32 %v7192_v32, %v5071_v47 }
 0xce6   :  { %v8501_v45 = vmul.f32 %v7193_v58, %v5072_v15 }
 0xce7   :  { %7566 = dma.done.wait [#allocation6 + $0x2], 79872 }
 0xce8   :  { %7567 = vsyncadd [#allocation6 + $0x2], 4294887424  ;;  %v8503_v29 = vpack.c.bf16 %v5074_v8, %v5074_v8  ;;  %v5089_v13 = vld [vmem:[#allocation4 + $0x8] sm:$0xff]  ;;  %v5088_v7 = vld [vmem:[#allocation4] sm:$0xff]  ;;  %s7599_s1 = smov [#allocation15]  }
 0xce9   :  { %v5091_v5 = vld [vmem:[#allocation4 + $0x18] sm:$0xff]  ;;  %5411 = vmatprep.subr.bf16.mxu1 %v5089_v13  ;;  %v5095_v41 = vld [vmem:[#allocation4 + $0x70] sm:$0xff]  ;;  %v5097_v56 = vld [vmem:[#allocation4 + $0x80] sm:$0xff]  ;;  %s6984_s20 = sshll.u32 %s7599_s1, 4  ;;  %s6985_s20 = int_to_ptr.vmem [resolvable:$true] %s6984_s20 }
 0xcea   :  { %5443 = vmatprep.mubr.bf16.mxu1 %v8503_v29  ;;  %5566 = vmatprep.mubr.bf16.mxu0 %v8503_v29  ;;  %v5090_v3 = vld [vmem:[#allocation4 + $0x10] sm:$0xff]  ;;  %v5094_v10 = vld [vmem:[#allocation4 + $0x68] sm:$0xff]  ;;  %v5096_v11 = vld [vmem:[#allocation4 + $0x78] sm:$0xff]  ;;  %s7534_s2 = scalar_lea.vmem %s6985_s20, 32  ;;  %p7539_p2 = scmp.lt.s32.totalorder %s6985_s20, %s6985_s20 }
 0xceb   :  { %5534 = vmatprep.subr.bf16.mxu0 %v5091_v5  ;;  %5412 = vmatpush1.bf16.msra.mxu1 %v5088_v7  ;;  %v5101_v62 = vld [vmem:[#allocation4 + $0xd8] sm:$0xff]  ;;  %v5103_v57 = vld [vmem:[#allocation4 + $0xe8] sm:$0xff]  ;;  %v5100_v63 = vld [vmem:[#allocation4 + $0xd0] sm:$0xff]  ;;  %p7535_p1 = scmp.ne.s32.totalorder %s6985_s20, %s7534_s2  ;;  %p7540_p3 = scmp.lt.s32.totalorder %s7534_s2, %s7534_s2 }
 0xcec   :  { %5535 = vmatpush1.bf16.msra.mxu0 %v5090_v3  ;;  %5413 = vmatprep.subr.bf16.mxu1 %v5095_v41  ;;  %v5102_v21 = vld [vmem:[#allocation4 + $0xe0] sm:$0xff]  ;;  %v5109_v31 = vld [vmem:[#allocation4 + $0x150] sm:$0xff]  ;;  %v5106_v35 = vld [vmem:[#allocation4 + $0x138] sm:$0xff] }
 0xced   :  { %5536 = vmatprep.subr.bf16.mxu0 %v5097_v56  ;;  %v5107_v6 = vld [vmem:[#allocation4 + $0x140] sm:$0xff]  ;;  %v5108_v8 = vld [vmem:[#allocation4 + $0x148] sm:$0xff]  ;;  %v5115_v52 = vld [vmem:[#allocation4 + $0x1b8] sm:$0xff]  ;;  %p7541_p4 = por %p7540_p3, %p7539_p2 }
 0xcee   :  { %v5113_v38 = vld [vmem:[#allocation4 + $0x1a8] sm:$0xff]  ;;  %v5112_v55 = vld [vmem:[#allocation4 + $0x1a0] sm:$0xff]  ;;  %v5114_v32 = vld [vmem:[#allocation4 + $0x1b0] sm:$0xff] }
 0xcef   :  { %5414 = vmatpush1.bf16.msra.mxu1 %v5094_v10  ;;  %v5119_v0 = vld [vmem:[#allocation4 + $0x210] sm:$0xff]  ;;  %v5121_v58 = vld [vmem:[#allocation4 + $0x220] sm:$0xff]  ;;  %v5118_v48 = vld [vmem:[#allocation4 + $0x208] sm:$0xff]  ;;  %p7542_p5 = pnand %p7541_p4, %p7535_p1 }
 0xcf0   :  { %5537 = vmatpush1.bf16.msra.mxu0 %v5096_v11  ;;  %5415 = vmatprep.subr.bf16.mxu1 %v5101_v62  ;;  %v5120_v14 = vld [vmem:[#allocation4 + $0x218] sm:$0xff]  ;;  %v5127_v37 = vld [vmem:[#allocation4 + $0x288] sm:$0xff]  ;;  %v5124_v50 = vld [vmem:[#allocation4 + $0x270] sm:$0xff] }
 0xcf1   :  { %5538 = vmatprep.subr.bf16.mxu0 %v5103_v57  ;;  %v5125_v17 = vld [vmem:[#allocation4 + $0x278] sm:$0xff]  ;;  %v5126_v54 = vld [vmem:[#allocation4 + $0x280] sm:$0xff]  ;;  %v5133_v1 = vld [vmem:[#allocation4 + $0x2f0] sm:$0xff] }
 0xcf2   :  { %v5131_v33 = vld [vmem:[#allocation4 + $0x2e0] sm:$0xff]  ;;  %v5130_v4 = vld [vmem:[#allocation4 + $0x2d8] sm:$0xff]  ;;  %v5132_v36 = vld [vmem:[#allocation4 + $0x2e8] sm:$0xff] }
 0xcf3   :  { %5416 = vmatpush1.bf16.msra.mxu1 %v5100_v63  ;;  %v5137_v9 = vld [vmem:[#allocation4 + $0x348] sm:$0xff]  ;;  %v5139_v44 = vld [vmem:[#allocation4 + $0x358] sm:$0xff]  ;;  %v5136_v59 = vld [vmem:[#allocation4 + $0x340] sm:$0xff] }
 0xcf4   :  { %5539 = vmatpush1.bf16.msra.mxu0 %v5102_v21  ;;  %5417 = vmatprep.subr.bf16.mxu1 %v5107_v6  ;;  %v5138_v2 = vld [vmem:[#allocation4 + $0x350] sm:$0xff]  ;;  %v5145_v20 = vld [vmem:[#allocation4 + $0x3c0] sm:$0xff]  ;;  %v5142_v47 = vld [vmem:[#allocation4 + $0x3a8] sm:$0xff] }
 0xcf5   :  { %5540 = vmatprep.subr.bf16.mxu0 %v5109_v31  ;;  %v5143_v53 = vld [vmem:[#allocation4 + $0x3b0] sm:$0xff]  ;;  %v5144_v15 = vld [vmem:[#allocation4 + $0x3b8] sm:$0xff]  ;;  %v5151_v7 = vld [vmem:[#allocation4 + $0x428] sm:$0xff] }
 0xcf6   :  { %v5149_v13 = vld [vmem:[#allocation4 + $0x418] sm:$0xff]  ;;  %v5148_v5 = vld [vmem:[#allocation4 + $0x410] sm:$0xff]  ;;  %v5150_v41 = vld [vmem:[#allocation4 + $0x420] sm:$0xff] }
 0xcf7   :  { %5418 = vmatpush1.bf16.msra.mxu1 %v5106_v35  ;;  %v5155_v3 = vld [vmem:[#allocation4 + $0x480] sm:$0xff]  ;;  %v5157_v56 = vld [vmem:[#allocation4 + $0x490] sm:$0xff]  ;;  %v5154_v10 = vld [vmem:[#allocation4 + $0x478] sm:$0xff] }
 0xcf8   :  { %5541 = vmatpush1.bf16.msra.mxu0 %v5108_v8  ;;  %5419 = vmatprep.subr.bf16.mxu1 %v5113_v38  ;;  %v5156_v11 = vld [vmem:[#allocation4 + $0x488] sm:$0xff]  ;;  %v5163_v57 = vld [vmem:[#allocation4 + $0x4f8] sm:$0xff]  ;;  %v5160_v63 = vld [vmem:[#allocation4 + $0x4e0] sm:$0xff] }
 0xcf9   :  { %5542 = vmatprep.subr.bf16.mxu0 %v5115_v52  ;;  %v5161_v62 = vld [vmem:[#allocation4 + $0x4e8] sm:$0xff]  ;;  %v5162_v21 = vld [vmem:[#allocation4 + $0x4f0] sm:$0xff]  ;;  %v5169_v31 = vld [vmem:[#allocation4 + $0x560] sm:$0xff] }
 0xcfa   :  { %v5167_v6 = vld [vmem:[#allocation4 + $0x550] sm:$0xff]  ;;  %v5166_v35 = vld [vmem:[#allocation4 + $0x548] sm:$0xff]  ;;  %v5168_v8 = vld [vmem:[#allocation4 + $0x558] sm:$0xff] }
 0xcfb   :  { %5420 = vmatpush1.bf16.msra.mxu1 %v5112_v55  ;;  %v5173_v38 = vld [vmem:[#allocation4 + $0x5b8] sm:$0xff]  ;;  %v5175_v52 = vld [vmem:[#allocation4 + $0x5c8] sm:$0xff]  ;;  %v5172_v55 = vld [vmem:[#allocation4 + $0x5b0] sm:$0xff] }
 0xcfc   :  { %5543 = vmatpush1.bf16.msra.mxu0 %v5114_v32  ;;  %5421 = vmatprep.subr.bf16.mxu1 %v5119_v0  ;;  %v5174_v32 = vld [vmem:[#allocation4 + $0x5c0] sm:$0xff] }
 0xcfd   :  { %5544 = vmatprep.subr.bf16.mxu0 %v5121_v58  ;;  %v5179_v0 = vld [vmem:[#allocation4 + $0x620] sm:$0xff]  ;;  %v5181_v58 = vld [vmem:[#allocation4 + $0x630] sm:$0xff] }
 0xcff   :  { %5422 = vmatpush1.bf16.msra.mxu1 %v5118_v48  ;;  %v5178_v48 = vld [vmem:[#allocation4 + $0x618] sm:$0xff] }
 0xd00   :  { %5545 = vmatpush1.bf16.msra.mxu0 %v5120_v14  ;;  %5423 = vmatprep.subr.bf16.mxu1 %v5125_v17  ;;  %v5180_v14 = vld [vmem:[#allocation4 + $0x628] sm:$0xff] }
 0xd01   :  { %5546 = vmatprep.subr.bf16.mxu0 %v5127_v37  ;;  %v5185_v17 = vld [vmem:[#allocation4 + $0x688] sm:$0xff]  ;;  %v5187_v37 = vld [vmem:[#allocation4 + $0x698] sm:$0xff] }
 0xd03   :  { %5424 = vmatpush1.bf16.msra.mxu1 %v5124_v50  ;;  %v8509_v50 = vpack.c.bf16 %v8489_v46, %v8489_v46  ;;  %v5190_v46 = vld [vmem:[#allocation4 + $0x6e8] sm:$0xff] }
 0xd04   :  { %5547 = vmatpush1.bf16.msra.mxu0 %v5126_v54  ;;  %5425 = vmatprep.subr.bf16.mxu1 %v5131_v33  ;;  %v5184_v54 = vld [vmem:[#allocation4 + $0x680] sm:$0xff]  ;;  %v5186_v33 = vld [vmem:[#allocation4 + $0x690] sm:$0xff] }
 0xd05   :  { %5548 = vmatprep.subr.bf16.mxu0 %v5133_v1  ;;  %v5191_v1 = vld [vmem:[#allocation4 + $0x6f0] sm:$0xff] }
 0xd07   :  { %5426 = vmatpush1.bf16.msra.mxu1 %v5130_v4  ;;  %v5193_v4 = vld [vmem:[#allocation4 + $0x700] sm:$0xff] }
 0xd08   :  { %5549 = vmatpush1.bf16.msra.mxu0 %v5132_v36  ;;  %5427 = vmatprep.subr.bf16.mxu1 %v5137_v9  ;;  %v8513_v36 = vpack.c.bf16 %v8493_v12, %v8493_v12  ;;  %v5192_v9 = vld [vmem:[#allocation4 + $0x6f8] sm:$0xff]  ;;  %v5196_v12 = vld [vmem:[#allocation4 + $0x750] sm:$0xff] }
 0xd09   :  { %5550 = vmatprep.subr.bf16.mxu0 %v5139_v44  ;;  %v5197_v44 = vld [vmem:[#allocation4 + $0x758] sm:$0xff] }
 0xd0b   :  { %5428 = vmatpush1.bf16.msra.mxu1 %v5136_v59  ;;  %v5199_v59 = vld [vmem:[#allocation4 + $0x768] sm:$0xff] }
 0xd0c   :  { %5551 = vmatpush1.bf16.msra.mxu0 %v5138_v2  ;;  %5429 = vmatprep.subr.bf16.mxu1 %v5143_v53  ;;  %v5198_v2 = vld [vmem:[#allocation4 + $0x760] sm:$0xff] }
 0xd0d   :  { %5552 = vmatprep.subr.bf16.mxu0 %v5145_v20  ;;  %v5203_v53 = vld [vmem:[#allocation4 + $0x7c0] sm:$0xff]  ;;  %v5205_v20 = vld [vmem:[#allocation4 + $0x7d0] sm:$0xff] }
 0xd0f   :  { %5430 = vmatpush1.bf16.msra.mxu1 %v5142_v47  ;;  %v5202_v47 = vld [vmem:[#allocation4 + $0x7b8] sm:$0xff] }
 0xd10   :  { %5553 = vmatpush1.bf16.msra.mxu0 %v5144_v15  ;;  %5431 = vmatprep.subr.bf16.mxu1 %v5149_v13  ;;  %v5204_v15 = vld [vmem:[#allocation4 + $0x7c8] sm:$0xff] }
 0xd11   :  { %5554 = vmatprep.subr.bf16.mxu0 %v5151_v7  ;;  %v5209_v13 = vld [vmem:[#allocation4 + $0x828] sm:$0xff]  ;;  %v5211_v7 = vld [vmem:[#allocation4 + $0x838] sm:$0xff] }
 0xd13   :  { %5432 = vmatpush1.bf16.msra.mxu1 %v5148_v5  ;;  %v5208_v5 = vld [vmem:[#allocation4 + $0x820] sm:$0xff] }
 0xd14   :  { %5555 = vmatpush1.bf16.msra.mxu0 %v5150_v41  ;;  %5433 = vmatprep.subr.bf16.mxu1 %v5155_v3  ;;  %v5210_v41 = vld [vmem:[#allocation4 + $0x830] sm:$0xff] }
 0xd15   :  { %5556 = vmatprep.subr.bf16.mxu0 %v5157_v56  ;;  %v5215_v3 = vld [vmem:[#allocation4 + $0x890] sm:$0xff]  ;;  %v5217_v56 = vld [vmem:[#allocation4 + $0x8a0] sm:$0xff] }
 0xd17   :  { %5434 = vmatpush1.bf16.msra.mxu1 %v5154_v10  ;;  %v5214_v10 = vld [vmem:[#allocation4 + $0x888] sm:$0xff] }
 0xd18   :  { %5557 = vmatpush1.bf16.msra.mxu0 %v5156_v11  ;;  %5435 = vmatprep.subr.bf16.mxu1 %v5161_v62  ;;  %v5216_v11 = vld [vmem:[#allocation4 + $0x898] sm:$0xff] }
 0xd19   :  { %5558 = vmatprep.subr.bf16.mxu0 %v5163_v57  ;;  %v5221_v62 = vld [vmem:[#allocation4 + $0x8f8] sm:$0xff]  ;;  %v5223_v57 = vld [vmem:[#allocation4 + $0x908] sm:$0xff] }
 0xd1b   :  { %5436 = vmatpush1.bf16.msra.mxu1 %v5160_v63  ;;  %v5220_v63 = vld [vmem:[#allocation4 + $0x8f0] sm:$0xff] }
 0xd1c   :  { %5559 = vmatpush1.bf16.msra.mxu0 %v5162_v21  ;;  %5437 = vmatprep.subr.bf16.mxu1 %v5167_v6  ;;  %v5222_v21 = vld [vmem:[#allocation4 + $0x900] sm:$0xff] }
 0xd1d   :  { %5560 = vmatprep.subr.bf16.mxu0 %v5169_v31  ;;  %v5227_v6 = vld [vmem:[#allocation4 + $0x960] sm:$0xff]  ;;  %v5229_v31 = vld [vmem:[#allocation4 + $0x970] sm:$0xff] }
 0xd1f   :  { %5438 = vmatpush1.bf16.msra.mxu1 %v5166_v35  ;;  %v5226_v35 = vld [vmem:[#allocation4 + $0x958] sm:$0xff] }
 0xd20   :  { %5561 = vmatpush1.bf16.msra.mxu0 %v5168_v8  ;;  %5439 = vmatprep.subr.bf16.mxu1 %v5173_v38  ;;  %v5228_v8 = vld [vmem:[#allocation4 + $0x968] sm:$0xff] }
 0xd21   :  { %5562 = vmatprep.subr.bf16.mxu0 %v5175_v52  ;;  %v5233_v38 = vld [vmem:[#allocation4 + $0x9c8] sm:$0xff]  ;;  %v5235_v52 = vld [vmem:[#allocation4 + $0x9d8] sm:$0xff] }
 0xd23   :  { %5440 = vmatpush1.bf16.msra.mxu1 %v5172_v55  ;;  %v5232_v55 = vld [vmem:[#allocation4 + $0x9c0] sm:$0xff] }
 0xd24   :  { %5563 = vmatpush1.bf16.msra.mxu0 %v5174_v32  ;;  %5441 = vmatprep.subr.bf16.mxu1 %v5179_v0  ;;  %v5234_v32 = vld [vmem:[#allocation4 + $0x9d0] sm:$0xff] }
 0xd25   :  { %5564 = vmatprep.subr.bf16.mxu0 %v5181_v58  ;;  %v5239_v0 = vld [vmem:[#allocation4 + $0xa30] sm:$0xff]  ;;  %v5241_v58 = vld [vmem:[#allocation4 + $0xa40] sm:$0xff] }
 0xd27   :  { %5442 = vmatpush1.bf16.msra.mxu1 %v5178_v48  ;;  %v5238_v48 = vld [vmem:[#allocation4 + $0xa28] sm:$0xff] }
 0xd28   :  { %5565 = vmatpush1.bf16.msra.mxu0 %v5180_v14  ;;  %5452 = vmatprep.subr.bf16.mxu1 %v5185_v17  ;;  %v5240_v14 = vld [vmem:[#allocation4 + $0xa38] sm:$0xff] }
 0xd29   :  { %5575 = vmatprep.subr.bf16.mxu0 %v5187_v37  ;;  %v5245_v17 = vld [vmem:[#allocation4 + $0xa98] sm:$0xff]  ;;  %v5247_v37 = vld [vmem:[#allocation4 + $0xaa8] sm:$0xff] }
 0xd2a   :  { %5444 = vmatmul.mubr.bf16.vlgmr.msra.gmra.mrb[60].mxu1 %v8509_v50 }
 0xd2b   :  { %5567 = vmatmul.mubr.bf16.vlgmr.msra.gmra.mrb[32].mxu0 %v8509_v50  ;;  %5453 = vmatpush1.bf16.msra.mxu1 %v5184_v54  ;;  %v5244_v54 = vld [vmem:[#allocation4 + $0xa90] sm:$0xff] }
 0xd2c   :  { %5576 = vmatpush1.bf16.msra.mxu0 %v5186_v33  ;;  %5454 = vmatprep.subr.bf16.mxu1 %v5191_v1  ;;  %v5246_v33 = vld [vmem:[#allocation4 + $0xaa0] sm:$0xff] }
 0xd2d   :  { %5577 = vmatprep.subr.bf16.mxu0 %v5193_v4  ;;  %5484 = vmatprep.mubr.bf16.mxu1 %v8513_v36  ;;  %v5251_v1 = vld [vmem:[#allocation4 + $0xb00] sm:$0xff]  ;;  %v5253_v4 = vld [vmem:[#allocation4 + $0xb10] sm:$0xff] }
 0xd2e   :  { %5607 = vmatprep.mubr.bf16.mxu0 %v8513_v36 }
 0xd2f   :  { %5455 = vmatpush1.bf16.msra.mxu1 %v5190_v46  ;;  %v5250_v46 = vld [vmem:[#allocation4 + $0xaf8] sm:$0xff] }
 0xd30   :  { %5578 = vmatpush1.bf16.msra.mxu0 %v5192_v9  ;;  %5456 = vmatprep.subr.bf16.mxu1 %v5197_v44  ;;  %v5252_v9 = vld [vmem:[#allocation4 + $0xb08] sm:$0xff] }
 0xd31   :  { %5579 = vmatprep.subr.bf16.mxu0 %v5199_v59  ;;  %v5257_v44 = vld [vmem:[#allocation4 + $0xb68] sm:$0xff]  ;;  %v5259_v59 = vld [vmem:[#allocation4 + $0xb78] sm:$0xff] }
 0xd33   :  { %5457 = vmatpush1.bf16.msra.mxu1 %v5196_v12  ;;  %v5256_v12 = vld [vmem:[#allocation4 + $0xb60] sm:$0xff] }
 0xd34   :  { %5580 = vmatpush1.bf16.msra.mxu0 %v5198_v2  ;;  %5458 = vmatprep.subr.bf16.mxu1 %v5203_v53  ;;  %v5258_v2 = vld [vmem:[#allocation4 + $0xb70] sm:$0xff] }
 0xd35   :  { %5581 = vmatprep.subr.bf16.mxu0 %v5205_v20  ;;  %v5263_v53 = vld [vmem:[#allocation4 + $0xbd0] sm:$0xff]  ;;  %v5265_v20 = vld [vmem:[#allocation4 + $0xbe0] sm:$0xff] }
 0xd37   :  { %5459 = vmatpush1.bf16.msra.mxu1 %v5202_v47  ;;  %v5262_v47 = vld [vmem:[#allocation4 + $0xbc8] sm:$0xff] }
 0xd38   :  { %5582 = vmatpush1.bf16.msra.mxu0 %v5204_v15  ;;  %5460 = vmatprep.subr.bf16.mxu1 %v5209_v13  ;;  %v5264_v15 = vld [vmem:[#allocation4 + $0xbd8] sm:$0xff] }
 0xd39   :  { %5583 = vmatprep.subr.bf16.mxu0 %v5211_v7  ;;  %v5269_v13 = vld [vmem:[#allocation4 + $0xc38] sm:$0xff]  ;;  %v5271_v7 = vld [vmem:[#allocation4 + $0xc48] sm:$0xff] }
 0xd3b   :  { %5461 = vmatpush1.bf16.msra.mxu1 %v5208_v5  ;;  %v5268_v5 = vld [vmem:[#allocation4 + $0xc30] sm:$0xff] }
 0xd3c   :  { %5584 = vmatpush1.bf16.msra.mxu0 %v5210_v41  ;;  %5462 = vmatprep.subr.bf16.mxu1 %v5215_v3  ;;  %v5270_v41 = vld [vmem:[#allocation4 + $0xc40] sm:$0xff] }
 0xd3d   :  { %5585 = vmatprep.subr.bf16.mxu0 %v5217_v56  ;;  %v5275_v3 = vld [vmem:[#allocation4 + $0xca0] sm:$0xff]  ;;  %v5277_v56 = vld [vmem:[#allocation4 + $0xcb0] sm:$0xff] }
 0xd3f   :  { %5463 = vmatpush1.bf16.msra.mxu1 %v5214_v10  ;;  %v5274_v10 = vld [vmem:[#allocation4 + $0xc98] sm:$0xff] }
 0xd40   :  { %5586 = vmatpush1.bf16.msra.mxu0 %v5216_v11  ;;  %5464 = vmatprep.subr.bf16.mxu1 %v5221_v62  ;;  %v5276_v11 = vld [vmem:[#allocation4 + $0xca8] sm:$0xff] }
 0xd41   :  { %5587 = vmatprep.subr.bf16.mxu0 %v5223_v57  ;;  %v5281_v62 = vld [vmem:[#allocation4 + $0xd08] sm:$0xff]  ;;  %v5283_v57 = vld [vmem:[#allocation4 + $0xd18] sm:$0xff] }
 0xd43   :  { %5465 = vmatpush1.bf16.msra.mxu1 %v5220_v63  ;;  %v8521_v63 = vpack.c.bf16 %v8491_v28, %v8491_v28  ;;  %v5286_v28 = vld [vmem:[#allocation4 + $0xd68] sm:$0xff] }
 0xd44   :  { %5588 = vmatpush1.bf16.msra.mxu0 %v5222_v21  ;;  %5466 = vmatprep.subr.bf16.mxu1 %v5227_v6  ;;  %v5280_v21 = vld [vmem:[#allocation4 + $0xd00] sm:$0xff]  ;;  %v5282_v6 = vld [vmem:[#allocation4 + $0xd10] sm:$0xff] }
 0xd45   :  { %5589 = vmatprep.subr.bf16.mxu0 %v5229_v31  ;;  %v5287_v31 = vld [vmem:[#allocation4 + $0xd70] sm:$0xff] }
 0xd47   :  { %5467 = vmatpush1.bf16.msra.mxu1 %v5226_v35  ;;  %v5289_v35 = vld [vmem:[#allocation4 + $0xd80] sm:$0xff] }
 0xd48   :  { %5590 = vmatpush1.bf16.msra.mxu0 %v5228_v8  ;;  %5468 = vmatprep.subr.bf16.mxu1 %v5233_v38  ;;  %v8525_v8 = vpack.c.bf16 %v8501_v45, %v8501_v45  ;;  %v5288_v38 = vld [vmem:[#allocation4 + $0xd78] sm:$0xff]  ;;  %v5292_v45 = vld [vmem:[#allocation4 + $0xdd0] sm:$0xff] }
 0xd49   :  { %5591 = vmatprep.subr.bf16.mxu0 %v5235_v52  ;;  %v5293_v52 = vld [vmem:[#allocation4 + $0xdd8] sm:$0xff] }
 0xd4b   :  { %5469 = vmatpush1.bf16.msra.mxu1 %v5232_v55  ;;  %v5295_v55 = vld [vmem:[#allocation4 + $0xde8] sm:$0xff] }
 0xd4c   :  { %5592 = vmatpush1.bf16.msra.mxu0 %v5234_v32  ;;  %5470 = vmatprep.subr.bf16.mxu1 %v5239_v0  ;;  %v5294_v32 = vld [vmem:[#allocation4 + $0xde0] sm:$0xff] }
 0xd4d   :  { %5593 = vmatprep.subr.bf16.mxu0 %v5241_v58  ;;  %v5299_v0 = vld [vmem:[#allocation4 + $0xe40] sm:$0xff]  ;;  %v5301_v58 = vld [vmem:[#allocation4 + $0xe50] sm:$0xff] }
 0xd4f   :  { %5471 = vmatpush1.bf16.msra.mxu1 %v5238_v48  ;;  %v5298_v48 = vld [vmem:[#allocation4 + $0xe38] sm:$0xff] }
 0xd50   :  { %5594 = vmatpush1.bf16.msra.mxu0 %v5240_v14  ;;  %5472 = vmatprep.subr.bf16.mxu1 %v5245_v17  ;;  %v5300_v14 = vld [vmem:[#allocation4 + $0xe48] sm:$0xff] }
 0xd51   :  { %5595 = vmatprep.subr.bf16.mxu0 %v5247_v37  ;;  %v5305_v17 = vld [vmem:[#allocation4 + $0xea8] sm:$0xff]  ;;  %v5307_v37 = vld [vmem:[#allocation4 + $0xeb8] sm:$0xff] }
 0xd53   :  { %5473 = vmatpush1.bf16.msra.mxu1 %v5244_v54  ;;  %v5304_v54 = vld [vmem:[#allocation4 + $0xea0] sm:$0xff] }
 0xd54   :  { %5596 = vmatpush1.bf16.msra.mxu0 %v5246_v33  ;;  %5474 = vmatprep.subr.bf16.mxu1 %v5251_v1  ;;  %v5306_v33 = vld [vmem:[#allocation4 + $0xeb0] sm:$0xff] }
 0xd55   :  { %5597 = vmatprep.subr.bf16.mxu0 %v5253_v4  ;;  %v5311_v1 = vld [vmem:[#allocation4 + $0xf10] sm:$0xff]  ;;  %v5313_v4 = vld [vmem:[#allocation4 + $0xf20] sm:$0xff] }
 0xd57   :  { %5475 = vmatpush1.bf16.msra.mxu1 %v5250_v46  ;;  %v5310_v46 = vld [vmem:[#allocation4 + $0xf08] sm:$0xff] }
 0xd58   :  { %5598 = vmatpush1.bf16.msra.mxu0 %v5252_v9  ;;  %5476 = vmatprep.subr.bf16.mxu1 %v5257_v44  ;;  %v5312_v9 = vld [vmem:[#allocation4 + $0xf18] sm:$0xff] }
 0xd59   :  { %5599 = vmatprep.subr.bf16.mxu0 %v5259_v59  ;;  %v5317_v44 = vld [vmem:[#allocation4 + $0xf78] sm:$0xff]  ;;  %v5319_v59 = vld [vmem:[#allocation4 + $0xf88] sm:$0xff] }
 0xd5b   :  { %5477 = vmatpush1.bf16.msra.mxu1 %v5256_v12  ;;  %v5316_v12 = vld [vmem:[#allocation4 + $0xf70] sm:$0xff] }
 0xd5c   :  { %5600 = vmatpush1.bf16.msra.mxu0 %v5258_v2  ;;  %5478 = vmatprep.subr.bf16.mxu1 %v5263_v53  ;;  %v5318_v2 = vld [vmem:[#allocation4 + $0xf80] sm:$0xff] }
 0xd5d   :  { %5601 = vmatprep.subr.bf16.mxu0 %v5265_v20  ;;  %v5323_v53 = vld [vmem:[#allocation4 + $0xfe0] sm:$0xff]  ;;  %v5325_v20 = vld [vmem:[#allocation4 + $0xff0] sm:$0xff] }
 0xd5f   :  { %5479 = vmatpush1.bf16.msra.mxu1 %v5262_v47  ;;  %v5322_v47 = vld [vmem:[#allocation4 + $0xfd8] sm:$0xff] }
 0xd60   :  { %5602 = vmatpush1.bf16.msra.mxu0 %v5264_v15  ;;  %5480 = vmatprep.subr.bf16.mxu1 %v5269_v13  ;;  %v5324_v15 = vld [vmem:[#allocation4 + $0xfe8] sm:$0xff] }
 0xd61   :  { %5603 = vmatprep.subr.bf16.mxu0 %v5271_v7  ;;  %v5329_v13 = vld [vmem:[#allocation4 + $0x1048] sm:$0xff]  ;;  %v5331_v7 = vld [vmem:[#allocation4 + $0x1058] sm:$0xff] }
 0xd63   :  { %5481 = vmatpush1.bf16.msra.mxu1 %v5268_v5  ;;  %v5328_v5 = vld [vmem:[#allocation4 + $0x1040] sm:$0xff] }
 0xd64   :  { %5604 = vmatpush1.bf16.msra.mxu0 %v5270_v41  ;;  %5482 = vmatprep.subr.bf16.mxu1 %v5275_v3  ;;  %v5330_v41 = vld [vmem:[#allocation4 + $0x1050] sm:$0xff] }
 0xd65   :  { %5605 = vmatprep.subr.bf16.mxu0 %v5277_v56  ;;  %v5335_v3 = vld [vmem:[#allocation4 + $0x10b0] sm:$0xff]  ;;  %v5337_v56 = vld [vmem:[#allocation4 + $0x10c0] sm:$0xff] }
 0xd67   :  { %5483 = vmatpush1.bf16.msra.mxu1 %v5274_v10  ;;  %v5334_v10 = vld [vmem:[#allocation4 + $0x10a8] sm:$0xff] }
 0xd68   :  { %5606 = vmatpush1.bf16.msra.mxu0 %v5276_v11  ;;  %5493 = vmatprep.subr.bf16.mxu1 %v5281_v62  ;;  %v5336_v11 = vld [vmem:[#allocation4 + $0x10b8] sm:$0xff] }
 0xd69   :  { %5616 = vmatprep.subr.bf16.mxu0 %v5283_v57  ;;  %v5341_v62 = vld [vmem:[#allocation4 + $0x1118] sm:$0xff]  ;;  %v5343_v57 = vld [vmem:[#allocation4 + $0x1128] sm:$0xff] }
 0xd6a   :  { %5485 = vmatmul.mubr.bf16.vlgmr.msra.gmra.mrb[60].mxu1 %v8521_v63 }
 0xd6b   :  { %5608 = vmatmul.mubr.bf16.vlgmr.msra.gmra.mrb[32].mxu0 %v8521_v63  ;;  %5494 = vmatpush1.bf16.msra.mxu1 %v5280_v21  ;;  %v5340_v21 = vld [vmem:[#allocation4 + $0x1110] sm:$0xff] }
 0xd6c   :  { %5617 = vmatpush1.bf16.msra.mxu0 %v5282_v6  ;;  %5495 = vmatprep.subr.bf16.mxu1 %v5287_v31  ;;  %v5342_v6 = vld [vmem:[#allocation4 + $0x1120] sm:$0xff] }
 0xd6d   :  { %5618 = vmatprep.subr.bf16.mxu0 %v5289_v35  ;;  %5525 = vmatprep.mubr.bf16.mxu1 %v8525_v8  ;;  %v5347_v31 = vld [vmem:[#allocation4 + $0x1180] sm:$0xff]  ;;  %v5349_v35 = vld [vmem:[#allocation4 + $0x1190] sm:$0xff] }
 0xd6e   :  { %5648 = vmatprep.mubr.bf16.mxu0 %v8525_v8 }
 0xd6f   :  { %5496 = vmatpush1.bf16.msra.mxu1 %v5286_v28  ;;  %v5346_v28 = vld [vmem:[#allocation4 + $0x1178] sm:$0xff] }
 0xd70   :  { %5619 = vmatpush1.bf16.msra.mxu0 %v5288_v38  ;;  %5497 = vmatprep.subr.bf16.mxu1 %v5293_v52  ;;  %v5348_v38 = vld [vmem:[#allocation4 + $0x1188] sm:$0xff] }
 0xd71   :  { %5620 = vmatprep.subr.bf16.mxu0 %v5295_v55  ;;  %v5353_v52 = vld [vmem:[#allocation4 + $0x11e8] sm:$0xff]  ;;  %v5355_v55 = vld [vmem:[#allocation4 + $0x11f8] sm:$0xff] }
 0xd73   :  { %5498 = vmatpush1.bf16.msra.mxu1 %v5292_v45  ;;  %v5352_v45 = vld [vmem:[#allocation4 + $0x11e0] sm:$0xff] }
 0xd74   :  { %5621 = vmatpush1.bf16.msra.mxu0 %v5294_v32  ;;  %5499 = vmatprep.subr.bf16.mxu1 %v5299_v0  ;;  %v5354_v32 = vld [vmem:[#allocation4 + $0x11f0] sm:$0xff] }
 0xd75   :  { %5622 = vmatprep.subr.bf16.mxu0 %v5301_v58  ;;  %v5359_v0 = vld [vmem:[#allocation4 + $0x1250] sm:$0xff]  ;;  %v5361_v58 = vld [vmem:[#allocation4 + $0x1260] sm:$0xff] }
 0xd77   :  { %5500 = vmatpush1.bf16.msra.mxu1 %v5298_v48  ;;  %v5358_v48 = vld [vmem:[#allocation4 + $0x1248] sm:$0xff] }
 0xd78   :  { %5623 = vmatpush1.bf16.msra.mxu0 %v5300_v14  ;;  %5501 = vmatprep.subr.bf16.mxu1 %v5305_v17  ;;  %v5360_v14 = vld [vmem:[#allocation4 + $0x1258] sm:$0xff] }
 0xd79   :  { %5624 = vmatprep.subr.bf16.mxu0 %v5307_v37  ;;  %v5365_v17 = vld [vmem:[#allocation4 + $0x12b8] sm:$0xff]  ;;  %v5367_v37 = vld [vmem:[#allocation4 + $0x12c8] sm:$0xff] }
 0xd7b   :  { %5502 = vmatpush1.bf16.msra.mxu1 %v5304_v54  ;;  %v5364_v54 = vld [vmem:[#allocation4 + $0x12b0] sm:$0xff] }
 0xd7c   :  { %5625 = vmatpush1.bf16.msra.mxu0 %v5306_v33  ;;  %5503 = vmatprep.subr.bf16.mxu1 %v5311_v1  ;;  %v5366_v33 = vld [vmem:[#allocation4 + $0x12c0] sm:$0xff] }
 0xd7d   :  { %5626 = vmatprep.subr.bf16.mxu0 %v5313_v4  ;;  %v5371_v1 = vld [vmem:[#allocation4 + $0x1320] sm:$0xff]  ;;  %v5373_v4 = vld [vmem:[#allocation4 + $0x1330] sm:$0xff] }
 0xd7f   :  { %5504 = vmatpush1.bf16.msra.mxu1 %v5310_v46  ;;  %v5370_v46 = vld [vmem:[#allocation4 + $0x1318] sm:$0xff] }
 0xd80   :  { %5627 = vmatpush1.bf16.msra.mxu0 %v5312_v9  ;;  %5505 = vmatprep.subr.bf16.mxu1 %v5317_v44  ;;  %v5372_v9 = vld [vmem:[#allocation4 + $0x1328] sm:$0xff] }
 0xd81   :  { %5628 = vmatprep.subr.bf16.mxu0 %v5319_v59  ;;  %v5093_v44 = vld [vmem:[#allocation4 + $0x28] sm:$0xff]  ;;  %v8533_v59 = vpack.c.bf16 %v8499_v16, %v8499_v16  ;;  %v5111_v16 = vld [vmem:[#allocation4 + $0x160] sm:$0xff] }
 0xd83   :  { %5506 = vmatpush1.bf16.msra.mxu1 %v5316_v12  ;;  %v5092_v12 = vld [vmem:[#allocation4 + $0x20] sm:$0xff] }
 0xd84   :  { %5629 = vmatpush1.bf16.msra.mxu0 %v5318_v2  ;;  %5507 = vmatprep.subr.bf16.mxu1 %v5323_v53  ;;  %v5099_v2 = vld [vmem:[#allocation4 + $0x90] sm:$0xff]  ;;  %v5098_v53 = vld [vmem:[#allocation4 + $0x88] sm:$0xff] }
 0xd85   :  { %5630 = vmatprep.subr.bf16.mxu0 %v5325_v20  ;;  %v5105_v20 = vld [vmem:[#allocation4 + $0xf8] sm:$0xff] }
 0xd87   :  { %5508 = vmatpush1.bf16.msra.mxu1 %v5322_v47  ;;  %v5104_v47 = vld [vmem:[#allocation4 + $0xf0] sm:$0xff] }
 0xd88   :  { %5631 = vmatpush1.bf16.msra.mxu0 %v5324_v15  ;;  %5509 = vmatprep.subr.bf16.mxu1 %v5329_v13  ;;  %v5110_v15 = vld [vmem:[#allocation4 + $0x158] sm:$0xff]  ;;  %v5117_v13 = vld [vmem:[#allocation4 + $0x1c8] sm:$0xff] }
 0xd89   :  { %5632 = vmatprep.subr.bf16.mxu0 %v5331_v7  ;;  %v5116_v7 = vld [vmem:[#allocation4 + $0x1c0] sm:$0xff] }
 0xd8b   :  { %5510 = vmatpush1.bf16.msra.mxu1 %v5328_v5  ;;  %v5123_v5 = vld [vmem:[#allocation4 + $0x230] sm:$0xff] }
 0xd8c   :  { %5633 = vmatpush1.bf16.msra.mxu0 %v5330_v41  ;;  %5511 = vmatprep.subr.bf16.mxu1 %v5335_v3  ;;  %v5122_v41 = vld [vmem:[#allocation4 + $0x228] sm:$0xff]  ;;  %v5129_v3 = vld [vmem:[#allocation4 + $0x298] sm:$0xff] }
 0xd8d   :  { %5634 = vmatprep.subr.bf16.mxu0 %v5337_v56  ;;  %v5135_v56 = vld [vmem:[#allocation4 + $0x300] sm:$0xff] }
 0xd8f   :  { %5512 = vmatpush1.bf16.msra.mxu1 %v5334_v10  ;;  %v5134_v10 = vld [vmem:[#allocation4 + $0x2f8] sm:$0xff] }
 0xd90   :  { %5635 = vmatpush1.bf16.msra.mxu0 %v5336_v11  ;;  %5513 = vmatprep.subr.bf16.mxu1 %v5341_v62  ;;  %v5141_v11 = vld [vmem:[#allocation4 + $0x368] sm:$0xff]  ;;  %v5140_v62 = vld [vmem:[#allocation4 + $0x360] sm:$0xff] }
 0xd91   :  { %5636 = vmatprep.subr.bf16.mxu0 %v5343_v57  ;;  %v5147_v57 = vld [vmem:[#allocation4 + $0x3d0] sm:$0xff] }
 0xd93   :  { %5514 = vmatpush1.bf16.msra.mxu1 %v5340_v21  ;;  %v5146_v21 = vld [vmem:[#allocation4 + $0x3c8] sm:$0xff] }
 0xd94   :  { %5637 = vmatpush1.bf16.msra.mxu0 %v5342_v6  ;;  %5515 = vmatprep.subr.bf16.mxu1 %v5347_v31  ;;  %v5153_v6 = vld [vmem:[#allocation4 + $0x438] sm:$0xff]  ;;  %v5152_v31 = vld [vmem:[#allocation4 + $0x430] sm:$0xff] }
 0xd95   :  { %5638 = vmatprep.subr.bf16.mxu0 %v5349_v35  ;;  %v5159_v35 = vld [vmem:[#allocation4 + $0x4a0] sm:$0xff] }
 0xd97   :  { %5516 = vmatpush1.bf16.msra.mxu1 %v5346_v28  ;;  %v5158_v28 = vld [vmem:[#allocation4 + $0x498] sm:$0xff] }
 0xd98   :  { %5639 = vmatpush1.bf16.msra.mxu0 %v5348_v38  ;;  %5517 = vmatprep.subr.bf16.mxu1 %v5353_v52  ;;  %v5165_v38 = vld [vmem:[#allocation4 + $0x508] sm:$0xff]  ;;  %v5164_v52 = vld [vmem:[#allocation4 + $0x500] sm:$0xff] }
 0xd99   :  { %5640 = vmatprep.subr.bf16.mxu0 %v5355_v55  ;;  %v5171_v55 = vld [vmem:[#allocation4 + $0x570] sm:$0xff] }
 0xd9b   :  { %5518 = vmatpush1.bf16.msra.mxu1 %v5352_v45  ;;  %v5170_v45 = vld [vmem:[#allocation4 + $0x568] sm:$0xff] }
 0xd9c   :  { %5641 = vmatpush1.bf16.msra.mxu0 %v5354_v32  ;;  %5519 = vmatprep.subr.bf16.mxu1 %v5359_v0  ;;  %v5177_v32 = vld [vmem:[#allocation4 + $0x5d8] sm:$0xff]  ;;  %v5176_v0 = vld [vmem:[#allocation4 + $0x5d0] sm:$0xff] }
 0xd9d   :  { %5642 = vmatprep.subr.bf16.mxu0 %v5361_v58  ;;  %v5183_v58 = vld [vmem:[#allocation4 + $0x640] sm:$0xff] }
 0xd9f   :  { %5520 = vmatpush1.bf16.msra.mxu1 %v5358_v48  ;;  %v5182_v48 = vld [vmem:[#allocation4 + $0x638] sm:$0xff] }
 0xda0   :  { %5643 = vmatpush1.bf16.msra.mxu0 %v5360_v14  ;;  %5521 = vmatprep.subr.bf16.mxu1 %v5365_v17  ;;  %v5189_v14 = vld [vmem:[#allocation4 + $0x6a8] sm:$0xff]  ;;  %v5188_v17 = vld [vmem:[#allocation4 + $0x6a0] sm:$0xff] }
 0xda1   :  { %5644 = vmatprep.subr.bf16.mxu0 %v5367_v37  ;;  %v5195_v37 = vld [vmem:[#allocation4 + $0x710] sm:$0xff] }
 0xda3   :  { %5522 = vmatpush1.bf16.msra.mxu1 %v5364_v54  ;;  %v5194_v54 = vld [vmem:[#allocation4 + $0x708] sm:$0xff] }
 0xda4   :  { %5645 = vmatpush1.bf16.msra.mxu0 %v5366_v33  ;;  %5523 = vmatprep.subr.bf16.mxu1 %v5371_v1  ;;  %v5201_v33 = vld [vmem:[#allocation4 + $0x778] sm:$0xff]  ;;  %v5200_v1 = vld [vmem:[#allocation4 + $0x770] sm:$0xff] }
 0xda5   :  { %5646 = vmatprep.subr.bf16.mxu0 %v5373_v4  ;;  %v5207_v4 = vld [vmem:[#allocation4 + $0x7e0] sm:$0xff] }
 0xda7   :  { %5524 = vmatpush1.bf16.msra.mxu1 %v5370_v46  ;;  %v5206_v46 = vld [vmem:[#allocation4 + $0x7d8] sm:$0xff] }
 0xda8   :  { %5647 = vmatpush1.bf16.msra.mxu0 %v5372_v9  ;;  %5657 = vmatprep.subr.bf16.mxu1 %v5093_v44  ;;  %v5213_v9 = vld [vmem:[#allocation4 + $0x848] sm:$0xff]  ;;  %v5212_v44 = vld [vmem:[#allocation4 + $0x840] sm:$0xff] }
 0xdaa   :  { %5526 = vmatmul.mubr.bf16.vlgmr.msra.gmra.mrb[60].mxu1 %v8533_v59 }
 0xdab   :  { %5649 = vmatmul.mubr.bf16.vlgmr.msra.gmra.mrb[32].mxu0 %v8533_v59  ;;  %5658 = vmatpush1.bf16.msra.mxu1 %v5092_v12  ;;  %v5219_v12 = vld [vmem:[#allocation4 + $0x8b0] sm:$0xff] }
 0xdac   :  { %5689 = vmatprep.mubr.bf16.mxu1 %v8503_v29  ;;  %5659 = vmatprep.subr.bf16.mxu1 %v5099_v2  ;;  %v5128_v29 = vld [vmem:[#allocation4 + $0x290] sm:$0xff]  ;;  %v5225_v2 = vld [vmem:[#allocation4 + $0x918] sm:$0xff] }
 0xdaf   :  { %5660 = vmatpush1.bf16.msra.mxu1 %v5098_v53  ;;  %v5231_v53 = vld [vmem:[#allocation4 + $0x980] sm:$0xff] }
 0xdb0   :  { %5661 = vmatprep.subr.bf16.mxu1 %v5105_v20  ;;  %v5230_v20 = vld [vmem:[#allocation4 + $0x978] sm:$0xff] }
 0xdb3   :  { %5662 = vmatpush1.bf16.msra.mxu1 %v5104_v47  ;;  %v5237_v47 = vld [vmem:[#allocation4 + $0x9e8] sm:$0xff] }
 0xdb4   :  { %5663 = vmatprep.subr.bf16.mxu1 %v5111_v16  ;;  %v5236_v16 = vld [vmem:[#allocation4 + $0x9e0] sm:$0xff] }
 0xdb7   :  { %5664 = vmatpush1.bf16.msra.mxu1 %v5110_v15  ;;  %v5243_v15 = vld [vmem:[#allocation4 + $0xa50] sm:$0xff] }
 0xdb8   :  { %5665 = vmatprep.subr.bf16.mxu1 %v5117_v13  ;;  %v5242_v13 = vld [vmem:[#allocation4 + $0xa48] sm:$0xff] }
 0xdbb   :  { %5666 = vmatpush1.bf16.msra.mxu1 %v5116_v7  ;;  %v5249_v7 = vld [vmem:[#allocation4 + $0xab8] sm:$0xff] }
 0xdbc   :  { %5667 = vmatprep.subr.bf16.mxu1 %v5123_v5  ;;  %v5248_v5 = vld [vmem:[#allocation4 + $0xab0] sm:$0xff] }
 0xdbf   :  { %5668 = vmatpush1.bf16.msra.mxu1 %v5122_v41  ;;  %v5255_v41 = vld [vmem:[#allocation4 + $0xb20] sm:$0xff] }
 0xdc0   :  { %5669 = vmatprep.subr.bf16.mxu1 %v5129_v3  ;;  %v5254_v3 = vld [vmem:[#allocation4 + $0xb18] sm:$0xff] }
 0xdc3   :  { %5670 = vmatpush1.bf16.msra.mxu1 %v5128_v29  ;;  %v5261_v29 = vld [vmem:[#allocation4 + $0xb88] sm:$0xff] }
 0xdc4   :  { %5671 = vmatprep.subr.bf16.mxu1 %v5135_v56  ;;  %v5260_v56 = vld [vmem:[#allocation4 + $0xb80] sm:$0xff] }
 0xdc7   :  { %5672 = vmatpush1.bf16.msra.mxu1 %v5134_v10  ;;  %v5267_v10 = vld [vmem:[#allocation4 + $0xbf0] sm:$0xff] }
 0xdc8   :  { %5673 = vmatprep.subr.bf16.mxu1 %v5141_v11  ;;  %v5266_v11 = vld [vmem:[#allocation4 + $0xbe8] sm:$0xff] }
 0xdcb   :  { %5674 = vmatpush1.bf16.msra.mxu1 %v5140_v62  ;;  %v5273_v62 = vld [vmem:[#allocation4 + $0xc58] sm:$0xff] }
 0xdcc   :  { %5675 = vmatprep.subr.bf16.mxu1 %v5147_v57  ;;  %v5272_v57 = vld [vmem:[#allocation4 + $0xc50] sm:$0xff] }
 0xdcf   :  { %5676 = vmatpush1.bf16.msra.mxu1 %v5146_v21  ;;  %v5279_v21 = vld [vmem:[#allocation4 + $0xcc0] sm:$0xff] }
 0xdd0   :  { %5677 = vmatprep.subr.bf16.mxu1 %v5153_v6  ;;  %v5278_v6 = vld [vmem:[#allocation4 + $0xcb8] sm:$0xff] }
 0xdd3   :  { %5678 = vmatpush1.bf16.msra.mxu1 %v5152_v31  ;;  %v5285_v31 = vld [vmem:[#allocation4 + $0xd28] sm:$0xff] }
 0xdd4   :  { %5679 = vmatprep.subr.bf16.mxu1 %v5159_v35  ;;  %v5284_v35 = vld [vmem:[#allocation4 + $0xd20] sm:$0xff] }
 0xdd7   :  { %5680 = vmatpush1.bf16.msra.mxu1 %v5158_v28  ;;  %v5291_v28 = vld [vmem:[#allocation4 + $0xd90] sm:$0xff] }
 0xdd8   :  { %5681 = vmatprep.subr.bf16.mxu1 %v5165_v38  ;;  %v5290_v38 = vld [vmem:[#allocation4 + $0xd88] sm:$0xff] }
 0xddb   :  { %5682 = vmatpush1.bf16.msra.mxu1 %v5164_v52  ;;  %v5297_v52 = vld [vmem:[#allocation4 + $0xdf8] sm:$0xff] }
 0xddc   :  { %5683 = vmatprep.subr.bf16.mxu1 %v5171_v55  ;;  %v5296_v55 = vld [vmem:[#allocation4 + $0xdf0] sm:$0xff] }
 0xddf   :  { %5684 = vmatpush1.bf16.msra.mxu1 %v5170_v45  ;;  %v5303_v45 = vld [vmem:[#allocation4 + $0xe60] sm:$0xff] }
 0xde0   :  { %5685 = vmatprep.subr.bf16.mxu1 %v5177_v32  ;;  %v5302_v32 = vld [vmem:[#allocation4 + $0xe58] sm:$0xff] }
 0xde3   :  { %5686 = vmatpush1.bf16.msra.mxu1 %v5176_v0  ;;  %v5309_v0 = vld [vmem:[#allocation4 + $0xec8] sm:$0xff] }
 0xde4   :  { %5687 = vmatprep.subr.bf16.mxu1 %v5183_v58  ;;  %v5308_v58 = vld [vmem:[#allocation4 + $0xec0] sm:$0xff] }
 0xde7   :  { %5688 = vmatpush1.bf16.msra.mxu1 %v5182_v48  ;;  %v5315_v48 = vld [vmem:[#allocation4 + $0xf30] sm:$0xff] }
 0xde8   :  { %5698 = vmatprep.subr.bf16.mxu1 %v5189_v14  ;;  %v5321_v14 = vld [vmem:[#allocation4 + $0xf98] sm:$0xff] }
 0xdea   :  { %5690 = vmatmul.mubr.bf16.vlgmr.msra.gmra.mrb[64].mxu1 %v8509_v50  ;;  %v5218_v50 = vld [vmem:[#allocation4 + $0x8a8] sm:$0xff] }
 0xdeb   :  { %5699 = vmatpush1.bf16.msra.mxu1 %v5188_v17  ;;  %5730 = vmatprep.mubr.bf16.mxu1 %v8513_v36  ;;  %v5224_v36 = vld [vmem:[#allocation4 + $0x910] sm:$0xff]  ;;  %v5327_v17 = vld [vmem:[#allocation4 + $0x1000] sm:$0xff] }
 0xdec   :  { %5700 = vmatprep.subr.bf16.mxu1 %v5195_v37  ;;  %v5326_v37 = vld [vmem:[#allocation4 + $0xff8] sm:$0xff] }
 0xdef   :  { %5701 = vmatpush1.bf16.msra.mxu1 %v5194_v54  ;;  %v5333_v54 = vld [vmem:[#allocation4 + $0x1068] sm:$0xff] }
 0xdf0   :  { %5702 = vmatprep.subr.bf16.mxu1 %v5201_v33  ;;  %v5332_v33 = vld [vmem:[#allocation4 + $0x1060] sm:$0xff] }
 0xdf3   :  { %5703 = vmatpush1.bf16.msra.mxu1 %v5200_v1  ;;  %v5339_v1 = vld [vmem:[#allocation4 + $0x10d0] sm:$0xff] }
 0xdf4   :  { %5704 = vmatprep.subr.bf16.mxu1 %v5207_v4  ;;  %v5338_v4 = vld [vmem:[#allocation4 + $0x10c8] sm:$0xff] }
 0xdf7   :  { %5705 = vmatpush1.bf16.msra.mxu1 %v5206_v46  ;;  %v5345_v46 = vld [vmem:[#allocation4 + $0x1138] sm:$0xff] }
 0xdf8   :  { %5706 = vmatprep.subr.bf16.mxu1 %v5213_v9  ;;  %v5344_v9 = vld [vmem:[#allocation4 + $0x1130] sm:$0xff] }
 0xdfb   :  { %5707 = vmatpush1.bf16.msra.mxu1 %v5212_v44  ;;  %v5351_v44 = vld [vmem:[#allocation4 + $0x11a0] sm:$0xff] }
 0xdfc   :  { %5708 = vmatprep.subr.bf16.mxu1 %v5219_v12  ;;  %v5350_v12 = vld [vmem:[#allocation4 + $0x1198] sm:$0xff] }
 0xdff   :  { %5709 = vmatpush1.bf16.msra.mxu1 %v5218_v50  ;;  %v5357_v50 = vld [vmem:[#allocation4 + $0x1208] sm:$0xff] }
 0xe00   :  { %5710 = vmatprep.subr.bf16.mxu1 %v5225_v2  ;;  %v5356_v2 = vld [vmem:[#allocation4 + $0x1200] sm:$0xff] }
 0xe03   :  { %5711 = vmatpush1.bf16.msra.mxu1 %v5224_v36  ;;  %v5363_v36 = vld [vmem:[#allocation4 + $0x1270] sm:$0xff] }
 0xe04   :  { %5712 = vmatprep.subr.bf16.mxu1 %v5231_v53  ;;  %v5362_v53 = vld [vmem:[#allocation4 + $0x1268] sm:$0xff] }
 0xe07   :  { %5713 = vmatpush1.bf16.msra.mxu1 %v5230_v20  ;;  %v5369_v20 = vld [vmem:[#allocation4 + $0x12d8] sm:$0xff] }
 0xe08   :  { %5714 = vmatprep.subr.bf16.mxu1 %v5237_v47  ;;  %v5368_v47 = vld [vmem:[#allocation4 + $0x12d0] sm:$0xff] }
 0xe0b   :  { %5715 = vmatpush1.bf16.msra.mxu1 %v5236_v16  ;;  %v5375_v16 = vld [vmem:[#allocation4 + $0x1340] sm:$0xff] }
 0xe0c   :  { %5716 = vmatprep.subr.bf16.mxu1 %v5243_v15  ;;  %v5374_v15 = vld [vmem:[#allocation4 + $0x1338] sm:$0xff] }
 0xe0f   :  { %5717 = vmatpush1.bf16.msra.mxu1 %v5242_v13 }
 0xe10   :  { %5718 = vmatprep.subr.bf16.mxu1 %v5249_v7 }
 0xe13   :  { %5719 = vmatpush1.bf16.msra.mxu1 %v5248_v5 }
 0xe14   :  { %5720 = vmatprep.subr.bf16.mxu1 %v5255_v41 }
 0xe17   :  { %5721 = vmatpush1.bf16.msra.mxu1 %v5254_v3 }
 0xe18   :  { %5722 = vmatprep.subr.bf16.mxu1 %v5261_v29 }
 0xe1b   :  { %5723 = vmatpush1.bf16.msra.mxu1 %v5260_v56 }
 0xe1c   :  { %5724 = vmatprep.subr.bf16.mxu1 %v5267_v10 }
 0xe1f   :  { %5725 = vmatpush1.bf16.msra.mxu1 %v5266_v11  ;;  %v5377_v11 = vld [vmem:[#allocation14 + $0x7] ss:$8 sm:$0xf] }
 0xe20   :  { %5726 = vmatprep.subr.bf16.mxu1 %v5273_v62  ;;  %v5378_v62 = vld [vmem:[#allocation14 + $0x7] ss:$8 sm:$0x30] }
 0xe23   :  { %5727 = vmatpush1.bf16.msra.mxu1 %v5272_v57  ;;  %v5379_v57 = vor.u32 %v5378_v62, %v5377_v11 }
 0xe24   :  { %5728 = vmatprep.subr.bf16.mxu1 %v5279_v21 }
 0xe25   :  { %v5384_v21 = vrot.slane %v5379_v57, %v7978_v51 }
 0xe27   :  { %5729 = vmatpush1.bf16.msra.mxu1 %v5278_v6  ;;  %v5388_v6 = vrot.slane %v5379_v57, %v7963_v23 }
 0xe28   :  { %5739 = vmatprep.subr.bf16.mxu1 %v5285_v31 }
 0xe2a   :  { %5731 = vmatmul.mubr.bf16.vlgmr.msra.gmra.mrb[64].mxu1 %v8521_v63  ;;  %v5314_v63 = vld [vmem:[#allocation4 + $0xf28] sm:$0xff] }
 0xe2b   :  { %5740 = vmatpush1.bf16.msra.mxu1 %v5284_v35  ;;  %5771 = vmatprep.mubr.bf16.mxu1 %v8525_v8  ;;  %v5320_v8 = vld [vmem:[#allocation4 + $0xf90] sm:$0xff] }
 0xe2c   :  { %5741 = vmatprep.subr.bf16.mxu1 %v5291_v28  ;;  %v5392_v28 = vrot.slane %v5379_v57, %v8007_v40 }
 0xe2f   :  { %5742 = vmatpush1.bf16.msra.mxu1 %v5290_v38 }
 0xe30   :  { %5743 = vmatprep.subr.bf16.mxu1 %v5297_v52 }
 0xe33   :  { %5744 = vmatpush1.bf16.msra.mxu1 %v5296_v55  ;;  %v5396_v55 = vrot.slane %v5379_v57, %v7987_v61 }
 0xe34   :  { %5745 = vmatprep.subr.bf16.mxu1 %v5303_v45 }
 0xe37   :  { %5746 = vmatpush1.bf16.msra.mxu1 %v5302_v32 }
 0xe38   :  { %5747 = vmatprep.subr.bf16.mxu1 %v5309_v0 }
 0xe3b   :  { %5748 = vmatpush1.bf16.msra.mxu1 %v5308_v58 }
 0xe3c   :  { %5749 = vmatprep.subr.bf16.mxu1 %v5315_v48 }
 0xe3f   :  { %5750 = vmatpush1.bf16.msra.mxu1 %v5314_v63 }
 0xe40   :  { %5751 = vmatprep.subr.bf16.mxu1 %v5321_v14 }
 0xe43   :  { %5752 = vmatpush1.bf16.msra.mxu1 %v5320_v8 }
 0xe44   :  { %5753 = vmatprep.subr.bf16.mxu1 %v5327_v17 }
 0xe47   :  { %5754 = vmatpush1.bf16.msra.mxu1 %v5326_v37 }
 0xe48   :  { %5755 = vmatprep.subr.bf16.mxu1 %v5333_v54 }
 0xe4b   :  { %5756 = vmatpush1.bf16.msra.mxu1 %v5332_v33 }
 0xe4c   :  { %5757 = vmatprep.subr.bf16.mxu1 %v5339_v1 }
 0xe4f   :  { %5758 = vmatpush1.bf16.msra.mxu1 %v5338_v4 }
 0xe50   :  { %5759 = vmatprep.subr.bf16.mxu1 %v5345_v46 }
 0xe53   :  { %5760 = vmatpush1.bf16.msra.mxu1 %v5344_v9 }
 0xe54   :  { %5761 = vmatprep.subr.bf16.mxu1 %v5351_v44 }
 0xe57   :  { %5762 = vmatpush1.bf16.msra.mxu1 %v5350_v12 }
 0xe58   :  { %5763 = vmatprep.subr.bf16.mxu1 %v5357_v50 }
 0xe5b   :  { %5764 = vmatpush1.bf16.msra.mxu1 %v5356_v2 }
 0xe5c   :  { %5765 = vmatprep.subr.bf16.mxu1 %v5363_v36 }
 0xe5f   :  { %5766 = vmatpush1.bf16.msra.mxu1 %v5362_v53 }
 0xe60   :  { %5767 = vmatprep.subr.bf16.mxu1 %v5369_v20 }
 0xe63   :  { %5768 = vmatpush1.bf16.msra.mxu1 %v5368_v47 }
 0xe64   :  { %5769 = vmatprep.subr.bf16.mxu1 %v5375_v16 }
 0xe67   :  { %5770 = vmatpush1.bf16.msra.mxu1 %v5374_v15 }
 0xe6a   :  { %5772 = vmatmul.mubr.bf16.vlgmr.msra.gmra.mrb[64].mxu1 %v8533_v59 }
 0xe7d   :  { %v5527_v13 = vpop.f32.mrb[60].mxu1 }
 0xe7e   :  { %v5650_v7 = vpop.f32.mrb[32].mxu0  ;;  %v5529_v5 = vpop.f32.mrb[61].mxu1  ;;  %v7194_v31 = vadd.f32 %v5527_v13, %v5384_v21  ;;  %v6057_v21 = vld [vmem:[#allocation4 + $0x38] sm:$0xff] }
 0xe7f   :  { %v5652_v41 = vpop.f32.mrb[33].mxu0  ;;  %v5531_v3 = vpop.f32.mrb[62].mxu1  ;;  %v7195_v35 = vadd.f32 %v5529_v5, %v5388_v6  ;;  %v7196_v52 = vadd.f32 %v5650_v7, %v5392_v28  ;;  %v6059_v6 = vld [vmem:[#allocation4 + $0x48] sm:$0xff]  ;;  %6427 = vmatprep.subr.bf16.mxu0 %v6057_v21  ;;  %v6065_v28 = vld [vmem:[#allocation4 + $0xb0] sm:$0xff] }
 0xe80   :  { %v5654_v29 = vpop.f32.mrb[34].mxu0  ;;  %v5532_v56 = vpop.f32.mrb[63].mxu1  ;;  %v5786_v59 = vrot.slane %v7194_v31, 1  ;;  %v7197_v58 = vadd.f32 %v5652_v41, %v5396_v55  ;;  %v8559_v17 = vadd.f32 %v7194_v31, %v8383_v27  ;;  %v5400_v27 = vrot.slane %v5379_v57, %v8032_v24  ;;  %6550 = vmatprep.subr.bf16.mxu1 %v6059_v6  ;;  %v6058_v31 = vld [vmem:[#allocation4 + $0x40] sm:$0xff]  ;;  %v6071_v55 = vld [vmem:[#allocation4 + $0x118] sm:$0xff] }
 0xe81   :  { %v5655_v10 = vpop.f32.mrb[35].mxu0  ;;  %v5787_v38 = vrot.slane %v7195_v35, 1  ;;  %v5788_v0 = vrot.slane %v7196_v52, 1  ;;  %v8562_v37 = vadd.f32 %v7195_v35, %v8381_v49  ;;  %v6063_v35 = vld [vmem:[#allocation4 + $0xa0] sm:$0xff]  ;;  %6551 = vmatpush1.bf16.msra.mxu1 %v6058_v31 }
 0xe82   :  { %v8548_v45 = vadd.f32 %v5786_v59, %v8393_v19  ;;  %v5789_v8 = vrot.slane %v7197_v58, 1  ;;  %v8565_v19 = vadd.f32 %v7196_v52, %v8387_v60  ;;  %v5404_v60 = vrot.slane %v5379_v57, %v8010_v26  ;;  %6552 = vmatprep.subr.bf16.mxu1 %v6065_v28  ;;  %v6062_v59 = vld [vmem:[#allocation4 + $0x98] sm:$0xff]  ;;  %v6069_v52 = vld [vmem:[#allocation4 + $0x108] sm:$0xff] }
 0xe83   :  { %v8551_v32 = vadd.f32 %v5787_v38, %v8389_v39  ;;  %v8556_v14 = vadd.f32 %v5788_v0, %v8401_v18  ;;  %v8582_v46 = vadd.f32 %v7197_v58, %v8385_v25  ;;  %v6064_v38 = vld [vmem:[#allocation4 + $0xa8] sm:$0xff]  ;;  %v6068_v0 = vld [vmem:[#allocation4 + $0x100] sm:$0xff]  ;;  %v6070_v58 = vld [vmem:[#allocation4 + $0x110] sm:$0xff] }
 0xe84   :  { %v5836_v48 = vrot.slane %v8548_v45, 7  ;;  %v8573_v18 = vadd.f32 %v5789_v8, %v8397_v30  ;;  %v6074_v8 = vld [vmem:[#allocation4 + $0x168] sm:$0xff] }
 0xe85   :  { %v5838_v63 = vrot.slane %v8551_v32, 7  ;;  %v5840_v33 = vrot.slane %v8556_v14, 7  ;;  %6553 = vmatpush1.bf16.msra.mxu1 %v6064_v38 }
 0xe86   :  { %v5837_v39 = vsel %vm3614_vm4, %v5836_v48, %v8559_v17  ;;  %v5842_v9 = vrot.slane %v8573_v18, 7  ;;  %6554 = vmatprep.subr.bf16.mxu1 %v6071_v55  ;;  %v6075_v48 = vld [vmem:[#allocation4 + $0x170] sm:$0xff] }
 0xe87   :  { %v5839_v54 = vsel %vm3614_vm4, %v5838_v63, %v8562_v37  ;;  %v5854_v1 = vsel %vm4081_vm5, %v5837_v39, 0.0  ;;  %v5841_v4 = vsel %vm3614_vm4, %v5840_v33, %v8565_v19  ;;  %v6077_v63 = vld [vmem:[#allocation4 + $0x180] sm:$0xff]  ;;  %v6076_v39 = vld [vmem:[#allocation4 + $0x178] sm:$0xff]  ;;  %v6083_v33 = vld [vmem:[#allocation4 + $0x1e8] sm:$0xff] }
 0xe88   :  { %v5855_v49 = vsel %vm4081_vm5, %v5839_v54, 0.0  ;;  %v5857_v2 = vsel %vm4081_vm5, %v5841_v4, 0.0  ;;  %v5843_v20 = vsel %vm3614_vm4, %v5842_v9, %v8582_v46  ;;  %v6081_v54 = vld [vmem:[#allocation4 + $0x1d8] sm:$0xff]  ;;  %v6088_v9 = vld [vmem:[#allocation4 + $0x248] sm:$0xff] }
 0xe89   :  { %v5856_v12 = vadd.f32 %v5855_v49, %v5854_v1  ;;  %v5859_v7 = vsel %vm4081_vm5, %v5843_v20, 0.0  ;;  %6555 = vmatpush1.bf16.msra.mxu1 %v6070_v58  ;;  %v6082_v1 = vld [vmem:[#allocation4 + $0x1e0] sm:$0xff]  ;;  %v6086_v4 = vld [vmem:[#allocation4 + $0x238] sm:$0xff] }
 0xe8a   :  { %6556 = vmatprep.subr.bf16.mxu1 %v6077_v63  ;;  %v6087_v49 = vld [vmem:[#allocation4 + $0x240] sm:$0xff]  ;;  %v6100_v20 = vld [vmem:[#allocation4 + $0x318] sm:$0xff] }
 0xe8b   :  { %v5858_v13 = vadd.f32 %v5857_v2, %v5856_v12  ;;  %v6095_v12 = vld [vmem:[#allocation4 + $0x2b8] sm:$0xff]  ;;  %v6099_v2 = vld [vmem:[#allocation4 + $0x310] sm:$0xff] }
 0xe8d   :  { %6557 = vmatpush1.bf16.msra.mxu1 %v6076_v39 }
 0xe8e   :  { %6558 = vmatprep.subr.bf16.mxu1 %v6083_v33 }
 0xe91   :  { %6559 = vmatpush1.bf16.msra.mxu1 %v6082_v1 }
 0xf3d   :  { %v5773_v44 = vpop.f32.mrb[64].mxu1 }
 0xf3e   :  { %v7198_v30 = vadd.f32 %v5773_v44, %v5400_v27  ;;  %v5775_v50 = vpop.f32.mrb[65].mxu1  ;;  %v6080_v27 = vld [vmem:[#allocation4 + $0x1d0] sm:$0xff]  ;;  %v6093_v44 = vld [vmem:[#allocation4 + $0x2a8] sm:$0xff] }
 0xf3f   :  { %v7199_v36 = vadd.f32 %v5775_v50, %v5404_v60  ;;  %v5777_v53 = vpop.f32.mrb[66].mxu1  ;;  %v6089_v60 = vld [vmem:[#allocation4 + $0x250] sm:$0xff] }
 0xf40   :  { %v5790_v47 = vrot.slane %v7198_v30, 1  ;;  %v5778_v16 = vpop.f32.mrb[67].mxu1  ;;  %v8596_v41 = vadd.f32 %v7198_v30, %v8417_v43  ;;  %6560 = vmatprep.subr.bf16.mxu1 %v6089_v60  ;;  %v6092_v30 = vld [vmem:[#allocation4 + $0x2a0] sm:$0xff]  ;;  %v6094_v50 = vld [vmem:[#allocation4 + $0x2b0] sm:$0xff]  ;;  %v6098_v53 = vld [vmem:[#allocation4 + $0x308] sm:$0xff] }
 0xf41   :  { %v5791_v15 = vrot.slane %v7199_v36, 1  ;;  %v8600_v29 = vadd.f32 %v7199_v36, %v8415_v34  ;;  %v6056_v34 = vld [vmem:[#allocation4 + $0x30] sm:$0xff]  ;;  %6561 = vmatpush1.bf16.msra.mxu1 %v6088_v9  ;;  %v6101_v36 = vld [vmem:[#allocation4 + $0x320] sm:$0xff] }
 0xf42   :  { %v8589_v25 = vadd.f32 %v5790_v47, %v8437_v42  ;;  %v5860_v42 = vadd.f32 %v5859_v7, %v5858_v13  ;;  %6428 = vmatpush1.bf16.msra.mxu0 %v6056_v34  ;;  %6562 = vmatprep.subr.bf16.mxu1 %v6095_v12  ;;  %v6107_v12 = vld [vmem:[#allocation4 + $0x388] sm:$0xff] }
 0xf43   :  { %v8593_v5 = vadd.f32 %v5791_v15, %v8421_v22  ;;  %6429 = vmatprep.subr.bf16.mxu0 %v6063_v35 }
 0xf44   :  { %v5844_v3 = vrot.slane %v8589_v25, 7 }
 0xf45   :  { %v5846_v56 = vrot.slane %v8593_v5, 7  ;;  %6563 = vmatpush1.bf16.msra.mxu1 %v6094_v50  ;;  %v6106_v50 = vld [vmem:[#allocation4 + $0x380] sm:$0xff] }
 0xf46   :  { %v5845_v10 = vsel %vm3614_vm4, %v5844_v3, %v8596_v41  ;;  %6430 = vmatpush1.bf16.msra.mxu0 %v6062_v59  ;;  %6564 = vmatprep.subr.bf16.mxu1 %v6101_v36  ;;  %v6113_v36 = vld [vmem:[#allocation4 + $0x3f0] sm:$0xff] }
 0xf47   :  { %v5847_v11 = vsel %vm3614_vm4, %v5846_v56, %v8600_v29  ;;  %v5861_v22 = vsel %vm4081_vm5, %v5845_v10, 0.0  ;;  %6431 = vmatprep.subr.bf16.mxu0 %v6069_v52 }
 0xf48   :  { %v5862_v62 = vadd.f32 %v5861_v22, %v5860_v42  ;;  %v5863_v43 = vsel %vm4081_vm5, %v5847_v11, 0.0 }
 0xf49   :  { %6565 = vmatpush1.bf16.msra.mxu1 %v6100_v20  ;;  %v6112_v20 = vld [vmem:[#allocation4 + $0x3e8] sm:$0xff] }
 0xf4a   :  { %v5864_v57 = vadd.f32 %v5863_v43, %v5862_v62  ;;  %6432 = vmatpush1.bf16.msra.mxu0 %v6068_v0  ;;  %6566 = vmatprep.subr.bf16.mxu1 %v6107_v12 }
 0xf4b   :  { %6433 = vmatprep.subr.bf16.mxu0 %v6075_v48 }
 0xf4c   :  { %5865 = vadd.xlane.f32.xlu0 %v5864_v57 }
 0xf4d   :  { %6567 = vmatpush1.bf16.msra.mxu1 %v6106_v50 }
 0xf4e   :  { %6434 = vmatpush1.bf16.msra.mxu0 %v6074_v8  ;;  %6568 = vmatprep.subr.bf16.mxu1 %v6113_v36 }
 0xf4f   :  { %6435 = vmatprep.subr.bf16.mxu0 %v6081_v54 }
 0xf51   :  { %6569 = vmatpush1.bf16.msra.mxu1 %v6112_v20 }
 0xf52   :  { %6436 = vmatpush1.bf16.msra.mxu0 %v6080_v27 }
 0xf53   :  { %6437 = vmatprep.subr.bf16.mxu0 %v6087_v49 }
 0xf56   :  { %6438 = vmatpush1.bf16.msra.mxu0 %v6086_v4 }
 0xf57   :  { %6439 = vmatprep.subr.bf16.mxu0 %v6093_v44  ;;  %v6105_v44 = vld [vmem:[#allocation4 + $0x378] sm:$0xff] }
 0xf5a   :  { %6440 = vmatpush1.bf16.msra.mxu0 %v6092_v30  ;;  %v6104_v30 = vld [vmem:[#allocation4 + $0x370] sm:$0xff] }
 0xf5b   :  { %6441 = vmatprep.subr.bf16.mxu0 %v6099_v2  ;;  %v6111_v2 = vld [vmem:[#allocation4 + $0x3e0] sm:$0xff] }
 0xf5e   :  { %6442 = vmatpush1.bf16.msra.mxu0 %v6098_v53  ;;  %v6110_v53 = vld [vmem:[#allocation4 + $0x3d8] sm:$0xff] }
 0xf5f   :  { %6443 = vmatprep.subr.bf16.mxu0 %v6105_v44 }
 0xf62   :  { %6444 = vmatpush1.bf16.msra.mxu0 %v6104_v30 }
 0xf63   :  { %6445 = vmatprep.subr.bf16.mxu0 %v6111_v2 }
 0xf66   :  { %6446 = vmatpush1.bf16.msra.mxu0 %v6110_v53 }
 0xfd9   :  { %v5866_v47 = vpop.xlane.xlu0 %5865 }
 0xfda   :  { %v5867_v16 = vmul.f32 0.0013020834, %v5866_v47  ;;  %v6117_v47 = vld [vmem:[#allocation4 + $0x448] sm:$0xff] }
 0xfdb   :  { %6447 = vmatprep.subr.bf16.mxu0 %v6117_v47 }
 0xfdc   :  { %v5869_v15 = vrot.slane %v5867_v16, 1  ;;  %v8610_v13 = vsub.f32 %v8559_v17, %v5867_v16  ;;  %v8613_v7 = vsub.f32 %v8562_v37, %v5867_v16  ;;  %v8616_v3 = vsub.f32 %v8565_v19, %v5867_v16 }
 0xfdd   :  { %v8637_v19 = vsub.f32 %v8582_v46, %v5867_v16  ;;  %v8661_v34 = vsub.f32 %v8600_v29, %v5867_v16 }
 0xfde   :  { %v8619_v56 = vsub.f32 %v8548_v45, %v5869_v15  ;;  %v8622_v10 = vsub.f32 %v8551_v32, %v5869_v15  ;;  %v8625_v42 = vsub.f32 %v8556_v14, %v5869_v15  ;;  %v8628_v11 = vsub.f32 %v8573_v18, %v5869_v15 }
 0xfdf   :  { %v8631_v17 = vsub.f32 %v8589_v25, %v5869_v15  ;;  %v8634_v37 = vsub.f32 %v8593_v5, %v5869_v15  ;;  %v8640_v45 = vsub.f32 %v8596_v41, %v5867_v16  ;;  %v5884_v32 = vmul.f32 %v8610_v13, %v8610_v13  ;;  %v6119_v16 = vld [vmem:[#allocation4 + $0x458] sm:$0xff]  ;;  %v6116_v15 = vld [vmem:[#allocation4 + $0x440] sm:$0xff] }
 0xfe0   :  { %v5890_v14 = vmul.f32 %v8619_v56, %v8619_v56  ;;  %v5891_v18 = vmul.f32 %v8622_v10, %v8622_v10  ;;  %v5892_v25 = vmul.f32 %v8625_v42, %v8625_v42  ;;  %v5893_v5 = vmul.f32 %v8628_v11, %v8628_v11  ;;  %6570 = vmatprep.subr.bf16.mxu1 %v6119_v16 }
 0xfe1   :  { %v5885_v46 = vmul.f32 %v8613_v7, %v8613_v7  ;;  %v5886_v41 = vmul.f32 %v8616_v3, %v8616_v3  ;;  %v5894_v22 = vmul.f32 %v8631_v17, %v8631_v17  ;;  %v5895_v62 = vmul.f32 %v8634_v37, %v8634_v37  ;;  %6448 = vmatpush1.bf16.msra.mxu0 %v6116_v15 }
 0xfe2   :  { %v5908_v43 = vrot.slane %v5890_v14, 7  ;;  %v5910_v57 = vrot.slane %v5891_v18, 7  ;;  %v5912_v21 = vrot.slane %v5892_v25, 7  ;;  %v5914_v6 = vrot.slane %v5893_v5, 7  ;;  %v6123_v14 = vld [vmem:[#allocation4 + $0x4b0] sm:$0xff]  ;;  %v6125_v18 = vld [vmem:[#allocation4 + $0x4c0] sm:$0xff] }
 0xfe3   :  { %v5887_v31 = vmul.f32 %v8637_v19, %v8637_v19  ;;  %v5916_v38 = vrot.slane %v5894_v22, 7  ;;  %v5888_v0 = vmul.f32 %v8640_v45, %v8640_v45  ;;  %v5918_v58 = vrot.slane %v5895_v62, 7  ;;  %6449 = vmatprep.subr.bf16.mxu0 %v6123_v14  ;;  %v6122_v25 = vld [vmem:[#allocation4 + $0x4a8] sm:$0xff]  ;;  %v6124_v5 = vld [vmem:[#allocation4 + $0x4b8] sm:$0xff]  ;;  %v6128_v22 = vld [vmem:[#allocation4 + $0x510] sm:$0xff] }
 0xfe4   :  { %v5909_v35 = vsel %vm3614_vm4, %v5908_v43, %v5884_v32  ;;  %v5911_v28 = vsel %vm3614_vm4, %v5910_v57, %v5885_v46  ;;  %v5913_v59 = vsel %vm3614_vm4, %v5912_v21, %v5886_v41  ;;  %v5889_v8 = vmul.f32 %v8661_v34, %v8661_v34  ;;  %v6118_v32 = vld [vmem:[#allocation4 + $0x450] sm:$0xff]  ;;  %v6129_v46 = vld [vmem:[#allocation4 + $0x518] sm:$0xff]  ;;  %v6131_v41 = vld [vmem:[#allocation4 + $0x528] sm:$0xff] }
 0xfe5   :  { %v5926_v52 = vsel %vm4081_vm5, %v5909_v35, 0.0  ;;  %v5927_v55 = vsel %vm4081_vm5, %v5911_v28, 0.0  ;;  %v5915_v29 = vsel %vm3614_vm4, %v5914_v6, %v5887_v31  ;;  %v5929_v63 = vsel %vm4081_vm5, %v5913_v59, 0.0  ;;  %6571 = vmatpush1.bf16.msra.mxu1 %v6118_v32  ;;  %6450 = vmatpush1.bf16.msra.mxu0 %v6122_v25  ;;  %v6130_v62 = vld [vmem:[#allocation4 + $0x520] sm:$0xff]  ;;  %v6137_v57 = vld [vmem:[#allocation4 + $0x590] sm:$0xff]  ;;  %v6134_v21 = vld [vmem:[#allocation4 + $0x578] sm:$0xff] }
 0xfe6   :  { %v5928_v48 = vadd.f32 %v5927_v55, %v5926_v52  ;;  %v5917_v39 = vsel %vm3614_vm4, %v5916_v38, %v5888_v0  ;;  %v5931_v33 = vsel %vm4081_vm5, %v5915_v29, 0.0  ;;  %v5919_v27 = vsel %vm3614_vm4, %v5918_v58, %v5889_v8  ;;  %6572 = vmatprep.subr.bf16.mxu1 %v6125_v18  ;;  %6451 = vmatprep.subr.bf16.mxu0 %v6129_v46  ;;  %v6135_v43 = vld [vmem:[#allocation4 + $0x580] sm:$0xff]  ;;  %v6136_v6 = vld [vmem:[#allocation4 + $0x588] sm:$0xff]  ;;  %v6143_v35 = vld [vmem:[#allocation4 + $0x5f8] sm:$0xff] }
 0xfe7   :  { %v5933_v49 = vsel %vm4081_vm5, %v5917_v39, 0.0  ;;  %v5935_v4 = vsel %vm4081_vm5, %v5919_v27, 0.0  ;;  %v6141_v31 = vld [vmem:[#allocation4 + $0x5e8] sm:$0xff]  ;;  %v6140_v28 = vld [vmem:[#allocation4 + $0x5e0] sm:$0xff]  ;;  %v6142_v59 = vld [vmem:[#allocation4 + $0x5f0] sm:$0xff] }
 0xfe8   :  { %v5930_v54 = vadd.f32 %v5929_v63, %v5928_v48  ;;  %v6147_v38 = vld [vmem:[#allocation4 + $0x650] sm:$0xff]  ;;  %v6149_v52 = vld [vmem:[#allocation4 + $0x660] sm:$0xff]  ;;  %v6146_v55 = vld [vmem:[#allocation4 + $0x648] sm:$0xff] }
 0xfe9   :  { %6573 = vmatpush1.bf16.msra.mxu1 %v6124_v5  ;;  %6452 = vmatpush1.bf16.msra.mxu0 %v6128_v22  ;;  %v6148_v0 = vld [vmem:[#allocation4 + $0x658] sm:$0xff]  ;;  %v6155_v58 = vld [vmem:[#allocation4 + $0x6c8] sm:$0xff] }
 0xfea   :  { %v5932_v1 = vadd.f32 %v5931_v33, %v5930_v54  ;;  %6574 = vmatprep.subr.bf16.mxu1 %v6131_v41  ;;  %6453 = vmatprep.subr.bf16.mxu0 %v6135_v43  ;;  %v6153_v29 = vld [vmem:[#allocation4 + $0x6b8] sm:$0xff] }
 0xfeb   :  { %v5817_v39 = vld [vmem:[#allocation14 + $0x30] ss:$8 sm:$0xf]  ;;  %v5821_v33 = vld [vmem:[#allocation14 + $0x31] ss:$8 sm:$0xf] }
 0xfec   :  { %v5934_v60 = vadd.f32 %v5933_v49, %v5932_v1  ;;  %v5818_v54 = vld [vmem:[#allocation14 + $0x30] ss:$8 sm:$0x30]  ;;  %v5822_v27 = vld [vmem:[#allocation14 + $0x31] ss:$8 sm:$0x30] }
 0xfed   :  { %6575 = vmatpush1.bf16.msra.mxu1 %v6130_v62  ;;  %6454 = vmatpush1.bf16.msra.mxu0 %v6134_v21  ;;  %v5819_v1 = vor.u32 %v5818_v54, %v5817_v39  ;;  %v5823_v49 = vor.u32 %v5822_v27, %v5821_v33 }
 0xfee   :  { %v5936_v9 = vadd.f32 %v5935_v4, %v5934_v60  ;;  %6576 = vmatprep.subr.bf16.mxu1 %v6137_v57  ;;  %6455 = vmatprep.subr.bf16.mxu0 %v6141_v31 }
 0xfef   :  { %v5966_v60 = vrot.slane %v5819_v1, %v7963_v23  ;;  %v5962_v4 = vrot.slane %v5819_v1, %v7978_v51  ;;  %v6009_v44 = vrot.slane %v5823_v49, %v7963_v23  ;;  %v6005_v12 = vrot.slane %v5823_v49, %v7978_v51 }
 0xff0   :  { %5937 = vadd.xlane.f32.xlu0 %v5936_v9  ;;  %v5974_v9 = vrot.slane %v5819_v1, %v7987_v61  ;;  %v6017_v30 = vrot.slane %v5823_v49, %v7987_v61  ;;  %v5970_v50 = vrot.slane %v5819_v1, %v8007_v40  ;;  %v6013_v36 = vrot.slane %v5823_v49, %v8007_v40 }
 0xff1   :  { %6577 = vmatpush1.bf16.msra.mxu1 %v6136_v6  ;;  %6456 = vmatpush1.bf16.msra.mxu0 %v6140_v28  ;;  %v5982_v53 = vrot.slane %v5819_v1, %v8010_v26  ;;  %v6025_v20 = vrot.slane %v5823_v49, %v8010_v26  ;;  %v5978_v47 = vrot.slane %v5819_v1, %v8032_v24 }
 0xff2   :  { %6578 = vmatprep.subr.bf16.mxu1 %v6143_v35  ;;  %6457 = vmatprep.subr.bf16.mxu0 %v6147_v38  ;;  %v6021_v46 = vrot.slane %v5823_v49, %v8032_v24 }
 0xff5   :  { %6579 = vmatpush1.bf16.msra.mxu1 %v6142_v59  ;;  %6458 = vmatpush1.bf16.msra.mxu0 %v6146_v55 }
 0xff6   :  { %6580 = vmatprep.subr.bf16.mxu1 %v6149_v52  ;;  %6468 = vmatprep.subr.bf16.mxu0 %v6153_v29 }
 0xff9   :  { %6581 = vmatpush1.bf16.msra.mxu1 %v6148_v0 }
 0xffa   :  { %6591 = vmatprep.subr.bf16.mxu1 %v6155_v58 }
0x107d   :  { %v5938_v48 = vpop.xlane.xlu0 %5937 }
0x107e   :  { %v5939_v63 = vmul.f32 0.0013020834, %v5938_v48 }
0x1080   :  { %v5940_v8 = vadd.f32 1e-05, %v5939_v63 }
0x1082   :  { %7442 = vrsqrt.f32 %v5940_v8 }
0x108c   :  { %v7443_v2 = vpop.eup %7442 }
0x108d   :  { %v5943_v16 = vrot.slane %v7443_v2, 1  ;;  %v5947_v15 = vmul.f32 %v7443_v2, %v8613_v7  ;;  %v5946_v32 = vmul.f32 %v7443_v2, %v8610_v13  ;;  %v5949_v14 = vmul.f32 %v7443_v2, %v8637_v19 }
0x108e   :  { %v5948_v18 = vmul.f32 %v7443_v2, %v8616_v3  ;;  %v5951_v25 = vmul.f32 %v7443_v2, %v8661_v34  ;;  %v5950_v5 = vmul.f32 %v7443_v2, %v8640_v45 }
0x108f   :  { %v5953_v41 = vmul.f32 %v5943_v16, %v8622_v10  ;;  %v5990_v22 = vmul.f32 %v5966_v60, %v5947_v15  ;;  %v5952_v62 = vmul.f32 %v5943_v16, %v8619_v56  ;;  %v5989_v43 = vmul.f32 %v5962_v4, %v5946_v32 }
0x1090   :  { %v5955_v7 = vmul.f32 %v5943_v16, %v8628_v11  ;;  %v5992_v57 = vmul.f32 %v5974_v9, %v5949_v14  ;;  %v5954_v13 = vmul.f32 %v5943_v16, %v8625_v42  ;;  %v5991_v19 = vmul.f32 %v5970_v50, %v5948_v18 }
0x1091   :  { %v5996_v21 = vmul.f32 %v5966_v60, %v5953_v41  ;;  %v6033_v3 = vadd.f32 %v6009_v44, %v5990_v22  ;;  %v5995_v6 = vmul.f32 %v5962_v4, %v5952_v62  ;;  %v6032_v34 = vadd.f32 %v6005_v12, %v5989_v43 }
0x1092   :  { %v5998_v31 = vmul.f32 %v5974_v9, %v5955_v7  ;;  %v6035_v45 = vadd.f32 %v6017_v30, %v5992_v57  ;;  %v5997_v35 = vmul.f32 %v5970_v50, %v5954_v13  ;;  %v6034_v28 = vadd.f32 %v6013_v36, %v5991_v19  ;;  %v6159_v7 = vld [vmem:[#allocation4 + $0x720] sm:$0xff]  ;;  %v6161_v57 = vld [vmem:[#allocation4 + $0x730] sm:$0xff] }
0x1093   :  { %v6039_v59 = vadd.f32 %v6009_v44, %v5996_v21  ;;  %v6045_v10 = vpack.c.bf16 %v6033_v3, %v6033_v3  ;;  %v6038_v38 = vadd.f32 %v6005_v12, %v5995_v6  ;;  %v6044_v52 = vpack.c.bf16 %v6032_v34, %v6032_v34  ;;  %v6158_v3 = vld [vmem:[#allocation4 + $0x718] sm:$0xff]  ;;  %v6160_v6 = vld [vmem:[#allocation4 + $0x728] sm:$0xff] }
0x1094   :  { %v6041_v56 = vadd.f32 %v6017_v30, %v5998_v31  ;;  %v6047_v55 = vpack.c.bf16 %v6035_v45, %v6035_v45  ;;  %v6040_v0 = vadd.f32 %v6013_v36, %v5997_v35  ;;  %v6046_v11 = vpack.c.bf16 %v6034_v28, %v6034_v28  ;;  %v6165_v31 = vld [vmem:[#allocation4 + $0x788] sm:$0xff]  ;;  %v6167_v45 = vld [vmem:[#allocation4 + $0x798] sm:$0xff] }
0x1095   :  { %v6051_v29 = vpack.c.bf16 %v6039_v59, %v6039_v59  ;;  %v6392_v58 = vunpack.c.l.b16 %v6045_v10  ;;  %v6050_v42 = vpack.c.bf16 %v6038_v38, %v6038_v38  ;;  %v6391_v48 = vunpack.c.l.b16 %v6044_v52  ;;  %v6164_v38 = vld [vmem:[#allocation4 + $0x780] sm:$0xff]  ;;  %v6166_v52 = vld [vmem:[#allocation4 + $0x790] sm:$0xff] }
0x1096   :  { %v6053_v63 = vpack.c.bf16 %v6041_v56, %v6041_v56  ;;  %v6394_v8 = vunpack.c.l.b16 %v6047_v55  ;;  %v6052_v39 = vpack.c.bf16 %v6040_v0, %v6040_v0  ;;  %v6393_v54 = vunpack.c.l.b16 %v6046_v11  ;;  %v6171_v56 = vld [vmem:[#allocation4 + $0x7f0] sm:$0xff]  ;;  %v6173_v55 = vld [vmem:[#allocation4 + $0x800] sm:$0xff]  ;;  %v6170_v11 = vld [vmem:[#allocation4 + $0x7e8] sm:$0xff] }
0x1097   :  { %v6398_v33 = vunpack.c.l.b16 %v6051_v29  ;;  %v6397_v27 = vunpack.c.l.b16 %v6050_v42  ;;  %v5957_v1 = vmul.f32 %v5943_v16, %v8634_v37  ;;  %v5994_v49 = vmul.f32 %v5982_v53, %v5951_v25  ;;  %v6172_v29 = vld [vmem:[#allocation4 + $0x7f8] sm:$0xff]  ;;  %v6179_v42 = vld [vmem:[#allocation4 + $0x868] sm:$0xff] }
0x1098   :  { %v6400_v60 = vunpack.c.l.b16 %v6053_v63  ;;  %v6399_v4 = vunpack.c.l.b16 %v6052_v39  ;;  %v5956_v9 = vmul.f32 %v5943_v16, %v8631_v17  ;;  %v5993_v44 = vmul.f32 %v5978_v47, %v5950_v5  ;;  %v6154_v5 = vld [vmem:[#allocation4 + $0x6c0] sm:$0xff]  ;;  %v6185_v39 = vld [vmem:[#allocation4 + $0x8d0] sm:$0xff] }
0x1099   :  { %v6405_v12 = vrot.slane %v6398_v33, 7  ;;  %v6403_v30 = vrot.slane %v6397_v27, 7  ;;  %v6000_v50 = vmul.f32 %v5982_v53, %v5957_v1  ;;  %v6037_v2 = vadd.f32 %v6025_v20, %v5994_v49  ;;  %v6152_v53 = vld [vmem:[#allocation4 + $0x6b0] sm:$0xff]  ;;  %v6178_v63 = vld [vmem:[#allocation4 + $0x860] sm:$0xff]  ;;  %v6184_v33 = vld [vmem:[#allocation4 + $0x8c8] sm:$0xff] }
0x109a   :  { %v6409_v36 = vrot.slane %v6400_v60, 7  ;;  %v6407_v15 = vrot.slane %v6399_v4, 7  ;;  %v5999_v32 = vmul.f32 %v5978_v47, %v5956_v9  ;;  %v6036_v14 = vadd.f32 %v6021_v46, %v5993_v44  ;;  %v6189_v27 = vld [vmem:[#allocation4 + $0x928] sm:$0xff]  ;;  %v6191_v1 = vld [vmem:[#allocation4 + $0x938] sm:$0xff]  ;;  %v6188_v49 = vld [vmem:[#allocation4 + $0x920] sm:$0xff] }
0x109b   :  { %v6406_v18 = vsel %vm3614_vm4, %v6405_v12, %v6392_v58  ;;  %v6404_v41 = vsel %vm3614_vm4, %v6403_v30, %v6391_v48  ;;  %v6043_v22 = vadd.f32 %v6025_v20, %v6000_v50  ;;  %v6049_v62 = vpack.c.bf16 %v6037_v2, %v6037_v2  ;;  %v6177_v58 = vld [vmem:[#allocation4 + $0x858] sm:$0xff]  ;;  %v6176_v48 = vld [vmem:[#allocation4 + $0x850] sm:$0xff]  ;;  %v6197_v9 = vld [vmem:[#allocation4 + $0x9a0] sm:$0xff] }
0x109c   :  { %v8707_v37 = vpack.c.b16 %v6406_v18, %v6406_v18  ;;  %v8709_v25 = vpack.c.b16 %v6404_v41, %v6404_v41  ;;  %v6410_v17 = vsel %vm3614_vm4, %v6409_v36, %v6394_v8  ;;  %v8713_v16 = vsel %vm3614_vm4, %v6407_v15, %v6393_v54  ;;  %v6183_v8 = vld [vmem:[#allocation4 + $0x8c0] sm:$0xff]  ;;  %v6182_v54 = vld [vmem:[#allocation4 + $0x8b8] sm:$0xff]  ;;  %v6190_v60 = vld [vmem:[#allocation4 + $0x930] sm:$0xff] }
0x109d   :  { %v6055_v43 = vpack.c.bf16 %v6043_v22, %v6043_v22  ;;  %v6042_v47 = vadd.f32 %v6021_v46, %v5999_v32  ;;  %v8719_v20 = vpack.c.b16 %v6410_v17, %v6410_v17  ;;  %v6048_v19 = vpack.c.bf16 %v6036_v14, %v6036_v14  ;;  %v6195_v4 = vld [vmem:[#allocation4 + $0x990] sm:$0xff]  ;;  %v6194_v44 = vld [vmem:[#allocation4 + $0x988] sm:$0xff]  ;;  %v6196_v12 = vld [vmem:[#allocation4 + $0x998] sm:$0xff] }
0x109e   :  { %6459 = vmatprep.mubr.bf16.mxu0 %v8707_v37  ;;  %6582 = vmatprep.mubr.bf16.mxu1 %v8707_v37  ;;  %v6396_v46 = vunpack.c.l.b16 %v6049_v62  ;;  %v6201_v30 = vld [vmem:[#allocation4 + $0x9f8] sm:$0xff]  ;;  %v6203_v50 = vld [vmem:[#allocation4 + $0xa08] sm:$0xff]  ;;  %v6200_v2 = vld [vmem:[#allocation4 + $0x9f0] sm:$0xff] }
0x109f   :  { %6460 = vmatmul.mubr.bf16.vlgmr.msra.gmra.mrb[36].mxu0 %v8709_v25  ;;  %6583 = vmatmul.mubr.bf16.vlgmr.msra.gmra.mrb[68].mxu1 %v8709_v25  ;;  %v6402_v13 = vunpack.c.l.b16 %v6055_v43  ;;  %v6054_v21 = vpack.c.bf16 %v6042_v47, %v6042_v47  ;;  %v6395_v59 = vunpack.c.l.b16 %v6048_v19  ;;  %v6202_v36 = vld [vmem:[#allocation4 + $0xa00] sm:$0xff]  ;;  %v6209_v32 = vld [vmem:[#allocation4 + $0xa70] sm:$0xff]  ;;  %v6206_v14 = vld [vmem:[#allocation4 + $0xa58] sm:$0xff] }
0x10a0   :  { %6469 = vmatpush1.bf16.msra.mxu0 %v6152_v53  ;;  %6592 = vmatpush1.bf16.msra.mxu1 %v6154_v5  ;;  %v6207_v15 = vld [vmem:[#allocation4 + $0xa60] sm:$0xff]  ;;  %v6208_v18 = vld [vmem:[#allocation4 + $0xa68] sm:$0xff]  ;;  %v6215_v22 = vld [vmem:[#allocation4 + $0xad8] sm:$0xff] }
0x10a1   :  { %6500 = vmatprep.mubr.bf16.mxu0 %v8719_v20  ;;  %6623 = vmatprep.mubr.bf16.mxu1 %v8719_v20  ;;  %v6413_v34 = vrot.slane %v6402_v13, 7  ;;  %v6401_v35 = vunpack.c.l.b16 %v6054_v21  ;;  %v6213_v41 = vld [vmem:[#allocation4 + $0xac8] sm:$0xff]  ;;  %v6212_v17 = vld [vmem:[#allocation4 + $0xac0] sm:$0xff]  ;;  %v6214_v53 = vld [vmem:[#allocation4 + $0xad0] sm:$0xff] }
0x10a2   :  { %6470 = vmatprep.subr.bf16.mxu0 %v6159_v7  ;;  %6593 = vmatprep.subr.bf16.mxu1 %v6161_v57  ;;  %v6219_v5 = vld [vmem:[#allocation4 + $0xb30] sm:$0xff]  ;;  %v6221_v62 = vld [vmem:[#allocation4 + $0xb40] sm:$0xff]  ;;  %v6218_v43 = vld [vmem:[#allocation4 + $0xb28] sm:$0xff] }
0x10a3   :  { %v8724_v28 = vsel %vm3614_vm4, %v6413_v34, %v6396_v46  ;;  %v6411_v10 = vrot.slane %v6401_v35, 7  ;;  %v6220_v47 = vld [vmem:[#allocation4 + $0xb38] sm:$0xff]  ;;  %v6227_v57 = vld [vmem:[#allocation4 + $0xba8] sm:$0xff]  ;;  %v6224_v13 = vld [vmem:[#allocation4 + $0xb90] sm:$0xff] }
0x10a4   :  { %6471 = vmatpush1.bf16.msra.mxu0 %v6158_v3  ;;  %6594 = vmatpush1.bf16.msra.mxu1 %v6160_v6  ;;  %v6225_v7 = vld [vmem:[#allocation4 + $0xb98] sm:$0xff]  ;;  %v6226_v19 = vld [vmem:[#allocation4 + $0xba0] sm:$0xff]  ;;  %v6233_v3 = vld [vmem:[#allocation4 + $0xc10] sm:$0xff] }
0x10a5   :  { %6472 = vmatprep.subr.bf16.mxu0 %v6165_v31  ;;  %6595 = vmatprep.subr.bf16.mxu1 %v6167_v45  ;;  %v8727_v0 = vsel %vm3614_vm4, %v6411_v10, %v6395_v59  ;;  %v6231_v21 = vld [vmem:[#allocation4 + $0xc00] sm:$0xff]  ;;  %v6230_v6 = vld [vmem:[#allocation4 + $0xbf8] sm:$0xff]  ;;  %v6232_v46 = vld [vmem:[#allocation4 + $0xc08] sm:$0xff] }
0x10a6   :  { %v6237_v34 = vld [vmem:[#allocation4 + $0xc68] sm:$0xff]  ;;  %v6239_v31 = vld [vmem:[#allocation4 + $0xc78] sm:$0xff]  ;;  %v6236_v45 = vld [vmem:[#allocation4 + $0xc60] sm:$0xff] }
0x10a7   :  { %v6238_v35 = vld [vmem:[#allocation4 + $0xc70] sm:$0xff]  ;;  %v6245_v10 = vld [vmem:[#allocation4 + $0xce0] sm:$0xff] }
0x10a8   :  { %6473 = vmatpush1.bf16.msra.mxu0 %v6164_v38  ;;  %6596 = vmatpush1.bf16.msra.mxu1 %v6166_v52  ;;  %v6243_v59 = vld [vmem:[#allocation4 + $0xcd0] sm:$0xff]  ;;  %v6242_v38 = vld [vmem:[#allocation4 + $0xcc8] sm:$0xff]  ;;  %v6244_v52 = vld [vmem:[#allocation4 + $0xcd8] sm:$0xff] }
0x10a9   :  { %6474 = vmatprep.subr.bf16.mxu0 %v6171_v56  ;;  %6597 = vmatprep.subr.bf16.mxu1 %v6173_v55  ;;  %v6249_v56 = vld [vmem:[#allocation4 + $0xd38] sm:$0xff]  ;;  %v6251_v55 = vld [vmem:[#allocation4 + $0xd48] sm:$0xff] }
0x10ac   :  { %6475 = vmatpush1.bf16.msra.mxu0 %v6170_v11  ;;  %6598 = vmatpush1.bf16.msra.mxu1 %v6172_v29  ;;  %v8731_v11 = vpack.c.b16 %v8713_v16, %v8713_v16  ;;  %v6248_v29 = vld [vmem:[#allocation4 + $0xd30] sm:$0xff]  ;;  %v6254_v16 = vld [vmem:[#allocation4 + $0xd98] sm:$0xff] }
0x10ad   :  { %6476 = vmatprep.subr.bf16.mxu0 %v6177_v58  ;;  %6599 = vmatprep.subr.bf16.mxu1 %v6179_v42  ;;  %v8735_v58 = vpack.c.b16 %v8724_v28, %v8724_v28  ;;  %v6250_v42 = vld [vmem:[#allocation4 + $0xd40] sm:$0xff]  ;;  %v6263_v28 = vld [vmem:[#allocation4 + $0xe18] sm:$0xff] }
0x10b0   :  { %6477 = vmatpush1.bf16.msra.mxu0 %v6176_v48  ;;  %6600 = vmatpush1.bf16.msra.mxu1 %v6178_v63  ;;  %v6255_v48 = vld [vmem:[#allocation4 + $0xda0] sm:$0xff]  ;;  %v6257_v63 = vld [vmem:[#allocation4 + $0xdb0] sm:$0xff] }
0x10b1   :  { %6478 = vmatprep.subr.bf16.mxu0 %v6183_v8  ;;  %6601 = vmatprep.subr.bf16.mxu1 %v6185_v39  ;;  %v6256_v8 = vld [vmem:[#allocation4 + $0xda8] sm:$0xff] }
0x10b2   :  { %v6261_v39 = vld [vmem:[#allocation4 + $0xe08] sm:$0xff] }
0x10b4   :  { %6479 = vmatpush1.bf16.msra.mxu0 %v6182_v54  ;;  %6602 = vmatpush1.bf16.msra.mxu1 %v6184_v33  ;;  %v6260_v54 = vld [vmem:[#allocation4 + $0xe00] sm:$0xff]  ;;  %v6262_v33 = vld [vmem:[#allocation4 + $0xe10] sm:$0xff] }
0x10b5   :  { %6480 = vmatprep.subr.bf16.mxu0 %v6189_v27  ;;  %6603 = vmatprep.subr.bf16.mxu1 %v6191_v1  ;;  %v6267_v27 = vld [vmem:[#allocation4 + $0xe70] sm:$0xff]  ;;  %v6269_v1 = vld [vmem:[#allocation4 + $0xe80] sm:$0xff] }
0x10b8   :  { %6481 = vmatpush1.bf16.msra.mxu0 %v6188_v49  ;;  %6604 = vmatpush1.bf16.msra.mxu1 %v6190_v60  ;;  %v6266_v49 = vld [vmem:[#allocation4 + $0xe68] sm:$0xff]  ;;  %v6268_v60 = vld [vmem:[#allocation4 + $0xe78] sm:$0xff] }
0x10b9   :  { %6482 = vmatprep.subr.bf16.mxu0 %v6195_v4  ;;  %6605 = vmatprep.subr.bf16.mxu1 %v6197_v9  ;;  %v6273_v4 = vld [vmem:[#allocation4 + $0xed8] sm:$0xff]  ;;  %v6275_v9 = vld [vmem:[#allocation4 + $0xee8] sm:$0xff] }
0x10bc   :  { %6483 = vmatpush1.bf16.msra.mxu0 %v6194_v44  ;;  %6606 = vmatpush1.bf16.msra.mxu1 %v6196_v12  ;;  %v6272_v44 = vld [vmem:[#allocation4 + $0xed0] sm:$0xff]  ;;  %v6274_v12 = vld [vmem:[#allocation4 + $0xee0] sm:$0xff] }
0x10bd   :  { %6484 = vmatprep.subr.bf16.mxu0 %v6201_v30  ;;  %6607 = vmatprep.subr.bf16.mxu1 %v6203_v50  ;;  %v6279_v30 = vld [vmem:[#allocation4 + $0xf40] sm:$0xff]  ;;  %v6281_v50 = vld [vmem:[#allocation4 + $0xf50] sm:$0xff] }
0x10c0   :  { %6485 = vmatpush1.bf16.msra.mxu0 %v6200_v2  ;;  %6608 = vmatpush1.bf16.msra.mxu1 %v6202_v36  ;;  %v6278_v2 = vld [vmem:[#allocation4 + $0xf38] sm:$0xff]  ;;  %v6280_v36 = vld [vmem:[#allocation4 + $0xf48] sm:$0xff] }
0x10c1   :  { %6486 = vmatprep.subr.bf16.mxu0 %v6207_v15  ;;  %6609 = vmatprep.subr.bf16.mxu1 %v6209_v32  ;;  %v6285_v15 = vld [vmem:[#allocation4 + $0xfa8] sm:$0xff]  ;;  %v6287_v32 = vld [vmem:[#allocation4 + $0xfb8] sm:$0xff] }
0x10c4   :  { %6487 = vmatpush1.bf16.msra.mxu0 %v6206_v14  ;;  %6610 = vmatpush1.bf16.msra.mxu1 %v6208_v18  ;;  %v6284_v14 = vld [vmem:[#allocation4 + $0xfa0] sm:$0xff]  ;;  %v6286_v18 = vld [vmem:[#allocation4 + $0xfb0] sm:$0xff] }
0x10c5   :  { %6488 = vmatprep.subr.bf16.mxu0 %v6213_v41  ;;  %6611 = vmatprep.subr.bf16.mxu1 %v6215_v22  ;;  %v6291_v41 = vld [vmem:[#allocation4 + $0x1010] sm:$0xff]  ;;  %v6293_v22 = vld [vmem:[#allocation4 + $0x1020] sm:$0xff] }
0x10c8   :  { %6489 = vmatpush1.bf16.msra.mxu0 %v6212_v17  ;;  %6612 = vmatpush1.bf16.msra.mxu1 %v6214_v53  ;;  %v6290_v17 = vld [vmem:[#allocation4 + $0x1008] sm:$0xff]  ;;  %v6292_v53 = vld [vmem:[#allocation4 + $0x1018] sm:$0xff] }
0x10c9   :  { %6490 = vmatprep.subr.bf16.mxu0 %v6219_v5  ;;  %6613 = vmatprep.subr.bf16.mxu1 %v6221_v62  ;;  %v6297_v5 = vld [vmem:[#allocation4 + $0x1078] sm:$0xff]  ;;  %v6299_v62 = vld [vmem:[#allocation4 + $0x1088] sm:$0xff] }
0x10cc   :  { %6491 = vmatpush1.bf16.msra.mxu0 %v6218_v43  ;;  %6614 = vmatpush1.bf16.msra.mxu1 %v6220_v47  ;;  %v6296_v43 = vld [vmem:[#allocation4 + $0x1070] sm:$0xff]  ;;  %v6298_v47 = vld [vmem:[#allocation4 + $0x1080] sm:$0xff] }
0x10cd   :  { %6492 = vmatprep.subr.bf16.mxu0 %v6225_v7  ;;  %6615 = vmatprep.subr.bf16.mxu1 %v6227_v57  ;;  %v6303_v7 = vld [vmem:[#allocation4 + $0x10e0] sm:$0xff]  ;;  %v6305_v57 = vld [vmem:[#allocation4 + $0x10f0] sm:$0xff] }
0x10d0   :  { %6493 = vmatpush1.bf16.msra.mxu0 %v6224_v13  ;;  %6616 = vmatpush1.bf16.msra.mxu1 %v6226_v19  ;;  %v6302_v13 = vld [vmem:[#allocation4 + $0x10d8] sm:$0xff]  ;;  %v6304_v19 = vld [vmem:[#allocation4 + $0x10e8] sm:$0xff] }
0x10d1   :  { %6494 = vmatprep.subr.bf16.mxu0 %v6231_v21  ;;  %6617 = vmatprep.subr.bf16.mxu1 %v6233_v3  ;;  %v6309_v21 = vld [vmem:[#allocation4 + $0x1148] sm:$0xff]  ;;  %v6311_v3 = vld [vmem:[#allocation4 + $0x1158] sm:$0xff] }
0x10d4   :  { %6495 = vmatpush1.bf16.msra.mxu0 %v6230_v6  ;;  %6618 = vmatpush1.bf16.msra.mxu1 %v6232_v46  ;;  %v6308_v6 = vld [vmem:[#allocation4 + $0x1140] sm:$0xff]  ;;  %v6310_v46 = vld [vmem:[#allocation4 + $0x1150] sm:$0xff] }
0x10d5   :  { %6496 = vmatprep.subr.bf16.mxu0 %v6237_v34  ;;  %6619 = vmatprep.subr.bf16.mxu1 %v6239_v31  ;;  %v6315_v34 = vld [vmem:[#allocation4 + $0x11b0] sm:$0xff]  ;;  %v6317_v31 = vld [vmem:[#allocation4 + $0x11c0] sm:$0xff] }
0x10d8   :  { %6497 = vmatpush1.bf16.msra.mxu0 %v6236_v45  ;;  %6620 = vmatpush1.bf16.msra.mxu1 %v6238_v35  ;;  %v6314_v45 = vld [vmem:[#allocation4 + $0x11a8] sm:$0xff]  ;;  %v6316_v35 = vld [vmem:[#allocation4 + $0x11b8] sm:$0xff] }
0x10d9   :  { %6498 = vmatprep.subr.bf16.mxu0 %v6243_v59  ;;  %6621 = vmatprep.subr.bf16.mxu1 %v6245_v10  ;;  %v6321_v59 = vld [vmem:[#allocation4 + $0x1218] sm:$0xff]  ;;  %v6323_v10 = vld [vmem:[#allocation4 + $0x1228] sm:$0xff] }
0x10dc   :  { %6499 = vmatpush1.bf16.msra.mxu0 %v6242_v38  ;;  %6622 = vmatpush1.bf16.msra.mxu1 %v6244_v52  ;;  %v6320_v38 = vld [vmem:[#allocation4 + $0x1210] sm:$0xff]  ;;  %v6322_v52 = vld [vmem:[#allocation4 + $0x1220] sm:$0xff] }
0x10dd   :  { %6509 = vmatprep.subr.bf16.mxu0 %v6249_v56  ;;  %6632 = vmatprep.subr.bf16.mxu1 %v6251_v55  ;;  %v6327_v56 = vld [vmem:[#allocation4 + $0x1280] sm:$0xff]  ;;  %v6329_v55 = vld [vmem:[#allocation4 + $0x1290] sm:$0xff] }
0x10df   :  { %6501 = vmatmul.mubr.bf16.vlgmr.msra.gmra.mrb[36].mxu0 %v8731_v11  ;;  %6624 = vmatmul.mubr.bf16.vlgmr.msra.gmra.mrb[68].mxu1 %v8731_v11 }
0x10e0   :  { %6510 = vmatpush1.bf16.msra.mxu0 %v6248_v29  ;;  %6541 = vmatprep.mubr.bf16.mxu0 %v8735_v58  ;;  %v6326_v29 = vld [vmem:[#allocation4 + $0x1278] sm:$0xff] }
0x10e1   :  { %6633 = vmatpush1.bf16.msra.mxu1 %v6250_v42  ;;  %6664 = vmatprep.mubr.bf16.mxu1 %v8735_v58  ;;  %v6328_v42 = vld [vmem:[#allocation4 + $0x1288] sm:$0xff] }
0x10e2   :  { %6511 = vmatprep.subr.bf16.mxu0 %v6255_v48  ;;  %6634 = vmatprep.subr.bf16.mxu1 %v6257_v63  ;;  %v6333_v48 = vld [vmem:[#allocation4 + $0x12e8] sm:$0xff]  ;;  %v6335_v63 = vld [vmem:[#allocation4 + $0x12f8] sm:$0xff] }
0x10e4   :  { %6512 = vmatpush1.bf16.msra.mxu0 %v6254_v16  ;;  %v6332_v16 = vld [vmem:[#allocation4 + $0x12e0] sm:$0xff] }
0x10e5   :  { %6635 = vmatpush1.bf16.msra.mxu1 %v6256_v8  ;;  %6513 = vmatprep.subr.bf16.mxu0 %v6261_v39  ;;  %v6334_v8 = vld [vmem:[#allocation4 + $0x12f0] sm:$0xff] }
0x10e6   :  { %6636 = vmatprep.subr.bf16.mxu1 %v6263_v28  ;;  %v6339_v39 = vld [vmem:[#allocation4 + $0x1350] sm:$0xff]  ;;  %v6341_v28 = vld [vmem:[#allocation4 + $0x1360] sm:$0xff] }
0x10e8   :  { %6514 = vmatpush1.bf16.msra.mxu0 %v6260_v54  ;;  %v6338_v54 = vld [vmem:[#allocation4 + $0x1348] sm:$0xff] }
0x10e9   :  { %6637 = vmatpush1.bf16.msra.mxu1 %v6262_v33  ;;  %6515 = vmatprep.subr.bf16.mxu0 %v6267_v27  ;;  %v6340_v33 = vld [vmem:[#allocation4 + $0x1358] sm:$0xff] }
0x10ea   :  { %6638 = vmatprep.subr.bf16.mxu1 %v6269_v1  ;;  %v6061_v27 = vld [vmem:[#allocation4 + $0x58] sm:$0xff]  ;;  %v8743_v1 = vpack.c.b16 %v8727_v0, %v8727_v0  ;;  %v6078_v0 = vld [vmem:[#allocation4 + $0x188] sm:$0xff] }
0x10ec   :  { %6516 = vmatpush1.bf16.msra.mxu0 %v6266_v49  ;;  %v6060_v49 = vld [vmem:[#allocation4 + $0x50] sm:$0xff] }
0x10ed   :  { %6639 = vmatpush1.bf16.msra.mxu1 %v6268_v60  ;;  %6517 = vmatprep.subr.bf16.mxu0 %v6273_v4  ;;  %v6067_v60 = vld [vmem:[#allocation4 + $0xc0] sm:$0xff]  ;;  %v6066_v4 = vld [vmem:[#allocation4 + $0xb8] sm:$0xff] }
0x10ee   :  { %6640 = vmatprep.subr.bf16.mxu1 %v6275_v9  ;;  %v6073_v9 = vld [vmem:[#allocation4 + $0x128] sm:$0xff] }
0x10f0   :  { %6518 = vmatpush1.bf16.msra.mxu0 %v6272_v44  ;;  %v6072_v44 = vld [vmem:[#allocation4 + $0x120] sm:$0xff] }
0x10f1   :  { %6641 = vmatpush1.bf16.msra.mxu1 %v6274_v12  ;;  %6519 = vmatprep.subr.bf16.mxu0 %v6279_v30  ;;  %v6079_v12 = vld [vmem:[#allocation4 + $0x190] sm:$0xff]  ;;  %v6085_v30 = vld [vmem:[#allocation4 + $0x1f8] sm:$0xff] }
0x10f2   :  { %6642 = vmatprep.subr.bf16.mxu1 %v6281_v50  ;;  %v6084_v50 = vld [vmem:[#allocation4 + $0x1f0] sm:$0xff] }
0x10f4   :  { %6520 = vmatpush1.bf16.msra.mxu0 %v6278_v2  ;;  %v6091_v2 = vld [vmem:[#allocation4 + $0x260] sm:$0xff] }
0x10f5   :  { %6643 = vmatpush1.bf16.msra.mxu1 %v6280_v36  ;;  %6521 = vmatprep.subr.bf16.mxu0 %v6285_v15  ;;  %v6090_v36 = vld [vmem:[#allocation4 + $0x258] sm:$0xff]  ;;  %v6097_v15 = vld [vmem:[#allocation4 + $0x2c8] sm:$0xff] }
0x10f6   :  { %6644 = vmatprep.subr.bf16.mxu1 %v6287_v32  ;;  %v6103_v32 = vld [vmem:[#allocation4 + $0x330] sm:$0xff] }
0x10f8   :  { %6522 = vmatpush1.bf16.msra.mxu0 %v6284_v14  ;;  %v6102_v14 = vld [vmem:[#allocation4 + $0x328] sm:$0xff] }
0x10f9   :  { %6645 = vmatpush1.bf16.msra.mxu1 %v6286_v18  ;;  %6523 = vmatprep.subr.bf16.mxu0 %v6291_v41  ;;  %v6109_v18 = vld [vmem:[#allocation4 + $0x398] sm:$0xff]  ;;  %v6108_v41 = vld [vmem:[#allocation4 + $0x390] sm:$0xff] }
0x10fa   :  { %6646 = vmatprep.subr.bf16.mxu1 %v6293_v22  ;;  %v6115_v22 = vld [vmem:[#allocation4 + $0x400] sm:$0xff] }
0x10fc   :  { %6524 = vmatpush1.bf16.msra.mxu0 %v6290_v17  ;;  %v6114_v17 = vld [vmem:[#allocation4 + $0x3f8] sm:$0xff] }
0x10fd   :  { %6647 = vmatpush1.bf16.msra.mxu1 %v6292_v53  ;;  %6525 = vmatprep.subr.bf16.mxu0 %v6297_v5  ;;  %v6121_v53 = vld [vmem:[#allocation4 + $0x468] sm:$0xff]  ;;  %v6120_v5 = vld [vmem:[#allocation4 + $0x460] sm:$0xff] }
0x10fe   :  { %6648 = vmatprep.subr.bf16.mxu1 %v6299_v62  ;;  %v6127_v62 = vld [vmem:[#allocation4 + $0x4d0] sm:$0xff] }
0x1100   :  { %6526 = vmatpush1.bf16.msra.mxu0 %v6296_v43  ;;  %v6126_v43 = vld [vmem:[#allocation4 + $0x4c8] sm:$0xff] }
0x1101   :  { %6649 = vmatpush1.bf16.msra.mxu1 %v6298_v47  ;;  %6527 = vmatprep.subr.bf16.mxu0 %v6303_v7  ;;  %v6133_v47 = vld [vmem:[#allocation4 + $0x538] sm:$0xff]  ;;  %v6132_v7 = vld [vmem:[#allocation4 + $0x530] sm:$0xff] }
0x1102   :  { %6650 = vmatprep.subr.bf16.mxu1 %v6305_v57  ;;  %v6139_v57 = vld [vmem:[#allocation4 + $0x5a0] sm:$0xff] }
0x1104   :  { %6528 = vmatpush1.bf16.msra.mxu0 %v6302_v13  ;;  %v6138_v13 = vld [vmem:[#allocation4 + $0x598] sm:$0xff] }
0x1105   :  { %6651 = vmatpush1.bf16.msra.mxu1 %v6304_v19  ;;  %6529 = vmatprep.subr.bf16.mxu0 %v6309_v21  ;;  %v6145_v19 = vld [vmem:[#allocation4 + $0x608] sm:$0xff]  ;;  %v6144_v21 = vld [vmem:[#allocation4 + $0x600] sm:$0xff] }
0x1106   :  { %6652 = vmatprep.subr.bf16.mxu1 %v6311_v3  ;;  %v6151_v3 = vld [vmem:[#allocation4 + $0x670] sm:$0xff] }
0x1108   :  { %6530 = vmatpush1.bf16.msra.mxu0 %v6308_v6  ;;  %v6150_v6 = vld [vmem:[#allocation4 + $0x668] sm:$0xff] }
0x1109   :  { %6653 = vmatpush1.bf16.msra.mxu1 %v6310_v46  ;;  %6531 = vmatprep.subr.bf16.mxu0 %v6315_v34  ;;  %v6157_v46 = vld [vmem:[#allocation4 + $0x6d8] sm:$0xff]  ;;  %v6156_v34 = vld [vmem:[#allocation4 + $0x6d0] sm:$0xff] }
0x110a   :  { %6654 = vmatprep.subr.bf16.mxu1 %v6317_v31  ;;  %v6163_v31 = vld [vmem:[#allocation4 + $0x740] sm:$0xff] }
0x110c   :  { %6532 = vmatpush1.bf16.msra.mxu0 %v6314_v45  ;;  %v6816_v45 = vld [vmem:[#allocation4 + $0x3a0] sm:$0xff] }
0x110d   :  { %6655 = vmatpush1.bf16.msra.mxu1 %v6316_v35  ;;  %6533 = vmatprep.subr.bf16.mxu0 %v6321_v59  ;;  %v6808_v35 = vld [vmem:[#allocation4 + $0x60] sm:$0xff]  ;;  %v6817_v59 = vld [vmem:[#allocation4 + $0x408] sm:$0xff] }
0x110e   :  { %6656 = vmatprep.subr.bf16.mxu1 %v6323_v10  ;;  %v6162_v10 = vld [vmem:[#allocation4 + $0x738] sm:$0xff] }
0x1110   :  { %6534 = vmatpush1.bf16.msra.mxu0 %v6320_v38  ;;  %v6169_v38 = vld [vmem:[#allocation4 + $0x7a8] sm:$0xff] }
0x1111   :  { %6657 = vmatpush1.bf16.msra.mxu1 %v6322_v52  ;;  %6535 = vmatprep.subr.bf16.mxu0 %v6327_v56  ;;  %v6809_v52 = vld [vmem:[#allocation4 + $0xc8] sm:$0xff]  ;;  %v6818_v56 = vld [vmem:[#allocation4 + $0x470] sm:$0xff] }
0x1112   :  { %6658 = vmatprep.subr.bf16.mxu1 %v6329_v55  ;;  %v6168_v55 = vld [vmem:[#allocation4 + $0x7a0] sm:$0xff] }
0x1114   :  { %6536 = vmatpush1.bf16.msra.mxu0 %v6326_v29  ;;  %v6175_v29 = vld [vmem:[#allocation4 + $0x810] sm:$0xff] }
0x1115   :  { %6659 = vmatpush1.bf16.msra.mxu1 %v6328_v42  ;;  %6537 = vmatprep.subr.bf16.mxu0 %v6333_v48  ;;  %v6819_v42 = vld [vmem:[#allocation4 + $0x4d8] sm:$0xff] }
0x1116   :  { %6660 = vmatprep.subr.bf16.mxu1 %v6335_v63  ;;  %v6181_v48 = vld [vmem:[#allocation4 + $0x878] sm:$0xff] }
0x1117   :  { %v6811_v63 = vld [vmem:[#allocation4 + $0x198] sm:$0xff] }
0x1118   :  { %6538 = vmatpush1.bf16.msra.mxu0 %v6332_v16  ;;  %v6180_v16 = vld [vmem:[#allocation4 + $0x870] sm:$0xff] }
0x1119   :  { %6661 = vmatpush1.bf16.msra.mxu1 %v6334_v8  ;;  %6539 = vmatprep.subr.bf16.mxu0 %v6339_v39  ;;  %v6187_v8 = vld [vmem:[#allocation4 + $0x8e0] sm:$0xff]  ;;  %v6186_v39 = vld [vmem:[#allocation4 + $0x8d8] sm:$0xff] }
0x111a   :  { %6662 = vmatprep.subr.bf16.mxu1 %v6341_v28  ;;  %v6193_v28 = vld [vmem:[#allocation4 + $0x948] sm:$0xff] }
0x111c   :  { %6540 = vmatpush1.bf16.msra.mxu0 %v6338_v54  ;;  %v6192_v54 = vld [vmem:[#allocation4 + $0x940] sm:$0xff] }
0x111d   :  { %6663 = vmatpush1.bf16.msra.mxu1 %v6340_v33  ;;  %6673 = vmatprep.subr.bf16.mxu0 %v6061_v27  ;;  %v6199_v33 = vld [vmem:[#allocation4 + $0x9b0] sm:$0xff]  ;;  %v6198_v27 = vld [vmem:[#allocation4 + $0x9a8] sm:$0xff] }
0x111e   :  { %7116 = vmatprep.subr.bf16.mxu1 %v6816_v45  ;;  %v6276_v45 = vld [vmem:[#allocation4 + $0xef0] sm:$0xff] }
0x111f   :  { %6542 = vmatmul.mubr.bf16.vlgmr.msra.gmra.mrb[36].mxu0 %v8743_v1 }
0x1120   :  { %6665 = vmatmul.mubr.bf16.vlgmr.msra.gmra.mrb[68].mxu1 %v8743_v1  ;;  %6674 = vmatpush1.bf16.msra.mxu0 %v6060_v49  ;;  %v6205_v49 = vld [vmem:[#allocation4 + $0xa18] sm:$0xff] }
0x1121   :  { %6705 = vmatprep.mubr.bf16.mxu0 %v8707_v37  ;;  %6675 = vmatprep.subr.bf16.mxu0 %v6067_v60  ;;  %v6096_v37 = vld [vmem:[#allocation4 + $0x2c0] sm:$0xff] }
0x1122   :  { %7117 = vmatpush3.bf16.msra.mxu1 %v6808_v35  ;;  %v6820_v60 = vld [vmem:[#allocation4 + $0x540] sm:$0xff] }
0x1123   :  { %7118 = vmatprep.subr.bf16.mxu1 %v6817_v59  ;;  %v6283_v35 = vld [vmem:[#allocation4 + $0xf60] sm:$0xff]  ;;  %v6289_v59 = vld [vmem:[#allocation4 + $0xfc8] sm:$0xff] }
0x1124   :  { %6676 = vmatpush1.bf16.msra.mxu0 %v6066_v4  ;;  %v6204_v4 = vld [vmem:[#allocation4 + $0xa10] sm:$0xff] }
0x1125   :  { %6677 = vmatprep.subr.bf16.mxu0 %v6073_v9  ;;  %v6812_v9 = vld [vmem:[#allocation4 + $0x200] sm:$0xff] }
0x1126   :  { %7119 = vmatpush3.bf16.msra.mxu1 %v6809_v52  ;;  %v6301_v52 = vld [vmem:[#allocation4 + $0x1098] sm:$0xff] }
0x1127   :  { %7120 = vmatprep.subr.bf16.mxu1 %v6818_v56  ;;  %v6300_v56 = vld [vmem:[#allocation4 + $0x1090] sm:$0xff] }
0x1128   :  { %6678 = vmatpush1.bf16.msra.mxu0 %v6072_v44  ;;  %v6211_v44 = vld [vmem:[#allocation4 + $0xa80] sm:$0xff] }
0x1129   :  { %6679 = vmatprep.subr.bf16.mxu0 %v6079_v12  ;;  %v6821_v12 = vld [vmem:[#allocation4 + $0x5a8] sm:$0xff] }
0x112c   :  { %6680 = vmatpush1.bf16.msra.mxu0 %v6078_v0  ;;  %v6210_v0 = vld [vmem:[#allocation4 + $0xa78] sm:$0xff] }
0x112d   :  { %6681 = vmatprep.subr.bf16.mxu0 %v6085_v30  ;;  %v6813_v30 = vld [vmem:[#allocation4 + $0x268] sm:$0xff] }
0x1130   :  { %6682 = vmatpush1.bf16.msra.mxu0 %v6084_v50  ;;  %v6217_v50 = vld [vmem:[#allocation4 + $0xae8] sm:$0xff] }
0x1131   :  { %6683 = vmatprep.subr.bf16.mxu0 %v6091_v2  ;;  %v6822_v2 = vld [vmem:[#allocation4 + $0x610] sm:$0xff] }
0x1134   :  { %6684 = vmatpush1.bf16.msra.mxu0 %v6090_v36  ;;  %v6814_v36 = vld [vmem:[#allocation4 + $0x2d0] sm:$0xff] }
0x1135   :  { %6685 = vmatprep.subr.bf16.mxu0 %v6097_v15  ;;  %v6823_v15 = vld [vmem:[#allocation4 + $0x678] sm:$0xff] }
0x1138   :  { %6686 = vmatpush1.bf16.msra.mxu0 %v6096_v37  ;;  %v6216_v37 = vld [vmem:[#allocation4 + $0xae0] sm:$0xff] }
0x1139   :  { %6687 = vmatprep.subr.bf16.mxu0 %v6103_v32  ;;  %v6223_v32 = vld [vmem:[#allocation4 + $0xb50] sm:$0xff] }
0x113c   :  { %6688 = vmatpush1.bf16.msra.mxu0 %v6102_v14  ;;  %v6815_v14 = vld [vmem:[#allocation4 + $0x338] sm:$0xff] }
0x113d   :  { %6689 = vmatprep.subr.bf16.mxu0 %v6109_v18  ;;  %v6832_v18 = vld [vmem:[#allocation4 + $0xa20] sm:$0xff] }
0x1140   :  { %6690 = vmatpush1.bf16.msra.mxu0 %v6108_v41  ;;  %v6222_v41 = vld [vmem:[#allocation4 + $0xb48] sm:$0xff] }
0x1141   :  { %6691 = vmatprep.subr.bf16.mxu0 %v6115_v22  ;;  %v6229_v22 = vld [vmem:[#allocation4 + $0xbb8] sm:$0xff] }
0x1144   :  { %6692 = vmatpush1.bf16.msra.mxu0 %v6114_v17  ;;  %v6228_v17 = vld [vmem:[#allocation4 + $0xbb0] sm:$0xff] }
0x1145   :  { %6693 = vmatprep.subr.bf16.mxu0 %v6121_v53  ;;  %v6235_v53 = vld [vmem:[#allocation4 + $0xc20] sm:$0xff] }
0x1148   :  { %6694 = vmatpush1.bf16.msra.mxu0 %v6120_v5  ;;  %v6234_v5 = vld [vmem:[#allocation4 + $0xc18] sm:$0xff] }
0x1149   :  { %6695 = vmatprep.subr.bf16.mxu0 %v6127_v62  ;;  %v6241_v62 = vld [vmem:[#allocation4 + $0xc88] sm:$0xff] }
0x114c   :  { %6696 = vmatpush1.bf16.msra.mxu0 %v6126_v43  ;;  %v6240_v43 = vld [vmem:[#allocation4 + $0xc80] sm:$0xff] }
0x114d   :  { %6697 = vmatprep.subr.bf16.mxu0 %v6133_v47  ;;  %v6247_v47 = vld [vmem:[#allocation4 + $0xcf0] sm:$0xff] }
0x1150   :  { %6698 = vmatpush1.bf16.msra.mxu0 %v6132_v7  ;;  %v6246_v7 = vld [vmem:[#allocation4 + $0xce8] sm:$0xff] }
0x1151   :  { %6699 = vmatprep.subr.bf16.mxu0 %v6139_v57  ;;  %v6253_v57 = vld [vmem:[#allocation4 + $0xd58] sm:$0xff] }
0x1154   :  { %6700 = vmatpush1.bf16.msra.mxu0 %v6138_v13  ;;  %v6252_v13 = vld [vmem:[#allocation4 + $0xd50] sm:$0xff] }
0x1155   :  { %6701 = vmatprep.subr.bf16.mxu0 %v6145_v19  ;;  %v6259_v19 = vld [vmem:[#allocation4 + $0xdc0] sm:$0xff] }
0x1158   :  { %6702 = vmatpush1.bf16.msra.mxu0 %v6144_v21  ;;  %v6258_v21 = vld [vmem:[#allocation4 + $0xdb8] sm:$0xff] }
0x1159   :  { %6703 = vmatprep.subr.bf16.mxu0 %v6151_v3  ;;  %v6265_v3 = vld [vmem:[#allocation4 + $0xe28] sm:$0xff] }
0x115c   :  { %6704 = vmatpush1.bf16.msra.mxu0 %v6150_v6  ;;  %v6264_v6 = vld [vmem:[#allocation4 + $0xe20] sm:$0xff] }
0x115d   :  { %6714 = vmatprep.subr.bf16.mxu0 %v6157_v46  ;;  %v6271_v46 = vld [vmem:[#allocation4 + $0xe90] sm:$0xff] }
0x115f   :  { %6706 = vmatmul.mubr.bf16.vlgmr.msra.gmra.mrb[40].mxu0 %v8709_v25  ;;  %v6810_v25 = vld [vmem:[#allocation4 + $0x130] sm:$0xff] }
0x1160   :  { %6715 = vmatpush1.bf16.msra.mxu0 %v6156_v34  ;;  %6746 = vmatprep.mubr.bf16.mxu0 %v8719_v20  ;;  %v6174_v20 = vld [vmem:[#allocation4 + $0x808] sm:$0xff] }
0x1161   :  { %6716 = vmatprep.subr.bf16.mxu0 %v6163_v31  ;;  %7121 = vmatpush3.bf16.msra.mxu1 %v6810_v25  ;;  %v6270_v34 = vld [vmem:[#allocation4 + $0xe88] sm:$0xff]  ;;  %v6277_v31 = vld [vmem:[#allocation4 + $0xef8] sm:$0xff] }
0x1162   :  { %7122 = vmatprep.subr.bf16.mxu1 %v6819_v42  ;;  %v6313_v25 = vld [vmem:[#allocation4 + $0x1168] sm:$0xff]  ;;  %v6312_v42 = vld [vmem:[#allocation4 + $0x1160] sm:$0xff] }
0x1164   :  { %6717 = vmatpush1.bf16.msra.mxu0 %v6162_v10  ;;  %v6295_v10 = vld [vmem:[#allocation4 + $0x1030] sm:$0xff] }
0x1165   :  { %6718 = vmatprep.subr.bf16.mxu0 %v6169_v38  ;;  %7123 = vmatpush3.bf16.msra.mxu1 %v6811_v63  ;;  %v6294_v38 = vld [vmem:[#allocation4 + $0x1028] sm:$0xff]  ;;  %v6325_v63 = vld [vmem:[#allocation4 + $0x1238] sm:$0xff] }
0x1166   :  { %7124 = vmatprep.subr.bf16.mxu1 %v6820_v60  ;;  %v6346_v60 = vld [vmem:[#allocation14 + $0x32] ss:$8 sm:$0x30] }
0x1168   :  { %6719 = vmatpush1.bf16.msra.mxu0 %v6168_v55  ;;  %v6307_v55 = vld [vmem:[#allocation4 + $0x1100] sm:$0xff] }
0x1169   :  { %6720 = vmatprep.subr.bf16.mxu0 %v6175_v29  ;;  %7125 = vmatpush3.bf16.msra.mxu1 %v6812_v9  ;;  %v6306_v29 = vld [vmem:[#allocation4 + $0x10f8] sm:$0xff] }
0x116a   :  { %7126 = vmatprep.subr.bf16.mxu1 %v6821_v12 }
0x116c   :  { %6721 = vmatpush1.bf16.msra.mxu0 %v6174_v20  ;;  %v6319_v20 = vld [vmem:[#allocation4 + $0x11d0] sm:$0xff] }
0x116d   :  { %6722 = vmatprep.subr.bf16.mxu0 %v6181_v48  ;;  %7127 = vmatpush3.bf16.msra.mxu1 %v6813_v30  ;;  %v6318_v48 = vld [vmem:[#allocation4 + $0x11c8] sm:$0xff] }
0x116e   :  { %7128 = vmatprep.subr.bf16.mxu1 %v6822_v2 }
0x1170   :  { %6723 = vmatpush1.bf16.msra.mxu0 %v6180_v16  ;;  %v6324_v16 = vld [vmem:[#allocation4 + $0x1230] sm:$0xff] }
0x1171   :  { %6724 = vmatprep.subr.bf16.mxu0 %v6187_v8  ;;  %7129 = vmatpush3.bf16.msra.mxu1 %v6814_v36  ;;  %v6331_v8 = vld [vmem:[#allocation4 + $0x12a0] sm:$0xff] }
0x1172   :  { %7130 = vmatprep.subr.bf16.mxu1 %v6823_v15 }
0x1174   :  { %6725 = vmatpush1.bf16.msra.mxu0 %v6186_v39  ;;  %v6330_v39 = vld [vmem:[#allocation4 + $0x1298] sm:$0xff] }
0x1175   :  { %6726 = vmatprep.subr.bf16.mxu0 %v6193_v28  ;;  %7131 = vmatpush3.bf16.msra.mxu1 %v6815_v14  ;;  %v6337_v28 = vld [vmem:[#allocation4 + $0x1308] sm:$0xff] }
0x1176   :  { %7138 = vmatprep.subr.bf16.mxu1 %v6832_v18 }
0x1178   :  { %6727 = vmatpush1.bf16.msra.mxu0 %v6192_v54  ;;  %v6336_v54 = vld [vmem:[#allocation4 + $0x1300] sm:$0xff] }
0x1179   :  { %6728 = vmatprep.subr.bf16.mxu0 %v6199_v33  ;;  %v6343_v33 = vld [vmem:[#allocation4 + $0x1370] sm:$0xff] }
0x117c   :  { %6729 = vmatpush1.bf16.msra.mxu0 %v6198_v27  ;;  %v6342_v27 = vld [vmem:[#allocation4 + $0x1368] sm:$0xff] }
0x117d   :  { %6730 = vmatprep.subr.bf16.mxu0 %v6205_v49  ;;  %v6345_v49 = vld [vmem:[#allocation14 + $0x32] ss:$8 sm:$0xf] }
0x1180   :  { %6731 = vmatpush1.bf16.msra.mxu0 %v6204_v4  ;;  %v8753_v4 = vor.u32 %v6346_v60, %v6345_v49 }
0x1181   :  { %6732 = vmatprep.subr.bf16.mxu0 %v6211_v44 }
0x1182   :  { %v6352_v9 = vrot.slane %v8753_v4, %v7978_v51  ;;  %v6356_v44 = vrot.slane %v8753_v4, %v7963_v23  ;;  %v6364_v12 = vrot.slane %v8753_v4, %v7987_v61  ;;  %v6824_v61 = vld [vmem:[#allocation4 + $0x6e0] sm:$0xff] }
0x1184   :  { %6733 = vmatpush1.bf16.msra.mxu0 %v6210_v0 }
0x1185   :  { %6734 = vmatprep.subr.bf16.mxu0 %v6217_v50 }
0x1188   :  { %6735 = vmatpush1.bf16.msra.mxu0 %v6216_v37 }
0x1189   :  { %6736 = vmatprep.subr.bf16.mxu0 %v6223_v32 }
0x118c   :  { %6737 = vmatpush1.bf16.msra.mxu0 %v6222_v41 }
0x118d   :  { %6738 = vmatprep.subr.bf16.mxu0 %v6229_v22 }
0x1190   :  { %6739 = vmatpush1.bf16.msra.mxu0 %v6228_v17 }
0x1191   :  { %6740 = vmatprep.subr.bf16.mxu0 %v6235_v53 }
0x1194   :  { %6741 = vmatpush1.bf16.msra.mxu0 %v6234_v5  ;;  %v6833_v5 = vld [vmem:[#allocation4 + $0xa88] sm:$0xff] }
0x1195   :  { %6742 = vmatprep.subr.bf16.mxu0 %v6241_v62  ;;  %v6825_v62 = vld [vmem:[#allocation4 + $0x748] sm:$0xff] }
0x1198   :  { %6743 = vmatpush1.bf16.msra.mxu0 %v6240_v43  ;;  %v6834_v43 = vld [vmem:[#allocation4 + $0xaf0] sm:$0xff] }
0x1199   :  { %6744 = vmatprep.subr.bf16.mxu0 %v6247_v47  ;;  %v6826_v47 = vld [vmem:[#allocation4 + $0x7b0] sm:$0xff] }
0x119c   :  { %6745 = vmatpush1.bf16.msra.mxu0 %v6246_v7  ;;  %v6835_v7 = vld [vmem:[#allocation4 + $0xb58] sm:$0xff] }
0x119d   :  { %6755 = vmatprep.subr.bf16.mxu0 %v6253_v57  ;;  %v6360_v57 = vrot.slane %v8753_v4, %v8007_v40  ;;  %v6831_v40 = vld [vmem:[#allocation4 + $0x9b8] sm:$0xff] }
0x119f   :  { %6747 = vmatmul.mubr.bf16.vlgmr.msra.gmra.mrb[40].mxu0 %v8731_v11  ;;  %v6282_v11 = vld [vmem:[#allocation4 + $0xf58] sm:$0xff] }
0x11a0   :  { %6756 = vmatpush1.bf16.msra.mxu0 %v6252_v13  ;;  %6787 = vmatprep.mubr.bf16.mxu0 %v8735_v58  ;;  %v6288_v58 = vld [vmem:[#allocation4 + $0xfc0] sm:$0xff]  ;;  %v6827_v13 = vld [vmem:[#allocation4 + $0x818] sm:$0xff] }
0x11a1   :  { %6757 = vmatprep.subr.bf16.mxu0 %v6259_v19  ;;  %v6836_v19 = vld [vmem:[#allocation4 + $0xbc0] sm:$0xff] }
0x11a4   :  { %6758 = vmatpush1.bf16.msra.mxu0 %v6258_v21 }
0x11a5   :  { %6759 = vmatprep.subr.bf16.mxu0 %v6265_v3  ;;  %v6828_v3 = vld [vmem:[#allocation4 + $0x880] sm:$0xff] }
0x11a8   :  { %6760 = vmatpush1.bf16.msra.mxu0 %v6264_v6  ;;  %v6837_v6 = vld [vmem:[#allocation4 + $0xc28] sm:$0xff] }
0x11a9   :  { %6761 = vmatprep.subr.bf16.mxu0 %v6271_v46  ;;  %v6829_v46 = vld [vmem:[#allocation4 + $0x8e8] sm:$0xff] }
0x11ac   :  { %6762 = vmatpush1.bf16.msra.mxu0 %v6270_v34  ;;  %v6838_v34 = vld [vmem:[#allocation4 + $0xc90] sm:$0xff] }
0x11ad   :  { %6763 = vmatprep.subr.bf16.mxu0 %v6277_v31  ;;  %v6830_v31 = vld [vmem:[#allocation4 + $0x950] sm:$0xff] }
0x11b0   :  { %6764 = vmatpush1.bf16.msra.mxu0 %v6276_v45  ;;  %v6839_v45 = vld [vmem:[#allocation4 + $0xcf8] sm:$0xff] }
0x11b1   :  { %6765 = vmatprep.subr.bf16.mxu0 %v6283_v35 }
0x11b4   :  { %6766 = vmatpush1.bf16.msra.mxu0 %v6282_v11  ;;  %v6848_v11 = vld [vmem:[#allocation4 + $0x10a0] sm:$0xff] }
0x11b5   :  { %6767 = vmatprep.subr.bf16.mxu0 %v6289_v59 }
0x11b8   :  { %6768 = vmatpush1.bf16.msra.mxu0 %v6288_v58  ;;  %v6840_v58 = vld [vmem:[#allocation4 + $0xd60] sm:$0xff] }
0x11b9   :  { %6769 = vmatprep.subr.bf16.mxu0 %v6295_v10  ;;  %v6849_v10 = vld [vmem:[#allocation4 + $0x1108] sm:$0xff] }
0x11bc   :  { %6770 = vmatpush1.bf16.msra.mxu0 %v6294_v38  ;;  %v6841_v38 = vld [vmem:[#allocation4 + $0xdc8] sm:$0xff] }
0x11bd   :  { %6771 = vmatprep.subr.bf16.mxu0 %v6301_v52  ;;  %v6850_v52 = vld [vmem:[#allocation4 + $0x1170] sm:$0xff] }
0x11c0   :  { %6772 = vmatpush1.bf16.msra.mxu0 %v6300_v56  ;;  %v6842_v56 = vld [vmem:[#allocation4 + $0xe30] sm:$0xff] }
0x11c1   :  { %6773 = vmatprep.subr.bf16.mxu0 %v6307_v55  ;;  %v6851_v55 = vld [vmem:[#allocation4 + $0x11d8] sm:$0xff] }
0x11c4   :  { %6774 = vmatpush1.bf16.msra.mxu0 %v6306_v29  ;;  %v6843_v29 = vld [vmem:[#allocation4 + $0xe98] sm:$0xff] }
0x11c5   :  { %6775 = vmatprep.subr.bf16.mxu0 %v6313_v25  ;;  %v6852_v25 = vld [vmem:[#allocation4 + $0x1240] sm:$0xff] }
0x11c8   :  { %6776 = vmatpush1.bf16.msra.mxu0 %v6312_v42  ;;  %v6844_v42 = vld [vmem:[#allocation4 + $0xf00] sm:$0xff] }
0x11c9   :  { %6777 = vmatprep.subr.bf16.mxu0 %v6319_v20  ;;  %v6853_v20 = vld [vmem:[#allocation4 + $0x12a8] sm:$0xff] }
0x11cc   :  { %6778 = vmatpush1.bf16.msra.mxu0 %v6318_v48  ;;  %v6845_v48 = vld [vmem:[#allocation4 + $0xf68] sm:$0xff] }
0x11cd   :  { %6779 = vmatprep.subr.bf16.mxu0 %v6325_v63  ;;  %v6854_v63 = vld [vmem:[#allocation4 + $0x1310] sm:$0xff] }
0x11d0   :  { %6780 = vmatpush1.bf16.msra.mxu0 %v6324_v16  ;;  %v6846_v16 = vld [vmem:[#allocation4 + $0xfd0] sm:$0xff] }
0x11d1   :  { %6781 = vmatprep.subr.bf16.mxu0 %v6331_v8  ;;  %v6855_v8 = vld [vmem:[#allocation4 + $0x1378] sm:$0xff] }
0x11d4   :  { %6782 = vmatpush1.bf16.msra.mxu0 %v6330_v39  ;;  %v6847_v39 = vld [vmem:[#allocation4 + $0x1038] sm:$0xff] }
0x11d5   :  { %6783 = vmatprep.subr.bf16.mxu0 %v6337_v28  ;;  %v6368_v28 = vrot.slane %v8753_v4, %v8032_v24 }
0x11d8   :  { %6784 = vmatpush1.bf16.msra.mxu0 %v6336_v54  ;;  %v6372_v54 = vrot.slane %v8753_v4, %v8010_v26  ;;  %v6856_v26 = vld [vmem:[#allocation14 + $0x33] ss:$0 sm:$0xff] }
0x11d9   :  { %6785 = vmatprep.subr.bf16.mxu0 %v6343_v33 }
0x11dc   :  { %6786 = vmatpush1.bf16.msra.mxu0 %v6342_v27 }
0x11df   :  { %6788 = vmatmul.mubr.bf16.vlgmr.msra.gmra.mrb[40].mxu0 %v8743_v1 }
0x11f2   :  { %v6543_v0 = vpop.f32.mrb[36].mxu0 }
0x11f3   :  { %v7200_v30 = vadd.f32 %v6543_v0, %v6352_v9  ;;  %v6666_v50 = vpop.f32.mrb[68].mxu1  ;;  %v6545_v2 = vpop.f32.mrb[37].mxu0 }
0x11f4   :  { %v7201_v36 = vadd.f32 %v6545_v2, %v6356_v44  ;;  %v6668_v15 = vpop.f32.mrb[69].mxu1  ;;  %v6547_v1 = vpop.f32.mrb[38].mxu0  ;;  %v7202_v21 = vadd.f32 %v6666_v50, %v6360_v57 }
0x11f5   :  { %v7203_v37 = vadd.f32 %v6668_v15, %v6364_v12  ;;  %v6670_v32 = vpop.f32.mrb[70].mxu1  ;;  %v6548_v14 = vpop.f32.mrb[39].mxu0  ;;  %7444 = vtanh.f32 %v7200_v30 }
0x11f6   :  { %v6671_v18 = vpop.f32.mrb[71].mxu1  ;;  %7446 = vtanh.f32 %v7201_v36 }
0x11f7   :  { %7448 = vtanh.f32 %v7203_v37 }
0x11f8   :  { %7450 = vtanh.f32 %v7202_v21 }
0x11ff   :  { %v7445_v51 = vpop.eup %7444 }
0x1200   :  { %v7447_v41 = vpop.eup %7446  ;;  %v6802_v17 = vpack.c.bf16 %v7445_v51, %v7445_v51 }
0x1201   :  { %v7449_v23 = vpop.eup %7448  ;;  %v6803_v22 = vpack.c.bf16 %v7447_v41, %v7447_v41 }
0x1202   :  { %v6805_v53 = vpack.c.bf16 %v7449_v23, %v7449_v23  ;;  %v7451_v35 = vpop.eup %7450 }
0x1203   :  { %6889 = vmatprep.mubr.bf16.mxu1 %v6803_v22  ;;  %v6804_v59 = vpack.c.bf16 %v7451_v35, %v7451_v35 }
0x1204   :  { %6890 = vmatmul.mubr.bf16.vlgmr.msra.gmra.mrb[72].mxu1 %v6802_v17 }
0x1205   :  { %7139 = vmatpush3.bf16.msra.mxu1 %v6824_v61  ;;  %6929 = vmatprep.mubr.bf16.mxu1 %v6805_v53 }
0x1206   :  { %7140 = vmatprep.subr.bf16.mxu1 %v6833_v5 }
0x1209   :  { %7141 = vmatpush3.bf16.msra.mxu1 %v6825_v62 }
0x120a   :  { %7142 = vmatprep.subr.bf16.mxu1 %v6834_v43 }
0x120d   :  { %7143 = vmatpush3.bf16.msra.mxu1 %v6826_v47 }
0x120e   :  { %7144 = vmatprep.subr.bf16.mxu1 %v6835_v7 }
0x1211   :  { %7145 = vmatpush3.bf16.msra.mxu1 %v6827_v13 }
0x1212   :  { %7146 = vmatprep.subr.bf16.mxu1 %v6836_v19 }
0x1215   :  { %7147 = vmatpush3.bf16.msra.mxu1 %v6828_v3 }
0x1216   :  { %7148 = vmatprep.subr.bf16.mxu1 %v6837_v6 }
0x1219   :  { %7149 = vmatpush3.bf16.msra.mxu1 %v6829_v46 }
0x121a   :  { %7150 = vmatprep.subr.bf16.mxu1 %v6838_v34 }
0x121d   :  { %7151 = vmatpush3.bf16.msra.mxu1 %v6830_v31 }
0x121e   :  { %7152 = vmatprep.subr.bf16.mxu1 %v6839_v45 }
0x1221   :  { %7153 = vmatpush3.bf16.msra.mxu1 %v6831_v40 }
0x1222   :  { %7160 = vmatprep.subr.bf16.mxu1 %v6848_v11 }
0x1224   :  { %6930 = vmatmul.mubr.bf16.vlgmr.msra.gmra.mrb[76].mxu1 %v6804_v59 }
0x1225   :  { %7161 = vmatpush3.bf16.msra.mxu1 %v6840_v58 }
0x1226   :  { %7162 = vmatprep.subr.bf16.mxu1 %v6849_v10 }
0x1229   :  { %7163 = vmatpush3.bf16.msra.mxu1 %v6841_v38 }
0x122a   :  { %7164 = vmatprep.subr.bf16.mxu1 %v6850_v52 }
0x122d   :  { %7165 = vmatpush3.bf16.msra.mxu1 %v6842_v56 }
0x122e   :  { %7166 = vmatprep.subr.bf16.mxu1 %v6851_v55 }
0x1231   :  { %7167 = vmatpush3.bf16.msra.mxu1 %v6843_v29 }
0x1232   :  { %7168 = vmatprep.subr.bf16.mxu1 %v6852_v25 }
0x1235   :  { %7169 = vmatpush3.bf16.msra.mxu1 %v6844_v42 }
0x1236   :  { %7170 = vmatprep.subr.bf16.mxu1 %v6853_v20 }
0x1239   :  { %7171 = vmatpush3.bf16.msra.mxu1 %v6845_v48 }
0x123a   :  { %7172 = vmatprep.subr.bf16.mxu1 %v6854_v63 }
0x123d   :  { %7173 = vmatpush3.bf16.msra.mxu1 %v6846_v16 }
0x123e   :  { %7174 = vmatprep.subr.bf16.mxu1 %v6855_v8 }
0x1241   :  { %7175 = vmatpush3.bf16.msra.mxu1 %v6847_v39 }
0x12b2   :  { %v6789_v33 = vpop.f32.mrb[40].mxu0 }
0x12b3   :  { %v7204_v27 = vadd.f32 %v6789_v33, %v6368_v28  ;;  %v6791_v49 = vpop.f32.mrb[41].mxu0 }
0x12b4   :  { %v7205_v60 = vadd.f32 %v6791_v49, %v6372_v54  ;;  %v6793_v9 = vpop.f32.mrb[42].mxu0 }
0x12b5   :  { %7452 = vtanh.f32 %v7204_v27  ;;  %v6794_v44 = vpop.f32.mrb[43].mxu0 }
0x12b6   :  { %7454 = vtanh.f32 %v7205_v60 }
0x12bf   :  { %v7453_v12 = vpop.eup %7452 }
0x12c0   :  { %v7455_v0 = vpop.eup %7454  ;;  %v6806_v50 = vpack.c.bf16 %v7453_v12, %v7453_v12 }
0x12c1   :  { %v6807_v30 = vpack.c.bf16 %v7455_v0, %v7455_v0 }
0x12c3   :  { %6969 = vmatprep.mubr.bf16.mxu1 %v6807_v30 }
0x12c4   :  { %6970 = vmatmul.mubr.bf16.vlgmr.msra.gmra.mrb[80].mxu1 %v6806_v50 }
0x12d7   :  { %v7132_v2 = vpop.f32.mrb[72].mxu1 }
0x12d8   :  { %v7133_v36 = vpop.f32.mrb[73].mxu1 }
0x12d9   :  { %v7134_v24 = vadd.f32 %v7133_v36, %v7132_v2  ;;  %v7135_v15 = vpop.f32.mrb[74].mxu1 }
0x12da   :  { %v7136_v1 = vpop.f32.mrb[75].mxu1 }
0x12db   :  { %v6892_v32 = vadd.f32 %v7134_v24, %v6856_v26 }
0x12f7   :  { %v7154_v4 = vpop.f32.mrb[76].mxu1 }
0x12f8   :  { %v7155_v37 = vpop.f32.mrb[77].mxu1 }
0x12f9   :  { %v7156_v14 = vadd.f32 %v7155_v37, %v7154_v4  ;;  %v7157_v18 = vpop.f32.mrb[78].mxu1 }
0x12fa   :  { %v7158_v51 = vpop.f32.mrb[79].mxu1 }
0x12fb   :  { %v6932_v41 = vadd.f32 %v7156_v14, %v6892_v32 }
0x1397   :  { %v7176_v23 = vpop.f32.mrb[80].mxu1 }
0x1398   :  { %v7177_v22 = vpop.f32.mrb[81].mxu1 }
0x1399   :  { %v7178_v17 = vadd.f32 %v7177_v22, %v7176_v23  ;;  %v7179_v61 = vpop.f32.mrb[82].mxu1 }
0x139a   :  { %v7180_v53 = vpop.f32.mrb[83].mxu1 }
0x139b   :  { %v6972_v5 = vadd.f32 %v7178_v17, %v6932_v41 }
0x139d   :  { %6977 = vst [vmem:[#allocation15] sm:$0x3] %v6972_v5 }
0x139e   :  { %7545 = shalt.err (!%p7542_p5)
}
0x139f   :  { %s7546_s22 = scalar_lea.hbm %s8787_s8, 32 }
0x13a0   :  { %p7547_p6 = scmp.ne.s32.totalorder %s8787_s8, %s7546_s22  ;;  %p7550_p7 = scmp.lt.u32.totalorder %s7546_s22, %s8787_s8 }
0x13a2   :  { %p7552_p8 = pnand %p7550_p7, %p7547_p6 }
0x13a4   :  { %7555 = shalt.err (!%p7552_p8)
}
0x13a5   :  { %6987 = dma.vmem_to_hbm [thread:$0]  %s6985_s20, 32, %s8787_s8, [#allocation9]  }
0x13a6   :  { %7568 = dma.done.wait [#allocation9], 32  }
0x13a7   :  { %7569 = vsyncadd [#allocation9], 4294967264 }
0x13a8   :  { %6991 = vsyncpa [#allocation8], 1 }
0x13a9   :  { %6992 = vsyncpa [#allocation13], 1 }
0x13aa   :  { %6993 = vsyncpa [#allocation9], 1 }
0x13ab   :  { %6994 = vsyncpa [#allocation10], 1 }
0x13ac   :  { %6995 = vsyncmov [#allocation6] }
0x13af   :  { %s6996_s25 = vpop.sfrf %6995 }
0x13b0   :  { %p7113_p9 = scmp.ne.s32.totalorder %s6996_s25, 0 }
0x13b2   :  { %7000 = shalt.err (%p7113_p9)  }
0x13b3   :  { %7002 = vsyncmov [#allocation6 + $0x1] }
0x13b6   :  { %s7003_s26 = vpop.sfrf %7002 }
0x13b7   :  { %p7114_p10 = scmp.ne.s32.totalorder %s7003_s26, 0 }
0x13b9   :  { %7007 = shalt.err (%p7114_p10)  }
0x13ba   :  { %7009 = vsyncmov [#allocation6 + $0x2] }
0x13bd   :  { %s7010_s4 = vpop.sfrf %7009 }
0x13be   :  { %p7115_p11 = scmp.ne.s32.totalorder %s7010_s4, 0 }
0x13c0   :  { %7014 = shalt.err (%p7115_p11)  }

</bundles_post_ra>
